<compile_context>
chip_gen: v7x
topology: tpu7x:2x2x1
jax: 0.10.0
libtpu: 0.0.40
codegen_flags: <defaults>
</compile_context>

<pallas_src>
import functools

import jax
import jax.numpy as jnp
from jax import lax
from jax.experimental import pallas as pl
from jax.experimental.pallas import tpu as pltpu


# ----------------------------------------------------------------------------
# Shared math helpers (pure jnp: used both inside the Pallas kernel and in the
# plain-JAX reference).
# ----------------------------------------------------------------------------
def _layer_norm(x, gamma, beta, eps=1e-5):
    mu = jnp.mean(x, axis=-1, keepdims=True)
    xc = x - mu
    var = jnp.mean(xc * xc, axis=-1, keepdims=True)
    return xc * lax.rsqrt(var + eps) * gamma + beta


def _gelu(x):
    # tanh-approximate GELU (jax.nn.gelu default), used consistently in kernel and
    # reference.
    # TODO(synk): PyTorch nn.GELU defaults to the exact erf formulation.
    return jax.nn.gelu(x, approximate=True)


def _round_up(n, m):
    return ((n + m - 1) // m) * m


# ----------------------------------------------------------------------------
# Fused Pallas kernel: embedding + class token + all transformer layers.
# ----------------------------------------------------------------------------
def _transformer_kernel(
    x_ref,          # (B, T, C)   raw input window
    emb_w_ref,      # (C, D)      patch_to_embedding weight
    emb_b_ref,      # (1, D)      patch_to_embedding bias
    ctok_ref,       # (1, D)      class token
    ln1_g_ref,      # (L, 1, D)   attention PreNorm gamma
    ln1_b_ref,      # (L, 1, D)   attention PreNorm beta
    qkv_w_ref,      # (L, D, 3D)  to_qkv (no bias)
    out_w_ref,      # (L, D, D)   to_out weight
    out_b_ref,      # (L, 1, D)   to_out bias
    ln2_g_ref,      # (L, 1, D)   MLP PreNorm gamma
    ln2_b_ref,      # (L, 1, D)   MLP PreNorm beta
    ff1_w_ref,      # (L, D, M)
    ff1_b_ref,      # (L, 1, M)
    ff2_w_ref,      # (L, M, D)
    ff2_b_ref,      # (L, 1, D)
    feat_ref,       # (B, D)      OUTPUT: class-token features
    *,
    heads,
):
    B, T, C = x_ref.shape
    D = emb_w_ref.shape[1]
    depth = qkv_w_ref.shape[0]
    N = T + 1                       # class token + T time steps
    Np = _round_up(N, 8)            # sublane-aligned per-batch token count
    pad_rows = Np - N
    dh = D // heads
    scale = float(D) ** -0.5        # TS-TCC Attention: scale = dim ** -0.5

    emb_w = emb_w_ref[...]
    emb_b = emb_b_ref[...]
    ctok = ctok_ref[...]            # (1, D)

    # Patch embedding: a single MXU matmul over all B*T timesteps.
    x_flat = x_ref[...].reshape(B * T, C)                                    # (B*T, C)
    emb = jnp.dot(x_flat, emb_w, preferred_element_type=jnp.float32) + emb_b  # (B*T, D)

    # Residual stream `tok`: flattened, lane-dense (B*Np, D); rows
    # [b*Np, b*Np + N) hold batch b's [class token; embedded timesteps],
    # rows [b*Np + N, (b+1)*Np) are zero padding (never read for the output).
    pieces = []
    for b in range(B):
        pieces.append(ctok)
        pieces.append(emb[b * T:(b + 1) * T, :])
        if pad_rows:
            pieces.append(jnp.zeros((pad_rows, D), jnp.float32))
    tok = jnp.concatenate(pieces, axis=0)                                    # (B*Np, D)

    # Key-padding mask (hoisted out of the layer loop): True for real key cols.
    key_mask = lax.broadcasted_iota(jnp.int32, (Np, Np), 1) < N
    neg_big = jnp.float32(-1e30)

    for l in range(depth):
        # ---- x = x + Attention(LayerNorm(x)) ----
        h = _layer_norm(tok, ln1_g_ref[l], ln1_b_ref[l])
        qkv = jnp.dot(h, qkv_w_ref[l], preferred_element_type=jnp.float32)   # (B*Np, 3D)

        batch_rows = []
        for b in range(B):
            qkv_b = qkv[b * Np:(b + 1) * Np, :]                              # (Np, 3D)
            head_outs = []
            for hh in range(heads):
                lo = hh * dh
                qh = qkv_b[:, lo:lo + dh]
                kh = qkv_b[:, D + lo:D + lo + dh]
                vh = qkv_b[:, 2 * D + lo:2 * D + lo + dh]
                # scores (Np, Np): contract over the head dim (== q @ k.T).
                s = lax.dot_general(
                    qh, kh, (((1,), (1,)), ((), ())),
                    preferred_element_type=jnp.float32) * scale
                s = jnp.where(key_mask, s, neg_big)
                s = s - jnp.max(s, axis=-1, keepdims=True)
                p = jnp.exp(s)
                attn = p / jnp.sum(p, axis=-1, keepdims=True)
                head_outs.append(
                    jnp.dot(attn, vh, preferred_element_type=jnp.float32))   # (Np, dh)
            batch_rows.append(jnp.concatenate(head_outs, axis=-1))           # (Np, D)
        attn_out = jnp.concatenate(batch_rows, axis=0)                        # (B*Np, D)

        proj = jnp.dot(attn_out, out_w_ref[l],
                       preferred_element_type=jnp.float32) + out_b_ref[l]
        tok = tok + proj

        # ---- x = x + FeedForward(LayerNorm(x)) ----
        h = _layer_norm(tok, ln2_g_ref[l], ln2_b_ref[l])
        h = jnp.dot(h, ff1_w_ref[l], preferred_element_type=jnp.float32) + ff1_b_ref[l]
        h = _gelu(h)
        h = jnp.dot(h, ff2_w_ref[l], preferred_element_type=jnp.float32) + ff2_b_ref[l]
        tok = tok + h

    # Class-token features: row 0 of each batch block (reshape is layout-free
    # because Np is a multiple of 8 sublanes).
    tok3 = tok.reshape(B, Np, D)
    feat_ref[...] = tok3[:, 0, :]


def _full_spec(shape):
    nd = len(shape)
    return pl.BlockSpec(shape, lambda *_ignored, _nd=nd: (0,) * _nd)


def transformer_forward_pallas(x, params, *, heads, backbone=True):
    """x: (B, len_sw, n_channels) f32 -> (None, feat) if backbone else (logits, feat)."""
    B, T, C = x.shape
    D = params["emb_w"].shape[1]

    operands = (
        x,
        params["emb_w"], params["emb_b"], params["c_token"],
        params["ln1_g"], params["ln1_b"], params["qkv_w"],
        params["out_w"], params["out_b"],
        params["ln2_g"], params["ln2_b"],
        params["ff1_w"], params["ff1_b"], params["ff2_w"], params["ff2_b"],
    )

    feat = pl.pallas_call(
        functools.partial(_transformer_kernel, heads=heads),
        out_shape=jax.ShapeDtypeStruct((B, D), jnp.float32),
        grid=(1,),
        in_specs=[_full_spec(op.shape) for op in operands],
        out_specs=pl.BlockSpec((B, D), lambda i: (0, 0)),
        compiler_params=pltpu.CompilerParams(
            dimension_semantics=("arbitrary",)),
    )(*operands)

    if backbone:
        return None, feat
    # Classifier head (only used when backbone=False): trivial Linear, plain-JAX glue.
    logits = feat @ params["cls_w"] + params["cls_b"]
    return logits, feat


# ----------------------------------------------------------------------------
# Plain-JAX reference mirroring the PyTorch forward (eval mode).
# ----------------------------------------------------------------------------
def transformer_forward_ref(x, params, *, heads):
    B, T, C = x.shape
    D = params["emb_w"].shape[1]
    depth = params["qkv_w"].shape[0]
    N = T + 1
    dh = D // heads
    scale = float(D) ** -0.5

    tok = jnp.concatenate(
        [jnp.broadcast_to(params["c_token"][None, :, :], (B, 1, D)),
         x @ params["emb_w"] + params["emb_b"]], axis=1)                    # (B, N, D)

    for l in range(depth):
        h = _layer_norm(tok, params["ln1_g"][l], params["ln1_b"][l])
        qkv = h @ params["qkv_w"][l]
        q, k, v = jnp.split(qkv, 3, axis=-1)
        q = q.reshape(B, N, heads, dh).transpose(0, 2, 1, 3)
        k = k.reshape(B, N, heads, dh).transpose(0, 2, 1, 3)
        v = v.reshape(B, N, heads, dh).transpose(0, 2, 1, 3)
        s = jnp.einsum("bhnd,bhmd->bhnm", q, k) * scale
        a = jax.nn.softmax(s, axis=-1)
        o = jnp.einsum("bhnm,bhmd->bhnd", a, v)
        o = o.transpose(0, 2, 1, 3).reshape(B, N, D)
        tok = tok + (o @ params["out_w"][l] + params["out_b"][l])

        h = _layer_norm(tok, params["ln2_g"][l], params["ln2_b"][l])
        h = _gelu(h @ params["ff1_w"][l] + params["ff1_b"][l])
        tok = tok + (h @ params["ff2_w"][l] + params["ff2_b"][l])
    return tok[:, 0, :]


# ----------------------------------------------------------------------------
# Deterministic synthetic parameters.
# ----------------------------------------------------------------------------
def init_params(key, n_channels, dim, depth, heads, mlp_dim, n_classes):
    keys = jax.random.split(key, 8 + depth * 11)
    it = iter(keys)

    def nrm(shape, s):
        return s * jax.random.normal(next(it), shape, jnp.float32)

    params = dict(
        emb_w=nrm((n_channels, dim), 0.3),
        emb_b=nrm((1, dim), 0.1),
        c_token=nrm((1, dim), 1.0),
        cls_w=nrm((dim, n_classes), 0.1),
        cls_b=jnp.zeros((n_classes,), jnp.float32),
    )

    def stacked(fn):
        return jnp.stack([fn() for _ in range(depth)], axis=0)

    params["ln1_g"] = stacked(lambda: 1.0 + nrm((1, dim), 0.05))
    params["ln1_b"] = stacked(lambda: nrm((1, dim), 0.05))
    params["qkv_w"] = stacked(lambda: nrm((dim, 3 * dim), 0.06))
    params["out_w"] = stacked(lambda: nrm((dim, dim), 0.06))
    params["out_b"] = stacked(lambda: nrm((1, dim), 0.02))
    params["ln2_g"] = stacked(lambda: 1.0 + nrm((1, dim), 0.05))
    params["ln2_b"] = stacked(lambda: nrm((1, dim), 0.05))
    params["ff1_w"] = stacked(lambda: nrm((dim, mlp_dim), 0.06))
    params["ff1_b"] = stacked(lambda: nrm((1, mlp_dim), 0.02))
    params["ff2_w"] = stacked(lambda: nrm((mlp_dim, dim), 0.06))
    params["ff2_b"] = stacked(lambda: nrm((1, dim), 0.02))
    return params


if __name__ == "__main__":
    # Small shapes consistent with Transformer(n_channels, len_sw, n_classes, ...).
    B, len_sw, n_channels = 2, 16, 4
    dim, depth, heads, mlp_dim, n_classes = 128, 4, 4, 64, 6

    key = jax.random.PRNGKey(0)
    key, kx = jax.random.split(key)
    x = jax.random.normal(kx, (B, len_sw, n_channels), jnp.float32)
    params = init_params(key, n_channels, dim, depth, heads, mlp_dim, n_classes)

    # backbone=True path (module default): returns (None, class-token features).
    none_out, feat = transformer_forward_pallas(x, params, heads=heads, backbone=True)
    feat = jax.block_until_ready(feat)
    assert none_out is None
    assert feat.shape == (B, dim), feat.shape

    feat_ref = transformer_forward_ref(x, params, heads=heads)
    max_err = float(jnp.max(jnp.abs(feat - feat_ref)))
    assert jnp.allclose(feat, feat_ref, atol=1e-3, rtol=1e-3), max_err

    # backbone=False path: classifier head on top of the kernel output.
    logits, _ = transformer_forward_pallas(x, params, heads=heads, backbone=False)
    logits = jax.block_until_ready(logits)
    assert logits.shape == (B, n_classes), logits.shape

    print("KERNEL_OK")
</pallas_src>

<mosaic_0001>
module attributes {stable_mosaic.version = 11 : i64} {
  func.func @_transformer_kernel(%arg0: i32, %arg1: memref<2x16x4xf32, #tpu.memory_space<vmem>>, %arg2: memref<4x128xf32, #tpu.memory_space<vmem>>, %arg3: memref<1x128xf32, #tpu.memory_space<vmem>>, %arg4: memref<1x128xf32, #tpu.memory_space<vmem>>, %arg5: memref<4x1x128xf32, #tpu.memory_space<vmem>>, %arg6: memref<4x1x128xf32, #tpu.memory_space<vmem>>, %arg7: memref<4x128x384xf32, #tpu.memory_space<vmem>>, %arg8: memref<4x128x128xf32, #tpu.memory_space<vmem>>, %arg9: memref<4x1x128xf32, #tpu.memory_space<vmem>>, %arg10: memref<4x1x128xf32, #tpu.memory_space<vmem>>, %arg11: memref<4x1x128xf32, #tpu.memory_space<vmem>>, %arg12: memref<4x128x64xf32, #tpu.memory_space<vmem>>, %arg13: memref<4x1x64xf32, #tpu.memory_space<vmem>>, %arg14: memref<4x64x128xf32, #tpu.memory_space<vmem>>, %arg15: memref<4x1x128xf32, #tpu.memory_space<vmem>>, %arg16: memref<2x128xf32, #tpu.memory_space<vmem>>) attributes {dimension_semantics = [#tpu.dimension_semantics<arbitrary>], iteration_bounds = array<i64: 1>, scalar_prefetch = 0 : i64, scratch_operands = 0 : i64, tpu.core_type = #tpu.core_type<tc>, window_params = [{pipeline_mode = #tpu.pipeline_mode<synchronous>, transform_indices = @transform_0, window_bounds = array<i64: 2, 16, 4>}, {pipeline_mode = #tpu.pipeline_mode<synchronous>, transform_indices = @transform_1, window_bounds = array<i64: 4, 128>}, {pipeline_mode = #tpu.pipeline_mode<synchronous>, transform_indices = @transform_2, window_bounds = array<i64: 1, 128>}, {pipeline_mode = #tpu.pipeline_mode<synchronous>, transform_indices = @transform_3, window_bounds = array<i64: 1, 128>}, {pipeline_mode = #tpu.pipeline_mode<synchronous>, transform_indices = @transform_4, window_bounds = array<i64: 4, 1, 128>}, {pipeline_mode = #tpu.pipeline_mode<synchronous>, transform_indices = @transform_5, window_bounds = array<i64: 4, 1, 128>}, {pipeline_mode = #tpu.pipeline_mode<synchronous>, transform_indices = @transform_6, window_bounds = array<i64: 4, 128, 384>}, {pipeline_mode = #tpu.pipeline_mode<synchronous>, transform_indices = @transform_7, window_bounds = array<i64: 4, 128, 128>}, {pipeline_mode = #tpu.pipeline_mode<synchronous>, transform_indices = @transform_8, window_bounds = array<i64: 4, 1, 128>}, {pipeline_mode = #tpu.pipeline_mode<synchronous>, transform_indices = @transform_9, window_bounds = array<i64: 4, 1, 128>}, {pipeline_mode = #tpu.pipeline_mode<synchronous>, transform_indices = @transform_10, window_bounds = array<i64: 4, 1, 128>}, {pipeline_mode = #tpu.pipeline_mode<synchronous>, transform_indices = @transform_11, window_bounds = array<i64: 4, 128, 64>}, {pipeline_mode = #tpu.pipeline_mode<synchronous>, transform_indices = @transform_12, window_bounds = array<i64: 4, 1, 64>}, {pipeline_mode = #tpu.pipeline_mode<synchronous>, transform_indices = @transform_13, window_bounds = array<i64: 4, 64, 128>}, {pipeline_mode = #tpu.pipeline_mode<synchronous>, transform_indices = @transform_14, window_bounds = array<i64: 4, 1, 128>}, {pipeline_mode = #tpu.pipeline_mode<synchronous>, transform_indices = @transform_15, window_bounds = array<i64: 2, 128>}]} {
    %c0 = arith.constant 0 : index
    %c0_0 = arith.constant 0 : index
    %0 = vector.load %arg2[%c0, %c0_0] : memref<4x128xf32, #tpu.memory_space<vmem>>, vector<4x128xf32>
    %c0_1 = arith.constant 0 : index
    %c0_2 = arith.constant 0 : index
    %1 = vector.load %arg3[%c0_1, %c0_2] : memref<1x128xf32, #tpu.memory_space<vmem>>, vector<1x128xf32>
    %c0_3 = arith.constant 0 : index
    %c0_4 = arith.constant 0 : index
    %2 = vector.load %arg4[%c0_3, %c0_4] : memref<1x128xf32, #tpu.memory_space<vmem>>, vector<1x128xf32>
    %c0_5 = arith.constant 0 : index
    %c0_6 = arith.constant 0 : index
    %c0_7 = arith.constant 0 : index
    %3 = vector.load %arg1[%c0_5, %c0_6, %c0_7] : memref<2x16x4xf32, #tpu.memory_space<vmem>>, vector<2x16x4xf32>
    %4 = vector.shape_cast %3 : vector<2x16x4xf32> to vector<32x4xf32>
    %cst = arith.constant dense<0.000000e+00> : vector<32x128xf32>
    %5 = tpu.matmul %4, %0, %cst {dimension_numbers = #tpu.dot_dimension_numbers<[1], [0], [0], [1], [0, 0, 1, 1], [], []>} : vector<32x4xf32>, vector<4x128xf32>, vector<32x128xf32> -> vector<32x128xf32>
    %6 = vector.broadcast %1 : vector<1x128xf32> to vector<32x128xf32>
    %7 = arith.addf %5, %6 : vector<32x128xf32>
    %8 = vector.extract_strided_slice %7 {offsets = [0, 0], sizes = [16, 128], strides = [1, 1]} : vector<32x128xf32> to vector<16x128xf32>
    %cst_8 = arith.constant 0.000000e+00 : f32
    %9 = vector.broadcast %cst_8 : f32 to vector<7x128xf32>
    %10 = vector.extract_strided_slice %7 {offsets = [16, 0], sizes = [16, 128], strides = [1, 1]} : vector<32x128xf32> to vector<16x128xf32>
    %cst_9 = arith.constant 0.000000e+00 : f32
    %11 = vector.broadcast %cst_9 : f32 to vector<7x128xf32>
    %12 = tpu.concatenate %2, %8, %9, %2, %10, %11 in 0 : vector<1x128xf32>, vector<16x128xf32>, vector<7x128xf32>, vector<1x128xf32>, vector<16x128xf32>, vector<7x128xf32> -> vector<48x128xf32>
    %13 = tpu.iota {dimensions = array<i32: 1>} : vector<24x24xi32>
    %c17_i32 = arith.constant 17 : i32
    %14 = vector.broadcast %c17_i32 : i32 to vector<24x24xi32>
    %15 = arith.cmpi slt, %13, %14 : vector<24x24xi32>
    %c0_10 = arith.constant 0 : index
    %c0_11 = arith.constant 0 : index
    %c0_12 = arith.constant 0 : index
    %16 = vector.load %arg5[%c0_10, %c0_11, %c0_12] : memref<4x1x128xf32, #tpu.memory_space<vmem>>, vector<1x1x128xf32>
    %17 = vector.shape_cast %16 : vector<1x1x128xf32> to vector<1x128xf32>
    %c0_13 = arith.constant 0 : index
    %c0_14 = arith.constant 0 : index
    %c0_15 = arith.constant 0 : index
    %18 = vector.load %arg6[%c0_13, %c0_14, %c0_15] : memref<4x1x128xf32, #tpu.memory_space<vmem>>, vector<1x1x128xf32>
    %19 = vector.shape_cast %18 : vector<1x1x128xf32> to vector<1x128xf32>
    %cst_16 = arith.constant dense<0.000000e+00> : vector<48xf32>
    %20 = vector.multi_reduction <add>, %12, %cst_16 [1] : vector<48x128xf32> to vector<48xf32>
    %21 = vector.shape_cast %20 : vector<48xf32> to vector<48x1xf32>
    %cst_17 = arith.constant 1.280000e+02 : f32
    %22 = vector.broadcast %cst_17 : f32 to vector<48x1xf32>
    %23 = arith.divf %21, %22 : vector<48x1xf32>
    %24 = vector.broadcast %23 : vector<48x1xf32> to vector<48x128xf32>
    %25 = arith.subf %12, %24 : vector<48x128xf32>
    %26 = arith.mulf %25, %25 : vector<48x128xf32>
    %cst_18 = arith.constant dense<0.000000e+00> : vector<48xf32>
    %27 = vector.multi_reduction <add>, %26, %cst_18 [1] : vector<48x128xf32> to vector<48xf32>
    %28 = vector.shape_cast %27 : vector<48xf32> to vector<48x1xf32>
    %cst_19 = arith.constant 1.280000e+02 : f32
    %29 = vector.broadcast %cst_19 : f32 to vector<48x1xf32>
    %30 = arith.divf %28, %29 : vector<48x1xf32>
    %cst_20 = arith.constant 9.99999974E-6 : f32
    %31 = vector.broadcast %cst_20 : f32 to vector<48x1xf32>
    %32 = arith.addf %30, %31 : vector<48x1xf32>
    %33 = math.rsqrt %32 : vector<48x1xf32>
    %34 = vector.broadcast %33 : vector<48x1xf32> to vector<48x128xf32>
    %35 = arith.mulf %25, %34 : vector<48x128xf32>
    %36 = vector.broadcast %17 : vector<1x128xf32> to vector<48x128xf32>
    %37 = arith.mulf %35, %36 : vector<48x128xf32>
    %38 = vector.broadcast %19 : vector<1x128xf32> to vector<48x128xf32>
    %39 = arith.addf %37, %38 : vector<48x128xf32>
    %c0_21 = arith.constant 0 : index
    %c0_22 = arith.constant 0 : index
    %c0_23 = arith.constant 0 : index
    %40 = vector.load %arg7[%c0_21, %c0_22, %c0_23] : memref<4x128x384xf32, #tpu.memory_space<vmem>>, vector<1x128x384xf32>
    %41 = vector.shape_cast %40 : vector<1x128x384xf32> to vector<128x384xf32>
    %cst_24 = arith.constant dense<0.000000e+00> : vector<48x384xf32>
    %42 = tpu.matmul %39, %41, %cst_24 {dimension_numbers = #tpu.dot_dimension_numbers<[1], [0], [0], [1], [0, 0, 1, 1], [], []>} : vector<48x128xf32>, vector<128x384xf32>, vector<48x384xf32> -> vector<48x384xf32>
    %43 = vector.extract_strided_slice %42 {offsets = [0, 0], sizes = [24, 384], strides = [1, 1]} : vector<48x384xf32> to vector<24x384xf32>
    %44 = vector.extract_strided_slice %43 {offsets = [0, 0], sizes = [24, 32], strides = [1, 1]} : vector<24x384xf32> to vector<24x32xf32>
    %45 = vector.extract_strided_slice %43 {offsets = [0, 128], sizes = [24, 32], strides = [1, 1]} : vector<24x384xf32> to vector<24x32xf32>
    %46 = vector.extract_strided_slice %43 {offsets = [0, 256], sizes = [24, 32], strides = [1, 1]} : vector<24x384xf32> to vector<24x32xf32>
    %cst_25 = arith.constant dense<0.000000e+00> : vector<24x24xf32>
    %47 = tpu.matmul %44, %45, %cst_25 {dimension_numbers = #tpu.dot_dimension_numbers<[1], [1], [0], [0], [0, 0, 1, 0], [], []>} : vector<24x32xf32>, vector<24x32xf32>, vector<24x24xf32> -> vector<24x24xf32>
    %cst_26 = arith.constant 0.0883883461 : f32
    %48 = vector.broadcast %cst_26 : f32 to vector<24x24xf32>
    %49 = arith.mulf %47, %48 : vector<24x24xf32>
    %cst_27 = arith.constant -1.000000e+30 : f32
    %50 = vector.broadcast %cst_27 : f32 to vector<24x24xf32>
    %51 = arith.select %15, %49, %50 : vector<24x24xi1>, vector<24x24xf32>
    %cst_28 = arith.constant dense<0xFF800000> : vector<24xf32>
    %52 = vector.multi_reduction <maximumf>, %51, %cst_28 [1] : vector<24x24xf32> to vector<24xf32>
    %53 = vector.shape_cast %52 : vector<24xf32> to vector<24x1xf32>
    %54 = vector.broadcast %53 : vector<24x1xf32> to vector<24x24xf32>
    %55 = arith.subf %51, %54 : vector<24x24xf32>
    %56 = math.exp %55 : vector<24x24xf32>
    %cst_29 = arith.constant dense<0.000000e+00> : vector<24xf32>
    %57 = vector.multi_reduction <add>, %56, %cst_29 [1] : vector<24x24xf32> to vector<24xf32>
    %58 = vector.shape_cast %57 : vector<24xf32> to vector<24x1xf32>
    %59 = vector.broadcast %58 : vector<24x1xf32> to vector<24x24xf32>
    %60 = arith.divf %56, %59 : vector<24x24xf32>
    %cst_30 = arith.constant dense<0.000000e+00> : vector<24x32xf32>
    %61 = tpu.matmul %60, %46, %cst_30 {dimension_numbers = #tpu.dot_dimension_numbers<[1], [0], [0], [1], [0, 0, 1, 1], [], []>} : vector<24x24xf32>, vector<24x32xf32>, vector<24x32xf32> -> vector<24x32xf32>
    %62 = vector.extract_strided_slice %43 {offsets = [0, 32], sizes = [24, 32], strides = [1, 1]} : vector<24x384xf32> to vector<24x32xf32>
    %63 = vector.extract_strided_slice %43 {offsets = [0, 160], sizes = [24, 32], strides = [1, 1]} : vector<24x384xf32> to vector<24x32xf32>
    %64 = vector.extract_strided_slice %43 {offsets = [0, 288], sizes = [24, 32], strides = [1, 1]} : vector<24x384xf32> to vector<24x32xf32>
    %cst_31 = arith.constant dense<0.000000e+00> : vector<24x24xf32>
    %65 = tpu.matmul %62, %63, %cst_31 {dimension_numbers = #tpu.dot_dimension_numbers<[1], [1], [0], [0], [0, 0, 1, 0], [], []>} : vector<24x32xf32>, vector<24x32xf32>, vector<24x24xf32> -> vector<24x24xf32>
    %cst_32 = arith.constant 0.0883883461 : f32
    %66 = vector.broadcast %cst_32 : f32 to vector<24x24xf32>
    %67 = arith.mulf %65, %66 : vector<24x24xf32>
    %cst_33 = arith.constant -1.000000e+30 : f32
    %68 = vector.broadcast %cst_33 : f32 to vector<24x24xf32>
    %69 = arith.select %15, %67, %68 : vector<24x24xi1>, vector<24x24xf32>
    %cst_34 = arith.constant dense<0xFF800000> : vector<24xf32>
    %70 = vector.multi_reduction <maximumf>, %69, %cst_34 [1] : vector<24x24xf32> to vector<24xf32>
    %71 = vector.shape_cast %70 : vector<24xf32> to vector<24x1xf32>
    %72 = vector.broadcast %71 : vector<24x1xf32> to vector<24x24xf32>
    %73 = arith.subf %69, %72 : vector<24x24xf32>
    %74 = math.exp %73 : vector<24x24xf32>
    %cst_35 = arith.constant dense<0.000000e+00> : vector<24xf32>
    %75 = vector.multi_reduction <add>, %74, %cst_35 [1] : vector<24x24xf32> to vector<24xf32>
    %76 = vector.shape_cast %75 : vector<24xf32> to vector<24x1xf32>
    %77 = vector.broadcast %76 : vector<24x1xf32> to vector<24x24xf32>
    %78 = arith.divf %74, %77 : vector<24x24xf32>
    %cst_36 = arith.constant dense<0.000000e+00> : vector<24x32xf32>
    %79 = tpu.matmul %78, %64, %cst_36 {dimension_numbers = #tpu.dot_dimension_numbers<[1], [0], [0], [1], [0, 0, 1, 1], [], []>} : vector<24x24xf32>, vector<24x32xf32>, vector<24x32xf32> -> vector<24x32xf32>
    %80 = vector.extract_strided_slice %43 {offsets = [0, 64], sizes = [24, 32], strides = [1, 1]} : vector<24x384xf32> to vector<24x32xf32>
    %81 = vector.extract_strided_slice %43 {offsets = [0, 192], sizes = [24, 32], strides = [1, 1]} : vector<24x384xf32> to vector<24x32xf32>
    %82 = vector.extract_strided_slice %43 {offsets = [0, 320], sizes = [24, 32], strides = [1, 1]} : vector<24x384xf32> to vector<24x32xf32>
    %cst_37 = arith.constant dense<0.000000e+00> : vector<24x24xf32>
    %83 = tpu.matmul %80, %81, %cst_37 {dimension_numbers = #tpu.dot_dimension_numbers<[1], [1], [0], [0], [0, 0, 1, 0], [], []>} : vector<24x32xf32>, vector<24x32xf32>, vector<24x24xf32> -> vector<24x24xf32>
    %cst_38 = arith.constant 0.0883883461 : f32
    %84 = vector.broadcast %cst_38 : f32 to vector<24x24xf32>
    %85 = arith.mulf %83, %84 : vector<24x24xf32>
    %cst_39 = arith.constant -1.000000e+30 : f32
    %86 = vector.broadcast %cst_39 : f32 to vector<24x24xf32>
    %87 = arith.select %15, %85, %86 : vector<24x24xi1>, vector<24x24xf32>
    %cst_40 = arith.constant dense<0xFF800000> : vector<24xf32>
    %88 = vector.multi_reduction <maximumf>, %87, %cst_40 [1] : vector<24x24xf32> to vector<24xf32>
    %89 = vector.shape_cast %88 : vector<24xf32> to vector<24x1xf32>
    %90 = vector.broadcast %89 : vector<24x1xf32> to vector<24x24xf32>
    %91 = arith.subf %87, %90 : vector<24x24xf32>
    %92 = math.exp %91 : vector<24x24xf32>
    %cst_41 = arith.constant dense<0.000000e+00> : vector<24xf32>
    %93 = vector.multi_reduction <add>, %92, %cst_41 [1] : vector<24x24xf32> to vector<24xf32>
    %94 = vector.shape_cast %93 : vector<24xf32> to vector<24x1xf32>
    %95 = vector.broadcast %94 : vector<24x1xf32> to vector<24x24xf32>
    %96 = arith.divf %92, %95 : vector<24x24xf32>
    %cst_42 = arith.constant dense<0.000000e+00> : vector<24x32xf32>
    %97 = tpu.matmul %96, %82, %cst_42 {dimension_numbers = #tpu.dot_dimension_numbers<[1], [0], [0], [1], [0, 0, 1, 1], [], []>} : vector<24x24xf32>, vector<24x32xf32>, vector<24x32xf32> -> vector<24x32xf32>
    %98 = vector.extract_strided_slice %43 {offsets = [0, 96], sizes = [24, 32], strides = [1, 1]} : vector<24x384xf32> to vector<24x32xf32>
    %99 = vector.extract_strided_slice %43 {offsets = [0, 224], sizes = [24, 32], strides = [1, 1]} : vector<24x384xf32> to vector<24x32xf32>
    %100 = vector.extract_strided_slice %43 {offsets = [0, 352], sizes = [24, 32], strides = [1, 1]} : vector<24x384xf32> to vector<24x32xf32>
    %cst_43 = arith.constant dense<0.000000e+00> : vector<24x24xf32>
    %101 = tpu.matmul %98, %99, %cst_43 {dimension_numbers = #tpu.dot_dimension_numbers<[1], [1], [0], [0], [0, 0, 1, 0], [], []>} : vector<24x32xf32>, vector<24x32xf32>, vector<24x24xf32> -> vector<24x24xf32>
    %cst_44 = arith.constant 0.0883883461 : f32
    %102 = vector.broadcast %cst_44 : f32 to vector<24x24xf32>
    %103 = arith.mulf %101, %102 : vector<24x24xf32>
    %cst_45 = arith.constant -1.000000e+30 : f32
    %104 = vector.broadcast %cst_45 : f32 to vector<24x24xf32>
    %105 = arith.select %15, %103, %104 : vector<24x24xi1>, vector<24x24xf32>
    %cst_46 = arith.constant dense<0xFF800000> : vector<24xf32>
    %106 = vector.multi_reduction <maximumf>, %105, %cst_46 [1] : vector<24x24xf32> to vector<24xf32>
    %107 = vector.shape_cast %106 : vector<24xf32> to vector<24x1xf32>
    %108 = vector.broadcast %107 : vector<24x1xf32> to vector<24x24xf32>
    %109 = arith.subf %105, %108 : vector<24x24xf32>
    %110 = math.exp %109 : vector<24x24xf32>
    %cst_47 = arith.constant dense<0.000000e+00> : vector<24xf32>
    %111 = vector.multi_reduction <add>, %110, %cst_47 [1] : vector<24x24xf32> to vector<24xf32>
    %112 = vector.shape_cast %111 : vector<24xf32> to vector<24x1xf32>
    %113 = vector.broadcast %112 : vector<24x1xf32> to vector<24x24xf32>
    %114 = arith.divf %110, %113 : vector<24x24xf32>
    %cst_48 = arith.constant dense<0.000000e+00> : vector<24x32xf32>
    %115 = tpu.matmul %114, %100, %cst_48 {dimension_numbers = #tpu.dot_dimension_numbers<[1], [0], [0], [1], [0, 0, 1, 1], [], []>} : vector<24x24xf32>, vector<24x32xf32>, vector<24x32xf32> -> vector<24x32xf32>
    %116 = tpu.concatenate %61, %79, %97, %115 in 1 : vector<24x32xf32>, vector<24x32xf32>, vector<24x32xf32>, vector<24x32xf32> -> vector<24x128xf32>
    %117 = vector.extract_strided_slice %42 {offsets = [24, 0], sizes = [24, 384], strides = [1, 1]} : vector<48x384xf32> to vector<24x384xf32>
    %118 = vector.extract_strided_slice %117 {offsets = [0, 0], sizes = [24, 32], strides = [1, 1]} : vector<24x384xf32> to vector<24x32xf32>
    %119 = vector.extract_strided_slice %117 {offsets = [0, 128], sizes = [24, 32], strides = [1, 1]} : vector<24x384xf32> to vector<24x32xf32>
    %120 = vector.extract_strided_slice %117 {offsets = [0, 256], sizes = [24, 32], strides = [1, 1]} : vector<24x384xf32> to vector<24x32xf32>
    %cst_49 = arith.constant dense<0.000000e+00> : vector<24x24xf32>
    %121 = tpu.matmul %118, %119, %cst_49 {dimension_numbers = #tpu.dot_dimension_numbers<[1], [1], [0], [0], [0, 0, 1, 0], [], []>} : vector<24x32xf32>, vector<24x32xf32>, vector<24x24xf32> -> vector<24x24xf32>
    %cst_50 = arith.constant 0.0883883461 : f32
    %122 = vector.broadcast %cst_50 : f32 to vector<24x24xf32>
    %123 = arith.mulf %121, %122 : vector<24x24xf32>
    %cst_51 = arith.constant -1.000000e+30 : f32
    %124 = vector.broadcast %cst_51 : f32 to vector<24x24xf32>
    %125 = arith.select %15, %123, %124 : vector<24x24xi1>, vector<24x24xf32>
    %cst_52 = arith.constant dense<0xFF800000> : vector<24xf32>
    %126 = vector.multi_reduction <maximumf>, %125, %cst_52 [1] : vector<24x24xf32> to vector<24xf32>
    %127 = vector.shape_cast %126 : vector<24xf32> to vector<24x1xf32>
    %128 = vector.broadcast %127 : vector<24x1xf32> to vector<24x24xf32>
    %129 = arith.subf %125, %128 : vector<24x24xf32>
    %130 = math.exp %129 : vector<24x24xf32>
    %cst_53 = arith.constant dense<0.000000e+00> : vector<24xf32>
    %131 = vector.multi_reduction <add>, %130, %cst_53 [1] : vector<24x24xf32> to vector<24xf32>
    %132 = vector.shape_cast %131 : vector<24xf32> to vector<24x1xf32>
    %133 = vector.broadcast %132 : vector<24x1xf32> to vector<24x24xf32>
    %134 = arith.divf %130, %133 : vector<24x24xf32>
    %cst_54 = arith.constant dense<0.000000e+00> : vector<24x32xf32>
    %135 = tpu.matmul %134, %120, %cst_54 {dimension_numbers = #tpu.dot_dimension_numbers<[1], [0], [0], [1], [0, 0, 1, 1], [], []>} : vector<24x24xf32>, vector<24x32xf32>, vector<24x32xf32> -> vector<24x32xf32>
    %136 = vector.extract_strided_slice %117 {offsets = [0, 32], sizes = [24, 32], strides = [1, 1]} : vector<24x384xf32> to vector<24x32xf32>
    %137 = vector.extract_strided_slice %117 {offsets = [0, 160], sizes = [24, 32], strides = [1, 1]} : vector<24x384xf32> to vector<24x32xf32>
    %138 = vector.extract_strided_slice %117 {offsets = [0, 288], sizes = [24, 32], strides = [1, 1]} : vector<24x384xf32> to vector<24x32xf32>
    %cst_55 = arith.constant dense<0.000000e+00> : vector<24x24xf32>
    %139 = tpu.matmul %136, %137, %cst_55 {dimension_numbers = #tpu.dot_dimension_numbers<[1], [1], [0], [0], [0, 0, 1, 0], [], []>} : vector<24x32xf32>, vector<24x32xf32>, vector<24x24xf32> -> vector<24x24xf32>
    %cst_56 = arith.constant 0.0883883461 : f32
    %140 = vector.broadcast %cst_56 : f32 to vector<24x24xf32>
    %141 = arith.mulf %139, %140 : vector<24x24xf32>
    %cst_57 = arith.constant -1.000000e+30 : f32
    %142 = vector.broadcast %cst_57 : f32 to vector<24x24xf32>
    %143 = arith.select %15, %141, %142 : vector<24x24xi1>, vector<24x24xf32>
    %cst_58 = arith.constant dense<0xFF800000> : vector<24xf32>
    %144 = vector.multi_reduction <maximumf>, %143, %cst_58 [1] : vector<24x24xf32> to vector<24xf32>
    %145 = vector.shape_cast %144 : vector<24xf32> to vector<24x1xf32>
    %146 = vector.broadcast %145 : vector<24x1xf32> to vector<24x24xf32>
    %147 = arith.subf %143, %146 : vector<24x24xf32>
    %148 = math.exp %147 : vector<24x24xf32>
    %cst_59 = arith.constant dense<0.000000e+00> : vector<24xf32>
    %149 = vector.multi_reduction <add>, %148, %cst_59 [1] : vector<24x24xf32> to vector<24xf32>
    %150 = vector.shape_cast %149 : vector<24xf32> to vector<24x1xf32>
    %151 = vector.broadcast %150 : vector<24x1xf32> to vector<24x24xf32>
    %152 = arith.divf %148, %151 : vector<24x24xf32>
    %cst_60 = arith.constant dense<0.000000e+00> : vector<24x32xf32>
    %153 = tpu.matmul %152, %138, %cst_60 {dimension_numbers = #tpu.dot_dimension_numbers<[1], [0], [0], [1], [0, 0, 1, 1], [], []>} : vector<24x24xf32>, vector<24x32xf32>, vector<24x32xf32> -> vector<24x32xf32>
    %154 = vector.extract_strided_slice %117 {offsets = [0, 64], sizes = [24, 32], strides = [1, 1]} : vector<24x384xf32> to vector<24x32xf32>
    %155 = vector.extract_strided_slice %117 {offsets = [0, 192], sizes = [24, 32], strides = [1, 1]} : vector<24x384xf32> to vector<24x32xf32>
    %156 = vector.extract_strided_slice %117 {offsets = [0, 320], sizes = [24, 32], strides = [1, 1]} : vector<24x384xf32> to vector<24x32xf32>
    %cst_61 = arith.constant dense<0.000000e+00> : vector<24x24xf32>
    %157 = tpu.matmul %154, %155, %cst_61 {dimension_numbers = #tpu.dot_dimension_numbers<[1], [1], [0], [0], [0, 0, 1, 0], [], []>} : vector<24x32xf32>, vector<24x32xf32>, vector<24x24xf32> -> vector<24x24xf32>
    %cst_62 = arith.constant 0.0883883461 : f32
    %158 = vector.broadcast %cst_62 : f32 to vector<24x24xf32>
    %159 = arith.mulf %157, %158 : vector<24x24xf32>
    %cst_63 = arith.constant -1.000000e+30 : f32
    %160 = vector.broadcast %cst_63 : f32 to vector<24x24xf32>
    %161 = arith.select %15, %159, %160 : vector<24x24xi1>, vector<24x24xf32>
    %cst_64 = arith.constant dense<0xFF800000> : vector<24xf32>
    %162 = vector.multi_reduction <maximumf>, %161, %cst_64 [1] : vector<24x24xf32> to vector<24xf32>
    %163 = vector.shape_cast %162 : vector<24xf32> to vector<24x1xf32>
    %164 = vector.broadcast %163 : vector<24x1xf32> to vector<24x24xf32>
    %165 = arith.subf %161, %164 : vector<24x24xf32>
    %166 = math.exp %165 : vector<24x24xf32>
    %cst_65 = arith.constant dense<0.000000e+00> : vector<24xf32>
    %167 = vector.multi_reduction <add>, %166, %cst_65 [1] : vector<24x24xf32> to vector<24xf32>
    %168 = vector.shape_cast %167 : vector<24xf32> to vector<24x1xf32>
    %169 = vector.broadcast %168 : vector<24x1xf32> to vector<24x24xf32>
    %170 = arith.divf %166, %169 : vector<24x24xf32>
    %cst_66 = arith.constant dense<0.000000e+00> : vector<24x32xf32>
    %171 = tpu.matmul %170, %156, %cst_66 {dimension_numbers = #tpu.dot_dimension_numbers<[1], [0], [0], [1], [0, 0, 1, 1], [], []>} : vector<24x24xf32>, vector<24x32xf32>, vector<24x32xf32> -> vector<24x32xf32>
    %172 = vector.extract_strided_slice %117 {offsets = [0, 96], sizes = [24, 32], strides = [1, 1]} : vector<24x384xf32> to vector<24x32xf32>
    %173 = vector.extract_strided_slice %117 {offsets = [0, 224], sizes = [24, 32], strides = [1, 1]} : vector<24x384xf32> to vector<24x32xf32>
    %174 = vector.extract_strided_slice %117 {offsets = [0, 352], sizes = [24, 32], strides = [1, 1]} : vector<24x384xf32> to vector<24x32xf32>
    %cst_67 = arith.constant dense<0.000000e+00> : vector<24x24xf32>
    %175 = tpu.matmul %172, %173, %cst_67 {dimension_numbers = #tpu.dot_dimension_numbers<[1], [1], [0], [0], [0, 0, 1, 0], [], []>} : vector<24x32xf32>, vector<24x32xf32>, vector<24x24xf32> -> vector<24x24xf32>
    %cst_68 = arith.constant 0.0883883461 : f32
    %176 = vector.broadcast %cst_68 : f32 to vector<24x24xf32>
    %177 = arith.mulf %175, %176 : vector<24x24xf32>
    %cst_69 = arith.constant -1.000000e+30 : f32
    %178 = vector.broadcast %cst_69 : f32 to vector<24x24xf32>
    %179 = arith.select %15, %177, %178 : vector<24x24xi1>, vector<24x24xf32>
    %cst_70 = arith.constant dense<0xFF800000> : vector<24xf32>
    %180 = vector.multi_reduction <maximumf>, %179, %cst_70 [1] : vector<24x24xf32> to vector<24xf32>
    %181 = vector.shape_cast %180 : vector<24xf32> to vector<24x1xf32>
    %182 = vector.broadcast %181 : vector<24x1xf32> to vector<24x24xf32>
    %183 = arith.subf %179, %182 : vector<24x24xf32>
    %184 = math.exp %183 : vector<24x24xf32>
    %cst_71 = arith.constant dense<0.000000e+00> : vector<24xf32>
    %185 = vector.multi_reduction <add>, %184, %cst_71 [1] : vector<24x24xf32> to vector<24xf32>
    %186 = vector.shape_cast %185 : vector<24xf32> to vector<24x1xf32>
    %187 = vector.broadcast %186 : vector<24x1xf32> to vector<24x24xf32>
    %188 = arith.divf %184, %187 : vector<24x24xf32>
    %cst_72 = arith.constant dense<0.000000e+00> : vector<24x32xf32>
    %189 = tpu.matmul %188, %174, %cst_72 {dimension_numbers = #tpu.dot_dimension_numbers<[1], [0], [0], [1], [0, 0, 1, 1], [], []>} : vector<24x24xf32>, vector<24x32xf32>, vector<24x32xf32> -> vector<24x32xf32>
    %190 = tpu.concatenate %135, %153, %171, %189 in 1 : vector<24x32xf32>, vector<24x32xf32>, vector<24x32xf32>, vector<24x32xf32> -> vector<24x128xf32>
    %191 = tpu.concatenate %116, %190 in 0 : vector<24x128xf32>, vector<24x128xf32> -> vector<48x128xf32>
    %c0_73 = arith.constant 0 : index
    %c0_74 = arith.constant 0 : index
    %c0_75 = arith.constant 0 : index
    %192 = vector.load %arg8[%c0_73, %c0_74, %c0_75] : memref<4x128x128xf32, #tpu.memory_space<vmem>>, vector<1x128x128xf32>
    %193 = vector.shape_cast %192 : vector<1x128x128xf32> to vector<128x128xf32>
    %cst_76 = arith.constant dense<0.000000e+00> : vector<48x128xf32>
    %194 = tpu.matmul %191, %193, %cst_76 {dimension_numbers = #tpu.dot_dimension_numbers<[1], [0], [0], [1], [0, 0, 1, 1], [], []>} : vector<48x128xf32>, vector<128x128xf32>, vector<48x128xf32> -> vector<48x128xf32>
    %c0_77 = arith.constant 0 : index
    %c0_78 = arith.constant 0 : index
    %c0_79 = arith.constant 0 : index
    %195 = vector.load %arg9[%c0_77, %c0_78, %c0_79] : memref<4x1x128xf32, #tpu.memory_space<vmem>>, vector<1x1x128xf32>
    %196 = vector.shape_cast %195 : vector<1x1x128xf32> to vector<1x128xf32>
    %197 = vector.broadcast %196 : vector<1x128xf32> to vector<48x128xf32>
    %198 = arith.addf %194, %197 : vector<48x128xf32>
    %199 = arith.addf %12, %198 : vector<48x128xf32>
    %c0_80 = arith.constant 0 : index
    %c0_81 = arith.constant 0 : index
    %c0_82 = arith.constant 0 : index
    %200 = vector.load %arg10[%c0_80, %c0_81, %c0_82] : memref<4x1x128xf32, #tpu.memory_space<vmem>>, vector<1x1x128xf32>
    %201 = vector.shape_cast %200 : vector<1x1x128xf32> to vector<1x128xf32>
    %c0_83 = arith.constant 0 : index
    %c0_84 = arith.constant 0 : index
    %c0_85 = arith.constant 0 : index
    %202 = vector.load %arg11[%c0_83, %c0_84, %c0_85] : memref<4x1x128xf32, #tpu.memory_space<vmem>>, vector<1x1x128xf32>
    %203 = vector.shape_cast %202 : vector<1x1x128xf32> to vector<1x128xf32>
    %cst_86 = arith.constant dense<0.000000e+00> : vector<48xf32>
    %204 = vector.multi_reduction <add>, %199, %cst_86 [1] : vector<48x128xf32> to vector<48xf32>
    %205 = vector.shape_cast %204 : vector<48xf32> to vector<48x1xf32>
    %cst_87 = arith.constant 1.280000e+02 : f32
    %206 = vector.broadcast %cst_87 : f32 to vector<48x1xf32>
    %207 = arith.divf %205, %206 : vector<48x1xf32>
    %208 = vector.broadcast %207 : vector<48x1xf32> to vector<48x128xf32>
    %209 = arith.subf %199, %208 : vector<48x128xf32>
    %210 = arith.mulf %209, %209 : vector<48x128xf32>
    %cst_88 = arith.constant dense<0.000000e+00> : vector<48xf32>
    %211 = vector.multi_reduction <add>, %210, %cst_88 [1] : vector<48x128xf32> to vector<48xf32>
    %212 = vector.shape_cast %211 : vector<48xf32> to vector<48x1xf32>
    %cst_89 = arith.constant 1.280000e+02 : f32
    %213 = vector.broadcast %cst_89 : f32 to vector<48x1xf32>
    %214 = arith.divf %212, %213 : vector<48x1xf32>
    %cst_90 = arith.constant 9.99999974E-6 : f32
    %215 = vector.broadcast %cst_90 : f32 to vector<48x1xf32>
    %216 = arith.addf %214, %215 : vector<48x1xf32>
    %217 = math.rsqrt %216 : vector<48x1xf32>
    %218 = vector.broadcast %217 : vector<48x1xf32> to vector<48x128xf32>
    %219 = arith.mulf %209, %218 : vector<48x128xf32>
    %220 = vector.broadcast %201 : vector<1x128xf32> to vector<48x128xf32>
    %221 = arith.mulf %219, %220 : vector<48x128xf32>
    %222 = vector.broadcast %203 : vector<1x128xf32> to vector<48x128xf32>
    %223 = arith.addf %221, %222 : vector<48x128xf32>
    %c0_91 = arith.constant 0 : index
    %c0_92 = arith.constant 0 : index
    %c0_93 = arith.constant 0 : index
    %224 = vector.load %arg12[%c0_91, %c0_92, %c0_93] : memref<4x128x64xf32, #tpu.memory_space<vmem>>, vector<1x128x64xf32>
    %225 = vector.shape_cast %224 : vector<1x128x64xf32> to vector<128x64xf32>
    %cst_94 = arith.constant dense<0.000000e+00> : vector<48x64xf32>
    %226 = tpu.matmul %223, %225, %cst_94 {dimension_numbers = #tpu.dot_dimension_numbers<[1], [0], [0], [1], [0, 0, 1, 1], [], []>} : vector<48x128xf32>, vector<128x64xf32>, vector<48x64xf32> -> vector<48x64xf32>
    %c0_95 = arith.constant 0 : index
    %c0_96 = arith.constant 0 : index
    %c0_97 = arith.constant 0 : index
    %227 = vector.load %arg13[%c0_95, %c0_96, %c0_97] : memref<4x1x64xf32, #tpu.memory_space<vmem>>, vector<1x1x64xf32>
    %228 = vector.shape_cast %227 : vector<1x1x64xf32> to vector<1x64xf32>
    %229 = vector.broadcast %228 : vector<1x64xf32> to vector<48x64xf32>
    %230 = arith.addf %226, %229 : vector<48x64xf32>
    %231 = arith.mulf %230, %230 : vector<48x64xf32>
    %232 = arith.mulf %230, %231 : vector<48x64xf32>
    %cst_98 = arith.constant 4.471500e-02 : f32
    %233 = vector.broadcast %cst_98 : f32 to vector<48x64xf32>
    %234 = arith.mulf %233, %232 : vector<48x64xf32>
    %235 = arith.addf %230, %234 : vector<48x64xf32>
    %cst_99 = arith.constant 0.797884583 : f32
    %236 = vector.broadcast %cst_99 : f32 to vector<48x64xf32>
    %237 = arith.mulf %236, %235 : vector<48x64xf32>
    %238 = math.tanh %237 : vector<48x64xf32>
    %cst_100 = arith.constant 1.000000e+00 : f32
    %239 = vector.broadcast %cst_100 : f32 to vector<48x64xf32>
    %240 = arith.addf %239, %238 : vector<48x64xf32>
    %cst_101 = arith.constant 5.000000e-01 : f32
    %241 = vector.broadcast %cst_101 : f32 to vector<48x64xf32>
    %242 = arith.mulf %241, %240 : vector<48x64xf32>
    %243 = arith.mulf %230, %242 : vector<48x64xf32>
    %c0_102 = arith.constant 0 : index
    %c0_103 = arith.constant 0 : index
    %c0_104 = arith.constant 0 : index
    %244 = vector.load %arg14[%c0_102, %c0_103, %c0_104] : memref<4x64x128xf32, #tpu.memory_space<vmem>>, vector<1x64x128xf32>
    %245 = vector.shape_cast %244 : vector<1x64x128xf32> to vector<64x128xf32>
    %cst_105 = arith.constant dense<0.000000e+00> : vector<48x128xf32>
    %246 = tpu.matmul %243, %245, %cst_105 {dimension_numbers = #tpu.dot_dimension_numbers<[1], [0], [0], [1], [0, 0, 1, 1], [], []>} : vector<48x64xf32>, vector<64x128xf32>, vector<48x128xf32> -> vector<48x128xf32>
    %c0_106 = arith.constant 0 : index
    %c0_107 = arith.constant 0 : index
    %c0_108 = arith.constant 0 : index
    %247 = vector.load %arg15[%c0_106, %c0_107, %c0_108] : memref<4x1x128xf32, #tpu.memory_space<vmem>>, vector<1x1x128xf32>
    %248 = vector.shape_cast %247 : vector<1x1x128xf32> to vector<1x128xf32>
    %249 = vector.broadcast %248 : vector<1x128xf32> to vector<48x128xf32>
    %250 = arith.addf %246, %249 : vector<48x128xf32>
    %251 = arith.addf %199, %250 : vector<48x128xf32>
    %c1 = arith.constant 1 : index
    %c0_109 = arith.constant 0 : index
    %c0_110 = arith.constant 0 : index
    %252 = vector.load %arg5[%c1, %c0_109, %c0_110] : memref<4x1x128xf32, #tpu.memory_space<vmem>>, vector<1x1x128xf32>
    %253 = vector.shape_cast %252 : vector<1x1x128xf32> to vector<1x128xf32>
    %c1_111 = arith.constant 1 : index
    %c0_112 = arith.constant 0 : index
    %c0_113 = arith.constant 0 : index
    %254 = vector.load %arg6[%c1_111, %c0_112, %c0_113] : memref<4x1x128xf32, #tpu.memory_space<vmem>>, vector<1x1x128xf32>
    %255 = vector.shape_cast %254 : vector<1x1x128xf32> to vector<1x128xf32>
    %cst_114 = arith.constant dense<0.000000e+00> : vector<48xf32>
    %256 = vector.multi_reduction <add>, %251, %cst_114 [1] : vector<48x128xf32> to vector<48xf32>
    %257 = vector.shape_cast %256 : vector<48xf32> to vector<48x1xf32>
    %cst_115 = arith.constant 1.280000e+02 : f32
    %258 = vector.broadcast %cst_115 : f32 to vector<48x1xf32>
    %259 = arith.divf %257, %258 : vector<48x1xf32>
    %260 = vector.broadcast %259 : vector<48x1xf32> to vector<48x128xf32>
    %261 = arith.subf %251, %260 : vector<48x128xf32>
    %262 = arith.mulf %261, %261 : vector<48x128xf32>
    %cst_116 = arith.constant dense<0.000000e+00> : vector<48xf32>
    %263 = vector.multi_reduction <add>, %262, %cst_116 [1] : vector<48x128xf32> to vector<48xf32>
    %264 = vector.shape_cast %263 : vector<48xf32> to vector<48x1xf32>
    %cst_117 = arith.constant 1.280000e+02 : f32
    %265 = vector.broadcast %cst_117 : f32 to vector<48x1xf32>
    %266 = arith.divf %264, %265 : vector<48x1xf32>
    %cst_118 = arith.constant 9.99999974E-6 : f32
    %267 = vector.broadcast %cst_118 : f32 to vector<48x1xf32>
    %268 = arith.addf %266, %267 : vector<48x1xf32>
    %269 = math.rsqrt %268 : vector<48x1xf32>
    %270 = vector.broadcast %269 : vector<48x1xf32> to vector<48x128xf32>
    %271 = arith.mulf %261, %270 : vector<48x128xf32>
    %272 = vector.broadcast %253 : vector<1x128xf32> to vector<48x128xf32>
    %273 = arith.mulf %271, %272 : vector<48x128xf32>
    %274 = vector.broadcast %255 : vector<1x128xf32> to vector<48x128xf32>
    %275 = arith.addf %273, %274 : vector<48x128xf32>
    %c1_119 = arith.constant 1 : index
    %c0_120 = arith.constant 0 : index
    %c0_121 = arith.constant 0 : index
    %276 = vector.load %arg7[%c1_119, %c0_120, %c0_121] : memref<4x128x384xf32, #tpu.memory_space<vmem>>, vector<1x128x384xf32>
    %277 = vector.shape_cast %276 : vector<1x128x384xf32> to vector<128x384xf32>
    %cst_122 = arith.constant dense<0.000000e+00> : vector<48x384xf32>
    %278 = tpu.matmul %275, %277, %cst_122 {dimension_numbers = #tpu.dot_dimension_numbers<[1], [0], [0], [1], [0, 0, 1, 1], [], []>} : vector<48x128xf32>, vector<128x384xf32>, vector<48x384xf32> -> vector<48x384xf32>
    %279 = vector.extract_strided_slice %278 {offsets = [0, 0], sizes = [24, 384], strides = [1, 1]} : vector<48x384xf32> to vector<24x384xf32>
    %280 = vector.extract_strided_slice %279 {offsets = [0, 0], sizes = [24, 32], strides = [1, 1]} : vector<24x384xf32> to vector<24x32xf32>
    %281 = vector.extract_strided_slice %279 {offsets = [0, 128], sizes = [24, 32], strides = [1, 1]} : vector<24x384xf32> to vector<24x32xf32>
    %282 = vector.extract_strided_slice %279 {offsets = [0, 256], sizes = [24, 32], strides = [1, 1]} : vector<24x384xf32> to vector<24x32xf32>
    %cst_123 = arith.constant dense<0.000000e+00> : vector<24x24xf32>
    %283 = tpu.matmul %280, %281, %cst_123 {dimension_numbers = #tpu.dot_dimension_numbers<[1], [1], [0], [0], [0, 0, 1, 0], [], []>} : vector<24x32xf32>, vector<24x32xf32>, vector<24x24xf32> -> vector<24x24xf32>
    %cst_124 = arith.constant 0.0883883461 : f32
    %284 = vector.broadcast %cst_124 : f32 to vector<24x24xf32>
    %285 = arith.mulf %283, %284 : vector<24x24xf32>
    %cst_125 = arith.constant -1.000000e+30 : f32
    %286 = vector.broadcast %cst_125 : f32 to vector<24x24xf32>
    %287 = arith.select %15, %285, %286 : vector<24x24xi1>, vector<24x24xf32>
    %cst_126 = arith.constant dense<0xFF800000> : vector<24xf32>
    %288 = vector.multi_reduction <maximumf>, %287, %cst_126 [1] : vector<24x24xf32> to vector<24xf32>
    %289 = vector.shape_cast %288 : vector<24xf32> to vector<24x1xf32>
    %290 = vector.broadcast %289 : vector<24x1xf32> to vector<24x24xf32>
    %291 = arith.subf %287, %290 : vector<24x24xf32>
    %292 = math.exp %291 : vector<24x24xf32>
    %cst_127 = arith.constant dense<0.000000e+00> : vector<24xf32>
    %293 = vector.multi_reduction <add>, %292, %cst_127 [1] : vector<24x24xf32> to vector<24xf32>
    %294 = vector.shape_cast %293 : vector<24xf32> to vector<24x1xf32>
    %295 = vector.broadcast %294 : vector<24x1xf32> to vector<24x24xf32>
    %296 = arith.divf %292, %295 : vector<24x24xf32>
    %cst_128 = arith.constant dense<0.000000e+00> : vector<24x32xf32>
    %297 = tpu.matmul %296, %282, %cst_128 {dimension_numbers = #tpu.dot_dimension_numbers<[1], [0], [0], [1], [0, 0, 1, 1], [], []>} : vector<24x24xf32>, vector<24x32xf32>, vector<24x32xf32> -> vector<24x32xf32>
    %298 = vector.extract_strided_slice %279 {offsets = [0, 32], sizes = [24, 32], strides = [1, 1]} : vector<24x384xf32> to vector<24x32xf32>
    %299 = vector.extract_strided_slice %279 {offsets = [0, 160], sizes = [24, 32], strides = [1, 1]} : vector<24x384xf32> to vector<24x32xf32>
    %300 = vector.extract_strided_slice %279 {offsets = [0, 288], sizes = [24, 32], strides = [1, 1]} : vector<24x384xf32> to vector<24x32xf32>
    %cst_129 = arith.constant dense<0.000000e+00> : vector<24x24xf32>
    %301 = tpu.matmul %298, %299, %cst_129 {dimension_numbers = #tpu.dot_dimension_numbers<[1], [1], [0], [0], [0, 0, 1, 0], [], []>} : vector<24x32xf32>, vector<24x32xf32>, vector<24x24xf32> -> vector<24x24xf32>
    %cst_130 = arith.constant 0.0883883461 : f32
    %302 = vector.broadcast %cst_130 : f32 to vector<24x24xf32>
    %303 = arith.mulf %301, %302 : vector<24x24xf32>
    %cst_131 = arith.constant -1.000000e+30 : f32
    %304 = vector.broadcast %cst_131 : f32 to vector<24x24xf32>
    %305 = arith.select %15, %303, %304 : vector<24x24xi1>, vector<24x24xf32>
    %cst_132 = arith.constant dense<0xFF800000> : vector<24xf32>
    %306 = vector.multi_reduction <maximumf>, %305, %cst_132 [1] : vector<24x24xf32> to vector<24xf32>
    %307 = vector.shape_cast %306 : vector<24xf32> to vector<24x1xf32>
    %308 = vector.broadcast %307 : vector<24x1xf32> to vector<24x24xf32>
    %309 = arith.subf %305, %308 : vector<24x24xf32>
    %310 = math.exp %309 : vector<24x24xf32>
    %cst_133 = arith.constant dense<0.000000e+00> : vector<24xf32>
    %311 = vector.multi_reduction <add>, %310, %cst_133 [1] : vector<24x24xf32> to vector<24xf32>
    %312 = vector.shape_cast %311 : vector<24xf32> to vector<24x1xf32>
    %313 = vector.broadcast %312 : vector<24x1xf32> to vector<24x24xf32>
    %314 = arith.divf %310, %313 : vector<24x24xf32>
    %cst_134 = arith.constant dense<0.000000e+00> : vector<24x32xf32>
    %315 = tpu.matmul %314, %300, %cst_134 {dimension_numbers = #tpu.dot_dimension_numbers<[1], [0], [0], [1], [0, 0, 1, 1], [], []>} : vector<24x24xf32>, vector<24x32xf32>, vector<24x32xf32> -> vector<24x32xf32>
    %316 = vector.extract_strided_slice %279 {offsets = [0, 64], sizes = [24, 32], strides = [1, 1]} : vector<24x384xf32> to vector<24x32xf32>
    %317 = vector.extract_strided_slice %279 {offsets = [0, 192], sizes = [24, 32], strides = [1, 1]} : vector<24x384xf32> to vector<24x32xf32>
    %318 = vector.extract_strided_slice %279 {offsets = [0, 320], sizes = [24, 32], strides = [1, 1]} : vector<24x384xf32> to vector<24x32xf32>
    %cst_135 = arith.constant dense<0.000000e+00> : vector<24x24xf32>
    %319 = tpu.matmul %316, %317, %cst_135 {dimension_numbers = #tpu.dot_dimension_numbers<[1], [1], [0], [0], [0, 0, 1, 0], [], []>} : vector<24x32xf32>, vector<24x32xf32>, vector<24x24xf32> -> vector<24x24xf32>
    %cst_136 = arith.constant 0.0883883461 : f32
    %320 = vector.broadcast %cst_136 : f32 to vector<24x24xf32>
    %321 = arith.mulf %319, %320 : vector<24x24xf32>
    %cst_137 = arith.constant -1.000000e+30 : f32
    %322 = vector.broadcast %cst_137 : f32 to vector<24x24xf32>
    %323 = arith.select %15, %321, %322 : vector<24x24xi1>, vector<24x24xf32>
    %cst_138 = arith.constant dense<0xFF800000> : vector<24xf32>
    %324 = vector.multi_reduction <maximumf>, %323, %cst_138 [1] : vector<24x24xf32> to vector<24xf32>
    %325 = vector.shape_cast %324 : vector<24xf32> to vector<24x1xf32>
    %326 = vector.broadcast %325 : vector<24x1xf32> to vector<24x24xf32>
    %327 = arith.subf %323, %326 : vector<24x24xf32>
    %328 = math.exp %327 : vector<24x24xf32>
    %cst_139 = arith.constant dense<0.000000e+00> : vector<24xf32>
    %329 = vector.multi_reduction <add>, %328, %cst_139 [1] : vector<24x24xf32> to vector<24xf32>
    %330 = vector.shape_cast %329 : vector<24xf32> to vector<24x1xf32>
    %331 = vector.broadcast %330 : vector<24x1xf32> to vector<24x24xf32>
    %332 = arith.divf %328, %331 : vector<24x24xf32>
    %cst_140 = arith.constant dense<0.000000e+00> : vector<24x32xf32>
    %333 = tpu.matmul %332, %318, %cst_140 {dimension_numbers = #tpu.dot_dimension_numbers<[1], [0], [0], [1], [0, 0, 1, 1], [], []>} : vector<24x24xf32>, vector<24x32xf32>, vector<24x32xf32> -> vector<24x32xf32>
    %334 = vector.extract_strided_slice %279 {offsets = [0, 96], sizes = [24, 32], strides = [1, 1]} : vector<24x384xf32> to vector<24x32xf32>
    %335 = vector.extract_strided_slice %279 {offsets = [0, 224], sizes = [24, 32], strides = [1, 1]} : vector<24x384xf32> to vector<24x32xf32>
    %336 = vector.extract_strided_slice %279 {offsets = [0, 352], sizes = [24, 32], strides = [1, 1]} : vector<24x384xf32> to vector<24x32xf32>
    %cst_141 = arith.constant dense<0.000000e+00> : vector<24x24xf32>
    %337 = tpu.matmul %334, %335, %cst_141 {dimension_numbers = #tpu.dot_dimension_numbers<[1], [1], [0], [0], [0, 0, 1, 0], [], []>} : vector<24x32xf32>, vector<24x32xf32>, vector<24x24xf32> -> vector<24x24xf32>
    %cst_142 = arith.constant 0.0883883461 : f32
    %338 = vector.broadcast %cst_142 : f32 to vector<24x24xf32>
    %339 = arith.mulf %337, %338 : vector<24x24xf32>
    %cst_143 = arith.constant -1.000000e+30 : f32
    %340 = vector.broadcast %cst_143 : f32 to vector<24x24xf32>
    %341 = arith.select %15, %339, %340 : vector<24x24xi1>, vector<24x24xf32>
    %cst_144 = arith.constant dense<0xFF800000> : vector<24xf32>
    %342 = vector.multi_reduction <maximumf>, %341, %cst_144 [1] : vector<24x24xf32> to vector<24xf32>
    %343 = vector.shape_cast %342 : vector<24xf32> to vector<24x1xf32>
    %344 = vector.broadcast %343 : vector<24x1xf32> to vector<24x24xf32>
    %345 = arith.subf %341, %344 : vector<24x24xf32>
    %346 = math.exp %345 : vector<24x24xf32>
    %cst_145 = arith.constant dense<0.000000e+00> : vector<24xf32>
    %347 = vector.multi_reduction <add>, %346, %cst_145 [1] : vector<24x24xf32> to vector<24xf32>
    %348 = vector.shape_cast %347 : vector<24xf32> to vector<24x1xf32>
    %349 = vector.broadcast %348 : vector<24x1xf32> to vector<24x24xf32>
    %350 = arith.divf %346, %349 : vector<24x24xf32>
    %cst_146 = arith.constant dense<0.000000e+00> : vector<24x32xf32>
    %351 = tpu.matmul %350, %336, %cst_146 {dimension_numbers = #tpu.dot_dimension_numbers<[1], [0], [0], [1], [0, 0, 1, 1], [], []>} : vector<24x24xf32>, vector<24x32xf32>, vector<24x32xf32> -> vector<24x32xf32>
    %352 = tpu.concatenate %297, %315, %333, %351 in 1 : vector<24x32xf32>, vector<24x32xf32>, vector<24x32xf32>, vector<24x32xf32> -> vector<24x128xf32>
    %353 = vector.extract_strided_slice %278 {offsets = [24, 0], sizes = [24, 384], strides = [1, 1]} : vector<48x384xf32> to vector<24x384xf32>
    %354 = vector.extract_strided_slice %353 {offsets = [0, 0], sizes = [24, 32], strides = [1, 1]} : vector<24x384xf32> to vector<24x32xf32>
    %355 = vector.extract_strided_slice %353 {offsets = [0, 128], sizes = [24, 32], strides = [1, 1]} : vector<24x384xf32> to vector<24x32xf32>
    %356 = vector.extract_strided_slice %353 {offsets = [0, 256], sizes = [24, 32], strides = [1, 1]} : vector<24x384xf32> to vector<24x32xf32>
    %cst_147 = arith.constant dense<0.000000e+00> : vector<24x24xf32>
    %357 = tpu.matmul %354, %355, %cst_147 {dimension_numbers = #tpu.dot_dimension_numbers<[1], [1], [0], [0], [0, 0, 1, 0], [], []>} : vector<24x32xf32>, vector<24x32xf32>, vector<24x24xf32> -> vector<24x24xf32>
    %cst_148 = arith.constant 0.0883883461 : f32
    %358 = vector.broadcast %cst_148 : f32 to vector<24x24xf32>
    %359 = arith.mulf %357, %358 : vector<24x24xf32>
    %cst_149 = arith.constant -1.000000e+30 : f32
    %360 = vector.broadcast %cst_149 : f32 to vector<24x24xf32>
    %361 = arith.select %15, %359, %360 : vector<24x24xi1>, vector<24x24xf32>
    %cst_150 = arith.constant dense<0xFF800000> : vector<24xf32>
    %362 = vector.multi_reduction <maximumf>, %361, %cst_150 [1] : vector<24x24xf32> to vector<24xf32>
    %363 = vector.shape_cast %362 : vector<24xf32> to vector<24x1xf32>
    %364 = vector.broadcast %363 : vector<24x1xf32> to vector<24x24xf32>
    %365 = arith.subf %361, %364 : vector<24x24xf32>
    %366 = math.exp %365 : vector<24x24xf32>
    %cst_151 = arith.constant dense<0.000000e+00> : vector<24xf32>
    %367 = vector.multi_reduction <add>, %366, %cst_151 [1] : vector<24x24xf32> to vector<24xf32>
    %368 = vector.shape_cast %367 : vector<24xf32> to vector<24x1xf32>
    %369 = vector.broadcast %368 : vector<24x1xf32> to vector<24x24xf32>
    %370 = arith.divf %366, %369 : vector<24x24xf32>
    %cst_152 = arith.constant dense<0.000000e+00> : vector<24x32xf32>
    %371 = tpu.matmul %370, %356, %cst_152 {dimension_numbers = #tpu.dot_dimension_numbers<[1], [0], [0], [1], [0, 0, 1, 1], [], []>} : vector<24x24xf32>, vector<24x32xf32>, vector<24x32xf32> -> vector<24x32xf32>
    %372 = vector.extract_strided_slice %353 {offsets = [0, 32], sizes = [24, 32], strides = [1, 1]} : vector<24x384xf32> to vector<24x32xf32>
    %373 = vector.extract_strided_slice %353 {offsets = [0, 160], sizes = [24, 32], strides = [1, 1]} : vector<24x384xf32> to vector<24x32xf32>
    %374 = vector.extract_strided_slice %353 {offsets = [0, 288], sizes = [24, 32], strides = [1, 1]} : vector<24x384xf32> to vector<24x32xf32>
    %cst_153 = arith.constant dense<0.000000e+00> : vector<24x24xf32>
    %375 = tpu.matmul %372, %373, %cst_153 {dimension_numbers = #tpu.dot_dimension_numbers<[1], [1], [0], [0], [0, 0, 1, 0], [], []>} : vector<24x32xf32>, vector<24x32xf32>, vector<24x24xf32> -> vector<24x24xf32>
    %cst_154 = arith.constant 0.0883883461 : f32
    %376 = vector.broadcast %cst_154 : f32 to vector<24x24xf32>
    %377 = arith.mulf %375, %376 : vector<24x24xf32>
    %cst_155 = arith.constant -1.000000e+30 : f32
    %378 = vector.broadcast %cst_155 : f32 to vector<24x24xf32>
    %379 = arith.select %15, %377, %378 : vector<24x24xi1>, vector<24x24xf32>
    %cst_156 = arith.constant dense<0xFF800000> : vector<24xf32>
    %380 = vector.multi_reduction <maximumf>, %379, %cst_156 [1] : vector<24x24xf32> to vector<24xf32>
    %381 = vector.shape_cast %380 : vector<24xf32> to vector<24x1xf32>
    %382 = vector.broadcast %381 : vector<24x1xf32> to vector<24x24xf32>
    %383 = arith.subf %379, %382 : vector<24x24xf32>
    %384 = math.exp %383 : vector<24x24xf32>
    %cst_157 = arith.constant dense<0.000000e+00> : vector<24xf32>
    %385 = vector.multi_reduction <add>, %384, %cst_157 [1] : vector<24x24xf32> to vector<24xf32>
    %386 = vector.shape_cast %385 : vector<24xf32> to vector<24x1xf32>
    %387 = vector.broadcast %386 : vector<24x1xf32> to vector<24x24xf32>
    %388 = arith.divf %384, %387 : vector<24x24xf32>
    %cst_158 = arith.constant dense<0.000000e+00> : vector<24x32xf32>
    %389 = tpu.matmul %388, %374, %cst_158 {dimension_numbers = #tpu.dot_dimension_numbers<[1], [0], [0], [1], [0, 0, 1, 1], [], []>} : vector<24x24xf32>, vector<24x32xf32>, vector<24x32xf32> -> vector<24x32xf32>
    %390 = vector.extract_strided_slice %353 {offsets = [0, 64], sizes = [24, 32], strides = [1, 1]} : vector<24x384xf32> to vector<24x32xf32>
    %391 = vector.extract_strided_slice %353 {offsets = [0, 192], sizes = [24, 32], strides = [1, 1]} : vector<24x384xf32> to vector<24x32xf32>
    %392 = vector.extract_strided_slice %353 {offsets = [0, 320], sizes = [24, 32], strides = [1, 1]} : vector<24x384xf32> to vector<24x32xf32>
    %cst_159 = arith.constant dense<0.000000e+00> : vector<24x24xf32>
    %393 = tpu.matmul %390, %391, %cst_159 {dimension_numbers = #tpu.dot_dimension_numbers<[1], [1], [0], [0], [0, 0, 1, 0], [], []>} : vector<24x32xf32>, vector<24x32xf32>, vector<24x24xf32> -> vector<24x24xf32>
    %cst_160 = arith.constant 0.0883883461 : f32
    %394 = vector.broadcast %cst_160 : f32 to vector<24x24xf32>
    %395 = arith.mulf %393, %394 : vector<24x24xf32>
    %cst_161 = arith.constant -1.000000e+30 : f32
    %396 = vector.broadcast %cst_161 : f32 to vector<24x24xf32>
    %397 = arith.select %15, %395, %396 : vector<24x24xi1>, vector<24x24xf32>
    %cst_162 = arith.constant dense<0xFF800000> : vector<24xf32>
    %398 = vector.multi_reduction <maximumf>, %397, %cst_162 [1] : vector<24x24xf32> to vector<24xf32>
    %399 = vector.shape_cast %398 : vector<24xf32> to vector<24x1xf32>
    %400 = vector.broadcast %399 : vector<24x1xf32> to vector<24x24xf32>
    %401 = arith.subf %397, %400 : vector<24x24xf32>
    %402 = math.exp %401 : vector<24x24xf32>
    %cst_163 = arith.constant dense<0.000000e+00> : vector<24xf32>
    %403 = vector.multi_reduction <add>, %402, %cst_163 [1] : vector<24x24xf32> to vector<24xf32>
    %404 = vector.shape_cast %403 : vector<24xf32> to vector<24x1xf32>
    %405 = vector.broadcast %404 : vector<24x1xf32> to vector<24x24xf32>
    %406 = arith.divf %402, %405 : vector<24x24xf32>
    %cst_164 = arith.constant dense<0.000000e+00> : vector<24x32xf32>
    %407 = tpu.matmul %406, %392, %cst_164 {dimension_numbers = #tpu.dot_dimension_numbers<[1], [0], [0], [1], [0, 0, 1, 1], [], []>} : vector<24x24xf32>, vector<24x32xf32>, vector<24x32xf32> -> vector<24x32xf32>
    %408 = vector.extract_strided_slice %353 {offsets = [0, 96], sizes = [24, 32], strides = [1, 1]} : vector<24x384xf32> to vector<24x32xf32>
    %409 = vector.extract_strided_slice %353 {offsets = [0, 224], sizes = [24, 32], strides = [1, 1]} : vector<24x384xf32> to vector<24x32xf32>
    %410 = vector.extract_strided_slice %353 {offsets = [0, 352], sizes = [24, 32], strides = [1, 1]} : vector<24x384xf32> to vector<24x32xf32>
    %cst_165 = arith.constant dense<0.000000e+00> : vector<24x24xf32>
    %411 = tpu.matmul %408, %409, %cst_165 {dimension_numbers = #tpu.dot_dimension_numbers<[1], [1], [0], [0], [0, 0, 1, 0], [], []>} : vector<24x32xf32>, vector<24x32xf32>, vector<24x24xf32> -> vector<24x24xf32>
    %cst_166 = arith.constant 0.0883883461 : f32
    %412 = vector.broadcast %cst_166 : f32 to vector<24x24xf32>
    %413 = arith.mulf %411, %412 : vector<24x24xf32>
    %cst_167 = arith.constant -1.000000e+30 : f32
    %414 = vector.broadcast %cst_167 : f32 to vector<24x24xf32>
    %415 = arith.select %15, %413, %414 : vector<24x24xi1>, vector<24x24xf32>
    %cst_168 = arith.constant dense<0xFF800000> : vector<24xf32>
    %416 = vector.multi_reduction <maximumf>, %415, %cst_168 [1] : vector<24x24xf32> to vector<24xf32>
    %417 = vector.shape_cast %416 : vector<24xf32> to vector<24x1xf32>
    %418 = vector.broadcast %417 : vector<24x1xf32> to vector<24x24xf32>
    %419 = arith.subf %415, %418 : vector<24x24xf32>
    %420 = math.exp %419 : vector<24x24xf32>
    %cst_169 = arith.constant dense<0.000000e+00> : vector<24xf32>
    %421 = vector.multi_reduction <add>, %420, %cst_169 [1] : vector<24x24xf32> to vector<24xf32>
    %422 = vector.shape_cast %421 : vector<24xf32> to vector<24x1xf32>
    %423 = vector.broadcast %422 : vector<24x1xf32> to vector<24x24xf32>
    %424 = arith.divf %420, %423 : vector<24x24xf32>
    %cst_170 = arith.constant dense<0.000000e+00> : vector<24x32xf32>
    %425 = tpu.matmul %424, %410, %cst_170 {dimension_numbers = #tpu.dot_dimension_numbers<[1], [0], [0], [1], [0, 0, 1, 1], [], []>} : vector<24x24xf32>, vector<24x32xf32>, vector<24x32xf32> -> vector<24x32xf32>
    %426 = tpu.concatenate %371, %389, %407, %425 in 1 : vector<24x32xf32>, vector<24x32xf32>, vector<24x32xf32>, vector<24x32xf32> -> vector<24x128xf32>
    %427 = tpu.concatenate %352, %426 in 0 : vector<24x128xf32>, vector<24x128xf32> -> vector<48x128xf32>
    %c1_171 = arith.constant 1 : index
    %c0_172 = arith.constant 0 : index
    %c0_173 = arith.constant 0 : index
    %428 = vector.load %arg8[%c1_171, %c0_172, %c0_173] : memref<4x128x128xf32, #tpu.memory_space<vmem>>, vector<1x128x128xf32>
    %429 = vector.shape_cast %428 : vector<1x128x128xf32> to vector<128x128xf32>
    %cst_174 = arith.constant dense<0.000000e+00> : vector<48x128xf32>
    %430 = tpu.matmul %427, %429, %cst_174 {dimension_numbers = #tpu.dot_dimension_numbers<[1], [0], [0], [1], [0, 0, 1, 1], [], []>} : vector<48x128xf32>, vector<128x128xf32>, vector<48x128xf32> -> vector<48x128xf32>
    %c1_175 = arith.constant 1 : index
    %c0_176 = arith.constant 0 : index
    %c0_177 = arith.constant 0 : index
    %431 = vector.load %arg9[%c1_175, %c0_176, %c0_177] : memref<4x1x128xf32, #tpu.memory_space<vmem>>, vector<1x1x128xf32>
    %432 = vector.shape_cast %431 : vector<1x1x128xf32> to vector<1x128xf32>
    %433 = vector.broadcast %432 : vector<1x128xf32> to vector<48x128xf32>
    %434 = arith.addf %430, %433 : vector<48x128xf32>
    %435 = arith.addf %251, %434 : vector<48x128xf32>
    %c1_178 = arith.constant 1 : index
    %c0_179 = arith.constant 0 : index
    %c0_180 = arith.constant 0 : index
    %436 = vector.load %arg10[%c1_178, %c0_179, %c0_180] : memref<4x1x128xf32, #tpu.memory_space<vmem>>, vector<1x1x128xf32>
    %437 = vector.shape_cast %436 : vector<1x1x128xf32> to vector<1x128xf32>
    %c1_181 = arith.constant 1 : index
    %c0_182 = arith.constant 0 : index
    %c0_183 = arith.constant 0 : index
    %438 = vector.load %arg11[%c1_181, %c0_182, %c0_183] : memref<4x1x128xf32, #tpu.memory_space<vmem>>, vector<1x1x128xf32>
    %439 = vector.shape_cast %438 : vector<1x1x128xf32> to vector<1x128xf32>
    %cst_184 = arith.constant dense<0.000000e+00> : vector<48xf32>
    %440 = vector.multi_reduction <add>, %435, %cst_184 [1] : vector<48x128xf32> to vector<48xf32>
    %441 = vector.shape_cast %440 : vector<48xf32> to vector<48x1xf32>
    %cst_185 = arith.constant 1.280000e+02 : f32
    %442 = vector.broadcast %cst_185 : f32 to vector<48x1xf32>
    %443 = arith.divf %441, %442 : vector<48x1xf32>
    %444 = vector.broadcast %443 : vector<48x1xf32> to vector<48x128xf32>
    %445 = arith.subf %435, %444 : vector<48x128xf32>
    %446 = arith.mulf %445, %445 : vector<48x128xf32>
    %cst_186 = arith.constant dense<0.000000e+00> : vector<48xf32>
    %447 = vector.multi_reduction <add>, %446, %cst_186 [1] : vector<48x128xf32> to vector<48xf32>
    %448 = vector.shape_cast %447 : vector<48xf32> to vector<48x1xf32>
    %cst_187 = arith.constant 1.280000e+02 : f32
    %449 = vector.broadcast %cst_187 : f32 to vector<48x1xf32>
    %450 = arith.divf %448, %449 : vector<48x1xf32>
    %cst_188 = arith.constant 9.99999974E-6 : f32
    %451 = vector.broadcast %cst_188 : f32 to vector<48x1xf32>
    %452 = arith.addf %450, %451 : vector<48x1xf32>
    %453 = math.rsqrt %452 : vector<48x1xf32>
    %454 = vector.broadcast %453 : vector<48x1xf32> to vector<48x128xf32>
    %455 = arith.mulf %445, %454 : vector<48x128xf32>
    %456 = vector.broadcast %437 : vector<1x128xf32> to vector<48x128xf32>
    %457 = arith.mulf %455, %456 : vector<48x128xf32>
    %458 = vector.broadcast %439 : vector<1x128xf32> to vector<48x128xf32>
    %459 = arith.addf %457, %458 : vector<48x128xf32>
    %c1_189 = arith.constant 1 : index
    %c0_190 = arith.constant 0 : index
    %c0_191 = arith.constant 0 : index
    %460 = vector.load %arg12[%c1_189, %c0_190, %c0_191] : memref<4x128x64xf32, #tpu.memory_space<vmem>>, vector<1x128x64xf32>
    %461 = vector.shape_cast %460 : vector<1x128x64xf32> to vector<128x64xf32>
    %cst_192 = arith.constant dense<0.000000e+00> : vector<48x64xf32>
    %462 = tpu.matmul %459, %461, %cst_192 {dimension_numbers = #tpu.dot_dimension_numbers<[1], [0], [0], [1], [0, 0, 1, 1], [], []>} : vector<48x128xf32>, vector<128x64xf32>, vector<48x64xf32> -> vector<48x64xf32>
    %c1_193 = arith.constant 1 : index
    %c0_194 = arith.constant 0 : index
    %c0_195 = arith.constant 0 : index
    %463 = vector.load %arg13[%c1_193, %c0_194, %c0_195] : memref<4x1x64xf32, #tpu.memory_space<vmem>>, vector<1x1x64xf32>
    %464 = vector.shape_cast %463 : vector<1x1x64xf32> to vector<1x64xf32>
    %465 = vector.broadcast %464 : vector<1x64xf32> to vector<48x64xf32>
    %466 = arith.addf %462, %465 : vector<48x64xf32>
    %467 = arith.mulf %466, %466 : vector<48x64xf32>
    %468 = arith.mulf %466, %467 : vector<48x64xf32>
    %cst_196 = arith.constant 4.471500e-02 : f32
    %469 = vector.broadcast %cst_196 : f32 to vector<48x64xf32>
    %470 = arith.mulf %469, %468 : vector<48x64xf32>
    %471 = arith.addf %466, %470 : vector<48x64xf32>
    %cst_197 = arith.constant 0.797884583 : f32
    %472 = vector.broadcast %cst_197 : f32 to vector<48x64xf32>
    %473 = arith.mulf %472, %471 : vector<48x64xf32>
    %474 = math.tanh %473 : vector<48x64xf32>
    %cst_198 = arith.constant 1.000000e+00 : f32
    %475 = vector.broadcast %cst_198 : f32 to vector<48x64xf32>
    %476 = arith.addf %475, %474 : vector<48x64xf32>
    %cst_199 = arith.constant 5.000000e-01 : f32
    %477 = vector.broadcast %cst_199 : f32 to vector<48x64xf32>
    %478 = arith.mulf %477, %476 : vector<48x64xf32>
    %479 = arith.mulf %466, %478 : vector<48x64xf32>
    %c1_200 = arith.constant 1 : index
    %c0_201 = arith.constant 0 : index
    %c0_202 = arith.constant 0 : index
    %480 = vector.load %arg14[%c1_200, %c0_201, %c0_202] : memref<4x64x128xf32, #tpu.memory_space<vmem>>, vector<1x64x128xf32>
    %481 = vector.shape_cast %480 : vector<1x64x128xf32> to vector<64x128xf32>
    %cst_203 = arith.constant dense<0.000000e+00> : vector<48x128xf32>
    %482 = tpu.matmul %479, %481, %cst_203 {dimension_numbers = #tpu.dot_dimension_numbers<[1], [0], [0], [1], [0, 0, 1, 1], [], []>} : vector<48x64xf32>, vector<64x128xf32>, vector<48x128xf32> -> vector<48x128xf32>
    %c1_204 = arith.constant 1 : index
    %c0_205 = arith.constant 0 : index
    %c0_206 = arith.constant 0 : index
    %483 = vector.load %arg15[%c1_204, %c0_205, %c0_206] : memref<4x1x128xf32, #tpu.memory_space<vmem>>, vector<1x1x128xf32>
    %484 = vector.shape_cast %483 : vector<1x1x128xf32> to vector<1x128xf32>
    %485 = vector.broadcast %484 : vector<1x128xf32> to vector<48x128xf32>
    %486 = arith.addf %482, %485 : vector<48x128xf32>
    %487 = arith.addf %435, %486 : vector<48x128xf32>
    %c2 = arith.constant 2 : index
    %c0_207 = arith.constant 0 : index
    %c0_208 = arith.constant 0 : index
    %488 = vector.load %arg5[%c2, %c0_207, %c0_208] : memref<4x1x128xf32, #tpu.memory_space<vmem>>, vector<1x1x128xf32>
    %489 = vector.shape_cast %488 : vector<1x1x128xf32> to vector<1x128xf32>
    %c2_209 = arith.constant 2 : index
    %c0_210 = arith.constant 0 : index
    %c0_211 = arith.constant 0 : index
    %490 = vector.load %arg6[%c2_209, %c0_210, %c0_211] : memref<4x1x128xf32, #tpu.memory_space<vmem>>, vector<1x1x128xf32>
    %491 = vector.shape_cast %490 : vector<1x1x128xf32> to vector<1x128xf32>
    %cst_212 = arith.constant dense<0.000000e+00> : vector<48xf32>
    %492 = vector.multi_reduction <add>, %487, %cst_212 [1] : vector<48x128xf32> to vector<48xf32>
    %493 = vector.shape_cast %492 : vector<48xf32> to vector<48x1xf32>
    %cst_213 = arith.constant 1.280000e+02 : f32
    %494 = vector.broadcast %cst_213 : f32 to vector<48x1xf32>
    %495 = arith.divf %493, %494 : vector<48x1xf32>
    %496 = vector.broadcast %495 : vector<48x1xf32> to vector<48x128xf32>
    %497 = arith.subf %487, %496 : vector<48x128xf32>
    %498 = arith.mulf %497, %497 : vector<48x128xf32>
    %cst_214 = arith.constant dense<0.000000e+00> : vector<48xf32>
    %499 = vector.multi_reduction <add>, %498, %cst_214 [1] : vector<48x128xf32> to vector<48xf32>
    %500 = vector.shape_cast %499 : vector<48xf32> to vector<48x1xf32>
    %cst_215 = arith.constant 1.280000e+02 : f32
    %501 = vector.broadcast %cst_215 : f32 to vector<48x1xf32>
    %502 = arith.divf %500, %501 : vector<48x1xf32>
    %cst_216 = arith.constant 9.99999974E-6 : f32
    %503 = vector.broadcast %cst_216 : f32 to vector<48x1xf32>
    %504 = arith.addf %502, %503 : vector<48x1xf32>
    %505 = math.rsqrt %504 : vector<48x1xf32>
    %506 = vector.broadcast %505 : vector<48x1xf32> to vector<48x128xf32>
    %507 = arith.mulf %497, %506 : vector<48x128xf32>
    %508 = vector.broadcast %489 : vector<1x128xf32> to vector<48x128xf32>
    %509 = arith.mulf %507, %508 : vector<48x128xf32>
    %510 = vector.broadcast %491 : vector<1x128xf32> to vector<48x128xf32>
    %511 = arith.addf %509, %510 : vector<48x128xf32>
    %c2_217 = arith.constant 2 : index
    %c0_218 = arith.constant 0 : index
    %c0_219 = arith.constant 0 : index
    %512 = vector.load %arg7[%c2_217, %c0_218, %c0_219] : memref<4x128x384xf32, #tpu.memory_space<vmem>>, vector<1x128x384xf32>
    %513 = vector.shape_cast %512 : vector<1x128x384xf32> to vector<128x384xf32>
    %cst_220 = arith.constant dense<0.000000e+00> : vector<48x384xf32>
    %514 = tpu.matmul %511, %513, %cst_220 {dimension_numbers = #tpu.dot_dimension_numbers<[1], [0], [0], [1], [0, 0, 1, 1], [], []>} : vector<48x128xf32>, vector<128x384xf32>, vector<48x384xf32> -> vector<48x384xf32>
    %515 = vector.extract_strided_slice %514 {offsets = [0, 0], sizes = [24, 384], strides = [1, 1]} : vector<48x384xf32> to vector<24x384xf32>
    %516 = vector.extract_strided_slice %515 {offsets = [0, 0], sizes = [24, 32], strides = [1, 1]} : vector<24x384xf32> to vector<24x32xf32>
    %517 = vector.extract_strided_slice %515 {offsets = [0, 128], sizes = [24, 32], strides = [1, 1]} : vector<24x384xf32> to vector<24x32xf32>
    %518 = vector.extract_strided_slice %515 {offsets = [0, 256], sizes = [24, 32], strides = [1, 1]} : vector<24x384xf32> to vector<24x32xf32>
    %cst_221 = arith.constant dense<0.000000e+00> : vector<24x24xf32>
    %519 = tpu.matmul %516, %517, %cst_221 {dimension_numbers = #tpu.dot_dimension_numbers<[1], [1], [0], [0], [0, 0, 1, 0], [], []>} : vector<24x32xf32>, vector<24x32xf32>, vector<24x24xf32> -> vector<24x24xf32>
    %cst_222 = arith.constant 0.0883883461 : f32
    %520 = vector.broadcast %cst_222 : f32 to vector<24x24xf32>
    %521 = arith.mulf %519, %520 : vector<24x24xf32>
    %cst_223 = arith.constant -1.000000e+30 : f32
    %522 = vector.broadcast %cst_223 : f32 to vector<24x24xf32>
    %523 = arith.select %15, %521, %522 : vector<24x24xi1>, vector<24x24xf32>
    %cst_224 = arith.constant dense<0xFF800000> : vector<24xf32>
    %524 = vector.multi_reduction <maximumf>, %523, %cst_224 [1] : vector<24x24xf32> to vector<24xf32>
    %525 = vector.shape_cast %524 : vector<24xf32> to vector<24x1xf32>
    %526 = vector.broadcast %525 : vector<24x1xf32> to vector<24x24xf32>
    %527 = arith.subf %523, %526 : vector<24x24xf32>
    %528 = math.exp %527 : vector<24x24xf32>
    %cst_225 = arith.constant dense<0.000000e+00> : vector<24xf32>
    %529 = vector.multi_reduction <add>, %528, %cst_225 [1] : vector<24x24xf32> to vector<24xf32>
    %530 = vector.shape_cast %529 : vector<24xf32> to vector<24x1xf32>
    %531 = vector.broadcast %530 : vector<24x1xf32> to vector<24x24xf32>
    %532 = arith.divf %528, %531 : vector<24x24xf32>
    %cst_226 = arith.constant dense<0.000000e+00> : vector<24x32xf32>
    %533 = tpu.matmul %532, %518, %cst_226 {dimension_numbers = #tpu.dot_dimension_numbers<[1], [0], [0], [1], [0, 0, 1, 1], [], []>} : vector<24x24xf32>, vector<24x32xf32>, vector<24x32xf32> -> vector<24x32xf32>
    %534 = vector.extract_strided_slice %515 {offsets = [0, 32], sizes = [24, 32], strides = [1, 1]} : vector<24x384xf32> to vector<24x32xf32>
    %535 = vector.extract_strided_slice %515 {offsets = [0, 160], sizes = [24, 32], strides = [1, 1]} : vector<24x384xf32> to vector<24x32xf32>
    %536 = vector.extract_strided_slice %515 {offsets = [0, 288], sizes = [24, 32], strides = [1, 1]} : vector<24x384xf32> to vector<24x32xf32>
    %cst_227 = arith.constant dense<0.000000e+00> : vector<24x24xf32>
    %537 = tpu.matmul %534, %535, %cst_227 {dimension_numbers = #tpu.dot_dimension_numbers<[1], [1], [0], [0], [0, 0, 1, 0], [], []>} : vector<24x32xf32>, vector<24x32xf32>, vector<24x24xf32> -> vector<24x24xf32>
    %cst_228 = arith.constant 0.0883883461 : f32
    %538 = vector.broadcast %cst_228 : f32 to vector<24x24xf32>
    %539 = arith.mulf %537, %538 : vector<24x24xf32>
    %cst_229 = arith.constant -1.000000e+30 : f32
    %540 = vector.broadcast %cst_229 : f32 to vector<24x24xf32>
    %541 = arith.select %15, %539, %540 : vector<24x24xi1>, vector<24x24xf32>
    %cst_230 = arith.constant dense<0xFF800000> : vector<24xf32>
    %542 = vector.multi_reduction <maximumf>, %541, %cst_230 [1] : vector<24x24xf32> to vector<24xf32>
    %543 = vector.shape_cast %542 : vector<24xf32> to vector<24x1xf32>
    %544 = vector.broadcast %543 : vector<24x1xf32> to vector<24x24xf32>
    %545 = arith.subf %541, %544 : vector<24x24xf32>
    %546 = math.exp %545 : vector<24x24xf32>
    %cst_231 = arith.constant dense<0.000000e+00> : vector<24xf32>
    %547 = vector.multi_reduction <add>, %546, %cst_231 [1] : vector<24x24xf32> to vector<24xf32>
    %548 = vector.shape_cast %547 : vector<24xf32> to vector<24x1xf32>
    %549 = vector.broadcast %548 : vector<24x1xf32> to vector<24x24xf32>
    %550 = arith.divf %546, %549 : vector<24x24xf32>
    %cst_232 = arith.constant dense<0.000000e+00> : vector<24x32xf32>
    %551 = tpu.matmul %550, %536, %cst_232 {dimension_numbers = #tpu.dot_dimension_numbers<[1], [0], [0], [1], [0, 0, 1, 1], [], []>} : vector<24x24xf32>, vector<24x32xf32>, vector<24x32xf32> -> vector<24x32xf32>
    %552 = vector.extract_strided_slice %515 {offsets = [0, 64], sizes = [24, 32], strides = [1, 1]} : vector<24x384xf32> to vector<24x32xf32>
    %553 = vector.extract_strided_slice %515 {offsets = [0, 192], sizes = [24, 32], strides = [1, 1]} : vector<24x384xf32> to vector<24x32xf32>
    %554 = vector.extract_strided_slice %515 {offsets = [0, 320], sizes = [24, 32], strides = [1, 1]} : vector<24x384xf32> to vector<24x32xf32>
    %cst_233 = arith.constant dense<0.000000e+00> : vector<24x24xf32>
    %555 = tpu.matmul %552, %553, %cst_233 {dimension_numbers = #tpu.dot_dimension_numbers<[1], [1], [0], [0], [0, 0, 1, 0], [], []>} : vector<24x32xf32>, vector<24x32xf32>, vector<24x24xf32> -> vector<24x24xf32>
    %cst_234 = arith.constant 0.0883883461 : f32
    %556 = vector.broadcast %cst_234 : f32 to vector<24x24xf32>
    %557 = arith.mulf %555, %556 : vector<24x24xf32>
    %cst_235 = arith.constant -1.000000e+30 : f32
    %558 = vector.broadcast %cst_235 : f32 to vector<24x24xf32>
    %559 = arith.select %15, %557, %558 : vector<24x24xi1>, vector<24x24xf32>
    %cst_236 = arith.constant dense<0xFF800000> : vector<24xf32>
    %560 = vector.multi_reduction <maximumf>, %559, %cst_236 [1] : vector<24x24xf32> to vector<24xf32>
    %561 = vector.shape_cast %560 : vector<24xf32> to vector<24x1xf32>
    %562 = vector.broadcast %561 : vector<24x1xf32> to vector<24x24xf32>
    %563 = arith.subf %559, %562 : vector<24x24xf32>
    %564 = math.exp %563 : vector<24x24xf32>
    %cst_237 = arith.constant dense<0.000000e+00> : vector<24xf32>
    %565 = vector.multi_reduction <add>, %564, %cst_237 [1] : vector<24x24xf32> to vector<24xf32>
    %566 = vector.shape_cast %565 : vector<24xf32> to vector<24x1xf32>
    %567 = vector.broadcast %566 : vector<24x1xf32> to vector<24x24xf32>
    %568 = arith.divf %564, %567 : vector<24x24xf32>
    %cst_238 = arith.constant dense<0.000000e+00> : vector<24x32xf32>
    %569 = tpu.matmul %568, %554, %cst_238 {dimension_numbers = #tpu.dot_dimension_numbers<[1], [0], [0], [1], [0, 0, 1, 1], [], []>} : vector<24x24xf32>, vector<24x32xf32>, vector<24x32xf32> -> vector<24x32xf32>
    %570 = vector.extract_strided_slice %515 {offsets = [0, 96], sizes = [24, 32], strides = [1, 1]} : vector<24x384xf32> to vector<24x32xf32>
    %571 = vector.extract_strided_slice %515 {offsets = [0, 224], sizes = [24, 32], strides = [1, 1]} : vector<24x384xf32> to vector<24x32xf32>
    %572 = vector.extract_strided_slice %515 {offsets = [0, 352], sizes = [24, 32], strides = [1, 1]} : vector<24x384xf32> to vector<24x32xf32>
    %cst_239 = arith.constant dense<0.000000e+00> : vector<24x24xf32>
    %573 = tpu.matmul %570, %571, %cst_239 {dimension_numbers = #tpu.dot_dimension_numbers<[1], [1], [0], [0], [0, 0, 1, 0], [], []>} : vector<24x32xf32>, vector<24x32xf32>, vector<24x24xf32> -> vector<24x24xf32>
    %cst_240 = arith.constant 0.0883883461 : f32
    %574 = vector.broadcast %cst_240 : f32 to vector<24x24xf32>
    %575 = arith.mulf %573, %574 : vector<24x24xf32>
    %cst_241 = arith.constant -1.000000e+30 : f32
    %576 = vector.broadcast %cst_241 : f32 to vector<24x24xf32>
    %577 = arith.select %15, %575, %576 : vector<24x24xi1>, vector<24x24xf32>
    %cst_242 = arith.constant dense<0xFF800000> : vector<24xf32>
    %578 = vector.multi_reduction <maximumf>, %577, %cst_242 [1] : vector<24x24xf32> to vector<24xf32>
    %579 = vector.shape_cast %578 : vector<24xf32> to vector<24x1xf32>
    %580 = vector.broadcast %579 : vector<24x1xf32> to vector<24x24xf32>
    %581 = arith.subf %577, %580 : vector<24x24xf32>
    %582 = math.exp %581 : vector<24x24xf32>
    %cst_243 = arith.constant dense<0.000000e+00> : vector<24xf32>
    %583 = vector.multi_reduction <add>, %582, %cst_243 [1] : vector<24x24xf32> to vector<24xf32>
    %584 = vector.shape_cast %583 : vector<24xf32> to vector<24x1xf32>
    %585 = vector.broadcast %584 : vector<24x1xf32> to vector<24x24xf32>
    %586 = arith.divf %582, %585 : vector<24x24xf32>
    %cst_244 = arith.constant dense<0.000000e+00> : vector<24x32xf32>
    %587 = tpu.matmul %586, %572, %cst_244 {dimension_numbers = #tpu.dot_dimension_numbers<[1], [0], [0], [1], [0, 0, 1, 1], [], []>} : vector<24x24xf32>, vector<24x32xf32>, vector<24x32xf32> -> vector<24x32xf32>
    %588 = tpu.concatenate %533, %551, %569, %587 in 1 : vector<24x32xf32>, vector<24x32xf32>, vector<24x32xf32>, vector<24x32xf32> -> vector<24x128xf32>
    %589 = vector.extract_strided_slice %514 {offsets = [24, 0], sizes = [24, 384], strides = [1, 1]} : vector<48x384xf32> to vector<24x384xf32>
    %590 = vector.extract_strided_slice %589 {offsets = [0, 0], sizes = [24, 32], strides = [1, 1]} : vector<24x384xf32> to vector<24x32xf32>
    %591 = vector.extract_strided_slice %589 {offsets = [0, 128], sizes = [24, 32], strides = [1, 1]} : vector<24x384xf32> to vector<24x32xf32>
    %592 = vector.extract_strided_slice %589 {offsets = [0, 256], sizes = [24, 32], strides = [1, 1]} : vector<24x384xf32> to vector<24x32xf32>
    %cst_245 = arith.constant dense<0.000000e+00> : vector<24x24xf32>
    %593 = tpu.matmul %590, %591, %cst_245 {dimension_numbers = #tpu.dot_dimension_numbers<[1], [1], [0], [0], [0, 0, 1, 0], [], []>} : vector<24x32xf32>, vector<24x32xf32>, vector<24x24xf32> -> vector<24x24xf32>
    %cst_246 = arith.constant 0.0883883461 : f32
    %594 = vector.broadcast %cst_246 : f32 to vector<24x24xf32>
    %595 = arith.mulf %593, %594 : vector<24x24xf32>
    %cst_247 = arith.constant -1.000000e+30 : f32
    %596 = vector.broadcast %cst_247 : f32 to vector<24x24xf32>
    %597 = arith.select %15, %595, %596 : vector<24x24xi1>, vector<24x24xf32>
    %cst_248 = arith.constant dense<0xFF800000> : vector<24xf32>
    %598 = vector.multi_reduction <maximumf>, %597, %cst_248 [1] : vector<24x24xf32> to vector<24xf32>
    %599 = vector.shape_cast %598 : vector<24xf32> to vector<24x1xf32>
    %600 = vector.broadcast %599 : vector<24x1xf32> to vector<24x24xf32>
    %601 = arith.subf %597, %600 : vector<24x24xf32>
    %602 = math.exp %601 : vector<24x24xf32>
    %cst_249 = arith.constant dense<0.000000e+00> : vector<24xf32>
    %603 = vector.multi_reduction <add>, %602, %cst_249 [1] : vector<24x24xf32> to vector<24xf32>
    %604 = vector.shape_cast %603 : vector<24xf32> to vector<24x1xf32>
    %605 = vector.broadcast %604 : vector<24x1xf32> to vector<24x24xf32>
    %606 = arith.divf %602, %605 : vector<24x24xf32>
    %cst_250 = arith.constant dense<0.000000e+00> : vector<24x32xf32>
    %607 = tpu.matmul %606, %592, %cst_250 {dimension_numbers = #tpu.dot_dimension_numbers<[1], [0], [0], [1], [0, 0, 1, 1], [], []>} : vector<24x24xf32>, vector<24x32xf32>, vector<24x32xf32> -> vector<24x32xf32>
    %608 = vector.extract_strided_slice %589 {offsets = [0, 32], sizes = [24, 32], strides = [1, 1]} : vector<24x384xf32> to vector<24x32xf32>
    %609 = vector.extract_strided_slice %589 {offsets = [0, 160], sizes = [24, 32], strides = [1, 1]} : vector<24x384xf32> to vector<24x32xf32>
    %610 = vector.extract_strided_slice %589 {offsets = [0, 288], sizes = [24, 32], strides = [1, 1]} : vector<24x384xf32> to vector<24x32xf32>
    %cst_251 = arith.constant dense<0.000000e+00> : vector<24x24xf32>
    %611 = tpu.matmul %608, %609, %cst_251 {dimension_numbers = #tpu.dot_dimension_numbers<[1], [1], [0], [0], [0, 0, 1, 0], [], []>} : vector<24x32xf32>, vector<24x32xf32>, vector<24x24xf32> -> vector<24x24xf32>
    %cst_252 = arith.constant 0.0883883461 : f32
    %612 = vector.broadcast %cst_252 : f32 to vector<24x24xf32>
    %613 = arith.mulf %611, %612 : vector<24x24xf32>
    %cst_253 = arith.constant -1.000000e+30 : f32
    %614 = vector.broadcast %cst_253 : f32 to vector<24x24xf32>
    %615 = arith.select %15, %613, %614 : vector<24x24xi1>, vector<24x24xf32>
    %cst_254 = arith.constant dense<0xFF800000> : vector<24xf32>
    %616 = vector.multi_reduction <maximumf>, %615, %cst_254 [1] : vector<24x24xf32> to vector<24xf32>
    %617 = vector.shape_cast %616 : vector<24xf32> to vector<24x1xf32>
    %618 = vector.broadcast %617 : vector<24x1xf32> to vector<24x24xf32>
    %619 = arith.subf %615, %618 : vector<24x24xf32>
    %620 = math.exp %619 : vector<24x24xf32>
    %cst_255 = arith.constant dense<0.000000e+00> : vector<24xf32>
    %621 = vector.multi_reduction <add>, %620, %cst_255 [1] : vector<24x24xf32> to vector<24xf32>
    %622 = vector.shape_cast %621 : vector<24xf32> to vector<24x1xf32>
    %623 = vector.broadcast %622 : vector<24x1xf32> to vector<24x24xf32>
    %624 = arith.divf %620, %623 : vector<24x24xf32>
    %cst_256 = arith.constant dense<0.000000e+00> : vector<24x32xf32>
    %625 = tpu.matmul %624, %610, %cst_256 {dimension_numbers = #tpu.dot_dimension_numbers<[1], [0], [0], [1], [0, 0, 1, 1], [], []>} : vector<24x24xf32>, vector<24x32xf32>, vector<24x32xf32> -> vector<24x32xf32>
    %626 = vector.extract_strided_slice %589 {offsets = [0, 64], sizes = [24, 32], strides = [1, 1]} : vector<24x384xf32> to vector<24x32xf32>
    %627 = vector.extract_strided_slice %589 {offsets = [0, 192], sizes = [24, 32], strides = [1, 1]} : vector<24x384xf32> to vector<24x32xf32>
    %628 = vector.extract_strided_slice %589 {offsets = [0, 320], sizes = [24, 32], strides = [1, 1]} : vector<24x384xf32> to vector<24x32xf32>
    %cst_257 = arith.constant dense<0.000000e+00> : vector<24x24xf32>
    %629 = tpu.matmul %626, %627, %cst_257 {dimension_numbers = #tpu.dot_dimension_numbers<[1], [1], [0], [0], [0, 0, 1, 0], [], []>} : vector<24x32xf32>, vector<24x32xf32>, vector<24x24xf32> -> vector<24x24xf32>
    %cst_258 = arith.constant 0.0883883461 : f32
    %630 = vector.broadcast %cst_258 : f32 to vector<24x24xf32>
    %631 = arith.mulf %629, %630 : vector<24x24xf32>
    %cst_259 = arith.constant -1.000000e+30 : f32
    %632 = vector.broadcast %cst_259 : f32 to vector<24x24xf32>
    %633 = arith.select %15, %631, %632 : vector<24x24xi1>, vector<24x24xf32>
    %cst_260 = arith.constant dense<0xFF800000> : vector<24xf32>
    %634 = vector.multi_reduction <maximumf>, %633, %cst_260 [1] : vector<24x24xf32> to vector<24xf32>
    %635 = vector.shape_cast %634 : vector<24xf32> to vector<24x1xf32>
    %636 = vector.broadcast %635 : vector<24x1xf32> to vector<24x24xf32>
    %637 = arith.subf %633, %636 : vector<24x24xf32>
    %638 = math.exp %637 : vector<24x24xf32>
    %cst_261 = arith.constant dense<0.000000e+00> : vector<24xf32>
    %639 = vector.multi_reduction <add>, %638, %cst_261 [1] : vector<24x24xf32> to vector<24xf32>
    %640 = vector.shape_cast %639 : vector<24xf32> to vector<24x1xf32>
    %641 = vector.broadcast %640 : vector<24x1xf32> to vector<24x24xf32>
    %642 = arith.divf %638, %641 : vector<24x24xf32>
    %cst_262 = arith.constant dense<0.000000e+00> : vector<24x32xf32>
    %643 = tpu.matmul %642, %628, %cst_262 {dimension_numbers = #tpu.dot_dimension_numbers<[1], [0], [0], [1], [0, 0, 1, 1], [], []>} : vector<24x24xf32>, vector<24x32xf32>, vector<24x32xf32> -> vector<24x32xf32>
    %644 = vector.extract_strided_slice %589 {offsets = [0, 96], sizes = [24, 32], strides = [1, 1]} : vector<24x384xf32> to vector<24x32xf32>
    %645 = vector.extract_strided_slice %589 {offsets = [0, 224], sizes = [24, 32], strides = [1, 1]} : vector<24x384xf32> to vector<24x32xf32>
    %646 = vector.extract_strided_slice %589 {offsets = [0, 352], sizes = [24, 32], strides = [1, 1]} : vector<24x384xf32> to vector<24x32xf32>
    %cst_263 = arith.constant dense<0.000000e+00> : vector<24x24xf32>
    %647 = tpu.matmul %644, %645, %cst_263 {dimension_numbers = #tpu.dot_dimension_numbers<[1], [1], [0], [0], [0, 0, 1, 0], [], []>} : vector<24x32xf32>, vector<24x32xf32>, vector<24x24xf32> -> vector<24x24xf32>
    %cst_264 = arith.constant 0.0883883461 : f32
    %648 = vector.broadcast %cst_264 : f32 to vector<24x24xf32>
    %649 = arith.mulf %647, %648 : vector<24x24xf32>
    %cst_265 = arith.constant -1.000000e+30 : f32
    %650 = vector.broadcast %cst_265 : f32 to vector<24x24xf32>
    %651 = arith.select %15, %649, %650 : vector<24x24xi1>, vector<24x24xf32>
    %cst_266 = arith.constant dense<0xFF800000> : vector<24xf32>
    %652 = vector.multi_reduction <maximumf>, %651, %cst_266 [1] : vector<24x24xf32> to vector<24xf32>
    %653 = vector.shape_cast %652 : vector<24xf32> to vector<24x1xf32>
    %654 = vector.broadcast %653 : vector<24x1xf32> to vector<24x24xf32>
    %655 = arith.subf %651, %654 : vector<24x24xf32>
    %656 = math.exp %655 : vector<24x24xf32>
    %cst_267 = arith.constant dense<0.000000e+00> : vector<24xf32>
    %657 = vector.multi_reduction <add>, %656, %cst_267 [1] : vector<24x24xf32> to vector<24xf32>
    %658 = vector.shape_cast %657 : vector<24xf32> to vector<24x1xf32>
    %659 = vector.broadcast %658 : vector<24x1xf32> to vector<24x24xf32>
    %660 = arith.divf %656, %659 : vector<24x24xf32>
    %cst_268 = arith.constant dense<0.000000e+00> : vector<24x32xf32>
    %661 = tpu.matmul %660, %646, %cst_268 {dimension_numbers = #tpu.dot_dimension_numbers<[1], [0], [0], [1], [0, 0, 1, 1], [], []>} : vector<24x24xf32>, vector<24x32xf32>, vector<24x32xf32> -> vector<24x32xf32>
    %662 = tpu.concatenate %607, %625, %643, %661 in 1 : vector<24x32xf32>, vector<24x32xf32>, vector<24x32xf32>, vector<24x32xf32> -> vector<24x128xf32>
    %663 = tpu.concatenate %588, %662 in 0 : vector<24x128xf32>, vector<24x128xf32> -> vector<48x128xf32>
    %c2_269 = arith.constant 2 : index
    %c0_270 = arith.constant 0 : index
    %c0_271 = arith.constant 0 : index
    %664 = vector.load %arg8[%c2_269, %c0_270, %c0_271] : memref<4x128x128xf32, #tpu.memory_space<vmem>>, vector<1x128x128xf32>
    %665 = vector.shape_cast %664 : vector<1x128x128xf32> to vector<128x128xf32>
    %cst_272 = arith.constant dense<0.000000e+00> : vector<48x128xf32>
    %666 = tpu.matmul %663, %665, %cst_272 {dimension_numbers = #tpu.dot_dimension_numbers<[1], [0], [0], [1], [0, 0, 1, 1], [], []>} : vector<48x128xf32>, vector<128x128xf32>, vector<48x128xf32> -> vector<48x128xf32>
    %c2_273 = arith.constant 2 : index
    %c0_274 = arith.constant 0 : index
    %c0_275 = arith.constant 0 : index
    %667 = vector.load %arg9[%c2_273, %c0_274, %c0_275] : memref<4x1x128xf32, #tpu.memory_space<vmem>>, vector<1x1x128xf32>
    %668 = vector.shape_cast %667 : vector<1x1x128xf32> to vector<1x128xf32>
    %669 = vector.broadcast %668 : vector<1x128xf32> to vector<48x128xf32>
    %670 = arith.addf %666, %669 : vector<48x128xf32>
    %671 = arith.addf %487, %670 : vector<48x128xf32>
    %c2_276 = arith.constant 2 : index
    %c0_277 = arith.constant 0 : index
    %c0_278 = arith.constant 0 : index
    %672 = vector.load %arg10[%c2_276, %c0_277, %c0_278] : memref<4x1x128xf32, #tpu.memory_space<vmem>>, vector<1x1x128xf32>
    %673 = vector.shape_cast %672 : vector<1x1x128xf32> to vector<1x128xf32>
    %c2_279 = arith.constant 2 : index
    %c0_280 = arith.constant 0 : index
    %c0_281 = arith.constant 0 : index
    %674 = vector.load %arg11[%c2_279, %c0_280, %c0_281] : memref<4x1x128xf32, #tpu.memory_space<vmem>>, vector<1x1x128xf32>
    %675 = vector.shape_cast %674 : vector<1x1x128xf32> to vector<1x128xf32>
    %cst_282 = arith.constant dense<0.000000e+00> : vector<48xf32>
    %676 = vector.multi_reduction <add>, %671, %cst_282 [1] : vector<48x128xf32> to vector<48xf32>
    %677 = vector.shape_cast %676 : vector<48xf32> to vector<48x1xf32>
    %cst_283 = arith.constant 1.280000e+02 : f32
    %678 = vector.broadcast %cst_283 : f32 to vector<48x1xf32>
    %679 = arith.divf %677, %678 : vector<48x1xf32>
    %680 = vector.broadcast %679 : vector<48x1xf32> to vector<48x128xf32>
    %681 = arith.subf %671, %680 : vector<48x128xf32>
    %682 = arith.mulf %681, %681 : vector<48x128xf32>
    %cst_284 = arith.constant dense<0.000000e+00> : vector<48xf32>
    %683 = vector.multi_reduction <add>, %682, %cst_284 [1] : vector<48x128xf32> to vector<48xf32>
    %684 = vector.shape_cast %683 : vector<48xf32> to vector<48x1xf32>
    %cst_285 = arith.constant 1.280000e+02 : f32
    %685 = vector.broadcast %cst_285 : f32 to vector<48x1xf32>
    %686 = arith.divf %684, %685 : vector<48x1xf32>
    %cst_286 = arith.constant 9.99999974E-6 : f32
    %687 = vector.broadcast %cst_286 : f32 to vector<48x1xf32>
    %688 = arith.addf %686, %687 : vector<48x1xf32>
    %689 = math.rsqrt %688 : vector<48x1xf32>
    %690 = vector.broadcast %689 : vector<48x1xf32> to vector<48x128xf32>
    %691 = arith.mulf %681, %690 : vector<48x128xf32>
    %692 = vector.broadcast %673 : vector<1x128xf32> to vector<48x128xf32>
    %693 = arith.mulf %691, %692 : vector<48x128xf32>
    %694 = vector.broadcast %675 : vector<1x128xf32> to vector<48x128xf32>
    %695 = arith.addf %693, %694 : vector<48x128xf32>
    %c2_287 = arith.constant 2 : index
    %c0_288 = arith.constant 0 : index
    %c0_289 = arith.constant 0 : index
    %696 = vector.load %arg12[%c2_287, %c0_288, %c0_289] : memref<4x128x64xf32, #tpu.memory_space<vmem>>, vector<1x128x64xf32>
    %697 = vector.shape_cast %696 : vector<1x128x64xf32> to vector<128x64xf32>
    %cst_290 = arith.constant dense<0.000000e+00> : vector<48x64xf32>
    %698 = tpu.matmul %695, %697, %cst_290 {dimension_numbers = #tpu.dot_dimension_numbers<[1], [0], [0], [1], [0, 0, 1, 1], [], []>} : vector<48x128xf32>, vector<128x64xf32>, vector<48x64xf32> -> vector<48x64xf32>
    %c2_291 = arith.constant 2 : index
    %c0_292 = arith.constant 0 : index
    %c0_293 = arith.constant 0 : index
    %699 = vector.load %arg13[%c2_291, %c0_292, %c0_293] : memref<4x1x64xf32, #tpu.memory_space<vmem>>, vector<1x1x64xf32>
    %700 = vector.shape_cast %699 : vector<1x1x64xf32> to vector<1x64xf32>
    %701 = vector.broadcast %700 : vector<1x64xf32> to vector<48x64xf32>
    %702 = arith.addf %698, %701 : vector<48x64xf32>
    %703 = arith.mulf %702, %702 : vector<48x64xf32>
    %704 = arith.mulf %702, %703 : vector<48x64xf32>
    %cst_294 = arith.constant 4.471500e-02 : f32
    %705 = vector.broadcast %cst_294 : f32 to vector<48x64xf32>
    %706 = arith.mulf %705, %704 : vector<48x64xf32>
    %707 = arith.addf %702, %706 : vector<48x64xf32>
    %cst_295 = arith.constant 0.797884583 : f32
    %708 = vector.broadcast %cst_295 : f32 to vector<48x64xf32>
    %709 = arith.mulf %708, %707 : vector<48x64xf32>
    %710 = math.tanh %709 : vector<48x64xf32>
    %cst_296 = arith.constant 1.000000e+00 : f32
    %711 = vector.broadcast %cst_296 : f32 to vector<48x64xf32>
    %712 = arith.addf %711, %710 : vector<48x64xf32>
    %cst_297 = arith.constant 5.000000e-01 : f32
    %713 = vector.broadcast %cst_297 : f32 to vector<48x64xf32>
    %714 = arith.mulf %713, %712 : vector<48x64xf32>
    %715 = arith.mulf %702, %714 : vector<48x64xf32>
    %c2_298 = arith.constant 2 : index
    %c0_299 = arith.constant 0 : index
    %c0_300 = arith.constant 0 : index
    %716 = vector.load %arg14[%c2_298, %c0_299, %c0_300] : memref<4x64x128xf32, #tpu.memory_space<vmem>>, vector<1x64x128xf32>
    %717 = vector.shape_cast %716 : vector<1x64x128xf32> to vector<64x128xf32>
    %cst_301 = arith.constant dense<0.000000e+00> : vector<48x128xf32>
    %718 = tpu.matmul %715, %717, %cst_301 {dimension_numbers = #tpu.dot_dimension_numbers<[1], [0], [0], [1], [0, 0, 1, 1], [], []>} : vector<48x64xf32>, vector<64x128xf32>, vector<48x128xf32> -> vector<48x128xf32>
    %c2_302 = arith.constant 2 : index
    %c0_303 = arith.constant 0 : index
    %c0_304 = arith.constant 0 : index
    %719 = vector.load %arg15[%c2_302, %c0_303, %c0_304] : memref<4x1x128xf32, #tpu.memory_space<vmem>>, vector<1x1x128xf32>
    %720 = vector.shape_cast %719 : vector<1x1x128xf32> to vector<1x128xf32>
    %721 = vector.broadcast %720 : vector<1x128xf32> to vector<48x128xf32>
    %722 = arith.addf %718, %721 : vector<48x128xf32>
    %723 = arith.addf %671, %722 : vector<48x128xf32>
    %c3 = arith.constant 3 : index
    %c0_305 = arith.constant 0 : index
    %c0_306 = arith.constant 0 : index
    %724 = vector.load %arg5[%c3, %c0_305, %c0_306] : memref<4x1x128xf32, #tpu.memory_space<vmem>>, vector<1x1x128xf32>
    %725 = vector.shape_cast %724 : vector<1x1x128xf32> to vector<1x128xf32>
    %c3_307 = arith.constant 3 : index
    %c0_308 = arith.constant 0 : index
    %c0_309 = arith.constant 0 : index
    %726 = vector.load %arg6[%c3_307, %c0_308, %c0_309] : memref<4x1x128xf32, #tpu.memory_space<vmem>>, vector<1x1x128xf32>
    %727 = vector.shape_cast %726 : vector<1x1x128xf32> to vector<1x128xf32>
    %cst_310 = arith.constant dense<0.000000e+00> : vector<48xf32>
    %728 = vector.multi_reduction <add>, %723, %cst_310 [1] : vector<48x128xf32> to vector<48xf32>
    %729 = vector.shape_cast %728 : vector<48xf32> to vector<48x1xf32>
    %cst_311 = arith.constant 1.280000e+02 : f32
    %730 = vector.broadcast %cst_311 : f32 to vector<48x1xf32>
    %731 = arith.divf %729, %730 : vector<48x1xf32>
    %732 = vector.broadcast %731 : vector<48x1xf32> to vector<48x128xf32>
    %733 = arith.subf %723, %732 : vector<48x128xf32>
    %734 = arith.mulf %733, %733 : vector<48x128xf32>
    %cst_312 = arith.constant dense<0.000000e+00> : vector<48xf32>
    %735 = vector.multi_reduction <add>, %734, %cst_312 [1] : vector<48x128xf32> to vector<48xf32>
    %736 = vector.shape_cast %735 : vector<48xf32> to vector<48x1xf32>
    %cst_313 = arith.constant 1.280000e+02 : f32
    %737 = vector.broadcast %cst_313 : f32 to vector<48x1xf32>
    %738 = arith.divf %736, %737 : vector<48x1xf32>
    %cst_314 = arith.constant 9.99999974E-6 : f32
    %739 = vector.broadcast %cst_314 : f32 to vector<48x1xf32>
    %740 = arith.addf %738, %739 : vector<48x1xf32>
    %741 = math.rsqrt %740 : vector<48x1xf32>
    %742 = vector.broadcast %741 : vector<48x1xf32> to vector<48x128xf32>
    %743 = arith.mulf %733, %742 : vector<48x128xf32>
    %744 = vector.broadcast %725 : vector<1x128xf32> to vector<48x128xf32>
    %745 = arith.mulf %743, %744 : vector<48x128xf32>
    %746 = vector.broadcast %727 : vector<1x128xf32> to vector<48x128xf32>
    %747 = arith.addf %745, %746 : vector<48x128xf32>
    %c3_315 = arith.constant 3 : index
    %c0_316 = arith.constant 0 : index
    %c0_317 = arith.constant 0 : index
    %748 = vector.load %arg7[%c3_315, %c0_316, %c0_317] : memref<4x128x384xf32, #tpu.memory_space<vmem>>, vector<1x128x384xf32>
    %749 = vector.shape_cast %748 : vector<1x128x384xf32> to vector<128x384xf32>
    %cst_318 = arith.constant dense<0.000000e+00> : vector<48x384xf32>
    %750 = tpu.matmul %747, %749, %cst_318 {dimension_numbers = #tpu.dot_dimension_numbers<[1], [0], [0], [1], [0, 0, 1, 1], [], []>} : vector<48x128xf32>, vector<128x384xf32>, vector<48x384xf32> -> vector<48x384xf32>
    %751 = vector.extract_strided_slice %750 {offsets = [0, 0], sizes = [24, 384], strides = [1, 1]} : vector<48x384xf32> to vector<24x384xf32>
    %752 = vector.extract_strided_slice %751 {offsets = [0, 0], sizes = [24, 32], strides = [1, 1]} : vector<24x384xf32> to vector<24x32xf32>
    %753 = vector.extract_strided_slice %751 {offsets = [0, 128], sizes = [24, 32], strides = [1, 1]} : vector<24x384xf32> to vector<24x32xf32>
    %754 = vector.extract_strided_slice %751 {offsets = [0, 256], sizes = [24, 32], strides = [1, 1]} : vector<24x384xf32> to vector<24x32xf32>
    %cst_319 = arith.constant dense<0.000000e+00> : vector<24x24xf32>
    %755 = tpu.matmul %752, %753, %cst_319 {dimension_numbers = #tpu.dot_dimension_numbers<[1], [1], [0], [0], [0, 0, 1, 0], [], []>} : vector<24x32xf32>, vector<24x32xf32>, vector<24x24xf32> -> vector<24x24xf32>
    %cst_320 = arith.constant 0.0883883461 : f32
    %756 = vector.broadcast %cst_320 : f32 to vector<24x24xf32>
    %757 = arith.mulf %755, %756 : vector<24x24xf32>
    %cst_321 = arith.constant -1.000000e+30 : f32
    %758 = vector.broadcast %cst_321 : f32 to vector<24x24xf32>
    %759 = arith.select %15, %757, %758 : vector<24x24xi1>, vector<24x24xf32>
    %cst_322 = arith.constant dense<0xFF800000> : vector<24xf32>
    %760 = vector.multi_reduction <maximumf>, %759, %cst_322 [1] : vector<24x24xf32> to vector<24xf32>
    %761 = vector.shape_cast %760 : vector<24xf32> to vector<24x1xf32>
    %762 = vector.broadcast %761 : vector<24x1xf32> to vector<24x24xf32>
    %763 = arith.subf %759, %762 : vector<24x24xf32>
    %764 = math.exp %763 : vector<24x24xf32>
    %cst_323 = arith.constant dense<0.000000e+00> : vector<24xf32>
    %765 = vector.multi_reduction <add>, %764, %cst_323 [1] : vector<24x24xf32> to vector<24xf32>
    %766 = vector.shape_cast %765 : vector<24xf32> to vector<24x1xf32>
    %767 = vector.broadcast %766 : vector<24x1xf32> to vector<24x24xf32>
    %768 = arith.divf %764, %767 : vector<24x24xf32>
    %cst_324 = arith.constant dense<0.000000e+00> : vector<24x32xf32>
    %769 = tpu.matmul %768, %754, %cst_324 {dimension_numbers = #tpu.dot_dimension_numbers<[1], [0], [0], [1], [0, 0, 1, 1], [], []>} : vector<24x24xf32>, vector<24x32xf32>, vector<24x32xf32> -> vector<24x32xf32>
    %770 = vector.extract_strided_slice %751 {offsets = [0, 32], sizes = [24, 32], strides = [1, 1]} : vector<24x384xf32> to vector<24x32xf32>
    %771 = vector.extract_strided_slice %751 {offsets = [0, 160], sizes = [24, 32], strides = [1, 1]} : vector<24x384xf32> to vector<24x32xf32>
    %772 = vector.extract_strided_slice %751 {offsets = [0, 288], sizes = [24, 32], strides = [1, 1]} : vector<24x384xf32> to vector<24x32xf32>
    %cst_325 = arith.constant dense<0.000000e+00> : vector<24x24xf32>
    %773 = tpu.matmul %770, %771, %cst_325 {dimension_numbers = #tpu.dot_dimension_numbers<[1], [1], [0], [0], [0, 0, 1, 0], [], []>} : vector<24x32xf32>, vector<24x32xf32>, vector<24x24xf32> -> vector<24x24xf32>
    %cst_326 = arith.constant 0.0883883461 : f32
    %774 = vector.broadcast %cst_326 : f32 to vector<24x24xf32>
    %775 = arith.mulf %773, %774 : vector<24x24xf32>
    %cst_327 = arith.constant -1.000000e+30 : f32
    %776 = vector.broadcast %cst_327 : f32 to vector<24x24xf32>
    %777 = arith.select %15, %775, %776 : vector<24x24xi1>, vector<24x24xf32>
    %cst_328 = arith.constant dense<0xFF800000> : vector<24xf32>
    %778 = vector.multi_reduction <maximumf>, %777, %cst_328 [1] : vector<24x24xf32> to vector<24xf32>
    %779 = vector.shape_cast %778 : vector<24xf32> to vector<24x1xf32>
    %780 = vector.broadcast %779 : vector<24x1xf32> to vector<24x24xf32>
    %781 = arith.subf %777, %780 : vector<24x24xf32>
    %782 = math.exp %781 : vector<24x24xf32>
    %cst_329 = arith.constant dense<0.000000e+00> : vector<24xf32>
    %783 = vector.multi_reduction <add>, %782, %cst_329 [1] : vector<24x24xf32> to vector<24xf32>
    %784 = vector.shape_cast %783 : vector<24xf32> to vector<24x1xf32>
    %785 = vector.broadcast %784 : vector<24x1xf32> to vector<24x24xf32>
    %786 = arith.divf %782, %785 : vector<24x24xf32>
    %cst_330 = arith.constant dense<0.000000e+00> : vector<24x32xf32>
    %787 = tpu.matmul %786, %772, %cst_330 {dimension_numbers = #tpu.dot_dimension_numbers<[1], [0], [0], [1], [0, 0, 1, 1], [], []>} : vector<24x24xf32>, vector<24x32xf32>, vector<24x32xf32> -> vector<24x32xf32>
    %788 = vector.extract_strided_slice %751 {offsets = [0, 64], sizes = [24, 32], strides = [1, 1]} : vector<24x384xf32> to vector<24x32xf32>
    %789 = vector.extract_strided_slice %751 {offsets = [0, 192], sizes = [24, 32], strides = [1, 1]} : vector<24x384xf32> to vector<24x32xf32>
    %790 = vector.extract_strided_slice %751 {offsets = [0, 320], sizes = [24, 32], strides = [1, 1]} : vector<24x384xf32> to vector<24x32xf32>
    %cst_331 = arith.constant dense<0.000000e+00> : vector<24x24xf32>
    %791 = tpu.matmul %788, %789, %cst_331 {dimension_numbers = #tpu.dot_dimension_numbers<[1], [1], [0], [0], [0, 0, 1, 0], [], []>} : vector<24x32xf32>, vector<24x32xf32>, vector<24x24xf32> -> vector<24x24xf32>
    %cst_332 = arith.constant 0.0883883461 : f32
    %792 = vector.broadcast %cst_332 : f32 to vector<24x24xf32>
    %793 = arith.mulf %791, %792 : vector<24x24xf32>
    %cst_333 = arith.constant -1.000000e+30 : f32
    %794 = vector.broadcast %cst_333 : f32 to vector<24x24xf32>
    %795 = arith.select %15, %793, %794 : vector<24x24xi1>, vector<24x24xf32>
    %cst_334 = arith.constant dense<0xFF800000> : vector<24xf32>
    %796 = vector.multi_reduction <maximumf>, %795, %cst_334 [1] : vector<24x24xf32> to vector<24xf32>
    %797 = vector.shape_cast %796 : vector<24xf32> to vector<24x1xf32>
    %798 = vector.broadcast %797 : vector<24x1xf32> to vector<24x24xf32>
    %799 = arith.subf %795, %798 : vector<24x24xf32>
    %800 = math.exp %799 : vector<24x24xf32>
    %cst_335 = arith.constant dense<0.000000e+00> : vector<24xf32>
    %801 = vector.multi_reduction <add>, %800, %cst_335 [1] : vector<24x24xf32> to vector<24xf32>
    %802 = vector.shape_cast %801 : vector<24xf32> to vector<24x1xf32>
    %803 = vector.broadcast %802 : vector<24x1xf32> to vector<24x24xf32>
    %804 = arith.divf %800, %803 : vector<24x24xf32>
    %cst_336 = arith.constant dense<0.000000e+00> : vector<24x32xf32>
    %805 = tpu.matmul %804, %790, %cst_336 {dimension_numbers = #tpu.dot_dimension_numbers<[1], [0], [0], [1], [0, 0, 1, 1], [], []>} : vector<24x24xf32>, vector<24x32xf32>, vector<24x32xf32> -> vector<24x32xf32>
    %806 = vector.extract_strided_slice %751 {offsets = [0, 96], sizes = [24, 32], strides = [1, 1]} : vector<24x384xf32> to vector<24x32xf32>
    %807 = vector.extract_strided_slice %751 {offsets = [0, 224], sizes = [24, 32], strides = [1, 1]} : vector<24x384xf32> to vector<24x32xf32>
    %808 = vector.extract_strided_slice %751 {offsets = [0, 352], sizes = [24, 32], strides = [1, 1]} : vector<24x384xf32> to vector<24x32xf32>
    %cst_337 = arith.constant dense<0.000000e+00> : vector<24x24xf32>
    %809 = tpu.matmul %806, %807, %cst_337 {dimension_numbers = #tpu.dot_dimension_numbers<[1], [1], [0], [0], [0, 0, 1, 0], [], []>} : vector<24x32xf32>, vector<24x32xf32>, vector<24x24xf32> -> vector<24x24xf32>
    %cst_338 = arith.constant 0.0883883461 : f32
    %810 = vector.broadcast %cst_338 : f32 to vector<24x24xf32>
    %811 = arith.mulf %809, %810 : vector<24x24xf32>
    %cst_339 = arith.constant -1.000000e+30 : f32
    %812 = vector.broadcast %cst_339 : f32 to vector<24x24xf32>
    %813 = arith.select %15, %811, %812 : vector<24x24xi1>, vector<24x24xf32>
    %cst_340 = arith.constant dense<0xFF800000> : vector<24xf32>
    %814 = vector.multi_reduction <maximumf>, %813, %cst_340 [1] : vector<24x24xf32> to vector<24xf32>
    %815 = vector.shape_cast %814 : vector<24xf32> to vector<24x1xf32>
    %816 = vector.broadcast %815 : vector<24x1xf32> to vector<24x24xf32>
    %817 = arith.subf %813, %816 : vector<24x24xf32>
    %818 = math.exp %817 : vector<24x24xf32>
    %cst_341 = arith.constant dense<0.000000e+00> : vector<24xf32>
    %819 = vector.multi_reduction <add>, %818, %cst_341 [1] : vector<24x24xf32> to vector<24xf32>
    %820 = vector.shape_cast %819 : vector<24xf32> to vector<24x1xf32>
    %821 = vector.broadcast %820 : vector<24x1xf32> to vector<24x24xf32>
    %822 = arith.divf %818, %821 : vector<24x24xf32>
    %cst_342 = arith.constant dense<0.000000e+00> : vector<24x32xf32>
    %823 = tpu.matmul %822, %808, %cst_342 {dimension_numbers = #tpu.dot_dimension_numbers<[1], [0], [0], [1], [0, 0, 1, 1], [], []>} : vector<24x24xf32>, vector<24x32xf32>, vector<24x32xf32> -> vector<24x32xf32>
    %824 = tpu.concatenate %769, %787, %805, %823 in 1 : vector<24x32xf32>, vector<24x32xf32>, vector<24x32xf32>, vector<24x32xf32> -> vector<24x128xf32>
    %825 = vector.extract_strided_slice %750 {offsets = [24, 0], sizes = [24, 384], strides = [1, 1]} : vector<48x384xf32> to vector<24x384xf32>
    %826 = vector.extract_strided_slice %825 {offsets = [0, 0], sizes = [24, 32], strides = [1, 1]} : vector<24x384xf32> to vector<24x32xf32>
    %827 = vector.extract_strided_slice %825 {offsets = [0, 128], sizes = [24, 32], strides = [1, 1]} : vector<24x384xf32> to vector<24x32xf32>
    %828 = vector.extract_strided_slice %825 {offsets = [0, 256], sizes = [24, 32], strides = [1, 1]} : vector<24x384xf32> to vector<24x32xf32>
    %cst_343 = arith.constant dense<0.000000e+00> : vector<24x24xf32>
    %829 = tpu.matmul %826, %827, %cst_343 {dimension_numbers = #tpu.dot_dimension_numbers<[1], [1], [0], [0], [0, 0, 1, 0], [], []>} : vector<24x32xf32>, vector<24x32xf32>, vector<24x24xf32> -> vector<24x24xf32>
    %cst_344 = arith.constant 0.0883883461 : f32
    %830 = vector.broadcast %cst_344 : f32 to vector<24x24xf32>
    %831 = arith.mulf %829, %830 : vector<24x24xf32>
    %cst_345 = arith.constant -1.000000e+30 : f32
    %832 = vector.broadcast %cst_345 : f32 to vector<24x24xf32>
    %833 = arith.select %15, %831, %832 : vector<24x24xi1>, vector<24x24xf32>
    %cst_346 = arith.constant dense<0xFF800000> : vector<24xf32>
    %834 = vector.multi_reduction <maximumf>, %833, %cst_346 [1] : vector<24x24xf32> to vector<24xf32>
    %835 = vector.shape_cast %834 : vector<24xf32> to vector<24x1xf32>
    %836 = vector.broadcast %835 : vector<24x1xf32> to vector<24x24xf32>
    %837 = arith.subf %833, %836 : vector<24x24xf32>
    %838 = math.exp %837 : vector<24x24xf32>
    %cst_347 = arith.constant dense<0.000000e+00> : vector<24xf32>
    %839 = vector.multi_reduction <add>, %838, %cst_347 [1] : vector<24x24xf32> to vector<24xf32>
    %840 = vector.shape_cast %839 : vector<24xf32> to vector<24x1xf32>
    %841 = vector.broadcast %840 : vector<24x1xf32> to vector<24x24xf32>
    %842 = arith.divf %838, %841 : vector<24x24xf32>
    %cst_348 = arith.constant dense<0.000000e+00> : vector<24x32xf32>
    %843 = tpu.matmul %842, %828, %cst_348 {dimension_numbers = #tpu.dot_dimension_numbers<[1], [0], [0], [1], [0, 0, 1, 1], [], []>} : vector<24x24xf32>, vector<24x32xf32>, vector<24x32xf32> -> vector<24x32xf32>
    %844 = vector.extract_strided_slice %825 {offsets = [0, 32], sizes = [24, 32], strides = [1, 1]} : vector<24x384xf32> to vector<24x32xf32>
    %845 = vector.extract_strided_slice %825 {offsets = [0, 160], sizes = [24, 32], strides = [1, 1]} : vector<24x384xf32> to vector<24x32xf32>
    %846 = vector.extract_strided_slice %825 {offsets = [0, 288], sizes = [24, 32], strides = [1, 1]} : vector<24x384xf32> to vector<24x32xf32>
    %cst_349 = arith.constant dense<0.000000e+00> : vector<24x24xf32>
    %847 = tpu.matmul %844, %845, %cst_349 {dimension_numbers = #tpu.dot_dimension_numbers<[1], [1], [0], [0], [0, 0, 1, 0], [], []>} : vector<24x32xf32>, vector<24x32xf32>, vector<24x24xf32> -> vector<24x24xf32>
    %cst_350 = arith.constant 0.0883883461 : f32
    %848 = vector.broadcast %cst_350 : f32 to vector<24x24xf32>
    %849 = arith.mulf %847, %848 : vector<24x24xf32>
    %cst_351 = arith.constant -1.000000e+30 : f32
    %850 = vector.broadcast %cst_351 : f32 to vector<24x24xf32>
    %851 = arith.select %15, %849, %850 : vector<24x24xi1>, vector<24x24xf32>
    %cst_352 = arith.constant dense<0xFF800000> : vector<24xf32>
    %852 = vector.multi_reduction <maximumf>, %851, %cst_352 [1] : vector<24x24xf32> to vector<24xf32>
    %853 = vector.shape_cast %852 : vector<24xf32> to vector<24x1xf32>
    %854 = vector.broadcast %853 : vector<24x1xf32> to vector<24x24xf32>
    %855 = arith.subf %851, %854 : vector<24x24xf32>
    %856 = math.exp %855 : vector<24x24xf32>
    %cst_353 = arith.constant dense<0.000000e+00> : vector<24xf32>
    %857 = vector.multi_reduction <add>, %856, %cst_353 [1] : vector<24x24xf32> to vector<24xf32>
    %858 = vector.shape_cast %857 : vector<24xf32> to vector<24x1xf32>
    %859 = vector.broadcast %858 : vector<24x1xf32> to vector<24x24xf32>
    %860 = arith.divf %856, %859 : vector<24x24xf32>
    %cst_354 = arith.constant dense<0.000000e+00> : vector<24x32xf32>
    %861 = tpu.matmul %860, %846, %cst_354 {dimension_numbers = #tpu.dot_dimension_numbers<[1], [0], [0], [1], [0, 0, 1, 1], [], []>} : vector<24x24xf32>, vector<24x32xf32>, vector<24x32xf32> -> vector<24x32xf32>
    %862 = vector.extract_strided_slice %825 {offsets = [0, 64], sizes = [24, 32], strides = [1, 1]} : vector<24x384xf32> to vector<24x32xf32>
    %863 = vector.extract_strided_slice %825 {offsets = [0, 192], sizes = [24, 32], strides = [1, 1]} : vector<24x384xf32> to vector<24x32xf32>
    %864 = vector.extract_strided_slice %825 {offsets = [0, 320], sizes = [24, 32], strides = [1, 1]} : vector<24x384xf32> to vector<24x32xf32>
    %cst_355 = arith.constant dense<0.000000e+00> : vector<24x24xf32>
    %865 = tpu.matmul %862, %863, %cst_355 {dimension_numbers = #tpu.dot_dimension_numbers<[1], [1], [0], [0], [0, 0, 1, 0], [], []>} : vector<24x32xf32>, vector<24x32xf32>, vector<24x24xf32> -> vector<24x24xf32>
    %cst_356 = arith.constant 0.0883883461 : f32
    %866 = vector.broadcast %cst_356 : f32 to vector<24x24xf32>
    %867 = arith.mulf %865, %866 : vector<24x24xf32>
    %cst_357 = arith.constant -1.000000e+30 : f32
    %868 = vector.broadcast %cst_357 : f32 to vector<24x24xf32>
    %869 = arith.select %15, %867, %868 : vector<24x24xi1>, vector<24x24xf32>
    %cst_358 = arith.constant dense<0xFF800000> : vector<24xf32>
    %870 = vector.multi_reduction <maximumf>, %869, %cst_358 [1] : vector<24x24xf32> to vector<24xf32>
    %871 = vector.shape_cast %870 : vector<24xf32> to vector<24x1xf32>
    %872 = vector.broadcast %871 : vector<24x1xf32> to vector<24x24xf32>
    %873 = arith.subf %869, %872 : vector<24x24xf32>
    %874 = math.exp %873 : vector<24x24xf32>
    %cst_359 = arith.constant dense<0.000000e+00> : vector<24xf32>
    %875 = vector.multi_reduction <add>, %874, %cst_359 [1] : vector<24x24xf32> to vector<24xf32>
    %876 = vector.shape_cast %875 : vector<24xf32> to vector<24x1xf32>
    %877 = vector.broadcast %876 : vector<24x1xf32> to vector<24x24xf32>
    %878 = arith.divf %874, %877 : vector<24x24xf32>
    %cst_360 = arith.constant dense<0.000000e+00> : vector<24x32xf32>
    %879 = tpu.matmul %878, %864, %cst_360 {dimension_numbers = #tpu.dot_dimension_numbers<[1], [0], [0], [1], [0, 0, 1, 1], [], []>} : vector<24x24xf32>, vector<24x32xf32>, vector<24x32xf32> -> vector<24x32xf32>
    %880 = vector.extract_strided_slice %825 {offsets = [0, 96], sizes = [24, 32], strides = [1, 1]} : vector<24x384xf32> to vector<24x32xf32>
    %881 = vector.extract_strided_slice %825 {offsets = [0, 224], sizes = [24, 32], strides = [1, 1]} : vector<24x384xf32> to vector<24x32xf32>
    %882 = vector.extract_strided_slice %825 {offsets = [0, 352], sizes = [24, 32], strides = [1, 1]} : vector<24x384xf32> to vector<24x32xf32>
    %cst_361 = arith.constant dense<0.000000e+00> : vector<24x24xf32>
    %883 = tpu.matmul %880, %881, %cst_361 {dimension_numbers = #tpu.dot_dimension_numbers<[1], [1], [0], [0], [0, 0, 1, 0], [], []>} : vector<24x32xf32>, vector<24x32xf32>, vector<24x24xf32> -> vector<24x24xf32>
    %cst_362 = arith.constant 0.0883883461 : f32
    %884 = vector.broadcast %cst_362 : f32 to vector<24x24xf32>
    %885 = arith.mulf %883, %884 : vector<24x24xf32>
    %cst_363 = arith.constant -1.000000e+30 : f32
    %886 = vector.broadcast %cst_363 : f32 to vector<24x24xf32>
    %887 = arith.select %15, %885, %886 : vector<24x24xi1>, vector<24x24xf32>
    %cst_364 = arith.constant dense<0xFF800000> : vector<24xf32>
    %888 = vector.multi_reduction <maximumf>, %887, %cst_364 [1] : vector<24x24xf32> to vector<24xf32>
    %889 = vector.shape_cast %888 : vector<24xf32> to vector<24x1xf32>
    %890 = vector.broadcast %889 : vector<24x1xf32> to vector<24x24xf32>
    %891 = arith.subf %887, %890 : vector<24x24xf32>
    %892 = math.exp %891 : vector<24x24xf32>
    %cst_365 = arith.constant dense<0.000000e+00> : vector<24xf32>
    %893 = vector.multi_reduction <add>, %892, %cst_365 [1] : vector<24x24xf32> to vector<24xf32>
    %894 = vector.shape_cast %893 : vector<24xf32> to vector<24x1xf32>
    %895 = vector.broadcast %894 : vector<24x1xf32> to vector<24x24xf32>
    %896 = arith.divf %892, %895 : vector<24x24xf32>
    %cst_366 = arith.constant dense<0.000000e+00> : vector<24x32xf32>
    %897 = tpu.matmul %896, %882, %cst_366 {dimension_numbers = #tpu.dot_dimension_numbers<[1], [0], [0], [1], [0, 0, 1, 1], [], []>} : vector<24x24xf32>, vector<24x32xf32>, vector<24x32xf32> -> vector<24x32xf32>
    %898 = tpu.concatenate %843, %861, %879, %897 in 1 : vector<24x32xf32>, vector<24x32xf32>, vector<24x32xf32>, vector<24x32xf32> -> vector<24x128xf32>
    %899 = tpu.concatenate %824, %898 in 0 : vector<24x128xf32>, vector<24x128xf32> -> vector<48x128xf32>
    %c3_367 = arith.constant 3 : index
    %c0_368 = arith.constant 0 : index
    %c0_369 = arith.constant 0 : index
    %900 = vector.load %arg8[%c3_367, %c0_368, %c0_369] : memref<4x128x128xf32, #tpu.memory_space<vmem>>, vector<1x128x128xf32>
    %901 = vector.shape_cast %900 : vector<1x128x128xf32> to vector<128x128xf32>
    %cst_370 = arith.constant dense<0.000000e+00> : vector<48x128xf32>
    %902 = tpu.matmul %899, %901, %cst_370 {dimension_numbers = #tpu.dot_dimension_numbers<[1], [0], [0], [1], [0, 0, 1, 1], [], []>} : vector<48x128xf32>, vector<128x128xf32>, vector<48x128xf32> -> vector<48x128xf32>
    %c3_371 = arith.constant 3 : index
    %c0_372 = arith.constant 0 : index
    %c0_373 = arith.constant 0 : index
    %903 = vector.load %arg9[%c3_371, %c0_372, %c0_373] : memref<4x1x128xf32, #tpu.memory_space<vmem>>, vector<1x1x128xf32>
    %904 = vector.shape_cast %903 : vector<1x1x128xf32> to vector<1x128xf32>
    %905 = vector.broadcast %904 : vector<1x128xf32> to vector<48x128xf32>
    %906 = arith.addf %902, %905 : vector<48x128xf32>
    %907 = arith.addf %723, %906 : vector<48x128xf32>
    %c3_374 = arith.constant 3 : index
    %c0_375 = arith.constant 0 : index
    %c0_376 = arith.constant 0 : index
    %908 = vector.load %arg10[%c3_374, %c0_375, %c0_376] : memref<4x1x128xf32, #tpu.memory_space<vmem>>, vector<1x1x128xf32>
    %909 = vector.shape_cast %908 : vector<1x1x128xf32> to vector<1x128xf32>
    %c3_377 = arith.constant 3 : index
    %c0_378 = arith.constant 0 : index
    %c0_379 = arith.constant 0 : index
    %910 = vector.load %arg11[%c3_377, %c0_378, %c0_379] : memref<4x1x128xf32, #tpu.memory_space<vmem>>, vector<1x1x128xf32>
    %911 = vector.shape_cast %910 : vector<1x1x128xf32> to vector<1x128xf32>
    %cst_380 = arith.constant dense<0.000000e+00> : vector<48xf32>
    %912 = vector.multi_reduction <add>, %907, %cst_380 [1] : vector<48x128xf32> to vector<48xf32>
    %913 = vector.shape_cast %912 : vector<48xf32> to vector<48x1xf32>
    %cst_381 = arith.constant 1.280000e+02 : f32
    %914 = vector.broadcast %cst_381 : f32 to vector<48x1xf32>
    %915 = arith.divf %913, %914 : vector<48x1xf32>
    %916 = vector.broadcast %915 : vector<48x1xf32> to vector<48x128xf32>
    %917 = arith.subf %907, %916 : vector<48x128xf32>
    %918 = arith.mulf %917, %917 : vector<48x128xf32>
    %cst_382 = arith.constant dense<0.000000e+00> : vector<48xf32>
    %919 = vector.multi_reduction <add>, %918, %cst_382 [1] : vector<48x128xf32> to vector<48xf32>
    %920 = vector.shape_cast %919 : vector<48xf32> to vector<48x1xf32>
    %cst_383 = arith.constant 1.280000e+02 : f32
    %921 = vector.broadcast %cst_383 : f32 to vector<48x1xf32>
    %922 = arith.divf %920, %921 : vector<48x1xf32>
    %cst_384 = arith.constant 9.99999974E-6 : f32
    %923 = vector.broadcast %cst_384 : f32 to vector<48x1xf32>
    %924 = arith.addf %922, %923 : vector<48x1xf32>
    %925 = math.rsqrt %924 : vector<48x1xf32>
    %926 = vector.broadcast %925 : vector<48x1xf32> to vector<48x128xf32>
    %927 = arith.mulf %917, %926 : vector<48x128xf32>
    %928 = vector.broadcast %909 : vector<1x128xf32> to vector<48x128xf32>
    %929 = arith.mulf %927, %928 : vector<48x128xf32>
    %930 = vector.broadcast %911 : vector<1x128xf32> to vector<48x128xf32>
    %931 = arith.addf %929, %930 : vector<48x128xf32>
    %c3_385 = arith.constant 3 : index
    %c0_386 = arith.constant 0 : index
    %c0_387 = arith.constant 0 : index
    %932 = vector.load %arg12[%c3_385, %c0_386, %c0_387] : memref<4x128x64xf32, #tpu.memory_space<vmem>>, vector<1x128x64xf32>
    %933 = vector.shape_cast %932 : vector<1x128x64xf32> to vector<128x64xf32>
    %cst_388 = arith.constant dense<0.000000e+00> : vector<48x64xf32>
    %934 = tpu.matmul %931, %933, %cst_388 {dimension_numbers = #tpu.dot_dimension_numbers<[1], [0], [0], [1], [0, 0, 1, 1], [], []>} : vector<48x128xf32>, vector<128x64xf32>, vector<48x64xf32> -> vector<48x64xf32>
    %c3_389 = arith.constant 3 : index
    %c0_390 = arith.constant 0 : index
    %c0_391 = arith.constant 0 : index
    %935 = vector.load %arg13[%c3_389, %c0_390, %c0_391] : memref<4x1x64xf32, #tpu.memory_space<vmem>>, vector<1x1x64xf32>
    %936 = vector.shape_cast %935 : vector<1x1x64xf32> to vector<1x64xf32>
    %937 = vector.broadcast %936 : vector<1x64xf32> to vector<48x64xf32>
    %938 = arith.addf %934, %937 : vector<48x64xf32>
    %939 = arith.mulf %938, %938 : vector<48x64xf32>
    %940 = arith.mulf %938, %939 : vector<48x64xf32>
    %cst_392 = arith.constant 4.471500e-02 : f32
    %941 = vector.broadcast %cst_392 : f32 to vector<48x64xf32>
    %942 = arith.mulf %941, %940 : vector<48x64xf32>
    %943 = arith.addf %938, %942 : vector<48x64xf32>
    %cst_393 = arith.constant 0.797884583 : f32
    %944 = vector.broadcast %cst_393 : f32 to vector<48x64xf32>
    %945 = arith.mulf %944, %943 : vector<48x64xf32>
    %946 = math.tanh %945 : vector<48x64xf32>
    %cst_394 = arith.constant 1.000000e+00 : f32
    %947 = vector.broadcast %cst_394 : f32 to vector<48x64xf32>
    %948 = arith.addf %947, %946 : vector<48x64xf32>
    %cst_395 = arith.constant 5.000000e-01 : f32
    %949 = vector.broadcast %cst_395 : f32 to vector<48x64xf32>
    %950 = arith.mulf %949, %948 : vector<48x64xf32>
    %951 = arith.mulf %938, %950 : vector<48x64xf32>
    %c3_396 = arith.constant 3 : index
    %c0_397 = arith.constant 0 : index
    %c0_398 = arith.constant 0 : index
    %952 = vector.load %arg14[%c3_396, %c0_397, %c0_398] : memref<4x64x128xf32, #tpu.memory_space<vmem>>, vector<1x64x128xf32>
    %953 = vector.shape_cast %952 : vector<1x64x128xf32> to vector<64x128xf32>
    %cst_399 = arith.constant dense<0.000000e+00> : vector<48x128xf32>
    %954 = tpu.matmul %951, %953, %cst_399 {dimension_numbers = #tpu.dot_dimension_numbers<[1], [0], [0], [1], [0, 0, 1, 1], [], []>} : vector<48x64xf32>, vector<64x128xf32>, vector<48x128xf32> -> vector<48x128xf32>
    %c3_400 = arith.constant 3 : index
    %c0_401 = arith.constant 0 : index
    %c0_402 = arith.constant 0 : index
    %955 = vector.load %arg15[%c3_400, %c0_401, %c0_402] : memref<4x1x128xf32, #tpu.memory_space<vmem>>, vector<1x1x128xf32>
    %956 = vector.shape_cast %955 : vector<1x1x128xf32> to vector<1x128xf32>
    %957 = vector.broadcast %956 : vector<1x128xf32> to vector<48x128xf32>
    %958 = arith.addf %954, %957 : vector<48x128xf32>
    %959 = arith.addf %907, %958 : vector<48x128xf32>
    %960 = vector.shape_cast %959 : vector<48x128xf32> to vector<2x24x128xf32>
    %961 = vector.extract_strided_slice %960 {offsets = [0, 0, 0], sizes = [2, 1, 128], strides = [1, 1, 1]} : vector<2x24x128xf32> to vector<2x1x128xf32>
    %962 = vector.shape_cast %961 : vector<2x1x128xf32> to vector<2x128xf32>
    %c0_403 = arith.constant 0 : index
    %c0_404 = arith.constant 0 : index
    %963 = vector.load %arg16[%c0_403, %c0_404] : memref<2x128xf32, #tpu.memory_space<vmem>>, vector<2x128xf32>
    tpu.vector_store %arg16[%c0_403, %c0_404], %962 {strides = array<i32>} : memref<2x128xf32, #tpu.memory_space<vmem>>, vector<2x128xf32>,
    return
  }
  func.func @transform_0(%arg0: i32) -> (i32, i32, i32) {
    %c0_i32 = arith.constant 0 : i32
    %c0_i32_0 = arith.constant 0 : i32
    %c0_i32_1 = arith.constant 0 : i32
    %c0_i32_2 = arith.constant 0 : i32
    return %c0_i32, %c0_i32_0, %c0_i32_1 : i32, i32, i32
  }
  func.func @transform_1(%arg0: i32) -> (i32, i32) {
    %c0_i32 = arith.constant 0 : i32
    %c0_i32_0 = arith.constant 0 : i32
    %c0_i32_1 = arith.constant 0 : i32
    return %c0_i32, %c0_i32_0 : i32, i32
  }
  func.func @transform_2(%arg0: i32) -> (i32, i32) {
    %c0_i32 = arith.constant 0 : i32
    %c0_i32_0 = arith.constant 0 : i32
    %c0_i32_1 = arith.constant 0 : i32
    return %c0_i32, %c0_i32_0 : i32, i32
  }
  func.func @transform_3(%arg0: i32) -> (i32, i32) {
    %c0_i32 = arith.constant 0 : i32
    %c0_i32_0 = arith.constant 0 : i32
    %c0_i32_1 = arith.constant 0 : i32
    return %c0_i32, %c0_i32_0 : i32, i32
  }
  func.func @transform_4(%arg0: i32) -> (i32, i32, i32) {
    %c0_i32 = arith.constant 0 : i32
    %c0_i32_0 = arith.constant 0 : i32
    %c0_i32_1 = arith.constant 0 : i32
    %c0_i32_2 = arith.constant 0 : i32
    return %c0_i32, %c0_i32_0, %c0_i32_1 : i32, i32, i32
  }
  func.func @transform_5(%arg0: i32) -> (i32, i32, i32) {
    %c0_i32 = arith.constant 0 : i32
    %c0_i32_0 = arith.constant 0 : i32
    %c0_i32_1 = arith.constant 0 : i32
    %c0_i32_2 = arith.constant 0 : i32
    return %c0_i32, %c0_i32_0, %c0_i32_1 : i32, i32, i32
  }
  func.func @transform_6(%arg0: i32) -> (i32, i32, i32) {
    %c0_i32 = arith.constant 0 : i32
    %c0_i32_0 = arith.constant 0 : i32
    %c0_i32_1 = arith.constant 0 : i32
    %c0_i32_2 = arith.constant 0 : i32
    return %c0_i32, %c0_i32_0, %c0_i32_1 : i32, i32, i32
  }
  func.func @transform_7(%arg0: i32) -> (i32, i32, i32) {
    %c0_i32 = arith.constant 0 : i32
    %c0_i32_0 = arith.constant 0 : i32
    %c0_i32_1 = arith.constant 0 : i32
    %c0_i32_2 = arith.constant 0 : i32
    return %c0_i32, %c0_i32_0, %c0_i32_1 : i32, i32, i32
  }
  func.func @transform_8(%arg0: i32) -> (i32, i32, i32) {
    %c0_i32 = arith.constant 0 : i32
    %c0_i32_0 = arith.constant 0 : i32
    %c0_i32_1 = arith.constant 0 : i32
    %c0_i32_2 = arith.constant 0 : i32
    return %c0_i32, %c0_i32_0, %c0_i32_1 : i32, i32, i32
  }
  func.func @transform_9(%arg0: i32) -> (i32, i32, i32) {
    %c0_i32 = arith.constant 0 : i32
    %c0_i32_0 = arith.constant 0 : i32
    %c0_i32_1 = arith.constant 0 : i32
    %c0_i32_2 = arith.constant 0 : i32
    return %c0_i32, %c0_i32_0, %c0_i32_1 : i32, i32, i32
  }
  func.func @transform_10(%arg0: i32) -> (i32, i32, i32) {
    %c0_i32 = arith.constant 0 : i32
    %c0_i32_0 = arith.constant 0 : i32
    %c0_i32_1 = arith.constant 0 : i32
    %c0_i32_2 = arith.constant 0 : i32
    return %c0_i32, %c0_i32_0, %c0_i32_1 : i32, i32, i32
  }
  func.func @transform_11(%arg0: i32) -> (i32, i32, i32) {
    %c0_i32 = arith.constant 0 : i32
    %c0_i32_0 = arith.constant 0 : i32
    %c0_i32_1 = arith.constant 0 : i32
    %c0_i32_2 = arith.constant 0 : i32
    return %c0_i32, %c0_i32_0, %c0_i32_1 : i32, i32, i32
  }
  func.func @transform_12(%arg0: i32) -> (i32, i32, i32) {
    %c0_i32 = arith.constant 0 : i32
    %c0_i32_0 = arith.constant 0 : i32
    %c0_i32_1 = arith.constant 0 : i32
    %c0_i32_2 = arith.constant 0 : i32
    return %c0_i32, %c0_i32_0, %c0_i32_1 : i32, i32, i32
  }
  func.func @transform_13(%arg0: i32) -> (i32, i32, i32) {
    %c0_i32 = arith.constant 0 : i32
    %c0_i32_0 = arith.constant 0 : i32
    %c0_i32_1 = arith.constant 0 : i32
    %c0_i32_2 = arith.constant 0 : i32
    return %c0_i32, %c0_i32_0, %c0_i32_1 : i32, i32, i32
  }
  func.func @transform_14(%arg0: i32) -> (i32, i32, i32) {
    %c0_i32 = arith.constant 0 : i32
    %c0_i32_0 = arith.constant 0 : i32
    %c0_i32_1 = arith.constant 0 : i32
    %c0_i32_2 = arith.constant 0 : i32
    return %c0_i32, %c0_i32_0, %c0_i32_1 : i32, i32, i32
  }
  func.func @transform_15(%arg0: i32) -> (i32, i32) {
    %c0_i32 = arith.constant 0 : i32
    %c0_i32_0 = arith.constant 0 : i32
    %c0_i32_1 = arith.constant 0 : i32
    return %c0_i32, %c0_i32_0 : i32, i32
  }
}

</mosaic_0001>

<bundles_post_ra>
// kernel: tpu_custom_call.1
= control target key start
LH: loop header
LB: loop body
LE: loop exit
PB: predicated region body
PF: predicated region fallthrough
CT: control target
= control target key end

     0   :  { %20 = vsyncpa [#allocation3], 0  ;;  %s19973_s0 = inlined_call_operand.vmem [shape: f32[2,16,4], index: 0, kind: input, shape index: {}]   ;;  %s19974_s1 = inlined_call_operand.vmem [shape: f32[4,128], index: 1, kind: input, shape index: {}]   ;;  %s19975_s2 = inlined_call_operand.vmem [shape: f32[1,128], index: 2, kind: input, shape index: {}]   ;;  %s19976_s3 = inlined_call_operand.vmem [shape: f32[1,128], index: 3, kind: input, shape index: {}]   ;;  %s19977_s4 = inlined_call_operand.vmem [shape: f32[4,1,128], index: 4, kind: input, shape index: {}]   ;;  %s19978_s5 = inlined_call_operand.vmem [shape: f32[4,1,128], index: 5, kind: input, shape index: {}]   ;;  %s19979_s6 = inlined_call_operand.hbm [shape: f32[4,128,384], index: 6, kind: input, shape index: {}]   ;;  %s19980_s7 = inlined_call_operand.vmem [shape: f32[4,128,128], index: 7, kind: input, shape index: {}]   ;;  %s19981_s8 = inlined_call_operand.vmem [shape: f32[4,1,128], index: 8, kind: input, shape index: {}]   ;;  %s19982_s9 = inlined_call_operand.vmem [shape: f32[4,1,128], index: 9, kind: input, shape index: {}]   ;;  %s19983_s10 = inlined_call_operand.vmem [shape: f32[4,1,128], index: 10, kind: input, shape index: {}]   ;;  %s19984_s11 = inlined_call_operand.vmem [shape: f32[4,128,64], index: 11, kind: input, shape index: {}]   ;;  %s19985_s12 = inlined_call_operand.vmem [shape: f32[4,1,64], index: 12, kind: input, shape index: {}]   ;;  %s19986_s13 = inlined_call_operand.vmem [shape: f32[4,64,128], index: 13, kind: input, shape index: {}]   ;;  %s19987_s14 = inlined_call_operand.vmem [shape: f32[4,1,128], index: 14, kind: input, shape index: {}]   ;;  %s19988_s15 = inlined_call_operand.hbm [shape: f32[2,128], index: 15, kind: output, shape index: {}]  }
   0x1   :  { %21 = vsyncpa [#allocation4], 0  ;;  %s16234_s18 = smov [#allocation2]   ;;  %s16186_s22 = scalar_lea.hbm %s19979_s6, 24576 }
   0x2   :  { %s39_s19 = sshll.u32 %s16234_s18, 4  ;;  %p16187_p0 = scmp.ne.s32.totalorder %s19979_s6, %s16186_s22  ;;  %s40_s19 = int_to_ptr.vmem [resolvable:$true] %s39_s19 }
   0x3   :  { %p16190_p1 = scmp.lt.u32.totalorder %s16186_s22, %s19979_s6 }
   0x5   :  { %p16192_p2 = pnand %p16190_p1, %p16187_p0 }
   0x7   :  { %16195 = shalt.err (!%p16192_p2)
}
   0x8   :  { %s16196_s27 = scalar_lea.vmem %s40_s19, 24576  ;;  %p16201_p4 = scmp.lt.s32.totalorder %s40_s19, %s40_s19 }
   0x9   :  { %p16197_p3 = scmp.ne.s32.totalorder %s40_s19, %s16196_s27  ;;  %p16202_p5 = scmp.lt.s32.totalorder %s16196_s27, %s16196_s27 }
   0xb   :  { %p16203_p6 = por %p16202_p5, %p16201_p4 }
   0xd   :  { %p16204_p7 = pnand %p16203_p6, %p16197_p3 }
   0xf   :  { %16207 = shalt.err (!%p16204_p7)
}
  0x10   :  { %s16235_s28 = smov 384   ;;  %s16236_s29 = smov 24  }
  0x11   :  { %45 = dma.hbm_to_vmem [thread:$0]  %s19979_s6, 24576, %s40_s19, [#allocation3], %s16235_s28, %s16235_s28, %s16236_s29  }
  0x12   :  { %16230 = dma.done.wait [#allocation3], 24576  }
  0x13   :  { %16231 = vsyncadd [#allocation3], 4294942720  ;;  %vm91_vm0 = vcmask 1043456   ;;  %vm78_vm1 = vcmask 31744   ;;  %v65_v0 = vld [vmem:[%s19974_s1] sm:$0xf] }
  0x14   :  { %v68_v1 = vld [vmem:[%s19973_s0] sm:$0xff]  ;;  %v69_v2 = vld [vmem:[%s19973_s0 + $0x8] sm:$0xff]  ;;  %12860 = vmatprep.subr.msk.mxu0 %vm91_vm0, %v65_v0  ;;  %v70_v3 = vld [vmem:[%s19973_s0 + $0x10] sm:$0xff]  ;;  %vm182_vm2 = vcmask 1040384   ;;  %vm16239_vm3 = vmmov 0   ;;  %vm541_vm4 = vcmask 261120  }
  0x15   :  { %12862 = vmatprep.mubr.msk.f32.mxu0 %vm78_vm1, %v68_v1  ;;  %12861 = vmatpush3.msk.msra.mxu0 %vm91_vm0, %v65_v0  ;;  %v71_v4 = vld [vmem:[%s19973_s0 + $0x18] sm:$0xff]  ;;  %v11664_v5 = vld [vmem:[%s19975_s2] ss:$0 sm:$0xff]  ;;  %v298_v25 = vld [vmem:[#allocation2 + $0x8] sm:$0xff]  ;;  %s16240_s30 = smov 64   ;;  %s16241_s16 = smov 96  }
  0x16   :  { %12863 = vmatmul.mubr.msk.f32.vlgmr.msra.gmra.mrb[0].mxu0 %vm78_vm1, %v69_v2  ;;  %v67_v11 = vld [vmem:[%s19976_s3] sm:$0x1]  ;;  %v300_v29 = vld [vmem:[#allocation2 + $0x18] sm:$0xff]  ;;  %v307_v31 = vld [vmem:[#allocation2 + $0x50] sm:$0xff]  ;;  %s16242_s17 = smov 32   ;;  %vm646_vm7 = vcmask 195584  }
  0x17   :  { %12865 = vmatprep.mubr.msk.f32.mxu0 %vm78_vm1, %v70_v3  ;;  %v301_v26 = vld [vmem:[#allocation2 + $0x20] sm:$0xff]  ;;  %v304_v30 = vld [vmem:[#allocation2 + $0x38] sm:$0xff]  ;;  %v299_v34 = vld [vmem:[#allocation2 + $0x10] sm:$0xff]  ;;  %vm1534_vm8 = vcmask 523264   ;;  %vm1538_vm9 = vcmask 785408   ;;  %s16243_s23 = smov [#allocation5]  }
  0x18   :  { %v297_v27 = vld [vmem:[#allocation2] sm:$0xff]  ;;  %v14420_v28 = vpack.c.bf16 %v301_v26, %v298_v25  ;;  %v14424_v33 = vpack.c.bf16 %v307_v31, %v304_v30  ;;  %v302_v35 = vld [vmem:[#allocation2 + $0x28] sm:$0xff]  ;;  %v303_v36 = vld [vmem:[#allocation2 + $0x30] sm:$0xff]  ;;  %s11655_s24 = sshll.u32 %s16243_s23, 4  ;;  %vm11645_vm10 = vcmask 1041409   ;;  %s11656_s24 = int_to_ptr.vmem [resolvable:$true] %s11655_s24 }
  0x19   :  { %v14422_v32 = vpack.c.bf16 %v300_v29, %v297_v27  ;;  %v14452_v37 = vpack.c.bf16 %v302_v35, %v299_v34  ;;  %v306_v38 = vld [vmem:[#allocation2 + $0x48] sm:$0xff]  ;;  %v313_v40 = vld [vmem:[#allocation2 + $0x80] sm:$0xff]  ;;  %v308_v43 = vld [vmem:[#allocation2 + $0x58] sm:$0xff]  ;;  %s16208_s6 = scalar_lea.vmem %s11656_s24, 32  ;;  %p16213_p9 = scmp.lt.s32.totalorder %s11656_s24, %s11656_s24 }
  0x1a   :  { %12866 = vmatmul.mubr.msk.f32.gmra.mrb[2].mxu0 %vm78_vm1, %v71_v4  ;;  %14421 = vmatprep.subr.bf16.mxu1 %v14420_v28  ;;  %v310_v39 = vld [vmem:[#allocation2 + $0x68] sm:$0xff]  ;;  %v14426_v41 = vpack.c.bf16 %v306_v38, %v303_v36  ;;  %v305_v42 = vld [vmem:[#allocation2 + $0x40] sm:$0xff]  ;;  %v312_v47 = vld [vmem:[#allocation2 + $0x78] sm:$0xff]  ;;  %p16209_p8 = scmp.ne.s32.totalorder %s11656_s24, %s16208_s6  ;;  %p16214_p10 = scmp.lt.s32.totalorder %s16208_s6, %s16208_s6 }
  0x1b   :  { %14423 = vmatpush1.bf16.msra.mxu1 %v14422_v32  ;;  %14453 = vmatprep.subr.bf16.mxu0 %v14452_v37  ;;  %v14428_v44 = vpack.c.bf16 %v313_v40, %v310_v39  ;;  %v14456_v45 = vpack.c.bf16 %v308_v43, %v305_v42  ;;  %v309_v46 = vld [vmem:[#allocation2 + $0x60] sm:$0xff]  ;;  %v320_v28 = vld [vmem:[#allocation2 + $0xb8] sm:$0xff]  ;;  %v331_v34 = vld [vmem:[#allocation2 + $0x110] sm:$0xff] }
  0x1c   :  { %14425 = vmatprep.subr.bf16.mxu1 %v14424_v33  ;;  %14455 = vmatpush3.bf16.msra.mxu0 %v14452_v37  ;;  %v14430_v48 = vpack.c.bf16 %v312_v47, %v309_v46  ;;  %v325_v25 = vld [vmem:[#allocation2 + $0xe0] sm:$0xff]  ;;  %v324_v30 = vld [vmem:[#allocation2 + $0xd8] sm:$0xff]  ;;  %v323_v35 = vld [vmem:[#allocation2 + $0xd0] sm:$0xff]  ;;  %p16215_p11 = por %p16214_p10, %p16213_p9 }
  0x1d   :  { %14457 = vmatprep.subr.bf16.mxu0 %v14456_v45  ;;  %v317_v26 = vld [vmem:[#allocation2 + $0xa0] sm:$0xff]  ;;  %v328_v33 = vld [vmem:[#allocation2 + $0xf8] sm:$0xff]  ;;  %v326_v37 = vld [vmem:[#allocation2 + $0xe8] sm:$0xff] }
  0x1e   :  { %v321_v29 = vld [vmem:[#allocation2 + $0xc0] sm:$0xff]  ;;  %v14464_v31 = vpack.c.bf16 %v320_v28, %v317_v26  ;;  %v14440_v36 = vpack.c.bf16 %v331_v34, %v328_v33  ;;  %v327_v38 = vld [vmem:[#allocation2 + $0xf0] sm:$0xff]  ;;  %v330_v39 = vld [vmem:[#allocation2 + $0x108] sm:$0xff]  ;;  %v14468_v40 = vpack.c.bf16 %v326_v37, %v323_v35  ;;  %p16216_p12 = pnand %p16215_p11, %p16209_p8 }
  0x1f   :  { %14427 = vmatpush1.bf16.msra.mxu1 %v14426_v41  ;;  %v14438_v32 = vpack.c.bf16 %v324_v30, %v321_v29  ;;  %v14442_v41 = vpack.c.bf16 %v330_v39, %v327_v38  ;;  %v334_v42 = vld [vmem:[#allocation2 + $0x128] sm:$0xff]  ;;  %v337_v43 = vld [vmem:[#allocation2 + $0x140] sm:$0xff]  ;;  %v332_v46 = vld [vmem:[#allocation2 + $0x118] sm:$0xff] }
  0x20   :  { %14429 = vmatprep.subr.bf16.mxu1 %v14428_v44  ;;  %14459 = vmatpush3.bf16.msra.mxu0 %v14456_v45  ;;  %v329_v44 = vld [vmem:[#allocation2 + $0x100] sm:$0xff]  ;;  %v14444_v45 = vpack.c.bf16 %v337_v43, %v334_v42  ;;  %vm16437_vm5 = vmpackc.low %vm541_vm4, %vm541_vm4 }
  0x21   :  { %v333_v47 = vld [vmem:[#allocation2 + $0x120] sm:$0xff] }
  0x22   :  { %v11671_v33 = vld [vmem:[%s19978_s5] ss:$0 sm:$0xff] }
  0x23   :  { %14431 = vmatpush1.bf16.msra.mxu1 %v14430_v48  ;;  %v336_v48 = vld [vmem:[#allocation2 + $0x138] sm:$0xff] }
  0xe9   :  { %v12864_v6 = vpop.f32.mrb[0].mxu0 }
  0xea   :  { %v167_v7 = vadd.f32 %v12864_v6, %v11664_v5  ;;  %v161_v8 = vpop.f32.mrb[1].mxu0 }
  0xeb   :  { %v162_v9 = vadd.f32 %v11664_v5, %v161_v8 }
  0xec   :  { %v184_v10 = vrot.slane %v167_v7, 7 }
  0xed   :  { %v183_v12 = vrot.slane %v162_v9, 7  ;;  %v12867_v13 = vpop.f32.mrb[2].mxu0  ;;  %v316_v9 = vld [vmem:[#allocation2 + $0x98] sm:$0xff] }
  0xee   :  { %v177_v14 = vadd.f32 %v12867_v13, %v11664_v5  ;;  %v171_v15 = vpop.f32.mrb[3].mxu0  ;;  %v16358_v16 = vsel %vm182_vm2, %v184_v10, 0.0  ;;  %v314_v13 = vld [vmem:[#allocation2 + $0x88] sm:$0xff] }
  0xef   :  { %v172_v17 = vadd.f32 %v11664_v5, %v171_v15  ;;  %210 = vadd.xlane.f32.xlu1 %v16358_v16  ;;  %v16362_v18 = vsel %vm182_vm2, %v67_v11, %v183_v12  ;;  %v16365_v19 = vsel %vm182_vm2, %v183_v12, %v184_v10  ;;  %v319_v10 = vld [vmem:[#allocation2 + $0xb0] sm:$0xff]  ;;  %v318_v15 = vld [vmem:[#allocation2 + $0xa8] sm:$0xff] }
  0xf0   :  { %206 = vadd.xlane.f32.xlu0 %v16362_v18  ;;  %v192_v20 = vrot.slane %v177_v14, 7  ;;  %v14432_v12 = vpack.c.bf16 %v319_v10, %v316_v9  ;;  %v315_v14 = vld [vmem:[#allocation2 + $0x90] sm:$0xff] }
  0xf1   :  { %v191_v21 = vrot.slane %v172_v17, 7 }
  0xf2   :  { %v16377_v24 = vsel %vm182_vm2, %v192_v20, 0.0  ;;  %14433 = vmatprep.subr.bf16.mxu1 %v14432_v12 }
  0xf3   :  { %v16369_v22 = vsel %vm182_vm2, %v67_v11, %v191_v21  ;;  %v16372_v23 = vsel %vm182_vm2, %v191_v21, %v192_v20  ;;  %v311_v11 = vld [vmem:[#allocation2 + $0x70] sm:$0xff]  ;;  %v14434_v20 = vpack.c.bf16 %v318_v15, %v315_v14  ;;  %v322_v21 = vld [vmem:[#allocation2 + $0xc8] sm:$0xff] }
  0xf4   :  { %212 = vadd.xlane.f32.xlu1 %v16369_v22  ;;  %208 = vadd.xlane.f32.xlu0 %v16365_v19  ;;  %v14460_v17 = vpack.c.bf16 %v314_v13, %v311_v11  ;;  %v14436_v27 = vpack.c.bf16 %v325_v25, %v322_v21 }
  0xf5   :  { %14435 = vmatpush1.bf16.msra.mxu1 %v14434_v20 }
  0xf6   :  { %14461 = vmatprep.subr.bf16.mxu0 %v14460_v17  ;;  %14437 = vmatprep.subr.bf16.mxu1 %v14436_v27 }
  0xf7   :  { %14463 = vmatpush3.bf16.msra.mxu0 %v14460_v17 }
  0xf8   :  { %216 = vadd.xlane.f32.xlu1 %v16377_v24  ;;  %214 = vadd.xlane.f32.xlu0 %v16372_v23 }
  0xf9   :  { %14465 = vmatprep.subr.bf16.mxu0 %v14464_v31  ;;  %14439 = vmatpush1.bf16.msra.mxu1 %v14438_v32 }
  0xfa   :  { %14441 = vmatprep.subr.bf16.mxu1 %v14440_v36 }
  0xfb   :  { %14467 = vmatpush3.bf16.msra.mxu0 %v14464_v31  ;;  %v11670_v31 = vld [vmem:[%s19977_s4] ss:$0 sm:$0xff] }
  0xfc   :  { %14469 = vmatprep.subr.bf16.mxu0 %v14468_v40 }
  0xfd   :  { %14443 = vmatpush1.bf16.msra.mxu1 %v14442_v41 }
  0xfe   :  { %14445 = vmatprep.subr.bf16.mxu1 %v14444_v45 }
  0xff   :  { %14471 = vmatpush3.bf16.msra.mxu0 %v14468_v40 }
 0x17c   :  { %v211_v49 = vpop.xlane.xlu1 %210 }
 0x17d   :  { %v221_v50 = vmul.f32 0.0078125, %v211_v49  ;;  %v207_v51 = vpop.xlane.xlu0 %206  ;;  %v14472_v49 = vpack.c.bf16 %v332_v46, %v329_v44 }
 0x17e   :  { %v219_v52 = vmul.f32 0.0078125, %v207_v51  ;;  %v340_v51 = vld [vmem:[#allocation2 + $0x158] sm:$0xff] }
 0x17f   :  { %v16385_v56 = vsub.f32 %v16358_v16, %v221_v50  ;;  %v14446_v50 = vpack.c.bf16 %v336_v48, %v333_v47  ;;  %14473 = vmatprep.subr.bf16.mxu0 %v14472_v49 }
 0x180   :  { %v16382_v53 = vsub.f32 %v16362_v18, %v219_v52  ;;  %v343_v52 = vld [vmem:[#allocation2 + $0x170] sm:$0xff]  ;;  %14475 = vmatpush3.bf16.msra.mxu0 %v14472_v49 }
 0x181   :  { %v213_v54 = vpop.xlane.xlu1 %212  ;;  %v209_v55 = vpop.xlane.xlu0 %208  ;;  %v233_v63 = vmul.f32 %v16385_v56, %v16385_v56  ;;  %14447 = vmatpush1.bf16.msra.mxu1 %v14446_v50 }
 0x182   :  { %v222_v57 = vmul.f32 0.0078125, %v213_v54  ;;  %v220_v58 = vmul.f32 0.0078125, %v209_v55  ;;  %v231_v59 = vmul.f32 %v16382_v53, %v16382_v53  ;;  %v335_v54 = vld [vmem:[#allocation2 + $0x130] sm:$0xff]  ;;  %v14448_v55 = vpack.c.bf16 %v343_v52, %v340_v51 }
 0x184   :  { %237 = vadd.xlane.f32.xlu0 %v231_v59  ;;  %v16390_v60 = vsub.f32 %v16365_v19, %v220_v58  ;;  %v16397_v3 = vsub.f32 %v16369_v22, %v222_v57  ;;  %v338_v57 = vld [vmem:[#allocation2 + $0x148] sm:$0xff]  ;;  %v339_v58 = vld [vmem:[#allocation2 + $0x150] sm:$0xff]  ;;  %14449 = vmatprep.subr.bf16.mxu1 %v14448_v55 }
 0x185   :  { %v217_v61 = vpop.xlane.xlu1 %216  ;;  %v215_v62 = vpop.xlane.xlu0 %214  ;;  %v342_v59 = vld [vmem:[#allocation2 + $0x168] sm:$0xff] }
 0x186   :  { %v224_v0 = vmul.f32 0.0078125, %v217_v61  ;;  %v223_v1 = vmul.f32 0.0078125, %v215_v62  ;;  %v232_v2 = vmul.f32 %v16390_v60, %v16390_v60  ;;  %v234_v5 = vmul.f32 %v16397_v3, %v16397_v3 }
 0x187   :  { %v14476_v61 = vpack.c.bf16 %v338_v57, %v335_v54  ;;  %v14450_v62 = vpack.c.bf16 %v342_v59, %v339_v58 }
 0x188   :  { %241 = vadd.xlane.f32.xlu0 %v233_v63  ;;  %239 = vadd.xlane.f32.xlu1 %v232_v2  ;;  %v16400_v4 = vsub.f32 %v16372_v23, %v223_v1  ;;  %v16407_v7 = vsub.f32 %v16377_v24, %v224_v0  ;;  %v16237_v63 = vmov 0.0   ;;  %v341_v0 = vld [vmem:[#allocation2 + $0x160] sm:$0xff]  ;;  %v344_v1 = vld [vmem:[#allocation2 + $0x178] sm:$0xff] }
 0x189   :  { %409 = vmatprep.mubr.f32.mxu1 %v16237_v63  ;;  %14477 = vmatprep.subr.bf16.mxu0 %v14476_v61  ;;  %v14480_v2 = vpack.c.bf16 %v344_v1, %v341_v0 }
 0x18a   :  { %v235_v6 = vmul.f32 %v16400_v4, %v16400_v4  ;;  %v236_v8 = vmul.f32 %v16407_v7, %v16407_v7  ;;  %14451 = vmatpush1.bf16.msra.mxu1 %v14450_v62  ;;  %14479 = vmatpush3.bf16.msra.mxu0 %v14476_v61 }
 0x18b   :  { %14481 = vmatprep.subr.bf16.mxu0 %v14480_v2 }
 0x18c   :  { %243 = vadd.xlane.f32.xlu1 %v234_v5  ;;  %245 = vadd.xlane.f32.xlu0 %v235_v6 }
 0x18e   :  { %14483 = vmatpush3.bf16.msra.mxu0 %v14480_v2 }
 0x190   :  { %247 = vadd.xlane.f32.xlu1 %v236_v8 }
 0x211   :  { %v238_v5 = vpop.xlane.xlu0 %237 }
 0x212   :  { %v249_v6 = vmul.f32 0.0078125, %v238_v5 }
 0x214   :  { %v255_v8 = vadd.f32 1e-05, %v249_v6 }
 0x215   :  { %v240_v9 = vpop.xlane.xlu1 %239  ;;  %v242_v10 = vpop.xlane.xlu0 %241 }
 0x216   :  { %15658 = vrsqrt.f32 %v255_v8  ;;  %v250_v11 = vmul.f32 0.0078125, %v240_v9  ;;  %v251_v12 = vmul.f32 0.0078125, %v242_v10 }
 0x218   :  { %v256_v13 = vadd.f32 1e-05, %v250_v11  ;;  %v257_v14 = vadd.f32 1e-05, %v251_v12 }
 0x219   :  { %v244_v15 = vpop.xlane.xlu1 %243  ;;  %v246_v17 = vpop.xlane.xlu0 %245 }
 0x21a   :  { %15660 = vrsqrt.f32 %v256_v13  ;;  %v252_v20 = vmul.f32 0.0078125, %v244_v15  ;;  %v253_v21 = vmul.f32 0.0078125, %v246_v17 }
 0x21b   :  { %15662 = vrsqrt.f32 %v257_v14 }
 0x21c   :  { %v258_v25 = vadd.f32 1e-05, %v252_v20  ;;  %v259_v26 = vadd.f32 1e-05, %v253_v21 }
 0x21d   :  { %v248_v27 = vpop.xlane.xlu1 %247 }
 0x21e   :  { %15664 = vrsqrt.f32 %v258_v25  ;;  %v254_v28 = vmul.f32 0.0078125, %v248_v27 }
 0x21f   :  { %15666 = vrsqrt.f32 %v259_v26 }
 0x220   :  { %v15659_v29 = vpop.eup %15658  ;;  %v260_v30 = vadd.f32 1e-05, %v254_v28 }
 0x221   :  { %v267_v32 = vmul.f32 %v15659_v29, %v16382_v53 }
 0x222   :  { %15668 = vrsqrt.f32 %v260_v30 }
 0x223   :  { %v279_v34 = vmul.f32 %v11670_v31, %v267_v32 }
 0x224   :  { %v15661_v35 = vpop.eup %15660 }
 0x225   :  { %v15663_v36 = vpop.eup %15662  ;;  %v291_v37 = vadd.f32 %v11671_v33, %v279_v34  ;;  %v268_v38 = vmul.f32 %v15661_v35, %v16390_v60 }
 0x226   :  { %v269_v39 = vmul.f32 %v15663_v36, %v16385_v56 }
 0x227   :  { %410 = vmatmul.mubr.f32.vlgmr.msra.gmra.mrb[0].mxu1 %v291_v37  ;;  %12900 = vmatprep.mubr.f32.mxu0 %v291_v37  ;;  %v280_v40 = vmul.f32 %v11670_v31, %v268_v38 }
 0x228   :  { %v15665_v41 = vpop.eup %15664  ;;  %415 = vmatprep.mubr.f32.mxu1 %v16237_v63  ;;  %v281_v53 = vmul.f32 %v11670_v31, %v269_v39 }
 0x229   :  { %v15667_v42 = vpop.eup %15666  ;;  %v292_v43 = vadd.f32 %v11671_v33, %v280_v40  ;;  %v270_v44 = vmul.f32 %v15665_v41, %v16397_v3 }
 0x22a   :  { %v293_v45 = vadd.f32 %v11671_v33, %v281_v53  ;;  %v271_v46 = vmul.f32 %v15667_v42, %v16400_v4  ;;  %v16238_v4 = vmov 0.0|0.0  }
 0x22b   :  { %416 = vmatmul.mubr.f32.gmra.mrb[2].mxu1 %v292_v43  ;;  %12901 = vmatmul.mubr.f32.vlgmr.msra.gmra.mrb[4].mxu0 %v292_v43  ;;  %v282_v47 = vmul.f32 %v11670_v31, %v270_v44 }
 0x22c   :  { %v15669_v60 = vpop.eup %15668  ;;  %12903 = vmatprep.mubr.f32.mxu0 %v293_v45  ;;  %421 = vmatprep.mubr.f32.mxu1 %v16237_v63  ;;  %v283_v56 = vmul.f32 %v11670_v31, %v271_v46 }
 0x22d   :  { %v294_v48 = vadd.f32 %v11671_v33, %v282_v47  ;;  %v272_v49 = vmul.f32 %v15669_v60, %v16407_v7  ;;  %14484 = vmatprep.subr.bf16.mxu0 %v16238_v4  ;;  %14488 = vmatprep.subr.bf16.mxu1 %v16238_v4 }
 0x22e   :  { %v295_v50 = vadd.f32 %v11671_v33, %v283_v56 }
 0x22f   :  { %422 = vmatmul.mubr.f32.gmra.mrb[4].mxu1 %v293_v45  ;;  %12904 = vmatmul.mubr.f32.gmra.mrb[6].mxu0 %v294_v48  ;;  %v284_v51 = vmul.f32 %v11670_v31, %v272_v49 }
 0x230   :  { %12906 = vmatprep.mubr.f32.mxu0 %v295_v50  ;;  %427 = vmatprep.mubr.f32.mxu1 %v16237_v63 }
 0x231   :  { %v296_v3 = vadd.f32 %v11671_v33, %v284_v51 }
 0x233   :  { %428 = vmatmul.mubr.f32.gmra.mrb[6].mxu1 %v294_v48  ;;  %12907 = vmatmul.mubr.f32.gmra.mrb[8].mxu0 %v296_v3 }
 0x234   :  { %433 = vmatprep.mubr.f32.mxu1 %v16237_v63  ;;  %12915 = vmatprep.mubr.msk.f32.mxu0 %vm16239_vm3, %v16237_v63 }
 0x237   :  { %434 = vmatmul.mubr.f32.gmra.mrb[8].mxu1 %v295_v50 }
 0x238   :  { %439 = vmatprep.mubr.f32.mxu1 %v16237_v63 }
 0x23b   :  { %440 = vmatmul.mubr.f32.gmra.mrb[10].mxu1 %v296_v3 }
 0x23c   :  { %12930 = vmatprep.mubr.msk.f32.mxu1 %vm16239_vm3, %v16237_v63 }
 0x2fa   :  { %v411_v7 = vpop.f32.mrb[0].mxu1 }
 0x2fb   :  { %v413_v52 = vpop.f32.mrb[1].mxu1 }
 0x2fe   :  { %v417_v54 = vpop.f32.mrb[2].mxu1  ;;  %v12902_v55 = vpop.f32.mrb[4].mxu0 }
 0x2ff   :  { %v419_v57 = vpop.f32.mrb[3].mxu1  ;;  %v512_v58 = vpop.f32.mrb[5].mxu0 }
 0x300   :  { %v14485_v59 = vpack.c.bf16 %v419_v57, %v413_v52  ;;  %v14489_v61 = vpack.c.bf16 %v12902_v55, %v512_v58  ;;  %v15243_v62 = vpack.i.bf16 %v419_v57, %v413_v52  ;;  %v16441_v1 = vpack.i.bf16 %v12902_v55, %v512_v58 }
 0x302   :  { %14490 = vmatpush3.bf16.msra.mxu1 %v14489_v61  ;;  %15244 = vrot.lane.b32.xlu1 %v15243_v62, %s16240_s30  ;;  %v423_v2 = vpop.f32.mrb[4].mxu1  ;;  %v16444_v5 = vpop.f32.mrb[6].mxu0 }
 0x303   :  { %15239 = vrot.lane.b32.xlu0 %v15243_v62, %s16241_s16  ;;  %14487 = vmatpush3.bf16.xpose.msk.msra.mxu0 %vm16437_vm5, %v14485_v59  ;;  %v425_v6 = vpop.f32.mrb[5].mxu1  ;;  %v16449_v8 = vpop.f32.mrb[7].mxu0 }
 0x304   :  { %12928 = vmatprep.subr.mxu1 %v16237_v63  ;;  %12913 = vmatprep.subr.mxu0 %v16237_v63 }
 0x306   :  { %12929 = vmatpush3.msra.mxu1 %v16449_v8  ;;  %779 = vrot.lane.b32.xlu1 %v425_v6, %s16241_s16  ;;  %v16455_v9 = vpop.f32.mrb[6].mxu1  ;;  %v16457_v10 = vpop.f32.mrb[8].mxu0 }
 0x307   :  { %771 = vrot.lane.b32.xlu0 %v417_v54, %s16241_s16  ;;  %v16460_v11 = vpop.f32.mrb[7].mxu1  ;;  %v16462_v12 = vpop.f32.mrb[9].mxu0  ;;  %14495 = vmatprep.subr.bf16.mxu1 %v16238_v4 }
 0x308   :  { %v14517_v13 = vpack.c.bf16 %v16462_v12, %v16444_v5  ;;  %v16469_v14 = vpack.i.bf16 %v16462_v12, %v16444_v5 }
 0x30a   :  { %769 = vrot.lane.b32.xlu1 %v411_v7, %s16241_s16  ;;  %v16472_v15 = vpop.f32.mrb[8].mxu1 }
 0x30b   :  { %1023 = vrot.lane.b32.xlu0 %v425_v6, %s16240_s30  ;;  %12914 = vmatpush3.xpose.msk.msra.mxu0 %vm541_vm4, %v425_v6  ;;  %v16476_v17 = vpop.f32.mrb[9].mxu1 }
 0x30c   :  { %v14513_v20 = vpack.c.bf16 %v16476_v17, %v16460_v11  ;;  %v15253_v21 = vpack.i.bf16 %v16476_v17, %v16460_v11  ;;  %14491 = vmatprep.subr.bf16.mxu0 %v16238_v4 }
 0x30e   :  { %12916 = vmatmul.mubr.msk.f32.vlgmr.msra.gmra.mrb[10].mxu0 %vm541_vm4, %v411_v7  ;;  %773 = vrot.lane.b32.xlu1 %v423_v2, %s16241_s16  ;;  %v16485_v25 = vpop.f32.mrb[10].mxu1 }
 0x30f   :  { %1013 = vrot.lane.b32.xlu0 %v411_v7, %s16240_s30  ;;  %v16488_v26 = vpop.f32.mrb[11].mxu1  ;;  %12918 = vmatprep.mubr.msk.f32.mxu0 %vm16239_vm3, %v16237_v63 }
 0x312   :  { %12919 = vmatmul.mubr.msk.f32.gmra.mrb[12].mxu0 %vm541_vm4, %v417_v54  ;;  %15249 = vrot.lane.b32.xlu1 %v15243_v62, %s16242_s17 }
 0x313   :  { %1017 = vrot.lane.b32.xlu0 %v423_v2, %s16240_s30  ;;  %12921 = vmatprep.mubr.msk.f32.mxu0 %vm16239_vm3, %v16237_v63 }
 0x316   :  { %12922 = vmatmul.mubr.msk.f32.gmra.mrb[14].mxu0 %vm541_vm4, %v423_v2  ;;  %1015 = vrot.lane.b32.xlu1 %v417_v54, %s16240_s30 }
 0x317   :  { %1254 = vrot.lane.b32.xlu0 %v411_v7, %s16242_s17  ;;  %12945 = vmatprep.mubr.msk.f32.mxu0 %vm16239_vm3, %v16237_v63 }
 0x31a   :  { %1264 = vrot.lane.b32.xlu1 %v425_v6, %s16242_s17 }
 0x31b   :  { %1258 = vrot.lane.b32.xlu0 %v423_v2, %s16242_s17 }
 0x31e   :  { %1256 = vrot.lane.b32.xlu1 %v417_v54, %s16242_s17 }
 0x31f   :  { %1778 = vrot.lane.b32.xlu0 %v16488_v26, %s16241_s16 }
 0x322   :  { %15254 = vrot.lane.b32.xlu1 %v15253_v21, %s16241_s16 }
 0x323   :  { %1768 = vrot.lane.b32.xlu0 %v16455_v9, %s16241_s16 }
 0x326   :  { %15259 = vrot.lane.b32.xlu1 %v15253_v21, %s16240_s30 }
 0x327   :  { %1772 = vrot.lane.b32.xlu0 %v16485_v25, %s16241_s16 }
 0x32a   :  { %1770 = vrot.lane.b32.xlu1 %v16472_v15, %s16241_s16 }
 0x32b   :  { %15264 = vrot.lane.b32.xlu0 %v15253_v21, %s16242_s17 }
 0x32e   :  { %2022 = vrot.lane.b32.xlu1 %v16488_v26, %s16240_s30 }
 0x32f   :  { %2014 = vrot.lane.b32.xlu0 %v16472_v15, %s16240_s30 }
 0x332   :  { %2012 = vrot.lane.b32.xlu1 %v16455_v9, %s16240_s30 }
 0x333   :  { %2263 = vrot.lane.b32.xlu0 %v16488_v26, %s16242_s17 }
 0x336   :  { %2016 = vrot.lane.b32.xlu1 %v16485_v25, %s16240_s30 }
 0x337   :  { %2255 = vrot.lane.b32.xlu0 %v16472_v15, %s16242_s17 }
 0x33a   :  { %2253 = vrot.lane.b32.xlu1 %v16455_v9, %s16242_s17 }
 0x33b   :  { %919 = vrot.lane.b32.xlu0 %v16449_v8, %s16241_s16 }
 0x33e   :  { %2257 = vrot.lane.b32.xlu1 %v16485_v25, %s16242_s17 }
 0x33f   :  { %15274 = vrot.lane.b32.xlu0 %v16441_v1, %s16240_s30 }
 0x342   :  { %15269 = vrot.lane.b32.xlu1 %v16441_v1, %s16241_s16 }
 0x346   :  { %1160 = vrot.lane.b32.xlu1 %v16449_v8, %s16240_s30 }
 0x374   :  { %v15245_v27 = vpop.permute.xlu1 %15244 }
 0x375   :  { %v15240_v28 = vpop.permute.xlu0 %15239  ;;  %v15247_v34 = vunpack.i.h.bf16 %v15245_v27  ;;  %v15246_v35 = vunpack.i.l.bf16 %v15245_v27  ;;  %v201_v27 = vlaneseq }
 0x376   :  { %v15242_v29 = vunpack.i.h.bf16 %v15240_v28  ;;  %v15241_v30 = vunpack.i.l.bf16 %v15240_v28 }
 0x377   :  { %v14499_v38 = vpack.c.bf16 %v15247_v34, %v15246_v35  ;;  %v16642_v28 = vand.u32 127, %v201_v27 }
 0x378   :  { %v14492_v31 = vpack.c.bf16 %v15242_v29, %v15241_v30  ;;  %v780_v32 = vpop.permute.xlu1 %779 }
 0x379   :  { %v772_v36 = vpop.permute.xlu0 %771  ;;  %vm203_vm6 = vcmp.lt.s32.totalorder %v16642_v28, 17 }
 0x37a   :  { %14494 = vmatpush3.bf16.xpose.msk.msra.mxu0 %vm16437_vm5, %v14492_v31 }
 0x37b   :  { %12943 = vmatprep.subr.mxu0 %v16237_v63 }
 0x37c   :  { %v770_v33 = vpop.permute.xlu1 %769 }
 0x37d   :  { %v1024_v39 = vpop.permute.xlu0 %1023 }
 0x380   :  { %v774_v37 = vpop.permute.xlu1 %773 }
 0x381   :  { %v1014_v42 = vpop.permute.xlu0 %1013 }
 0x382   :  { %12944 = vmatpush3.xpose.msk.msra.mxu0 %vm541_vm4, %v780_v32 }
 0x383   :  { %14498 = vmatprep.subr.bf16.mxu0 %v16238_v4 }
 0x384   :  { %v15250_v40 = vpop.permute.xlu1 %15249 }
 0x385   :  { %12946 = vmatmul.mubr.msk.f32.vlgmr.msra.gmra.mrb[16].mxu0 %vm541_vm4, %v770_v33  ;;  %v15252_v41 = vunpack.i.h.bf16 %v15250_v40  ;;  %v15251_v53 = vunpack.i.l.bf16 %v15250_v40  ;;  %v1018_v45 = vpop.permute.xlu0 %1017 }
 0x386   :  { %14501 = vmatpush3.bf16.xpose.msk.msra.mxu0 %vm16437_vm5, %v14499_v38  ;;  %12948 = vmatprep.mubr.msk.f32.mxu0 %vm16239_vm3, %v16237_v63 }
 0x387   :  { %12973 = vmatprep.subr.mxu0 %v16237_v63  ;;  %v14506_v44 = vpack.c.bf16 %v15252_v41, %v15251_v53 }
 0x388   :  { %v1016_v43 = vpop.permute.xlu1 %1015 }
 0x389   :  { %12949 = vmatmul.mubr.msk.f32.gmra.mrb[18].mxu0 %vm541_vm4, %v772_v36  ;;  %v1255_v47 = vpop.permute.xlu0 %1254 }
 0x38a   :  { %12951 = vmatprep.mubr.msk.f32.mxu0 %vm16239_vm3, %v16237_v63 }
 0x38c   :  { %v1265_v46 = vpop.permute.xlu1 %1264 }
 0x38d   :  { %12952 = vmatmul.mubr.msk.f32.gmra.mrb[20].mxu0 %vm541_vm4, %v774_v37  ;;  %v1259_v56 = vpop.permute.xlu0 %1258 }
 0x38e   :  { %12974 = vmatpush3.xpose.msk.msra.mxu0 %vm541_vm4, %v1024_v39  ;;  %12975 = vmatprep.mubr.msk.f32.mxu0 %vm16239_vm3, %v16237_v63 }
 0x38f   :  { %14505 = vmatprep.subr.bf16.mxu0 %v16238_v4 }
 0x390   :  { %v1257_v60 = vpop.permute.xlu1 %1256 }
 0x391   :  { %12976 = vmatmul.mubr.msk.f32.vlgmr.msra.gmra.mrb[22].mxu0 %vm541_vm4, %v1014_v42  ;;  %v1779_v51 = vpop.permute.xlu0 %1778 }
 0x392   :  { %14508 = vmatpush3.bf16.xpose.msk.msra.mxu0 %vm16437_vm5, %v14506_v44  ;;  %12978 = vmatprep.mubr.msk.f32.mxu0 %vm16239_vm3, %v16237_v63 }
 0x393   :  { %13003 = vmatprep.subr.mxu0 %v16237_v63 }
 0x394   :  { %v15255_v48 = vpop.permute.xlu1 %15254 }
 0x395   :  { %12979 = vmatmul.mubr.msk.f32.gmra.mrb[24].mxu0 %vm541_vm4, %v1016_v43  ;;  %v15257_v49 = vunpack.i.h.bf16 %v15255_v48  ;;  %v15256_v50 = vunpack.i.l.bf16 %v15255_v48  ;;  %v1769_v7 = vpop.permute.xlu0 %1768 }
 0x396   :  { %12981 = vmatprep.mubr.msk.f32.mxu0 %vm16239_vm3, %v16237_v63 }
 0x397   :  { %v14520_v3 = vpack.c.bf16 %v15257_v49, %v15256_v50 }
 0x398   :  { %v15260_v52 = vpop.permute.xlu1 %15259 }
 0x399   :  { %12982 = vmatmul.mubr.msk.f32.gmra.mrb[26].mxu0 %vm541_vm4, %v1018_v45  ;;  %v15262_v54 = vunpack.i.h.bf16 %v15260_v52  ;;  %v15261_v55 = vunpack.i.l.bf16 %v15260_v52  ;;  %v1773_v57 = vpop.permute.xlu0 %1772 }
 0x39a   :  { %13004 = vmatpush3.xpose.msk.msra.mxu0 %vm541_vm4, %v1265_v46  ;;  %13005 = vmatprep.mubr.msk.f32.mxu0 %vm16239_vm3, %v16237_v63 }
 0x39b   :  { %14512 = vmatprep.subr.bf16.mxu0 %v16238_v4  ;;  %v14527_v58 = vpack.c.bf16 %v15262_v54, %v15261_v55 }
 0x39c   :  { %v1771_v59 = vpop.permute.xlu1 %1770 }
 0x39d   :  { %13006 = vmatmul.mubr.msk.f32.vlgmr.msra.gmra.mrb[28].mxu0 %vm541_vm4, %v1255_v47  ;;  %v15265_v61 = vpop.permute.xlu0 %15264 }
 0x39e   :  { %14515 = vmatpush3.bf16.xpose.msk.msra.mxu0 %vm16437_vm5, %v14513_v20  ;;  %13008 = vmatprep.mubr.msk.f32.mxu0 %vm16239_vm3, %v16237_v63  ;;  %v15267_v2 = vunpack.i.h.bf16 %v15265_v61  ;;  %v15266_v6 = vunpack.i.l.bf16 %v15265_v61 }
 0x39f   :  { %13033 = vmatprep.subr.mxu0 %v16237_v63 }
 0x3a0   :  { %v2023_v62 = vpop.permute.xlu1 %2022 }
 0x3a1   :  { %13009 = vmatmul.mubr.msk.f32.gmra.mrb[30].mxu0 %vm541_vm4, %v1257_v60 }
 0x3a2   :  { %13011 = vmatprep.mubr.msk.f32.mxu0 %vm16239_vm3, %v16237_v63 }
 0x3a4   :  { %v2013_v11 = vpop.permute.xlu1 %2012 }
 0x3a5   :  { %13012 = vmatmul.mubr.msk.f32.gmra.mrb[32].mxu0 %vm541_vm4, %v1259_v56 }
 0x3a6   :  { %13034 = vmatpush3.xpose.msk.msra.mxu0 %vm541_vm4, %v16488_v26  ;;  %13035 = vmatprep.mubr.msk.f32.mxu0 %vm16239_vm3, %v16237_v63 }
 0x3a7   :  { %14519 = vmatprep.subr.bf16.mxu0 %v16238_v4 }
 0x3a8   :  { %v2017_v17 = vpop.permute.xlu1 %2016 }
 0x3a9   :  { %13036 = vmatmul.mubr.msk.f32.vlgmr.msra.gmra.mrb[34].mxu0 %vm541_vm4, %v16455_v9  ;;  %v14534_v9 = vpack.c.bf16 %v15267_v2, %v15266_v6 }
 0x3aa   :  { %14522 = vmatpush3.bf16.xpose.msk.msra.mxu0 %vm16437_vm5, %v14520_v3  ;;  %13038 = vmatprep.mubr.msk.f32.mxu0 %vm16239_vm3, %v16237_v63 }
 0x3ab   :  { %13063 = vmatprep.subr.mxu0 %v16237_v63 }
 0x3ac   :  { %v2254_v21 = vpop.permute.xlu1 %2253 }
 0x3ad   :  { %13039 = vmatmul.mubr.msk.f32.gmra.mrb[36].mxu0 %vm541_vm4, %v16472_v15  ;;  %v2015_v15 = vpop.permute.xlu0 %2014 }
 0x3ae   :  { %13041 = vmatprep.mubr.msk.f32.mxu0 %vm16239_vm3, %v16237_v63 }
 0x3b0   :  { %v2258_v26 = vpop.permute.xlu1 %2257 }
 0x3b1   :  { %13042 = vmatmul.mubr.msk.f32.gmra.mrb[38].mxu0 %vm541_vm4, %v16485_v25  ;;  %v2264_v20 = vpop.permute.xlu0 %2263 }
 0x3b2   :  { %13064 = vmatpush3.xpose.msk.msra.mxu0 %vm541_vm4, %v1779_v51  ;;  %13065 = vmatprep.mubr.msk.f32.mxu0 %vm16239_vm3, %v16237_v63 }
 0x3b3   :  { %14526 = vmatprep.subr.bf16.mxu0 %v16238_v4 }
 0x3b5   :  { %13066 = vmatmul.mubr.msk.f32.vlgmr.msra.gmra.mrb[40].mxu0 %vm541_vm4, %v1769_v7  ;;  %v2256_v25 = vpop.permute.xlu0 %2255 }
 0x3b6   :  { %14529 = vmatpush3.bf16.xpose.msk.msra.mxu0 %vm16437_vm5, %v14527_v58  ;;  %13068 = vmatprep.mubr.msk.f32.mxu0 %vm16239_vm3, %v16237_v63 }
 0x3b7   :  { %13093 = vmatprep.subr.mxu0 %v16237_v63 }
 0x3b9   :  { %13069 = vmatmul.mubr.msk.f32.gmra.mrb[42].mxu0 %vm541_vm4, %v1771_v59 }
 0x3ba   :  { %13071 = vmatprep.mubr.msk.f32.mxu0 %vm16239_vm3, %v16237_v63 }
 0x3bd   :  { %13072 = vmatmul.mubr.msk.f32.gmra.mrb[44].mxu0 %vm541_vm4, %v1773_v57 }
 0x3be   :  { %13094 = vmatpush3.xpose.msk.msra.mxu0 %vm541_vm4, %v2023_v62  ;;  %13095 = vmatprep.mubr.msk.f32.mxu0 %vm16239_vm3, %v16237_v63  ;;  %v16689_v62 = vpop.permute.xlu0 %919 }
 0x3bf   :  { %14533 = vmatprep.subr.bf16.mxu0 %v16238_v4 }
 0x3c1   :  { %13096 = vmatmul.mubr.msk.f32.vlgmr.msra.gmra.mrb[46].mxu0 %vm541_vm4, %v2013_v11 }
 0x3c2   :  { %14536 = vmatpush3.bf16.xpose.msk.msra.mxu0 %vm16437_vm5, %v14534_v9  ;;  %13098 = vmatprep.mubr.msk.f32.mxu0 %vm16239_vm3, %v16237_v63 }
 0x3c3   :  { %13123 = vmatprep.subr.mxu0 %v16237_v63 }
 0x3c5   :  { %13099 = vmatmul.mubr.msk.f32.gmra.mrb[48].mxu0 %vm541_vm4, %v2015_v15 }
 0x3c6   :  { %13101 = vmatprep.mubr.msk.f32.mxu0 %vm16239_vm3, %v16237_v63 }
 0x3c9   :  { %13102 = vmatmul.mubr.msk.f32.gmra.mrb[50].mxu0 %vm541_vm4, %v2017_v17  ;;  %v16697_v17 = vpop.permute.xlu1 %15269 }
 0x3ca   :  { %13124 = vmatpush3.xpose.msk.msra.mxu0 %vm541_vm4, %v2264_v20  ;;  %13125 = vmatprep.mubr.msk.f32.mxu0 %vm16239_vm3, %v16237_v63 }
 0x3cd   :  { %13126 = vmatmul.mubr.msk.f32.vlgmr.msra.gmra.mrb[52].mxu0 %vm541_vm4, %v2254_v21 }
 0x3ce   :  { %13128 = vmatprep.mubr.msk.f32.mxu0 %vm16239_vm3, %v16237_v63 }
 0x3d1   :  { %13129 = vmatmul.mubr.msk.f32.gmra.mrb[54].mxu0 %vm541_vm4, %v2256_v25  ;;  %v16699_v25 = vpop.permute.xlu0 %15274 }
 0x3d2   :  { %13131 = vmatprep.mubr.msk.f32.mxu0 %vm16239_vm3, %v16237_v63 }
 0x3d5   :  { %13132 = vmatmul.mubr.msk.f32.gmra.mrb[56].mxu0 %vm541_vm4, %v2258_v26 }
 0x3e1   :  { %v626_v29 = vpop.f32.mrb[10].mxu0 }
 0x3e2   :  { %v640_v30 = vmul.f32 0.088388346, %v626_v29  ;;  %v12917_v31 = vpop.f32.mrb[11].mxu0 }
 0x3e4   :  { %v16647_v32 = vsel %vm203_vm6, %v640_v30, -1e+30 }
 0x3e5   :  { %v631_v33 = vpop.f32.mrb[12].mxu0  ;;  %v647_v34 = vsel %vm646_vm7, %v16647_v32, -inf }
 0x3e6   :  { %v641_v35 = vmul.f32 0.088388346, %v631_v33  ;;  %v12920_v36 = vpop.f32.mrb[13].mxu0  ;;  %648 = vmax.xlane.f32.xlu0 %v647_v34  ;;  %v16707_v33 = vpop.permute.xlu1 %1160 }
 0x3e8   :  { %v16653_v37 = vsel %vm203_vm6, %v641_v35, -1e+30 }
 0x3e9   :  { %v636_v38 = vpop.f32.mrb[14].mxu0  ;;  %v650_v39 = vsel %vm646_vm7, %v16653_v37, -inf }
 0x3ea   :  { %v642_v40 = vmul.f32 0.088388346, %v636_v38  ;;  %v12923_v41 = vpop.f32.mrb[15].mxu0  ;;  %651 = vmax.xlane.f32.xlu1 %v650_v39 }
 0x3ec   :  { %v16659_v53 = vsel %vm203_vm6, %v642_v40, -1e+30 }
 0x3ed   :  { %v653_v42 = vsel %vm646_vm7, %v16659_v53, -inf }
 0x3ee   :  { %654 = vmax.xlane.f32.xlu0 %v653_v42 }
 0x3fb   :  { %15279 = vrot.lane.b32.xlu1 %v16441_v1, %s16242_s17 }
 0x458   :  { %v859_v43 = vpop.f32.mrb[16].mxu0 }
 0x459   :  { %v873_v44 = vmul.f32 0.088388346, %v859_v43  ;;  %v12947_v45 = vpop.f32.mrb[17].mxu0 }
 0x45b   :  { %v16667_v46 = vsel %vm203_vm6, %v873_v44, -1e+30 }
 0x45c   :  { %v864_v47 = vpop.f32.mrb[18].mxu0  ;;  %v879_v60 = vsel %vm646_vm7, %v16667_v46, -inf }
 0x45d   :  { %v874_v56 = vmul.f32 0.088388346, %v864_v47  ;;  %880 = vmax.xlane.f32.xlu0 %v879_v60  ;;  %v12950_v48 = vpop.f32.mrb[19].mxu0 }
 0x45f   :  { %v16673_v49 = vsel %vm203_vm6, %v874_v56, -1e+30 }
 0x460   :  { %v869_v50 = vpop.f32.mrb[20].mxu0  ;;  %v882_v1 = vsel %vm646_vm7, %v16673_v49, -inf }
 0x461   :  { %v875_v51 = vmul.f32 0.088388346, %v869_v50  ;;  %883 = vmax.xlane.f32.xlu0 %v882_v1  ;;  %v12953_v3 = vpop.f32.mrb[21].mxu0 }
 0x463   :  { %v16679_v7 = vsel %vm203_vm6, %v875_v51, -1e+30 }
 0x464   :  { %v1103_v52 = vpop.f32.mrb[22].mxu0  ;;  %v885_v54 = vsel %vm646_vm7, %v16679_v7, -inf }
 0x465   :  { %v1117_v55 = vmul.f32 0.088388346, %v1103_v52  ;;  %886 = vmax.xlane.f32.xlu1 %v885_v54  ;;  %v12977_v57 = vpop.f32.mrb[23].mxu0 }
 0x467   :  { %v16685_v58 = vsel %vm203_vm6, %v1117_v55, -1e+30 }
 0x468   :  { %v1108_v59 = vpop.f32.mrb[24].mxu0  ;;  %v1123_v61 = vsel %vm646_vm7, %v16685_v58, -inf }
 0x469   :  { %v1118_v2 = vmul.f32 0.088388346, %v1108_v59  ;;  %1124 = vmax.xlane.f32.xlu0 %v1123_v61  ;;  %v12980_v6 = vpop.f32.mrb[25].mxu0 }
 0x46b   :  { %v16693_v9 = vsel %vm203_vm6, %v1118_v2, -1e+30 }
 0x46c   :  { %v1113_v11 = vpop.f32.mrb[26].mxu0  ;;  %v1126_v15 = vsel %vm646_vm7, %v16693_v9, -inf }
 0x46d   :  { %v1119_v20 = vmul.f32 0.088388346, %v1113_v11  ;;  %1127 = vmax.xlane.f32.xlu1 %v1126_v15  ;;  %v12983_v21 = vpop.f32.mrb[27].mxu0 }
 0x46f   :  { %v16703_v26 = vsel %vm203_vm6, %v1119_v20, -1e+30 }
 0x470   :  { %v1344_v27 = vpop.f32.mrb[28].mxu0  ;;  %v1129_v29 = vsel %vm646_vm7, %v16703_v26, -inf }
 0x471   :  { %v1358_v30 = vmul.f32 0.088388346, %v1344_v27  ;;  %1130 = vmax.xlane.f32.xlu0 %v1129_v29  ;;  %v13007_v31 = vpop.f32.mrb[29].mxu0 }
 0x473   :  { %v649_v34 = vpop.xlane.xlu0 %648  ;;  %v16711_v35 = vsel %vm203_vm6, %v1358_v30, -1e+30 }
 0x474   :  { %v656_v36 = vsub.f32 %v16647_v32, %v649_v34  ;;  %v1349_v38 = vpop.f32.mrb[30].mxu0  ;;  %v1364_v39 = vsel %vm646_vm7, %v16711_v35, -inf }
 0x475   :  { %v1359_v40 = vmul.f32 0.088388346, %v1349_v38  ;;  %1365 = vmax.xlane.f32.xlu1 %v1364_v39  ;;  %v13010_v41 = vpop.f32.mrb[31].mxu0 }
 0x476   :  { %v659_v42 = vmul.f32 1.442695, %v656_v36 }
 0x477   :  { %v652_v43 = vpop.xlane.xlu1 %651  ;;  %v16718_v44 = vsel %vm203_vm6, %v1359_v40, -1e+30 }
 0x478   :  { %15670 = vpow2.f32 %v659_v42  ;;  %v657_v45 = vsub.f32 %v16653_v37, %v652_v43  ;;  %v1354_v47 = vpop.f32.mrb[32].mxu0  ;;  %v1367_v32 = vsel %vm646_vm7, %v16718_v44, -inf }
 0x479   :  { %v1360_v60 = vmul.f32 0.088388346, %v1354_v47  ;;  %1368 = vmax.xlane.f32.xlu0 %v1367_v32  ;;  %v13013_v56 = vpop.f32.mrb[33].mxu0 }
 0x47a   :  { %v661_v48 = vmul.f32 1.442695, %v657_v45 }
 0x47b   :  { %v655_v50 = vpop.xlane.xlu0 %654  ;;  %v16725_v1 = vsel %vm203_vm6, %v1360_v60, -1e+30 }
 0x47c   :  { %15672 = vpow2.f32 %v661_v48  ;;  %v658_v51 = vsub.f32 %v16659_v53, %v655_v50  ;;  %v1626_v3 = vpop.f32.mrb[34].mxu0  ;;  %v1370_v37 = vsel %vm646_vm7, %v16725_v1, -inf }
 0x47d   :  { %v1640_v52 = vmul.f32 0.088388346, %v1626_v3  ;;  %v13037_v54 = vpop.f32.mrb[35].mxu0  ;;  %1371 = vmax.xlane.f32.xlu1 %v1370_v37 }
 0x47e   :  { %v663_v55 = vmul.f32 1.442695, %v658_v51 }
 0x47f   :  { %v16732_v57 = vsel %vm203_vm6, %v1640_v52, -1e+30 }
 0x480   :  { %15674 = vpow2.f32 %v663_v55  ;;  %v1631_v59 = vpop.f32.mrb[36].mxu0  ;;  %v1646_v61 = vsel %vm646_vm7, %v16732_v57, -inf }
 0x481   :  { %v1641_v2 = vmul.f32 0.088388346, %v1631_v59  ;;  %1647 = vmax.xlane.f32.xlu0 %v1646_v61  ;;  %v13040_v53 = vpop.f32.mrb[37].mxu0 }
 0x482   :  { %v16736_v6 = vpop.eup %15670 }
 0x483   :  { %v665_v11 = vsel %vm646_vm7, %v16736_v6, 0.0  ;;  %v16742_v15 = vsel %vm203_vm6, %v1641_v2, -1e+30 }
 0x484   :  { %v1636_v20 = vpop.f32.mrb[38].mxu0  ;;  %v1649_v21 = vsel %vm646_vm7, %v16742_v15, -inf }
 0x485   :  { %v1642_v27 = vmul.f32 0.088388346, %v1636_v20  ;;  %666 = vadd.xlane.f32.xlu0 %v665_v11  ;;  %1650 = vmax.xlane.f32.xlu1 %v1649_v21  ;;  %v13043_v29 = vpop.f32.mrb[39].mxu0 }
 0x486   :  { %v16746_v30 = vpop.eup %15672 }
 0x487   :  { %v668_v31 = vsel %vm646_vm7, %v16746_v30, 0.0  ;;  %v16752_v34 = vsel %vm203_vm6, %v1642_v27, -1e+30 }
 0x488   :  { %v1858_v36 = vpop.f32.mrb[40].mxu0  ;;  %v1652_v38 = vsel %vm646_vm7, %v16752_v34, -inf }
 0x489   :  { %v1872_v39 = vmul.f32 0.088388346, %v1858_v36  ;;  %669 = vadd.xlane.f32.xlu1 %v668_v31  ;;  %1653 = vmax.xlane.f32.xlu0 %v1652_v38  ;;  %v13067_v40 = vpop.f32.mrb[41].mxu0 }
 0x48a   :  { %v16756_v41 = vpop.eup %15674 }
 0x48b   :  { %v671_v42 = vsel %vm646_vm7, %v16756_v41, 0.0  ;;  %v16762_v43 = vsel %vm203_vm6, %v1872_v39, -1e+30 }
 0x48c   :  { %v1863_v45 = vpop.f32.mrb[42].mxu0  ;;  %v1878_v47 = vsel %vm646_vm7, %v16762_v43, -inf }
 0x48d   :  { %v1873_v32 = vmul.f32 0.088388346, %v1863_v45  ;;  %672 = vadd.xlane.f32.xlu0 %v671_v42  ;;  %1879 = vmax.xlane.f32.xlu1 %v1878_v47  ;;  %v13070_v60 = vpop.f32.mrb[43].mxu0 }
 0x48f   :  { %v16768_v56 = vsel %vm203_vm6, %v1873_v32, -1e+30 }
 0x490   :  { %v1868_v48 = vpop.f32.mrb[44].mxu0  ;;  %v1881_v50 = vsel %vm646_vm7, %v16768_v56, -inf }
 0x491   :  { %v1874_v51 = vmul.f32 0.088388346, %v1868_v48  ;;  %1882 = vmax.xlane.f32.xlu0 %v1881_v50  ;;  %v13073_v3 = vpop.f32.mrb[45].mxu0 }
 0x493   :  { %v16774_v52 = vsel %vm203_vm6, %v1874_v51, -1e+30 }
 0x494   :  { %v2102_v37 = vpop.f32.mrb[46].mxu0  ;;  %v1884_v54 = vsel %vm646_vm7, %v16774_v52, -inf }
 0x495   :  { %v2116_v55 = vmul.f32 0.088388346, %v2102_v37  ;;  %1885 = vmax.xlane.f32.xlu1 %v1884_v54  ;;  %v13097_v59 = vpop.f32.mrb[47].mxu0 }
 0x497   :  { %v16780_v61 = vsel %vm203_vm6, %v2116_v55, -1e+30 }
 0x498   :  { %v2107_v2 = vpop.f32.mrb[48].mxu0  ;;  %v2122_v53 = vsel %vm646_vm7, %v16780_v61, -inf }
 0x499   :  { %v2117_v11 = vmul.f32 0.088388346, %v2107_v2  ;;  %2123 = vmax.xlane.f32.xlu0 %v2122_v53  ;;  %v13100_v20 = vpop.f32.mrb[49].mxu0 }
 0x49b   :  { %v16786_v21 = vsel %vm203_vm6, %v2117_v11, -1e+30 }
 0x49c   :  { %v2112_v27 = vpop.f32.mrb[50].mxu0  ;;  %v2125_v29 = vsel %vm646_vm7, %v16786_v21, -inf }
 0x49d   :  { %v2118_v31 = vmul.f32 0.088388346, %v2112_v27  ;;  %2126 = vmax.xlane.f32.xlu1 %v2125_v29  ;;  %v13103_v36 = vpop.f32.mrb[51].mxu0  ;;  %v16815_v27 = vpop.permute.xlu1 %15279 }
 0x49f   :  { %v16792_v38 = vsel %vm203_vm6, %v2118_v31, -1e+30 }
 0x4a0   :  { %v2343_v39 = vpop.f32.mrb[52].mxu0  ;;  %v2128_v40 = vsel %vm646_vm7, %v16792_v38, -inf }
 0x4a1   :  { %v2357_v42 = vmul.f32 0.088388346, %v2343_v39  ;;  %2129 = vmax.xlane.f32.xlu0 %v2128_v40  ;;  %v13127_v45 = vpop.f32.mrb[53].mxu0 }
 0x4a3   :  { %v16798_v47 = vsel %vm203_vm6, %v2357_v42, -1e+30 }
 0x4a4   :  { %v2348_v32 = vpop.f32.mrb[54].mxu0  ;;  %v2363_v60 = vsel %vm646_vm7, %v16798_v47, -inf }
 0x4a5   :  { %v2358_v48 = vmul.f32 0.088388346, %v2348_v32  ;;  %2364 = vmax.xlane.f32.xlu1 %v2363_v60  ;;  %v13130_v50 = vpop.f32.mrb[55].mxu0 }
 0x4a7   :  { %v16804_v51 = vsel %vm203_vm6, %v2358_v48, -1e+30 }
 0x4a8   :  { %v2353_v3 = vpop.f32.mrb[56].mxu0  ;;  %v2366_v37 = vsel %vm646_vm7, %v16804_v51, -inf }
 0x4a9   :  { %v2359_v54 = vmul.f32 0.088388346, %v2353_v3  ;;  %2367 = vmax.xlane.f32.xlu0 %v2366_v37  ;;  %v13133_v55 = vpop.f32.mrb[57].mxu0 }
 0x4ab   :  { %v16810_v59 = vsel %vm203_vm6, %v2359_v54, -1e+30 }
 0x4ac   :  { %v2369_v2 = vsel %vm646_vm7, %v16810_v59, -inf }
 0x4ad   :  { %2370 = vmax.xlane.f32.xlu0 %v2369_v2 }
 0x4ea   :  { %v881_v53 = vpop.xlane.xlu0 %880 }
 0x4eb   :  { %v888_v11 = vsub.f32 %v16667_v46, %v881_v53 }
 0x4ed   :  { %v891_v20 = vmul.f32 1.442695, %v888_v11 }
 0x4ee   :  { %v884_v29 = vpop.xlane.xlu0 %883 }
 0x4ef   :  { %15676 = vpow2.f32 %v891_v20  ;;  %v889_v31 = vsub.f32 %v16673_v49, %v884_v29 }
 0x4f1   :  { %v893_v36 = vmul.f32 1.442695, %v889_v31 }
 0x4f2   :  { %v887_v39 = vpop.xlane.xlu1 %886 }
 0x4f3   :  { %15678 = vpow2.f32 %v893_v36  ;;  %v890_v40 = vsub.f32 %v16679_v7, %v887_v39 }
 0x4f5   :  { %v895_v42 = vmul.f32 1.442695, %v890_v40 }
 0x4f6   :  { %v1125_v3 = vpop.xlane.xlu0 %1124 }
 0x4f7   :  { %15680 = vpow2.f32 %v895_v42  ;;  %v15272_v42 = vunpack.i.h.bf16 %v16697_v17 }
 0x4f9   :  { %v16819_v45 = vpop.eup %15676 }
 0x4fa   :  { %v1128_v32 = vpop.xlane.xlu1 %1127  ;;  %v897_v46 = vsel %vm646_vm7, %v16819_v45, 0.0 }
 0x4fb   :  { %v1133_v60 = vsub.f32 %v16693_v9, %v1128_v32  ;;  %898 = vadd.xlane.f32.xlu1 %v897_v46  ;;  %v15271_v32 = vunpack.i.l.bf16 %v16697_v17 }
 0x4fd   :  { %v16824_v48 = vpop.eup %15678  ;;  %v1137_v50 = vmul.f32 1.442695, %v1133_v60  ;;  %v1132_v60 = vsub.f32 %v16685_v58, %v1125_v3 }
 0x4fe   :  { %v900_v49 = vsel %vm646_vm7, %v16824_v48, 0.0  ;;  %v1131_v54 = vpop.xlane.xlu0 %1130 }
 0x4ff   :  { %15682 = vpow2.f32 %v1137_v50  ;;  %901 = vadd.xlane.f32.xlu0 %v900_v49  ;;  %v14496_v49 = vpack.c.bf16 %v15272_v42, %v15271_v32 }
 0x501   :  { %v16828_v7 = vpop.eup %15680 }
 0x502   :  { %v903_v37 = vsel %vm646_vm7, %v16828_v7, 0.0  ;;  %v1366_v9 = vpop.xlane.xlu1 %1365 }
 0x503   :  { %904 = vadd.xlane.f32.xlu1 %v903_v37  ;;  %v1135_v37 = vmul.f32 1.442695, %v1132_v60  ;;  %v1373_v3 = vsub.f32 %v16711_v35, %v1366_v9 }
 0x506   :  { %v1369_v2 = vpop.xlane.xlu0 %1368 }
 0x509   :  { %v16832_v55 = vpop.eup %15682 }
 0x50a   :  { %v1144_v53 = vsel %vm646_vm7, %v16832_v55, 0.0  ;;  %v1372_v11 = vpop.xlane.xlu1 %1371 }
 0x50b   :  { %1145 = vadd.xlane.f32.xlu1 %v1144_v53  ;;  %v1134_v53 = vsub.f32 %v16703_v26, %v1131_v54  ;;  %v1374_v54 = vsub.f32 %v16718_v44, %v1369_v2 }
 0x50d   :  { %v1378_v35 = vmul.f32 1.442695, %v1374_v54 }
 0x50e   :  { %v1648_v20 = vpop.xlane.xlu0 %1647 }
 0x512   :  { %v667_v29 = vpop.xlane.xlu0 %666  ;;  %v1651_v31 = vpop.xlane.xlu1 %1650 }
 0x513   :  { %15684 = vrcp.f32 %v667_v29  ;;  %v1375_v29 = vsub.f32 %v16725_v1, %v1372_v11 }
 0x515   :  { %1401 = vrot.lane.b32.xlu0 %v16449_v8, %s16242_s17  ;;  %v1380_v9 = vmul.f32 1.442695, %v1375_v29 }
 0x516   :  { %v670_v36 = vpop.xlane.xlu1 %669  ;;  %v1654_v39 = vpop.xlane.xlu0 %1653 }
 0x517   :  { %15686 = vrcp.f32 %v670_v36  ;;  %v1657_v2 = vsub.f32 %v16752_v34, %v1654_v39 }
 0x51a   :  { %v673_v40 = vpop.xlane.xlu0 %672  ;;  %v1880_v36 = vpop.xlane.xlu1 %1879 }
 0x51b   :  { %15688 = vrcp.f32 %v673_v40  ;;  %v1887_v11 = vsub.f32 %v16762_v43, %v1880_v36 }
 0x51c   :  { %15284 = vrot.lane.b32.xlu1 %v16469_v14, %s16241_s16  ;;  %15690 = vpow2.f32 %v1135_v37 }
 0x51d   :  { %v15685_v46 = vpop.eup %15684  ;;  %v1890_v60 = vmul.f32 1.442695, %v1887_v11 }
 0x51e   :  { %v675_v50 = vmul.f32 %v15685_v46, %v16736_v6  ;;  %v1139_v6 = vmul.f32 1.442695, %v1134_v53  ;;  %v1883_v40 = vpop.xlane.xlu0 %1882 }
 0x520   :  { %12931 = vmatmul.mubr.msk.f32.vlgmr.msra.gmra.mrb[12].mxu1 %vm646_vm7, %v675_v50  ;;  %15692 = vpow2.f32 %v1139_v6 }
 0x521   :  { %v15687_v8 = vpop.eup %15686  ;;  %14497 = vmatpush3.bf16.msra.mxu1 %v14496_v49  ;;  %12933 = vmatprep.mubr.msk.f32.mxu1 %vm16239_vm3, %v16237_v63 }
 0x522   :  { %12958 = vmatprep.subr.mxu1 %v16237_v63  ;;  %v677_v17 = vmul.f32 %v15687_v8, %v16746_v30  ;;  %v1376_v30 = vmul.f32 1.442695, %v1373_v3  ;;  %v1886_v32 = vpop.xlane.xlu1 %1885 }
 0x523   :  { %v1889_v34 = vsub.f32 %v16774_v52, %v1886_v32 }
 0x524   :  { %12934 = vmatmul.mubr.msk.f32.gmra.mrb[14].mxu1 %vm646_vm7, %v677_v17  ;;  %15694 = vpow2.f32 %v1376_v30 }
 0x525   :  { %v15689_v58 = vpop.eup %15688  ;;  %12959 = vmatpush3.msra.mxu1 %v16689_v62  ;;  %12936 = vmatprep.mubr.msk.f32.mxu1 %vm16239_vm3, %v16237_v63  ;;  %v1655_v62 = vsub.f32 %v16732_v57, %v1648_v20  ;;  %15696 = vpow2.f32 %v1378_v35  ;;  %v1894_v53 = vmul.f32 1.442695, %v1889_v34 }
 0x526   :  { %v679_v26 = vmul.f32 %v15689_v58, %v16756_v41  ;;  %14502 = vmatprep.subr.bf16.mxu1 %v16238_v4  ;;  %v1656_v41 = vsub.f32 %v16742_v15, %v1651_v31  ;;  %v16864_v42 = vpop.eup %15690  ;;  %15698 = vpow2.f32 %v1380_v9  ;;  %v2124_v46 = vpop.xlane.xlu0 %2123  ;;  %v1662_v15 = vmul.f32 1.442695, %v1657_v2 }
 0x527   :  { %v1658_v44 = vmul.f32 1.442695, %v1655_v62  ;;  %v1141_v57 = vsel %vm646_vm7, %v16864_v42, 0.0  ;;  %v1888_v31 = vsub.f32 %v16768_v56, %v1883_v40  ;;  %v2131_v37 = vsub.f32 %v16780_v61, %v2124_v46 }
 0x528   :  { %12937 = vmatmul.mubr.msk.f32.gmra.mrb[16].mxu1 %vm646_vm7, %v679_v26  ;;  %v1660_v1 = vmul.f32 1.442695, %v1656_v41 }
 0x529   :  { %12960 = vmatprep.mubr.msk.f32.mxu1 %vm16239_vm3, %v16237_v63  ;;  %15700 = vpow2.f32 %v1658_v44  ;;  %v1892_v8 = vmul.f32 1.442695, %v1888_v31  ;;  %v2134_v3 = vmul.f32 1.442695, %v2131_v37 }
 0x52a   :  { %v16870_v20 = vpop.eup %15692  ;;  %15702 = vpow2.f32 %v1660_v1  ;;  %v2127_v39 = vpop.xlane.xlu1 %2126 }
 0x52b   :  { %v1147_v43 = vsel %vm646_vm7, %v16870_v20, 0.0  ;;  %15704 = vpow2.f32 %v1662_v15  ;;  %v2132_v26 = vsub.f32 %v16786_v21, %v2127_v39 }
 0x52c   :  { %15706 = vpow2.f32 %v1890_v60 }
 0x52d   :  { %15708 = vpow2.f32 %v1892_v8  ;;  %v2136_v62 = vmul.f32 1.442695, %v2132_v26 }
 0x52e   :  { %v2130_v50 = vpop.xlane.xlu0 %2129  ;;  %v16876_v49 = vpop.eup %15694  ;;  %15710 = vpow2.f32 %v1894_v53 }
 0x52f   :  { %v2133_v56 = vsub.f32 %v16792_v38, %v2130_v50  ;;  %v16880_v17 = vpop.eup %15696  ;;  %v1382_v52 = vsel %vm646_vm7, %v16876_v49, 0.0  ;;  %15712 = vpow2.f32 %v2134_v3 }
 0x530   :  { %v16884_v6 = vpop.eup %15698  ;;  %v1385_v38 = vsel %vm646_vm7, %v16880_v17, 0.0 }
 0x531   :  { %v2138_v54 = vmul.f32 1.442695, %v2133_v56  ;;  %v1388_v29 = vsel %vm646_vm7, %v16884_v6, 0.0 }
 0x532   :  { %v2365_v58 = vpop.xlane.xlu1 %2364 }
 0x533   :  { %v2372_v61 = vsub.f32 %v16798_v47, %v2365_v58  ;;  %v16888_v30 = vpop.eup %15700  ;;  %15714 = vpow2.f32 %v2138_v54 }
 0x534   :  { %1142 = vadd.xlane.f32.xlu0 %v1141_v57  ;;  %v16894_v35 = vpop.eup %15702  ;;  %v1664_v47 = vsel %vm646_vm7, %v16888_v30, 0.0  ;;  %15716 = vpow2.f32 %v2136_v62 }
 0x535   :  { %v2375_v21 = vmul.f32 1.442695, %v2372_v61  ;;  %v16896_v9 = vpop.eup %15704  ;;  %v1667_v41 = vsel %vm646_vm7, %v16894_v35, 0.0 }
 0x536   :  { %v16902_v36 = vpop.eup %15706  ;;  %v1670_v2 = vsel %vm646_vm7, %v16896_v9, 0.0 }
 0x537   :  { %15718 = vpow2.f32 %v2375_v21  ;;  %v16904_v40 = vpop.eup %15708  ;;  %v1896_v44 = vsel %vm646_vm7, %v16902_v36, 0.0 }
 0x538   :  { %1148 = vadd.xlane.f32.xlu0 %v1147_v43  ;;  %v16910_v1 = vpop.eup %15710  ;;  %v1899_v46 = vsel %vm646_vm7, %v16904_v40, 0.0  ;;  %v2368_v43 = vpop.xlane.xlu0 %2367 }
 0x539   :  { %v16912_v11 = vpop.eup %15712  ;;  %v1902_v32 = vsel %vm646_vm7, %v16910_v1, 0.0  ;;  %v2373_v56 = vsub.f32 %v16804_v51, %v2368_v43 }
 0x53a   :  { %v2140_v31 = vsel %vm646_vm7, %v16912_v11, 0.0 }
 0x53b   :  { %v2377_v58 = vmul.f32 1.442695, %v2373_v56 }
 0x53c   :  { %1383 = vadd.xlane.f32.xlu0 %v1382_v52  ;;  %v2371_v8 = vpop.xlane.xlu0 %2370 }
 0x53d   :  { %v16918_v57 = vpop.eup %15714  ;;  %v2374_v37 = vsub.f32 %v16810_v59, %v2371_v8  ;;  %v15277_v59 = vunpack.i.h.bf16 %v16699_v25 }
 0x53e   :  { %v16920_v15 = vpop.eup %15716  ;;  %v2146_v60 = vsel %vm646_vm7, %v16918_v57, 0.0 }
 0x53f   :  { %v2143_v39 = vsel %vm646_vm7, %v16920_v15, 0.0  ;;  %v2379_v53 = vmul.f32 1.442695, %v2374_v37 }
 0x540   :  { %1386 = vadd.xlane.f32.xlu1 %v1385_v38  ;;  %1389 = vadd.xlane.f32.xlu0 %v1388_v29  ;;  %v15276_v38 = vunpack.i.l.bf16 %v16699_v25 }
 0x541   :  { %v16926_v34 = vpop.eup %15718  ;;  %15720 = vpow2.f32 %v2379_v53 }
 0x542   :  { %v2381_v50 = vsel %vm646_vm7, %v16926_v34, 0.0  ;;  %15722 = vpow2.f32 %v2377_v58  ;;  %v14503_v21 = vpack.c.bf16 %v15277_v59, %v15276_v38 }
 0x544   :  { %1665 = vadd.xlane.f32.xlu1 %v1664_v47  ;;  %1668 = vadd.xlane.f32.xlu0 %v1667_v41 }
 0x548   :  { %1897 = vadd.xlane.f32.xlu1 %v1896_v44  ;;  %1671 = vadd.xlane.f32.xlu0 %v1670_v2 }
 0x54b   :  { %v16944_v52 = vpop.eup %15720 }
 0x54c   :  { %1903 = vadd.xlane.f32.xlu1 %v1902_v32  ;;  %1900 = vadd.xlane.f32.xlu0 %v1899_v46  ;;  %v2387_v26 = vsel %vm646_vm7, %v16944_v52, 0.0  ;;  %v16948_v61 = vpop.eup %15722 }
 0x54d   :  { %v2384_v62 = vsel %vm646_vm7, %v16948_v61, 0.0 }
 0x550   :  { %2141 = vadd.xlane.f32.xlu1 %v2140_v31  ;;  %2147 = vadd.xlane.f32.xlu0 %v2146_v60  ;;  %v15282_v31 = vunpack.i.h.bf16 %v16815_v27 }
 0x554   :  { %2144 = vadd.xlane.f32.xlu1 %v2143_v39  ;;  %2382 = vadd.xlane.f32.xlu0 %v2381_v50 }
 0x565   :  { %15289 = vrot.lane.b32.xlu1 %v16469_v14, %s16240_s30 }
 0x569   :  { %2159 = vrot.lane.b32.xlu1 %v16457_v10, %s16240_s30 }
 0x56a   :  { %1918 = vrot.lane.b32.xlu0 %v16457_v10, %s16241_s16 }
 0x56d   :  { %15294 = vrot.lane.b32.xlu1 %v16469_v14, %s16242_s17 }
 0x571   :  { %2400 = vrot.lane.b32.xlu1 %v16457_v10, %s16242_s17 }
 0x588   :  { %v899_v3 = vpop.xlane.xlu1 %898 }
 0x589   :  { %15724 = vrcp.f32 %v899_v3  ;;  %2388 = vadd.xlane.f32.xlu0 %v2387_v26 }
 0x58c   :  { %v902_v14 = vpop.xlane.xlu0 %901 }
 0x58d   :  { %15726 = vrcp.f32 %v902_v14 }
 0x590   :  { %v905_v54 = vpop.xlane.xlu1 %904  ;;  %v1402_v44 = vpop.permute.xlu0 %1401 }
 0x591   :  { %15728 = vrcp.f32 %v905_v54 }
 0x593   :  { %v15725_v51 = vpop.eup %15724 }
 0x594   :  { %v907_v29 = vmul.f32 %v15725_v51, %v16819_v45 }
 0x595   :  { %2385 = vadd.xlane.f32.xlu1 %v2384_v62 }
 0x596   :  { %12961 = vmatmul.mubr.msk.f32.vlgmr.msra.gmra.mrb[18].mxu1 %vm646_vm7, %v907_v29 }
 0x597   :  { %v15727_v47 = vpop.eup %15726  ;;  %14504 = vmatpush3.bf16.msra.mxu1 %v14503_v21  ;;  %12963 = vmatprep.mubr.msk.f32.mxu1 %vm16239_vm3, %v16237_v63 }
 0x598   :  { %12988 = vmatprep.subr.mxu1 %v16237_v63  ;;  %v909_v25 = vmul.f32 %v15727_v47, %v16824_v48  ;;  %v1146_v2 = vpop.xlane.xlu1 %1145 }
 0x59a   :  { %12964 = vmatmul.mubr.msk.f32.gmra.mrb[20].mxu1 %vm646_vm7, %v909_v25 }
 0x59b   :  { %v15729_v41 = vpop.eup %15728  ;;  %12989 = vmatpush3.msra.mxu1 %v16707_v33  ;;  %12966 = vmatprep.mubr.msk.f32.mxu1 %vm16239_vm3, %v16237_v63 }
 0x59c   :  { %v911_v45 = vmul.f32 %v15729_v41, %v16828_v7  ;;  %14509 = vmatprep.subr.bf16.mxu1 %v16238_v4  ;;  %v15285_v33 = vpop.permute.xlu1 %15284  ;;  %v15281_v7 = vunpack.i.l.bf16 %v16815_v27 }
 0x59d   :  { %v15286_v62 = vunpack.i.l.bf16 %v15285_v33 }
 0x59e   :  { %12967 = vmatmul.mubr.msk.f32.gmra.mrb[22].mxu1 %vm646_vm7, %v911_v45  ;;  %v14510_v37 = vpack.c.bf16 %v15282_v31, %v15281_v7 }
 0x59f   :  { %12990 = vmatprep.mubr.msk.f32.mxu1 %vm16239_vm3, %v16237_v63 }
 0x5c1   :  { %v1143_v48 = vpop.xlane.xlu0 %1142 }
 0x5c2   :  { %15730 = vrcp.f32 %v1143_v48 }
 0x5c3   :  { %15732 = vrcp.f32 %v1146_v2 }
 0x5c5   :  { %v1149_v32 = vpop.xlane.xlu0 %1148 }
 0x5c6   :  { %15734 = vrcp.f32 %v1149_v32 }
 0x5c9   :  { %v1384_v46 = vpop.xlane.xlu0 %1383 }
 0x5ca   :  { %15736 = vrcp.f32 %v1384_v46 }
 0x5cc   :  { %v15731_v60 = vpop.eup %15730 }
 0x5cd   :  { %v1151_v39 = vmul.f32 %v15731_v60, %v16864_v42  ;;  %v1387_v50 = vpop.xlane.xlu1 %1386  ;;  %v1390_v43 = vpop.xlane.xlu0 %1389 }
 0x5ce   :  { %v15733_v8 = vpop.eup %15732  ;;  %15738 = vrcp.f32 %v1387_v50 }
 0x5cf   :  { %12991 = vmatmul.mubr.msk.f32.vlgmr.msra.gmra.mrb[24].mxu1 %vm646_vm7, %v1151_v39  ;;  %v1153_v27 = vmul.f32 %v15733_v8, %v16832_v55  ;;  %15740 = vrcp.f32 %v1390_v43 }
 0x5d0   :  { %14511 = vmatpush3.bf16.msra.mxu1 %v14510_v37  ;;  %12993 = vmatprep.mubr.msk.f32.mxu1 %vm16239_vm3, %v16237_v63  ;;  %v15735_v58 = vpop.eup %15734 }
 0x5d1   :  { %v1666_v53 = vpop.xlane.xlu1 %1665  ;;  %v1669_v56 = vpop.xlane.xlu0 %1668  ;;  %13018 = vmatprep.subr.mxu1 %v16237_v63  ;;  %v1155_v26 = vmul.f32 %v15735_v58, %v16870_v20 }
 0x5d2   :  { %15742 = vrcp.f32 %v1666_v53 }
 0x5d3   :  { %12994 = vmatmul.mubr.msk.f32.gmra.mrb[26].mxu1 %vm646_vm7, %v1153_v27  ;;  %15744 = vrcp.f32 %v1669_v56 }
 0x5d4   :  { %13019 = vmatpush3.msra.mxu1 %v1402_v44  ;;  %12996 = vmatprep.mubr.msk.f32.mxu1 %vm16239_vm3, %v16237_v63  ;;  %v15737_v14 = vpop.eup %15736 }
 0x5d5   :  { %v1898_v42 = vpop.xlane.xlu1 %1897  ;;  %v1672_v3 = vpop.xlane.xlu0 %1671  ;;  %14516 = vmatprep.subr.bf16.mxu1 %v16238_v4  ;;  %v1392_v55 = vmul.f32 %v15737_v14, %v16876_v49 }
 0x5d6   :  { %15746 = vrcp.f32 %v1672_v3 }
 0x5d7   :  { %12997 = vmatmul.mubr.msk.f32.gmra.mrb[28].mxu1 %vm646_vm7, %v1155_v26  ;;  %15748 = vrcp.f32 %v1898_v42 }
 0x5d8   :  { %13020 = vmatprep.mubr.msk.f32.mxu1 %vm16239_vm3, %v16237_v63  ;;  %v15739_v38 = vpop.eup %15738 }
 0x5d9   :  { %v1904_v54 = vpop.xlane.xlu1 %1903  ;;  %v1901_v59 = vpop.xlane.xlu0 %1900  ;;  %v1394_v20 = vmul.f32 %v15739_v38, %v16880_v17 }
 0x5da   :  { %v15741_v51 = vpop.eup %15740  ;;  %15750 = vrcp.f32 %v1901_v59 }
 0x5db   :  { %13021 = vmatmul.mubr.msk.f32.vlgmr.msra.gmra.mrb[30].mxu1 %vm646_vm7, %v1392_v55  ;;  %v1396_v5 = vmul.f32 %v15741_v51, %v16884_v6  ;;  %15752 = vrcp.f32 %v1904_v54 }
 0x5dc   :  { %14518 = vmatpush3.bf16.msra.mxu1 %v14517_v13  ;;  %13023 = vmatprep.mubr.msk.f32.mxu1 %vm16239_vm3, %v16237_v63  ;;  %v15743_v12 = vpop.eup %15742  ;;  %v15287_v13 = vunpack.i.h.bf16 %v15285_v33 }
 0x5dd   :  { %13048 = vmatprep.subr.mxu1 %v16237_v63  ;;  %v2142_v29 = vpop.xlane.xlu1 %2141  ;;  %v2148_v49 = vpop.xlane.xlu0 %2147  ;;  %v1674_v17 = vmul.f32 %v15743_v12, %v16888_v30 }
 0x5de   :  { %v15745_v47 = vpop.eup %15744  ;;  %v14524_v25 = vpack.c.bf16 %v15287_v13, %v15286_v62  ;;  %15754 = vrcp.f32 %v2142_v29  ;;  %v2539_v62 = vld [vmem:[%s19980_s7] sm:$0xff] }
 0x5df   :  { %13024 = vmatmul.mubr.msk.f32.gmra.mrb[32].mxu1 %vm646_vm7, %v1394_v20  ;;  %v1676_v6 = vmul.f32 %v15745_v47, %v16894_v35 }
 0x5e0   :  { %13049 = vmatpush3.msra.mxu1 %v16457_v10  ;;  %13026 = vmatprep.mubr.msk.f32.mxu1 %vm16239_vm3, %v16237_v63  ;;  %v15747_v41 = vpop.eup %15746 }
 0x5e1   :  { %14523 = vmatprep.subr.bf16.mxu1 %v16238_v4  ;;  %v2145_v21 = vpop.xlane.xlu1 %2144  ;;  %v2383_v10 = vpop.xlane.xlu0 %2382  ;;  %v1678_v30 = vmul.f32 %v15747_v41, %v16896_v9 }
 0x5e2   :  { %v15749_v2 = vpop.eup %15748  ;;  %15756 = vrcp.f32 %v2145_v21 }
 0x5e3   :  { %13027 = vmatmul.mubr.msk.f32.gmra.mrb[34].mxu1 %vm646_vm7, %v1396_v5  ;;  %v1906_v35 = vmul.f32 %v15749_v2, %v16902_v36  ;;  %15758 = vrcp.f32 %v2148_v49  ;;  %v2547_v2 = vld [vmem:[%s19980_s7 + $0x40] sm:$0xff] }
 0x5e4   :  { %13050 = vmatprep.mubr.msk.f32.mxu1 %vm16239_vm3, %v16237_v63  ;;  %v15751_v46 = vpop.eup %15750  ;;  %15760 = vrcp.f32 %v2383_v10  ;;  %v2542_v10 = vld [vmem:[%s19980_s7 + $0x18] sm:$0xff] }
 0x5e5   :  { %v15290_v45 = vpop.permute.xlu1 %15289  ;;  %v1919_v44 = vpop.permute.xlu0 %1918  ;;  %v1908_v60 = vmul.f32 %v15751_v46, %v16904_v40 }
 0x5e6   :  { %v15292_v48 = vunpack.i.h.bf16 %v15290_v45  ;;  %v15291_v32 = vunpack.i.l.bf16 %v15290_v45  ;;  %v15753_v39 = vpop.eup %15752  ;;  %v2545_v45 = vld [vmem:[%s19980_s7 + $0x30] sm:$0xff] }
 0x5e7   :  { %13051 = vmatmul.mubr.msk.f32.vlgmr.msra.gmra.mrb[36].mxu1 %vm646_vm7, %v1674_v17  ;;  %v1910_v8 = vmul.f32 %v15753_v39, %v16910_v1  ;;  %v2541_v17 = vld [vmem:[%s19980_s7 + $0x10] sm:$0xff] }
 0x5e8   :  { %14525 = vmatpush3.bf16.msra.mxu1 %v14524_v25  ;;  %13053 = vmatprep.mubr.msk.f32.mxu1 %vm16239_vm3, %v16237_v63  ;;  %v14531_v31 = vpack.c.bf16 %v15292_v48, %v15291_v32  ;;  %v15755_v37 = vpop.eup %15754  ;;  %v14544_v47 = vpack.c.bf16 %v2542_v10, %v2541_v17  ;;  %v2543_v25 = vld [vmem:[%s19980_s7 + $0x20] sm:$0xff]  ;;  %v2548_v48 = vld [vmem:[%s19980_s7 + $0x48] sm:$0xff] }
 0x5e9   :  { %13078 = vmatprep.subr.mxu1 %v16237_v63  ;;  %v2160_v33 = vpop.permute.xlu1 %2159  ;;  %v2150_v27 = vmul.f32 %v15755_v37, %v16912_v11  ;;  %v14556_v32 = vpack.c.bf16 %v2548_v48, %v2547_v2 }
 0x5eb   :  { %13054 = vmatmul.mubr.msk.f32.gmra.mrb[38].mxu1 %vm646_vm7, %v1676_v6  ;;  %v2544_v6 = vld [vmem:[%s19980_s7 + $0x28] sm:$0xff] }
 0x5ec   :  { %13079 = vmatpush3.msra.mxu1 %v1919_v44  ;;  %13056 = vmatprep.mubr.msk.f32.mxu1 %vm16239_vm3, %v16237_v63  ;;  %v15757_v42 = vpop.eup %15756  ;;  %v14548_v41 = vpack.c.bf16 %v2544_v6, %v2543_v25  ;;  %v2546_v44 = vld [vmem:[%s19980_s7 + $0x38] sm:$0xff] }
 0x5ed   :  { %14530 = vmatprep.subr.bf16.mxu1 %v16238_v4  ;;  %v15295_v50 = vpop.permute.xlu1 %15294  ;;  %v2152_v1 = vmul.f32 %v15757_v42, %v16920_v15  ;;  %v15759_v26 = vpop.eup %15758 }
 0x5ee   :  { %v15297_v53 = vunpack.i.h.bf16 %v15295_v50  ;;  %v15296_v56 = vunpack.i.l.bf16 %v15295_v50  ;;  %v2154_v11 = vmul.f32 %v15759_v26, %v16918_v57  ;;  %v15761_v55 = vpop.eup %15760 }
 0x5ef   :  { %13057 = vmatmul.mubr.msk.f32.gmra.mrb[40].mxu1 %vm646_vm7, %v1678_v30  ;;  %v2391_v54 = vmul.f32 %v15761_v55, %v16926_v34  ;;  %v14552_v30 = vpack.c.bf16 %v2546_v44, %v2545_v45 }
 0x5f0   :  { %13080 = vmatprep.mubr.msk.f32.mxu1 %vm16239_vm3, %v16237_v63  ;;  %v14538_v3 = vpack.c.bf16 %v15297_v53, %v15296_v56  ;;  %v2553_v53 = vld [vmem:[%s19980_s7 + $0x70] sm:$0xff]  ;;  %v2554_v56 = vld [vmem:[%s19980_s7 + $0x78] sm:$0xff] }
 0x5f1   :  { %v2401_v14 = vpop.permute.xlu1 %2400 }
 0x5f3   :  { %13081 = vmatmul.mubr.msk.f32.vlgmr.msra.gmra.mrb[42].mxu1 %vm646_vm7, %v1906_v35  ;;  %v17019_v9 = vpop.f32.mrb[12].mxu1  ;;  %v2549_v35 = vld [vmem:[%s19980_s7 + $0x50] sm:$0xff] }
 0x5f4   :  { %14532 = vmatpush3.bf16.msra.mxu1 %v14531_v31  ;;  %13083 = vmatprep.mubr.msk.f32.mxu1 %vm16239_vm3, %v16237_v63  ;;  %v12932_v7 = vpop.f32.mrb[13].mxu1  ;;  %v2551_v31 = vld [vmem:[%s19980_s7 + $0x60] sm:$0xff] }
 0x5f5   :  { %13108 = vmatprep.subr.mxu1 %v16237_v63  ;;  %v2552_v7 = vld [vmem:[%s19980_s7 + $0x68] sm:$0xff] }
 0x5f7   :  { %13084 = vmatmul.mubr.msk.f32.gmra.mrb[44].mxu1 %vm646_vm7, %v1908_v60  ;;  %v17026_v36 = vpop.f32.mrb[14].mxu1  ;;  %v14564_v60 = vpack.c.bf16 %v2552_v7, %v2551_v31 }
 0x5f8   :  { %13109 = vmatpush3.msra.mxu1 %v2160_v33  ;;  %13086 = vmatprep.mubr.msk.f32.mxu1 %vm16239_vm3, %v16237_v63  ;;  %v12935_v43 = vpop.f32.mrb[15].mxu1  ;;  %v2550_v33 = vld [vmem:[%s19980_s7 + $0x58] sm:$0xff] }
 0x5f9   :  { %14537 = vmatprep.subr.bf16.mxu1 %v16238_v4  ;;  %v14560_v46 = vpack.c.bf16 %v2550_v33, %v2549_v35 }
 0x5fb   :  { %13087 = vmatmul.mubr.msk.f32.gmra.mrb[46].mxu1 %vm646_vm7, %v1910_v8  ;;  %v17033_v40 = vpop.f32.mrb[16].mxu1 }
 0x5fc   :  { %13110 = vmatprep.mubr.msk.f32.mxu1 %vm16239_vm3, %v16237_v63  ;;  %v12938_v58 = vpop.f32.mrb[17].mxu1 }
 0x5ff   :  { %13111 = vmatmul.mubr.msk.f32.vlgmr.msra.gmra.mrb[48].mxu1 %vm646_vm7, %v2150_v27  ;;  %v14568_v27 = vpack.c.bf16 %v2554_v56, %v2553_v53 }
 0x600   :  { %14539 = vmatpush3.bf16.msra.mxu1 %v14538_v3  ;;  %13113 = vmatprep.mubr.msk.f32.mxu1 %vm16239_vm3, %v16237_v63 }
 0x601   :  { %13138 = vmatprep.subr.mxu1 %v16237_v63 }
 0x603   :  { %13114 = vmatmul.mubr.msk.f32.gmra.mrb[50].mxu1 %vm646_vm7, %v2152_v1 }
 0x604   :  { %13139 = vmatpush3.msra.mxu1 %v2401_v14  ;;  %13116 = vmatprep.mubr.msk.f32.mxu1 %vm16239_vm3, %v16237_v63 }
 0x607   :  { %13117 = vmatmul.mubr.msk.f32.gmra.mrb[52].mxu1 %vm646_vm7, %v2154_v11 }
 0x608   :  { %13140 = vmatprep.mubr.msk.f32.mxu1 %vm16239_vm3, %v16237_v63 }
 0x60b   :  { %13141 = vmatmul.mubr.msk.f32.vlgmr.msra.gmra.mrb[54].mxu1 %vm646_vm7, %v2391_v54 }
 0x60c   :  { %13143 = vmatprep.mubr.msk.f32.mxu1 %vm16239_vm3, %v16237_v63 }
 0x616   :  { %v2389_v15 = vpop.xlane.xlu0 %2388 }
 0x622   :  { %v2386_v59 = vpop.xlane.xlu1 %2385 }
 0x623   :  { %15762 = vrcp.f32 %v2386_v59 }
 0x624   :  { %15764 = vrcp.f32 %v2389_v15 }
 0x62d   :  { %v15763_v38 = vpop.eup %15762 }
 0x62e   :  { %v2393_v57 = vmul.f32 %v15763_v38, %v16948_v61  ;;  %v15765_v20 = vpop.eup %15764 }
 0x62f   :  { %v2395_v34 = vmul.f32 %v15765_v20, %v16944_v52  ;;  %v2540_v52 = vld [vmem:[%s19980_s7 + $0x8] sm:$0xff] }
 0x630   :  { %13144 = vmatmul.mubr.msk.f32.gmra.mrb[56].mxu1 %vm646_vm7, %v2393_v57  ;;  %v14540_v21 = vpack.c.bf16 %v2540_v52, %v2539_v62 }
 0x631   :  { %13146 = vmatprep.mubr.msk.f32.mxu1 %vm16239_vm3, %v16237_v63 }
 0x632   :  { %14541 = vmatprep.subr.bf16.mxu0 %v14540_v21 }
 0x633   :  { %14543 = vmatpush3.bf16.msra.mxu0 %v14540_v21 }
 0x634   :  { %13147 = vmatmul.mubr.msk.f32.gmra.mrb[58].mxu1 %vm646_vm7, %v2395_v34  ;;  %14545 = vmatprep.subr.bf16.mxu0 %v14544_v47 }
 0x637   :  { %14547 = vmatpush3.bf16.msra.mxu0 %v14544_v47 }
 0x638   :  { %14549 = vmatprep.subr.bf16.mxu0 %v14548_v41 }
 0x63b   :  { %14551 = vmatpush3.bf16.msra.mxu0 %v14548_v41 }
 0x63c   :  { %14553 = vmatprep.subr.bf16.mxu0 %v14552_v30 }
 0x63f   :  { %14555 = vmatpush3.bf16.msra.mxu0 %v14552_v30 }
 0x640   :  { %14557 = vmatprep.subr.bf16.mxu0 %v14556_v32 }
 0x643   :  { %14559 = vmatpush3.bf16.msra.mxu0 %v14556_v32 }
 0x644   :  { %14561 = vmatprep.subr.bf16.mxu0 %v14560_v46 }
 0x647   :  { %14563 = vmatpush3.bf16.msra.mxu0 %v14560_v46 }
 0x648   :  { %14565 = vmatprep.subr.bf16.mxu0 %v14564_v60 }
 0x64b   :  { %14567 = vmatpush3.bf16.msra.mxu0 %v14564_v60 }
 0x64c   :  { %14569 = vmatprep.subr.bf16.mxu0 %v14568_v27 }
 0x64f   :  { %14571 = vmatpush3.bf16.msra.mxu0 %v14568_v27 }
 0x669   :  { %v999_v51 = vpop.f32.mrb[18].mxu1 }
 0x66a   :  { %v12962_v29 = vpop.f32.mrb[19].mxu1 }
 0x66d   :  { %v1004_v49 = vpop.f32.mrb[20].mxu1 }
 0x66e   :  { %v15298_v5 = vpack.i.bf16 %v1004_v49, %v999_v51  ;;  %v12965_v12 = vpop.f32.mrb[21].mxu1 }
 0x670   :  { %15299 = vrot.lane.b32.xlu0 %v15298_v5, %s16242_s17 }
 0x671   :  { %v17061_v13 = vpop.f32.mrb[22].mxu1 }
 0x672   :  { %v12968_v61 = vpop.f32.mrb[23].mxu1 }
 0x6a2   :  { %v1240_v39 = vpop.f32.mrb[24].mxu1 }
 0x6a3   :  { %v12992_v50 = vpop.f32.mrb[25].mxu1 }
 0x6a6   :  { %v1245_v43 = vpop.f32.mrb[26].mxu1 }
 0x6a7   :  { %v15303_v8 = vpack.i.bf16 %v1245_v43, %v1240_v39  ;;  %v12995_v37 = vpop.f32.mrb[27].mxu1 }
 0x6a9   :  { %15304 = vrot.lane.b32.xlu1 %v15303_v8, %s16240_s30 }
 0x6aa   :  { %v1250_v58 = vpop.f32.mrb[28].mxu1 }
 0x6ab   :  { %v12998_v42 = vpop.f32.mrb[29].mxu1 }
 0x6ae   :  { %v1481_v3 = vpop.f32.mrb[30].mxu1 }
 0x6af   :  { %v13022_v1 = vpop.f32.mrb[31].mxu1 }
 0x6b2   :  { %v1486_v26 = vpop.f32.mrb[32].mxu1 }
 0x6b3   :  { %v15308_v14 = vpack.i.bf16 %v1486_v26, %v1481_v3  ;;  %v13025_v11 = vpop.f32.mrb[33].mxu1 }
 0x6b5   :  { %15309 = vrot.lane.b32.xlu1 %v15308_v14, %s16241_s16 }
 0x6b6   :  { %v1491_v55 = vpop.f32.mrb[34].mxu1 }
 0x6b7   :  { %v13028_v54 = vpop.f32.mrb[35].mxu1 }
 0x6ba   :  { %v17113_v15 = vpop.f32.mrb[36].mxu1 }
 0x6bb   :  { %v13052_v59 = vpop.f32.mrb[37].mxu1 }
 0x6be   :  { %v17115_v38 = vpop.f32.mrb[38].mxu1 }
 0x6bf   :  { %v13055_v57 = vpop.f32.mrb[39].mxu1 }
 0x6c2   :  { %v17117_v20 = vpop.f32.mrb[40].mxu1 }
 0x6c3   :  { %v13058_v34 = vpop.f32.mrb[41].mxu1 }
 0x6c6   :  { %v1998_v51 = vpop.f32.mrb[42].mxu1 }
 0x6c7   :  { %v15313_v29 = vpack.i.bf16 %v1998_v51, %v17061_v13  ;;  %v13082_v49 = vpop.f32.mrb[43].mxu1 }
 0x6c9   :  { %15314 = vrot.lane.b32.xlu1 %v15313_v29, %s16242_s17 }
 0x6ca   :  { %v2003_v5 = vpop.f32.mrb[44].mxu1 }
 0x6cb   :  { %v13085_v12 = vpop.f32.mrb[45].mxu1 }
 0x6ce   :  { %v2008_v61 = vpop.f32.mrb[46].mxu1 }
 0x6cf   :  { %v15328_v62 = vpack.i.bf16 %v2008_v61, %v2003_v5  ;;  %v13088_v52 = vpop.f32.mrb[47].mxu1 }
 0x6d2   :  { %v2239_v17 = vpop.f32.mrb[48].mxu1 }
 0x6d3   :  { %v15318_v21 = vpack.i.bf16 %v2239_v17, %v1250_v58  ;;  %v13112_v10 = vpop.f32.mrb[49].mxu1 }
 0x6d5   :  { %15319 = vrot.lane.b32.xlu0 %v15318_v21, %s16240_s30 }
 0x6d6   :  { %v2244_v47 = vpop.f32.mrb[50].mxu1 }
 0x6d7   :  { %v13115_v25 = vpop.f32.mrb[51].mxu1 }
 0x6d9   :  { %15329 = vrot.lane.b32.xlu0 %v15328_v62, %s16242_s17 }
 0x6da   :  { %v2249_v6 = vpop.f32.mrb[52].mxu1 }
 0x6db   :  { %v15333_v41 = vpack.i.bf16 %v2249_v6, %v2244_v47  ;;  %v13118_v13 = vpop.f32.mrb[53].mxu1 }
 0x6de   :  { %v2480_v45 = vpop.f32.mrb[54].mxu1 }
 0x6df   :  { %v15323_v44 = vpack.i.bf16 %v2480_v45, %v1491_v55  ;;  %v13142_v30 = vpop.f32.mrb[55].mxu1 }
 0x6e1   :  { %15324 = vrot.lane.b32.xlu1 %v15323_v44, %s16241_s16  ;;  %v11744_v44 = vld [vmem:[%s19981_s8] ss:$0 sm:$0xff] }
 0x6e2   :  { %v15300_v46 = vpop.permute.xlu0 %15299 }
 0x6e3   :  { %v15302_v7 = vunpack.i.h.bf16 %v15300_v46  ;;  %v15301_v60 = vunpack.i.l.bf16 %v15300_v46 }
 0x6e5   :  { %15334 = vrot.lane.b32.xlu1 %v15333_v41, %s16240_s30  ;;  %v1532_v8 = vsel %vm541_vm4, %v17026_v36, %v15302_v7  ;;  %v1531_v56 = vsel %vm541_vm4, %v17019_v9, %v15301_v60 }
 0x703   :  { %v2485_v2 = vpop.f32.mrb[56].mxu1 }
 0x704   :  { %v13145_v48 = vpop.f32.mrb[57].mxu1 }
 0x707   :  { %v2490_v32 = vpop.f32.mrb[58].mxu1 }
 0x708   :  { %v15338_v35 = vpack.i.bf16 %v2490_v32, %v2485_v2  ;;  %v13148_v33 = vpop.f32.mrb[59].mxu1 }
 0x70a   :  { %15339 = vrot.lane.b32.xlu0 %v15338_v35, %s16241_s16 }
 0x71b   :  { %v15305_v31 = vpop.permute.xlu1 %15304 }
 0x71c   :  { %v15307_v39 = vunpack.i.h.bf16 %v15305_v31  ;;  %v15306_v50 = vunpack.i.l.bf16 %v15305_v31 }
 0x71e   :  { %v1535_v27 = vsel %vm1534_vm8, %v1531_v56, %v15306_v50  ;;  %v1536_v58 = vsel %vm1534_vm8, %v1532_v8, %v15307_v39  ;;  %v2759_v56 = vld [vmem:[%s19984_s11 + $0x20] sm:$0xff] }
 0x727   :  { %v15310_v43 = vpop.permute.xlu1 %15309 }
 0x728   :  { %v15312_v37 = vunpack.i.h.bf16 %v15310_v43  ;;  %v15311_v53 = vunpack.i.l.bf16 %v15310_v43 }
 0x72a   :  { %v1539_v42 = vsel %vm1538_vm9, %v1535_v27, %v15311_v53  ;;  %v1540_v3 = vsel %vm1538_vm9, %v1536_v58, %v15312_v37  ;;  %v2760_v27 = vld [vmem:[%s19984_s11 + $0x28] sm:$0xff] }
 0x72b   :  { %13181 = vmatprep.mubr.f32.mxu0 %v1539_v42  ;;  %v14580_v58 = vpack.c.bf16 %v2760_v27, %v2759_v56 }
 0x72c   :  { %13182 = vmatmul.mubr.f32.vlgmr.msra.gmra.mrb[58].mxu0 %v1540_v3 }
 0x73b   :  { %v15315_v1 = vpop.permute.xlu1 %15314 }
 0x73c   :  { %v15317_v14 = vunpack.i.h.bf16 %v15315_v1  ;;  %v15316_v11 = vunpack.i.l.bf16 %v15315_v1 }
 0x73e   :  { %v1533_v9 = vsel %vm541_vm4, %v17033_v40, %v15316_v11  ;;  %v2530_v34 = vsel %vm541_vm4, %v17113_v15, %v15317_v14 }
 0x747   :  { %v15320_v26 = vpop.permute.xlu0 %15319 }
 0x748   :  { %v15322_v36 = vunpack.i.h.bf16 %v15320_v26  ;;  %v15321_v55 = vunpack.i.l.bf16 %v15320_v26 }
 0x74a   :  { %v1537_v51 = vsel %vm1534_vm8, %v1533_v9, %v15321_v55  ;;  %v2533_v29 = vsel %vm1534_vm8, %v2530_v34, %v15322_v36  ;;  %v2763_v9 = vld [vmem:[%s19984_s11 + $0x40] sm:$0xff]  ;;  %v2764_v34 = vld [vmem:[%s19984_s11 + $0x48] sm:$0xff] }
 0x74b   :  { %v15330_v12 = vpop.permute.xlu0 %15329 }
 0x74c   :  { %v15332_v62 = vunpack.i.h.bf16 %v15330_v12  ;;  %v15331_v52 = vunpack.i.l.bf16 %v15330_v12  ;;  %v2767_v12 = vld [vmem:[%s19984_s11 + $0x60] sm:$0xff] }
 0x74e   :  { %v2531_v15 = vsel %vm541_vm4, %v17115_v38, %v15331_v52  ;;  %v2532_v25 = vsel %vm541_vm4, %v17117_v20, %v15332_v62  ;;  %v2769_v52 = vld [vmem:[%s19984_s11 + $0x70] sm:$0xff] }
 0x753   :  { %v15325_v54 = vpop.permute.xlu1 %15324 }
 0x754   :  { %v15327_v59 = vunpack.i.h.bf16 %v15325_v54  ;;  %v15326_v57 = vunpack.i.l.bf16 %v15325_v54  ;;  %v2761_v54 = vld [vmem:[%s19984_s11 + $0x30] sm:$0xff] }
 0x756   :  { %v1541_v49 = vsel %vm1538_vm9, %v1537_v51, %v15326_v57  ;;  %v2536_v5 = vsel %vm1538_vm9, %v2533_v29, %v15327_v59  ;;  %v2762_v59 = vld [vmem:[%s19984_s11 + $0x38] sm:$0xff]  ;;  %v14588_v51 = vpack.c.bf16 %v2764_v34, %v2763_v9  ;;  %v2765_v29 = vld [vmem:[%s19984_s11 + $0x50] sm:$0xff] }
 0x757   :  { %13184 = vmatprep.mubr.f32.mxu0 %v1541_v49  ;;  %v15335_v61 = vpop.permute.xlu1 %15334  ;;  %v14584_v57 = vpack.c.bf16 %v2762_v59, %v2761_v54  ;;  %v2766_v49 = vld [vmem:[%s19984_s11 + $0x58] sm:$0xff] }
 0x758   :  { %13185 = vmatmul.mubr.f32.gmra.mrb[60].mxu0 %v2536_v5  ;;  %v15337_v17 = vunpack.i.h.bf16 %v15335_v61  ;;  %v15336_v21 = vunpack.i.l.bf16 %v15335_v61  ;;  %v14592_v5 = vpack.c.bf16 %v2766_v49, %v2765_v29  ;;  %v2768_v61 = vld [vmem:[%s19984_s11 + $0x68] sm:$0xff] }
 0x759   :  { %v14596_v62 = vpack.c.bf16 %v2768_v61, %v2767_v12 }
 0x75a   :  { %v2534_v6 = vsel %vm1534_vm8, %v2531_v15, %v15336_v21  ;;  %v2535_v41 = vsel %vm1534_vm8, %v2532_v25, %v15337_v17  ;;  %v2770_v17 = vld [vmem:[%s19984_s11 + $0x78] sm:$0xff] }
 0x75b   :  { %v14600_v21 = vpack.c.bf16 %v2770_v17, %v2769_v52 }
 0x77c   :  { %v15340_v40 = vpop.permute.xlu0 %15339 }
 0x77d   :  { %v15342_v10 = vunpack.i.h.bf16 %v15340_v40  ;;  %v15341_v47 = vunpack.i.l.bf16 %v15340_v40 }
 0x77f   :  { %v2537_v13 = vsel %vm1538_vm9, %v2534_v6, %v15341_v47  ;;  %v2538_v45 = vsel %vm1538_vm9, %v2535_v41, %v15342_v10 }
 0x780   :  { %13187 = vmatprep.mubr.f32.mxu0 %v2537_v13 }
 0x781   :  { %13188 = vmatmul.mubr.f32.gmra.mrb[62].mxu0 %v2538_v45 }
 0x7ff   :  { %v13183_v30 = vpop.f32.mrb[58].mxu0 }
 0x800   :  { %v2634_v2 = vadd.f32 %v13183_v30, %v11744_v44  ;;  %v2628_v38 = vpop.f32.mrb[59].mxu0 }
 0x801   :  { %v2629_v48 = vadd.f32 %v11744_v44, %v2628_v38 }
 0x802   :  { %v17154_v20 = vadd.f32 %v2634_v2, %v16365_v19 }
 0x803   :  { %v17157_v32 = vadd.f32 %v2629_v48, %v16362_v18 }
 0x804   :  { %2667 = vadd.xlane.f32.xlu0 %v17154_v20 }
 0x805   :  { %2665 = vadd.xlane.f32.xlu1 %v17157_v32 }
 0x82b   :  { %v13186_v35 = vpop.f32.mrb[60].mxu0 }
 0x82c   :  { %v2638_v33 = vpop.f32.mrb[61].mxu0  ;;  %v2644_v31 = vadd.f32 %v13186_v35, %v11744_v44 }
 0x82d   :  { %v2639_v46 = vadd.f32 %v11744_v44, %v2638_v33 }
 0x82e   :  { %v17166_v60 = vadd.f32 %v2644_v31, %v16369_v22  ;;  %v2756_v22 = vld [vmem:[%s19984_s11 + $0x8] sm:$0xff] }
 0x82f   :  { %v17162_v7 = vadd.f32 %v2639_v46, %v16358_v16  ;;  %v2755_v16 = vld [vmem:[%s19984_s11] sm:$0xff] }
 0x830   :  { %v14572_v37 = vpack.c.bf16 %v2756_v22, %v2755_v16  ;;  %v11745_v22 = vld [vmem:[%s19982_s9] ss:$0 sm:$0xff] }
 0x831   :  { %2669 = vadd.xlane.f32.xlu0 %v17162_v7 }
 0x832   :  { %14573 = vmatprep.subr.bf16.mxu1 %v14572_v37 }
 0x833   :  { %14575 = vmatpush3.bf16.msra.mxu1 %v14572_v37 }
 0x835   :  { %2671 = vadd.xlane.f32.xlu0 %v17166_v60 }
 0x854   :  { %v13189_v18 = vpop.f32.mrb[62].mxu0 }
 0x855   :  { %v2654_v19 = vadd.f32 %v13189_v18, %v11744_v44  ;;  %v2648_v39 = vpop.f32.mrb[63].mxu0 }
 0x856   :  { %v2649_v50 = vadd.f32 %v11744_v44, %v2648_v39 }
 0x857   :  { %v17170_v43 = vadd.f32 %v2654_v19, %v16377_v24  ;;  %v2757_v24 = vld [vmem:[%s19984_s11 + $0x10] sm:$0xff] }
 0x858   :  { %v17173_v8 = vadd.f32 %v2649_v50, %v16372_v23  ;;  %v2758_v23 = vld [vmem:[%s19984_s11 + $0x18] sm:$0xff] }
 0x859   :  { %2675 = vadd.xlane.f32.xlu0 %v17170_v43  ;;  %v14576_v53 = vpack.c.bf16 %v2758_v23, %v2757_v24 }
 0x85a   :  { %2673 = vadd.xlane.f32.xlu1 %v17173_v8 }
 0x85b   :  { %14577 = vmatprep.subr.bf16.mxu1 %v14576_v53 }
 0x85c   :  { %14579 = vmatpush3.bf16.msra.mxu1 %v14576_v53  ;;  %v11746_v53 = vld [vmem:[%s19983_s10] ss:$0 sm:$0xff] }
 0x85d   :  { %14581 = vmatprep.subr.bf16.mxu1 %v14580_v58 }
 0x860   :  { %14583 = vmatpush3.bf16.msra.mxu1 %v14580_v58 }
 0x861   :  { %14585 = vmatprep.subr.bf16.mxu1 %v14584_v57 }
 0x864   :  { %14587 = vmatpush3.bf16.msra.mxu1 %v14584_v57 }
 0x865   :  { %14589 = vmatprep.subr.bf16.mxu1 %v14588_v51 }
 0x868   :  { %14591 = vmatpush3.bf16.msra.mxu1 %v14588_v51 }
 0x869   :  { %14593 = vmatprep.subr.bf16.mxu1 %v14592_v5 }
 0x86c   :  { %14595 = vmatpush3.bf16.msra.mxu1 %v14592_v5 }
 0x86d   :  { %14597 = vmatprep.subr.bf16.mxu1 %v14596_v62 }
 0x870   :  { %14599 = vmatpush3.bf16.msra.mxu1 %v14596_v62 }
 0x871   :  { %14601 = vmatprep.subr.bf16.mxu1 %v14600_v21 }
 0x874   :  { %14603 = vmatpush3.bf16.msra.mxu1 %v14600_v21 }
 0x891   :  { %v2668_v42 = vpop.xlane.xlu0 %2667 }
 0x892   :  { %v2678_v3 = vmul.f32 0.0078125, %v2668_v42  ;;  %v2666_v1 = vpop.xlane.xlu1 %2665 }
 0x893   :  { %v2677_v26 = vmul.f32 0.0078125, %v2666_v1 }
 0x894   :  { %v2684_v14 = vsub.f32 %v17154_v20, %v2678_v3 }
 0x895   :  { %v2683_v11 = vsub.f32 %v17157_v32, %v2677_v26 }
 0x896   :  { %v2690_v36 = vmul.f32 %v2684_v14, %v2684_v14 }
 0x897   :  { %v2689_v55 = vmul.f32 %v2683_v11, %v2683_v11 }
 0x898   :  { %2697 = vadd.xlane.f32.xlu0 %v2690_v36 }
 0x899   :  { %2695 = vadd.xlane.f32.xlu1 %v2689_v55 }
 0x8be   :  { %v2670_v40 = vpop.xlane.xlu0 %2669 }
 0x8bf   :  { %v2679_v10 = vmul.f32 0.0078125, %v2670_v40 }
 0x8c1   :  { %v2685_v47 = vsub.f32 %v17162_v7, %v2679_v10 }
 0x8c2   :  { %v2672_v15 = vpop.xlane.xlu0 %2671 }
 0x8c3   :  { %v2680_v25 = vmul.f32 0.0078125, %v2672_v15  ;;  %v2691_v6 = vmul.f32 %v2685_v47, %v2685_v47 }
 0x8c5   :  { %v2686_v41 = vsub.f32 %v17166_v60, %v2680_v25  ;;  %2699 = vadd.xlane.f32.xlu1 %v2691_v6 }
 0x8c7   :  { %v2692_v13 = vmul.f32 %v2686_v41, %v2686_v41 }
 0x8c9   :  { %2701 = vadd.xlane.f32.xlu0 %v2692_v13  ;;  %v2928_v13 = vld [vmem:[%s19986_s13 + $0x8] sm:$0xff] }
 0x8e6   :  { %v2676_v45 = vpop.xlane.xlu0 %2675 }
 0x8e7   :  { %v2682_v44 = vmul.f32 0.0078125, %v2676_v45  ;;  %v2674_v30 = vpop.xlane.xlu1 %2673 }
 0x8e8   :  { %v2681_v2 = vmul.f32 0.0078125, %v2674_v30  ;;  %v2930_v30 = vld [vmem:[%s19986_s13 + $0x18] sm:$0xff] }
 0x8e9   :  { %v2688_v38 = vsub.f32 %v17170_v43, %v2682_v44  ;;  %v2929_v44 = vld [vmem:[%s19986_s13 + $0x10] sm:$0xff] }
 0x8ea   :  { %v2687_v48 = vsub.f32 %v17173_v8, %v2681_v2  ;;  %v14608_v2 = vpack.c.bf16 %v2930_v30, %v2929_v44 }
 0x8eb   :  { %v2694_v35 = vmul.f32 %v2688_v38, %v2688_v38 }
 0x8ec   :  { %v2693_v33 = vmul.f32 %v2687_v48, %v2687_v48 }
 0x8ed   :  { %2705 = vadd.xlane.f32.xlu0 %v2694_v35 }
 0x8ee   :  { %2703 = vadd.xlane.f32.xlu1 %v2693_v33  ;;  %v2933_v33 = vld [vmem:[%s19986_s13 + $0x30] sm:$0xff] }
 0x925   :  { %v2698_v46 = vpop.xlane.xlu0 %2697 }
 0x926   :  { %v2708_v31 = vmul.f32 0.0078125, %v2698_v46  ;;  %v2696_v18 = vpop.xlane.xlu1 %2695  ;;  %v2934_v46 = vld [vmem:[%s19986_s13 + $0x38] sm:$0xff] }
 0x927   :  { %v2707_v19 = vmul.f32 0.0078125, %v2696_v18  ;;  %v11747_v18 = vld [vmem:[%s19985_s12] ss:$0 sm:$0xff] }
 0x928   :  { %v2714_v39 = vadd.f32 1e-05, %v2708_v31  ;;  %v14616_v31 = vpack.c.bf16 %v2934_v46, %v2933_v33 }
 0x929   :  { %v2713_v50 = vadd.f32 1e-05, %v2707_v19 }
 0x92a   :  { %15766 = vrsqrt.f32 %v2714_v39 }
 0x92b   :  { %15768 = vrsqrt.f32 %v2713_v50 }
 0x934   :  { %v15767_v16 = vpop.eup %15766 }
 0x935   :  { %v15769_v24 = vpop.eup %15768  ;;  %v2726_v37 = vmul.f32 %v15767_v16, %v2684_v14 }
 0x936   :  { %v2725_v23 = vmul.f32 %v15769_v24, %v2683_v11 }
 0x937   :  { %v2738_v56 = vmul.f32 %v11745_v22, %v2726_v37 }
 0x938   :  { %v2737_v27 = vmul.f32 %v11745_v22, %v2725_v23 }
 0x939   :  { %v2750_v42 = vadd.f32 %v11746_v53, %v2738_v56 }
 0x93a   :  { %v2749_v58 = vadd.f32 %v11746_v53, %v2737_v27 }
 0x93c   :  { %13222 = vmatprep.mubr.f32.mxu1 %v2749_v58 }
 0x93d   :  { %13223 = vmatmul.mubr.f32.vlgmr.msra.gmra.mrb[60].mxu1 %v2750_v42 }
 0x952   :  { %v2700_v3 = vpop.xlane.xlu1 %2699 }
 0x953   :  { %v2709_v1 = vmul.f32 0.0078125, %v2700_v3 }
 0x955   :  { %v2715_v26 = vadd.f32 1e-05, %v2709_v1 }
 0x956   :  { %v2702_v36 = vpop.xlane.xlu0 %2701 }
 0x957   :  { %15770 = vrsqrt.f32 %v2715_v26  ;;  %v2710_v55 = vmul.f32 0.0078125, %v2702_v36 }
 0x959   :  { %v2716_v54 = vadd.f32 1e-05, %v2710_v55 }
 0x95b   :  { %15772 = vrsqrt.f32 %v2716_v54 }
 0x961   :  { %v15771_v14 = vpop.eup %15770 }
 0x962   :  { %v2727_v11 = vmul.f32 %v15771_v14, %v2685_v47 }
 0x964   :  { %v2739_v59 = vmul.f32 %v11745_v22, %v2727_v11 }
 0x965   :  { %v15773_v57 = vpop.eup %15772 }
 0x966   :  { %v2751_v9 = vadd.f32 %v11746_v53, %v2739_v59  ;;  %v2728_v34 = vmul.f32 %v15773_v57, %v2686_v41  ;;  %v2927_v41 = vld [vmem:[%s19986_s13] sm:$0xff] }
 0x967   :  { %v14604_v45 = vpack.c.bf16 %v2928_v13, %v2927_v41 }
 0x968   :  { %13225 = vmatprep.mubr.f32.mxu1 %v2751_v9  ;;  %v2740_v51 = vmul.f32 %v11745_v22, %v2728_v34 }
 0x969   :  { %14605 = vmatprep.subr.bf16.mxu0 %v14604_v45 }
 0x96a   :  { %v2752_v29 = vadd.f32 %v11746_v53, %v2740_v51  ;;  %14607 = vmatpush3.bf16.msra.mxu0 %v14604_v45 }
 0x96b   :  { %14609 = vmatprep.subr.bf16.mxu0 %v14608_v2 }
 0x96c   :  { %13226 = vmatmul.mubr.f32.gmra.mrb[62].mxu1 %v2752_v29 }
 0x96e   :  { %14611 = vmatpush3.bf16.msra.mxu0 %v14608_v2 }
 0x97a   :  { %v2706_v49 = vpop.xlane.xlu0 %2705 }
 0x97b   :  { %v2712_v5 = vmul.f32 0.0078125, %v2706_v49  ;;  %v2704_v12 = vpop.xlane.xlu1 %2703 }
 0x97c   :  { %v2711_v61 = vmul.f32 0.0078125, %v2704_v12 }
 0x97d   :  { %v2718_v62 = vadd.f32 1e-05, %v2712_v5 }
 0x97e   :  { %v2717_v52 = vadd.f32 1e-05, %v2711_v61 }
 0x97f   :  { %15774 = vrsqrt.f32 %v2718_v62 }
 0x980   :  { %15776 = vrsqrt.f32 %v2717_v52 }
 0x989   :  { %v15775_v17 = vpop.eup %15774 }
 0x98a   :  { %v15777_v21 = vpop.eup %15776  ;;  %v2730_v40 = vmul.f32 %v15775_v17, %v2688_v38  ;;  %v2931_v38 = vld [vmem:[%s19986_s13 + $0x20] sm:$0xff] }
 0x98b   :  { %v2729_v10 = vmul.f32 %v15777_v21, %v2687_v48  ;;  %v2932_v48 = vld [vmem:[%s19986_s13 + $0x28] sm:$0xff] }
 0x98c   :  { %v2742_v47 = vmul.f32 %v11745_v22, %v2730_v40  ;;  %v14612_v35 = vpack.c.bf16 %v2932_v48, %v2931_v38 }
 0x98d   :  { %v2741_v15 = vmul.f32 %v11745_v22, %v2729_v10 }
 0x98e   :  { %v2754_v6 = vadd.f32 %v11746_v53, %v2742_v47  ;;  %14613 = vmatprep.subr.bf16.mxu0 %v14612_v35 }
 0x98f   :  { %v2753_v25 = vadd.f32 %v11746_v53, %v2741_v15  ;;  %14615 = vmatpush3.bf16.msra.mxu0 %v14612_v35 }
 0x990   :  { %14617 = vmatprep.subr.bf16.mxu0 %v14616_v31 }
 0x991   :  { %13228 = vmatprep.mubr.f32.mxu1 %v2753_v25 }
 0x992   :  { %13229 = vmatmul.mubr.f32.gmra.mrb[64].mxu1 %v2754_v6 }
 0x993   :  { %3268 = vmatprep.mubr.f32.mxu1 %v16237_v63  ;;  %14619 = vmatpush3.bf16.msra.mxu0 %v14616_v31 }
 0xa10   :  { %v13224_v19 = vpop.f32.mrb[60].mxu1 }
 0xa11   :  { %v2850_v39 = vadd.f32 %v13224_v19, %v11747_v18  ;;  %v2844_v50 = vpop.f32.mrb[61].mxu1 }
 0xa12   :  { %v2845_v16 = vadd.f32 %v11747_v18, %v2844_v50 }
 0xa13   :  { %v2874_v22 = vmul.f32 %v2850_v39, %v2850_v39 }
 0xa14   :  { %v2873_v24 = vmul.f32 %v2845_v16, %v2845_v16 }
 0xa15   :  { %v2880_v37 = vmul.f32 %v2874_v22, %v2850_v39 }
 0xa16   :  { %v2879_v23 = vmul.f32 %v2873_v24, %v2845_v16 }
 0xa17   :  { %v2886_v53 = vmul.f32 0.044715, %v2880_v37 }
 0xa18   :  { %v2885_v56 = vmul.f32 0.044715, %v2879_v23 }
 0xa19   :  { %v2892_v27 = vadd.f32 %v2886_v53, %v2850_v39 }
 0xa1a   :  { %v2891_v58 = vadd.f32 %v2885_v56, %v2845_v16 }
 0xa1b   :  { %v2898_v42 = vmul.f32 0.7978846, %v2892_v27 }
 0xa1c   :  { %v2897_v3 = vmul.f32 0.7978846, %v2891_v58 }
 0xa1d   :  { %15778 = vtanh.f32 %v2898_v42  ;;  %v11748_v42 = vld [vmem:[%s19987_s14] ss:$0 sm:$0xff] }
 0xa1e   :  { %15780 = vtanh.f32 %v2897_v3 }
 0xa27   :  { %v15779_v1 = vpop.eup %15778 }
 0xa28   :  { %v15781_v26 = vpop.eup %15780  ;;  %v2910_v36 = vadd.f32 1.0, %v15779_v1 }
 0xa29   :  { %v2909_v55 = vadd.f32 1.0, %v15781_v26 }
 0xa2a   :  { %v2916_v54 = vmul.f32 0.5, %v2910_v36 }
 0xa2b   :  { %v2915_v14 = vmul.f32 0.5, %v2909_v55 }
 0xa2c   :  { %v2922_v59 = vmul.f32 %v2916_v54, %v2850_v39 }
 0xa2d   :  { %v2921_v11 = vmul.f32 %v2915_v14, %v2845_v16 }
 0xa2f   :  { %13247 = vmatprep.mubr.msk.f32.mxu0 %vm1534_vm8, %v2921_v11 }
 0xa30   :  { %13248 = vmatmul.mubr.msk.f32.vlgmr.msra.gmra.mrb[64].mxu0 %vm1534_vm8, %v2922_v59 }
 0xa3f   :  { %v13227_v57 = vpop.f32.mrb[62].mxu1 }
 0xa40   :  { %v2860_v9 = vadd.f32 %v13227_v57, %v11747_v18  ;;  %v2854_v34 = vpop.f32.mrb[63].mxu1 }
 0xa41   :  { %v2855_v51 = vadd.f32 %v11747_v18, %v2854_v34 }
 0xa42   :  { %v2876_v29 = vmul.f32 %v2860_v9, %v2860_v9 }
 0xa43   :  { %v2875_v49 = vmul.f32 %v2855_v51, %v2855_v51 }
 0xa44   :  { %v2882_v5 = vmul.f32 %v2876_v29, %v2860_v9 }
 0xa45   :  { %v2881_v12 = vmul.f32 %v2875_v49, %v2855_v51 }
 0xa46   :  { %v2888_v61 = vmul.f32 0.044715, %v2882_v5 }
 0xa47   :  { %v2887_v62 = vmul.f32 0.044715, %v2881_v12  ;;  %v3156_v12 = vld [vmem:[#allocation2 + $0x180] sm:$0xff] }
 0xa48   :  { %v2894_v52 = vadd.f32 %v2888_v61, %v2860_v9 }
 0xa49   :  { %v2893_v17 = vadd.f32 %v2887_v62, %v2855_v51  ;;  %v3159_v62 = vld [vmem:[#allocation2 + $0x198] sm:$0xff] }
 0xa4a   :  { %v2900_v21 = vmul.f32 0.7978846, %v2894_v52  ;;  %v3158_v52 = vld [vmem:[#allocation2 + $0x190] sm:$0xff] }
 0xa4b   :  { %v2899_v40 = vmul.f32 0.7978846, %v2893_v17  ;;  %v3161_v17 = vld [vmem:[#allocation2 + $0x1a8] sm:$0xff] }
 0xa4c   :  { %15782 = vtanh.f32 %v2900_v21  ;;  %v14622_v21 = vpack.c.bf16 %v3159_v62, %v3156_v12  ;;  %v3186_v12 = vld [vmem:[#allocation2 + $0x270] sm:$0xff]  ;;  %v3188_v62 = vld [vmem:[#allocation2 + $0x280] sm:$0xff] }
 0xa4d   :  { %15784 = vtanh.f32 %v2899_v40  ;;  %v14652_v40 = vpack.c.bf16 %v3161_v17, %v3158_v52  ;;  %v3191_v17 = vld [vmem:[#allocation2 + $0x298] sm:$0xff] }
 0xa4f   :  { %14653 = vmatprep.subr.bf16.mxu0 %v14652_v40 }
 0xa50   :  { %14655 = vmatpush3.bf16.msra.mxu0 %v14652_v40  ;;  %v3193_v40 = vld [vmem:[#allocation2 + $0x2a8] sm:$0xff] }
 0xa56   :  { %v15783_v10 = vpop.eup %15782 }
 0xa57   :  { %v15785_v47 = vpop.eup %15784  ;;  %v2912_v15 = vadd.f32 1.0, %v15783_v10  ;;  %v3163_v10 = vld [vmem:[#allocation2 + $0x1b8] sm:$0xff] }
 0xa58   :  { %v2911_v25 = vadd.f32 1.0, %v15785_v47  ;;  %v3166_v47 = vld [vmem:[#allocation2 + $0x1d0] sm:$0xff] }
 0xa59   :  { %v2918_v6 = vmul.f32 0.5, %v2912_v15  ;;  %v14624_v15 = vpack.c.bf16 %v3166_v47, %v3163_v10  ;;  %v3196_v10 = vld [vmem:[#allocation2 + $0x2c0] sm:$0xff] }
 0xa5a   :  { %v2917_v41 = vmul.f32 0.5, %v2911_v25  ;;  %v3164_v25 = vld [vmem:[#allocation2 + $0x1c0] sm:$0xff]  ;;  %v14644_v47 = vpack.c.bf16 %v3196_v10, %v3193_v40 }
 0xa5b   :  { %v2924_v45 = vmul.f32 %v2918_v6, %v2860_v9  ;;  %v3167_v6 = vld [vmem:[#allocation2 + $0x1d8] sm:$0xff] }
 0xa5c   :  { %v2923_v13 = vmul.f32 %v2917_v41, %v2855_v51 }
 0xa5e   :  { %13250 = vmatprep.mubr.msk.f32.mxu0 %vm1534_vm8, %v2923_v13  ;;  %v14656_v13 = vpack.c.bf16 %v3167_v6, %v3164_v25  ;;  %v3197_v6 = vld [vmem:[#allocation2 + $0x2c8] sm:$0xff] }
 0xa5f   :  { %13251 = vmatmul.mubr.msk.f32.gmra.mrb[66].mxu0 %vm1534_vm8, %v2924_v45  ;;  %v3169_v45 = vld [vmem:[#allocation2 + $0x1e8] sm:$0xff] }
 0xa60   :  { %14657 = vmatprep.subr.bf16.mxu0 %v14656_v13 }
 0xa61   :  { %14659 = vmatpush3.bf16.msra.mxu0 %v14656_v13  ;;  %v3199_v13 = vld [vmem:[#allocation2 + $0x2d8] sm:$0xff] }
 0xa65   :  { %v13230_v44 = vpop.f32.mrb[64].mxu1 }
 0xa66   :  { %v2870_v30 = vadd.f32 %v13230_v44, %v11747_v18  ;;  %v2864_v2 = vpop.f32.mrb[65].mxu1  ;;  %v3172_v44 = vld [vmem:[#allocation2 + $0x200] sm:$0xff] }
 0xa67   :  { %v2865_v38 = vadd.f32 %v11747_v18, %v2864_v2  ;;  %v14628_v2 = vpack.c.bf16 %v3172_v44, %v3169_v45  ;;  %v3202_v45 = vld [vmem:[#allocation2 + $0x2f0] sm:$0xff] }
 0xa68   :  { %v2878_v48 = vmul.f32 %v2870_v30, %v2870_v30  ;;  %v3198_v44 = vld [vmem:[#allocation2 + $0x2d0] sm:$0xff] }
 0xa69   :  { %v2877_v35 = vmul.f32 %v2865_v38, %v2865_v38 }
 0xa6a   :  { %v2884_v33 = vmul.f32 %v2878_v48, %v2870_v30  ;;  %v3170_v48 = vld [vmem:[#allocation2 + $0x1f0] sm:$0xff] }
 0xa6b   :  { %v2883_v46 = vmul.f32 %v2877_v35, %v2865_v38  ;;  %v3173_v35 = vld [vmem:[#allocation2 + $0x208] sm:$0xff] }
 0xa6c   :  { %v2890_v31 = vmul.f32 0.044715, %v2884_v33  ;;  %v14660_v33 = vpack.c.bf16 %v3173_v35, %v3170_v48  ;;  %v3203_v48 = vld [vmem:[#allocation2 + $0x2f8] sm:$0xff] }
 0xa6d   :  { %v2889_v19 = vmul.f32 0.044715, %v2883_v46 }
 0xa6e   :  { %v2896_v39 = vadd.f32 %v2890_v31, %v2870_v30  ;;  %14661 = vmatprep.subr.bf16.mxu0 %v14660_v33 }
 0xa6f   :  { %v2895_v50 = vadd.f32 %v2889_v19, %v2865_v38  ;;  %14663 = vmatpush3.bf16.msra.mxu0 %v14660_v33 }
 0xa70   :  { %v2902_v16 = vmul.f32 0.7978846, %v2896_v39 }
 0xa71   :  { %v2901_v22 = vmul.f32 0.7978846, %v2895_v50 }
 0xa72   :  { %15786 = vtanh.f32 %v2902_v16 }
 0xa73   :  { %15788 = vtanh.f32 %v2901_v22 }
 0xa7c   :  { %v15787_v24 = vpop.eup %15786 }
 0xa7d   :  { %v15789_v37 = vpop.eup %15788  ;;  %v2914_v23 = vadd.f32 1.0, %v15787_v24 }
 0xa7e   :  { %v2913_v53 = vadd.f32 1.0, %v15789_v37 }
 0xa7f   :  { %v2920_v56 = vmul.f32 0.5, %v2914_v23  ;;  %v3175_v23 = vld [vmem:[#allocation2 + $0x218] sm:$0xff] }
 0xa80   :  { %v2919_v27 = vmul.f32 0.5, %v2913_v53  ;;  %v3178_v53 = vld [vmem:[#allocation2 + $0x230] sm:$0xff] }
 0xa81   :  { %v2926_v18 = vmul.f32 %v2920_v56, %v2870_v30  ;;  %v3168_v30 = vld [vmem:[#allocation2 + $0x1e0] sm:$0xff]  ;;  %v14632_v56 = vpack.c.bf16 %v3178_v53, %v3175_v23 }
 0xa82   :  { %v2925_v58 = vmul.f32 %v2919_v27, %v2865_v38  ;;  %v3171_v38 = vld [vmem:[#allocation2 + $0x1f8] sm:$0xff]  ;;  %v3174_v27 = vld [vmem:[#allocation2 + $0x210] sm:$0xff] }
 0xa83   :  { %v14630_v46 = vpack.c.bf16 %v3171_v38, %v3168_v30  ;;  %v14648_v30 = vpack.c.bf16 %v3202_v45, %v3199_v13  ;;  %v3200_v38 = vld [vmem:[#allocation2 + $0x2e0] sm:$0xff] }
 0xa84   :  { %13253 = vmatprep.mubr.msk.f32.mxu0 %vm1534_vm8, %v2925_v58  ;;  %v3177_v58 = vld [vmem:[#allocation2 + $0x228] sm:$0xff]  ;;  %v14680_v33 = vpack.c.bf16 %v3203_v48, %v3200_v38 }
 0xa85   :  { %13254 = vmatmul.mubr.msk.f32.gmra.mrb[68].mxu0 %vm1534_vm8, %v2926_v18  ;;  %v3176_v18 = vld [vmem:[#allocation2 + $0x220] sm:$0xff] }
 0xb03   :  { %v13249_v3 = vpop.f32.mrb[64].mxu0 }
 0xb04   :  { %v3032_v1 = vadd.f32 %v13249_v3, %v11748_v42  ;;  %v3026_v26 = vpop.f32.mrb[65].mxu0  ;;  %v3179_v3 = vld [vmem:[#allocation2 + $0x238] sm:$0xff] }
 0xb05   :  { %v3027_v36 = vadd.f32 %v11748_v42, %v3026_v26  ;;  %v3181_v26 = vld [vmem:[#allocation2 + $0x248] sm:$0xff] }
 0xb06   :  { %v17275_v55 = vadd.f32 %v3032_v1, %v17154_v20  ;;  %v14664_v1 = vpack.c.bf16 %v3179_v3, %v3176_v18 }
 0xb07   :  { %v17278_v54 = vadd.f32 %v3027_v36, %v17157_v32  ;;  %v3184_v36 = vld [vmem:[#allocation2 + $0x260] sm:$0xff] }
 0xb08   :  { %3067 = vadd.xlane.f32.xlu0 %v17275_v55  ;;  %14665 = vmatprep.subr.bf16.mxu0 %v14664_v1 }
 0xb09   :  { %3065 = vadd.xlane.f32.xlu1 %v17278_v54  ;;  %14667 = vmatpush3.bf16.msra.mxu0 %v14664_v1 }
 0xb32   :  { %v13252_v14 = vpop.f32.mrb[66].mxu0 }
 0xb33   :  { %v3042_v11 = vadd.f32 %v13252_v14, %v11748_v42  ;;  %v3036_v59 = vpop.f32.mrb[67].mxu0  ;;  %v14636_v14 = vpack.c.bf16 %v3184_v36, %v3181_v26 }
 0xb34   :  { %v3037_v57 = vadd.f32 %v11748_v42, %v3036_v59  ;;  %v3183_v59 = vld [vmem:[#allocation2 + $0x258] sm:$0xff] }
 0xb35   :  { %v17283_v9 = vadd.f32 %v3042_v11, %v17166_v60  ;;  %v3160_v60 = vld [vmem:[#allocation2 + $0x1a0] sm:$0xff] }
 0xb36   :  { %v17286_v34 = vadd.f32 %v3037_v57, %v17162_v7  ;;  %v3157_v7 = vld [vmem:[#allocation2 + $0x188] sm:$0xff]  ;;  %v3180_v11 = vld [vmem:[#allocation2 + $0x240] sm:$0xff]  ;;  %v3182_v57 = vld [vmem:[#allocation2 + $0x250] sm:$0xff] }
 0xb37   :  { %3071 = vadd.xlane.f32.xlu0 %v17283_v9  ;;  %v14620_v61 = vpack.c.bf16 %v3160_v60, %v3157_v7  ;;  %v3190_v7 = vld [vmem:[#allocation2 + $0x290] sm:$0xff] }
 0xb38   :  { %3069 = vadd.xlane.f32.xlu1 %v17286_v34 }
 0xb39   :  { %14621 = vmatprep.subr.bf16.mxu1 %v14620_v61  ;;  %v3189_v61 = vld [vmem:[#allocation2 + $0x288] sm:$0xff] }
 0xb3a   :  { %14623 = vmatpush1.bf16.msra.mxu1 %v14622_v21  ;;  %v14642_v52 = vpack.c.bf16 %v3189_v61, %v3186_v12  ;;  %v14672_v21 = vpack.c.bf16 %v3191_v17, %v3188_v62 }
 0xb3b   :  { %14625 = vmatprep.subr.bf16.mxu1 %v14624_v15  ;;  %v3195_v15 = vld [vmem:[#allocation2 + $0x2b8] sm:$0xff] }
 0xb58   :  { %v13255_v20 = vpop.f32.mrb[68].mxu0 }
 0xb59   :  { %v3052_v32 = vadd.f32 %v13255_v20, %v11748_v42  ;;  %v3046_v51 = vpop.f32.mrb[69].mxu0  ;;  %v14638_v20 = vpack.c.bf16 %v3183_v59, %v3180_v11 }
 0xb5a   :  { %v3047_v29 = vadd.f32 %v11748_v42, %v3046_v51  ;;  %v14634_v42 = vpack.c.bf16 %v3177_v58, %v3174_v27 }
 0xb5b   :  { %v17291_v49 = vadd.f32 %v3052_v32, %v17170_v43  ;;  %v3162_v43 = vld [vmem:[#allocation2 + $0x1b0] sm:$0xff]  ;;  %v3185_v32 = vld [vmem:[#allocation2 + $0x268] sm:$0xff] }
 0xb5c   :  { %v17294_v5 = vadd.f32 %v3047_v29, %v17173_v8  ;;  %v3165_v8 = vld [vmem:[#allocation2 + $0x1c8] sm:$0xff]  ;;  %v14668_v51 = vpack.c.bf16 %v3185_v32, %v3182_v57  ;;  %v3187_v29 = vld [vmem:[#allocation2 + $0x278] sm:$0xff]  ;;  %v11757_v32 = vld [vmem:[%s19977_s4 + $0x1] ss:$0 sm:$0xff] }
 0xb5d   :  { %3075 = vadd.xlane.f32.xlu0 %v17291_v49  ;;  %v14626_v41 = vpack.c.bf16 %v3165_v8, %v3162_v43  ;;  %v14640_v60 = vpack.c.bf16 %v3190_v7, %v3187_v29  ;;  %v3192_v43 = vld [vmem:[#allocation2 + $0x2a0] sm:$0xff]  ;;  %v3194_v8 = vld [vmem:[#allocation2 + $0x2b0] sm:$0xff] }
 0xb5e   :  { %3073 = vadd.xlane.f32.xlu1 %v17294_v5  ;;  %14669 = vmatprep.subr.bf16.mxu0 %v14668_v51  ;;  %v14646_v25 = vpack.c.bf16 %v3195_v15, %v3192_v43 }
 0xb5f   :  { %14627 = vmatpush1.bf16.msra.mxu1 %v14626_v41  ;;  %14671 = vmatpush3.bf16.msra.mxu0 %v14668_v51  ;;  %v14676_v41 = vpack.c.bf16 %v3197_v6, %v3194_v8 }
 0xb60   :  { %14629 = vmatprep.subr.bf16.mxu1 %v14628_v2  ;;  %14673 = vmatprep.subr.bf16.mxu0 %v14672_v21  ;;  %v3201_v2 = vld [vmem:[#allocation2 + $0x2e8] sm:$0xff] }
 0xb61   :  { %v14650_v35 = vpack.c.bf16 %v3201_v2, %v3198_v44 }
 0xb63   :  { %14631 = vmatpush1.bf16.msra.mxu1 %v14630_v46  ;;  %14675 = vmatpush3.bf16.msra.mxu0 %v14672_v21 }
 0xb64   :  { %14633 = vmatprep.subr.bf16.mxu1 %v14632_v56  ;;  %14677 = vmatprep.subr.bf16.mxu0 %v14676_v41 }
 0xb67   :  { %14635 = vmatpush1.bf16.msra.mxu1 %v14634_v42  ;;  %14679 = vmatpush3.bf16.msra.mxu0 %v14676_v41 }
 0xb68   :  { %14637 = vmatprep.subr.bf16.mxu1 %v14636_v14  ;;  %14681 = vmatprep.subr.bf16.mxu0 %v14680_v33 }
 0xb6b   :  { %14639 = vmatpush1.bf16.msra.mxu1 %v14638_v20  ;;  %14683 = vmatpush3.bf16.msra.mxu0 %v14680_v33 }
 0xb6c   :  { %14641 = vmatprep.subr.bf16.mxu1 %v14640_v60  ;;  %14684 = vmatprep.subr.bf16.mxu0 %v16238_v4  ;;  %v11758_v60 = vld [vmem:[%s19978_s5 + $0x1] ss:$0 sm:$0xff] }
 0xb6f   :  { %14643 = vmatpush1.bf16.msra.mxu1 %v14642_v52 }
 0xb70   :  { %14645 = vmatprep.subr.bf16.mxu1 %v14644_v47 }
 0xb73   :  { %14647 = vmatpush1.bf16.msra.mxu1 %v14646_v25 }
 0xb74   :  { %14649 = vmatprep.subr.bf16.mxu1 %v14648_v30 }
 0xb77   :  { %14651 = vmatpush1.bf16.msra.mxu1 %v14650_v35 }
 0xb78   :  { %14688 = vmatprep.subr.bf16.mxu1 %v16238_v4 }
 0xb95   :  { %v3068_v31 = vpop.xlane.xlu0 %3067 }
 0xb96   :  { %v3078_v19 = vmul.f32 0.0078125, %v3068_v31  ;;  %v3066_v39 = vpop.xlane.xlu1 %3065 }
 0xb97   :  { %v3077_v50 = vmul.f32 0.0078125, %v3066_v39 }
 0xb98   :  { %v17299_v16 = vsub.f32 %v17275_v55, %v3078_v19 }
 0xb99   :  { %v17302_v22 = vsub.f32 %v17278_v54, %v3077_v50 }
 0xb9a   :  { %v3090_v24 = vmul.f32 %v17299_v16, %v17299_v16 }
 0xb9b   :  { %v3089_v37 = vmul.f32 %v17302_v22, %v17302_v22 }
 0xb9c   :  { %3097 = vadd.xlane.f32.xlu0 %v3090_v24 }
 0xb9d   :  { %3095 = vadd.xlane.f32.xlu1 %v3089_v37 }
 0xbc4   :  { %v3072_v46 = vpop.xlane.xlu0 %3071 }
 0xbc5   :  { %v3080_v31 = vmul.f32 0.0078125, %v3072_v46  ;;  %v3070_v19 = vpop.xlane.xlu1 %3069 }
 0xbc6   :  { %v3079_v39 = vmul.f32 0.0078125, %v3070_v19 }
 0xbc7   :  { %v3086_v50 = vsub.f32 %v17283_v9, %v3080_v31 }
 0xbc8   :  { %v3085_v24 = vsub.f32 %v17286_v34, %v3079_v39 }
 0xbc9   :  { %v3092_v37 = vmul.f32 %v3086_v50, %v3086_v50 }
 0xbca   :  { %v3091_v23 = vmul.f32 %v3085_v24, %v3085_v24 }
 0xbcb   :  { %3101 = vadd.xlane.f32.xlu0 %v3092_v37 }
 0xbcc   :  { %3099 = vadd.xlane.f32.xlu1 %v3091_v23 }
 0xbea   :  { %v3076_v53 = vpop.xlane.xlu0 %3075 }
 0xbeb   :  { %v3082_v56 = vmul.f32 0.0078125, %v3076_v53  ;;  %v3074_v27 = vpop.xlane.xlu1 %3073 }
 0xbec   :  { %v3081_v58 = vmul.f32 0.0078125, %v3074_v27 }
 0xbed   :  { %v3088_v18 = vsub.f32 %v17291_v49, %v3082_v56 }
 0xbee   :  { %v3087_v42 = vsub.f32 %v17294_v5, %v3081_v58 }
 0xbef   :  { %v3094_v3 = vmul.f32 %v3088_v18, %v3088_v18 }
 0xbf0   :  { %v3093_v1 = vmul.f32 %v3087_v42, %v3087_v42 }
 0xbf1   :  { %3105 = vadd.xlane.f32.xlu0 %v3094_v3 }
 0xbf2   :  { %3103 = vadd.xlane.f32.xlu1 %v3093_v1 }
 0xc29   :  { %v3098_v26 = vpop.xlane.xlu0 %3097 }
 0xc2a   :  { %v3108_v36 = vmul.f32 0.0078125, %v3098_v26  ;;  %v3096_v14 = vpop.xlane.xlu1 %3095 }
 0xc2b   :  { %v3107_v11 = vmul.f32 0.0078125, %v3096_v14 }
 0xc2c   :  { %v3114_v59 = vadd.f32 1e-05, %v3108_v36 }
 0xc2d   :  { %v3113_v57 = vadd.f32 1e-05, %v3107_v11 }
 0xc2e   :  { %15790 = vrsqrt.f32 %v3114_v59 }
 0xc2f   :  { %15792 = vrsqrt.f32 %v3113_v57 }
 0xc38   :  { %v15791_v20 = vpop.eup %15790 }
 0xc39   :  { %v15793_v51 = vpop.eup %15792  ;;  %v3126_v29 = vmul.f32 %v15791_v20, %v17299_v16 }
 0xc3a   :  { %v3125_v7 = vmul.f32 %v15793_v51, %v17302_v22 }
 0xc3b   :  { %v3138_v12 = vmul.f32 %v11757_v32, %v3126_v29 }
 0xc3c   :  { %v3137_v61 = vmul.f32 %v11757_v32, %v3125_v7 }
 0xc3d   :  { %v3150_v52 = vadd.f32 %v11758_v60, %v3138_v12 }
 0xc3e   :  { %v3149_v62 = vadd.f32 %v11758_v60, %v3137_v61 }
 0xc40   :  { %3269 = vmatmul.mubr.f32.vlgmr.msra.gmra.mrb[66].mxu1 %v3149_v62  ;;  %13288 = vmatprep.mubr.f32.mxu0 %v3149_v62 }
 0xc41   :  { %13289 = vmatmul.mubr.f32.vlgmr.msra.gmra.mrb[70].mxu0 %v3150_v52  ;;  %3274 = vmatprep.mubr.f32.mxu1 %v16237_v63 }
 0xc44   :  { %3275 = vmatmul.mubr.f32.gmra.mrb[68].mxu1 %v3150_v52 }
 0xc45   :  { %3280 = vmatprep.mubr.f32.mxu1 %v16237_v63 }
 0xc58   :  { %v3102_v17 = vpop.xlane.xlu0 %3101 }
 0xc59   :  { %v3110_v16 = vmul.f32 0.0078125, %v3102_v17  ;;  %v3100_v21 = vpop.xlane.xlu1 %3099 }
 0xc5a   :  { %v3109_v22 = vmul.f32 0.0078125, %v3100_v21 }
 0xc5b   :  { %v3116_v40 = vadd.f32 1e-05, %v3110_v16 }
 0xc5c   :  { %v3115_v10 = vadd.f32 1e-05, %v3109_v22 }
 0xc5d   :  { %15794 = vrsqrt.f32 %v3116_v40 }
 0xc5e   :  { %15796 = vrsqrt.f32 %v3115_v10 }
 0xc67   :  { %v15795_v47 = vpop.eup %15794 }
 0xc68   :  { %v15797_v43 = vpop.eup %15796  ;;  %v3128_v15 = vmul.f32 %v15795_v47, %v3086_v50 }
 0xc69   :  { %v3127_v8 = vmul.f32 %v15797_v43, %v3085_v24 }
 0xc6a   :  { %v3140_v25 = vmul.f32 %v11757_v32, %v3128_v15 }
 0xc6b   :  { %v3139_v6 = vmul.f32 %v11757_v32, %v3127_v8 }
 0xc6c   :  { %v3152_v13 = vadd.f32 %v11758_v60, %v3140_v25 }
 0xc6d   :  { %v3151_v41 = vadd.f32 %v11758_v60, %v3139_v6 }
 0xc6f   :  { %3281 = vmatmul.mubr.f32.gmra.mrb[70].mxu1 %v3151_v41  ;;  %13291 = vmatprep.mubr.f32.mxu0 %v3151_v41 }
 0xc70   :  { %13292 = vmatmul.mubr.f32.gmra.mrb[72].mxu0 %v3152_v13  ;;  %3286 = vmatprep.mubr.f32.mxu1 %v16237_v63 }
 0xc73   :  { %3287 = vmatmul.mubr.f32.gmra.mrb[72].mxu1 %v3152_v13 }
 0xc74   :  { %3292 = vmatprep.mubr.f32.mxu1 %v16237_v63 }
 0xc7e   :  { %v3106_v45 = vpop.xlane.xlu0 %3105 }
 0xc7f   :  { %v3112_v44 = vmul.f32 0.0078125, %v3106_v45  ;;  %v3104_v30 = vpop.xlane.xlu1 %3103 }
 0xc80   :  { %v3111_v2 = vmul.f32 0.0078125, %v3104_v30 }
 0xc81   :  { %v3118_v38 = vadd.f32 1e-05, %v3112_v44 }
 0xc82   :  { %v3117_v48 = vadd.f32 1e-05, %v3111_v2 }
 0xc83   :  { %15798 = vrsqrt.f32 %v3118_v38 }
 0xc84   :  { %15800 = vrsqrt.f32 %v3117_v48 }
 0xc8d   :  { %v15799_v35 = vpop.eup %15798 }
 0xc8e   :  { %v15801_v33 = vpop.eup %15800  ;;  %v3130_v46 = vmul.f32 %v15799_v35, %v3088_v18 }
 0xc8f   :  { %v3129_v31 = vmul.f32 %v15801_v33, %v3087_v42 }
 0xc90   :  { %v3142_v19 = vmul.f32 %v11757_v32, %v3130_v46 }
 0xc91   :  { %v3141_v39 = vmul.f32 %v11757_v32, %v3129_v31 }
 0xc92   :  { %v3154_v24 = vadd.f32 %v11758_v60, %v3142_v19 }
 0xc93   :  { %v3153_v50 = vadd.f32 %v11758_v60, %v3141_v39 }
 0xc95   :  { %3293 = vmatmul.mubr.f32.gmra.mrb[74].mxu1 %v3153_v50  ;;  %13294 = vmatprep.mubr.f32.mxu0 %v3153_v50 }
 0xc96   :  { %13295 = vmatmul.mubr.f32.gmra.mrb[74].mxu0 %v3154_v24  ;;  %3298 = vmatprep.mubr.f32.mxu1 %v16237_v63 }
 0xc97   :  { %13303 = vmatprep.mubr.msk.f32.mxu0 %vm16239_vm3, %v16237_v63 }
 0xc99   :  { %3299 = vmatmul.mubr.f32.gmra.mrb[76].mxu1 %v3154_v24 }
 0xc9a   :  { %13318 = vmatprep.mubr.msk.f32.mxu1 %vm16239_vm3, %v16237_v63 }
 0xd13   :  { %v3270_v37 = vpop.f32.mrb[66].mxu1 }
 0xd14   :  { %v3272_v23 = vpop.f32.mrb[67].mxu1  ;;  %v13290_v53 = vpop.f32.mrb[70].mxu0 }
 0xd15   :  { %v3371_v56 = vpop.f32.mrb[71].mxu0 }
 0xd16   :  { %v17331_v27 = vpack.i.bf16 %v13290_v53, %v3371_v56  ;;  %v14689_v58 = vpack.c.bf16 %v13290_v53, %v3371_v56 }
 0xd17   :  { %v3276_v18 = vpop.f32.mrb[68].mxu1 }
 0xd18   :  { %v3278_v42 = vpop.f32.mrb[69].mxu1  ;;  %14690 = vmatpush3.bf16.msra.mxu1 %v14689_v58 }
 0xd19   :  { %v15353_v3 = vpack.i.bf16 %v3278_v42, %v3272_v23  ;;  %v14685_v1 = vpack.c.bf16 %v3278_v42, %v3272_v23  ;;  %13316 = vmatprep.subr.mxu1 %v16237_v63 }
 0xd1b   :  { %15344 = vrot.lane.b32.xlu1 %v15353_v3, %s16241_s16  ;;  %14687 = vmatpush3.bf16.xpose.msk.msra.mxu0 %vm16437_vm5, %v14685_v1 }
 0xd1c   :  { %13301 = vmatprep.subr.mxu0 %v16237_v63 }
 0xd1f   :  { %15349 = vrot.lane.b32.xlu1 %v15353_v3, %s16240_s30 }
 0xd23   :  { %3626 = vrot.lane.b32.xlu1 %v3270_v37, %s16241_s16 }
 0xd27   :  { %3628 = vrot.lane.b32.xlu1 %v3276_v18, %s16241_s16 }
 0xd42   :  { %v3282_v26 = vpop.f32.mrb[70].mxu1 }
 0xd43   :  { %v3284_v36 = vpop.f32.mrb[71].mxu1  ;;  %v17341_v14 = vpop.f32.mrb[72].mxu0 }
 0xd44   :  { %v3381_v11 = vpop.f32.mrb[73].mxu0  ;;  %3880 = vrot.lane.b32.xlu1 %v3284_v36, %s16240_s30  ;;  %3636 = vrot.lane.b32.xlu0 %v3284_v36, %s16241_s16 }
 0xd45   :  { %13302 = vmatpush3.xpose.msk.msra.mxu0 %vm541_vm4, %v3284_v36  ;;  %13317 = vmatpush3.msra.mxu1 %v3381_v11 }
 0xd46   :  { %v17346_v59 = vpop.f32.mrb[72].mxu1  ;;  %14691 = vmatprep.subr.bf16.mxu0 %v16238_v4  ;;  %14695 = vmatprep.subr.bf16.mxu1 %v16238_v4 }
 0xd47   :  { %v17350_v57 = vpop.f32.mrb[73].mxu1 }
 0xd48   :  { %13304 = vmatmul.mubr.msk.f32.vlgmr.msra.gmra.mrb[76].mxu0 %vm541_vm4, %v3270_v37  ;;  %3870 = vrot.lane.b32.xlu1 %v3270_v37, %s16240_s30 }
 0xd49   :  { %3630 = vrot.lane.b32.xlu0 %v3282_v26, %s16241_s16  ;;  %13306 = vmatprep.mubr.msk.f32.mxu0 %vm16239_vm3, %v16237_v63 }
 0xd4c   :  { %13307 = vmatmul.mubr.msk.f32.gmra.mrb[78].mxu0 %vm541_vm4, %v3276_v18  ;;  %3874 = vrot.lane.b32.xlu1 %v3282_v26, %s16240_s30 }
 0xd4d   :  { %15354 = vrot.lane.b32.xlu0 %v15353_v3, %s16242_s17  ;;  %13309 = vmatprep.mubr.msk.f32.mxu0 %vm16239_vm3, %v16237_v63 }
 0xd50   :  { %13310 = vmatmul.mubr.msk.f32.gmra.mrb[80].mxu0 %vm541_vm4, %v3282_v26  ;;  %4111 = vrot.lane.b32.xlu1 %v3270_v37, %s16242_s17 }
 0xd51   :  { %3872 = vrot.lane.b32.xlu0 %v3276_v18, %s16240_s30  ;;  %13333 = vmatprep.mubr.msk.f32.mxu0 %vm16239_vm3, %v16237_v63 }
 0xd54   :  { %4115 = vrot.lane.b32.xlu1 %v3282_v26, %s16242_s17 }
 0xd55   :  { %4121 = vrot.lane.b32.xlu0 %v3284_v36, %s16242_s17 }
 0xd59   :  { %4113 = vrot.lane.b32.xlu0 %v3276_v18, %s16242_s17 }
 0xd68   :  { %v17370_v20 = vpop.f32.mrb[74].mxu1 }
 0xd69   :  { %v17372_v32 = vpop.f32.mrb[75].mxu1  ;;  %v17374_v51 = vpop.f32.mrb[74].mxu0 }
 0xd6a   :  { %v15368_v29 = vpack.i.bf16 %v17372_v32, %v17350_v57  ;;  %v14713_v7 = vpack.c.bf16 %v17372_v32, %v17350_v57  ;;  %v17380_v60 = vpop.f32.mrb[75].mxu0 }
 0xd6b   :  { %v17384_v12 = vpack.i.bf16 %v17380_v60, %v17341_v14  ;;  %v14717_v61 = vpack.c.bf16 %v17380_v60, %v17341_v14 }
 0xd6c   :  { %15359 = vrot.lane.b32.xlu0 %v15368_v29, %s16241_s16  ;;  %v17389_v62 = vpop.f32.mrb[76].mxu1 }
 0xd6d   :  { %v17391_v52 = vpop.f32.mrb[77].mxu1 }
 0xd6e   :  { %4633 = vrot.lane.b32.xlu1 %v17391_v52, %s16241_s16 }
 0xd70   :  { %15364 = vrot.lane.b32.xlu0 %v15368_v29, %s16240_s30 }
 0xd72   :  { %4623 = vrot.lane.b32.xlu1 %v17346_v59, %s16241_s16 }
 0xd74   :  { %4625 = vrot.lane.b32.xlu0 %v17370_v20, %s16241_s16 }
 0xd76   :  { %4627 = vrot.lane.b32.xlu1 %v17389_v62, %s16241_s16 }
 0xd78   :  { %4877 = vrot.lane.b32.xlu0 %v17391_v52, %s16240_s30 }
 0xd7a   :  { %15369 = vrot.lane.b32.xlu1 %v15368_v29, %s16242_s17 }
 0xd7c   :  { %4867 = vrot.lane.b32.xlu0 %v17346_v59, %s16240_s30 }
 0xd7e   :  { %4869 = vrot.lane.b32.xlu1 %v17370_v20, %s16240_s30 }
 0xd80   :  { %4871 = vrot.lane.b32.xlu0 %v17389_v62, %s16240_s30 }
 0xd82   :  { %5118 = vrot.lane.b32.xlu1 %v17391_v52, %s16242_s17 }
 0xd84   :  { %5108 = vrot.lane.b32.xlu0 %v17346_v59, %s16242_s17 }
 0xd86   :  { %5110 = vrot.lane.b32.xlu1 %v17370_v20, %s16242_s17 }
 0xd88   :  { %5112 = vrot.lane.b32.xlu0 %v17389_v62, %s16242_s17 }
 0xd8a   :  { %3776 = vrot.lane.b32.xlu1 %v3381_v11, %s16241_s16 }
 0xd8c   :  { %15374 = vrot.lane.b32.xlu0 %v17331_v27, %s16241_s16 }
 0xd8d   :  { %v15345_v17 = vpop.permute.xlu1 %15344 }
 0xd8e   :  { %v15347_v16 = vunpack.i.h.bf16 %v15345_v17  ;;  %v15346_v21 = vunpack.i.l.bf16 %v15345_v17  ;;  %15379 = vrot.lane.b32.xlu1 %v17331_v27, %s16240_s30 }
 0xd90   :  { %v14692_v22 = vpack.c.bf16 %v15347_v16, %v15346_v21  ;;  %4017 = vrot.lane.b32.xlu0 %v3381_v11, %s16240_s30 }
 0xd91   :  { %v15350_v40 = vpop.permute.xlu1 %15349 }
 0xd92   :  { %14694 = vmatpush3.bf16.xpose.msk.msra.mxu0 %vm16437_vm5, %v14692_v22  ;;  %v15352_v10 = vunpack.i.h.bf16 %v15350_v40  ;;  %v15351_v47 = vunpack.i.l.bf16 %v15350_v40 }
 0xd93   :  { %13331 = vmatprep.subr.mxu0 %v16237_v63 }
 0xd94   :  { %4258 = vrot.lane.b32.xlu0 %v3381_v11, %s16242_s17  ;;  %v14699_v8 = vpack.c.bf16 %v15352_v10, %v15351_v47 }
 0xd95   :  { %v3627_v43 = vpop.permute.xlu1 %3626 }
 0xd99   :  { %v3629_v25 = vpop.permute.xlu1 %3628 }
 0xdb6   :  { %v3637_v15 = vpop.permute.xlu0 %3636  ;;  %v3881_v41 = vpop.permute.xlu1 %3880 }
 0xdb7   :  { %13332 = vmatpush3.xpose.msk.msra.mxu0 %vm541_vm4, %v3637_v15 }
 0xdb8   :  { %14698 = vmatprep.subr.bf16.mxu0 %v16238_v4 }
 0xdba   :  { %13334 = vmatmul.mubr.msk.f32.vlgmr.msra.gmra.mrb[82].mxu0 %vm541_vm4, %v3627_v43  ;;  %v3871_v30 = vpop.permute.xlu1 %3870 }
 0xdbb   :  { %v3631_v6 = vpop.permute.xlu0 %3630  ;;  %14701 = vmatpush3.bf16.xpose.msk.msra.mxu0 %vm16437_vm5, %v14699_v8  ;;  %13336 = vmatprep.mubr.msk.f32.mxu0 %vm16239_vm3, %v16237_v63 }
 0xdbc   :  { %13361 = vmatprep.subr.mxu0 %v16237_v63 }
 0xdbe   :  { %13337 = vmatmul.mubr.msk.f32.gmra.mrb[84].mxu0 %vm541_vm4, %v3629_v25  ;;  %v3875_v48 = vpop.permute.xlu1 %3874 }
 0xdbf   :  { %v15355_v13 = vpop.permute.xlu0 %15354  ;;  %13339 = vmatprep.mubr.msk.f32.mxu0 %vm16239_vm3, %v16237_v63 }
 0xdc0   :  { %v15357_v45 = vunpack.i.h.bf16 %v15355_v13  ;;  %v15356_v44 = vunpack.i.l.bf16 %v15355_v13 }
 0xdc2   :  { %13340 = vmatmul.mubr.msk.f32.gmra.mrb[86].mxu0 %vm541_vm4, %v3631_v6  ;;  %v14706_v2 = vpack.c.bf16 %v15357_v45, %v15356_v44  ;;  %v4112_v33 = vpop.permute.xlu1 %4111 }
 0xdc3   :  { %13362 = vmatpush3.xpose.msk.msra.mxu0 %vm541_vm4, %v3881_v41  ;;  %13363 = vmatprep.mubr.msk.f32.mxu0 %vm16239_vm3, %v16237_v63  ;;  %v3873_v38 = vpop.permute.xlu0 %3872 }
 0xdc4   :  { %14705 = vmatprep.subr.bf16.mxu0 %v16238_v4 }
 0xdc6   :  { %13364 = vmatmul.mubr.msk.f32.vlgmr.msra.gmra.mrb[88].mxu0 %vm541_vm4, %v3871_v30  ;;  %v4116_v31 = vpop.permute.xlu1 %4115 }
 0xdc7   :  { %14708 = vmatpush3.bf16.xpose.msk.msra.mxu0 %vm16437_vm5, %v14706_v2  ;;  %13366 = vmatprep.mubr.msk.f32.mxu0 %vm16239_vm3, %v16237_v63  ;;  %v4122_v35 = vpop.permute.xlu0 %4121 }
 0xdc8   :  { %13391 = vmatprep.subr.mxu0 %v16237_v63 }
 0xdca   :  { %13367 = vmatmul.mubr.msk.f32.gmra.mrb[90].mxu0 %vm541_vm4, %v3873_v38 }
 0xdcb   :  { %13369 = vmatprep.mubr.msk.f32.mxu0 %vm16239_vm3, %v16237_v63  ;;  %v4114_v46 = vpop.permute.xlu0 %4113 }
 0xdce   :  { %13370 = vmatmul.mubr.msk.f32.gmra.mrb[92].mxu0 %vm541_vm4, %v3875_v48 }
 0xdcf   :  { %13392 = vmatpush3.xpose.msk.msra.mxu0 %vm541_vm4, %v4122_v35  ;;  %13393 = vmatprep.mubr.msk.f32.mxu0 %vm16239_vm3, %v16237_v63 }
 0xdd0   :  { %14712 = vmatprep.subr.bf16.mxu0 %v16238_v4 }
 0xdd2   :  { %13394 = vmatmul.mubr.msk.f32.vlgmr.msra.gmra.mrb[94].mxu0 %vm541_vm4, %v4112_v33 }
 0xdd3   :  { %14715 = vmatpush3.bf16.xpose.msk.msra.mxu0 %vm16437_vm5, %v14713_v7  ;;  %13396 = vmatprep.mubr.msk.f32.mxu0 %vm16239_vm3, %v16237_v63 }
 0xdd4   :  { %13421 = vmatprep.subr.mxu0 %v16237_v63 }
 0xdd6   :  { %13397 = vmatmul.mubr.msk.f32.gmra.mrb[96].mxu0 %vm541_vm4, %v4114_v46 }
 0xdd7   :  { %13399 = vmatprep.mubr.msk.f32.mxu0 %vm16239_vm3, %v16237_v63 }
 0xdda   :  { %13400 = vmatmul.mubr.msk.f32.gmra.mrb[98].mxu0 %vm541_vm4, %v4116_v31 }
 0xddb   :  { %13422 = vmatpush3.xpose.msk.msra.mxu0 %vm541_vm4, %v17391_v52  ;;  %13423 = vmatprep.mubr.msk.f32.mxu0 %vm16239_vm3, %v16237_v63 }
 0xddc   :  { %14719 = vmatprep.subr.bf16.mxu0 %v16238_v4 }
 0xdde   :  { %v15360_v19 = vpop.permute.xlu0 %15359  ;;  %13424 = vmatmul.mubr.msk.f32.vlgmr.msra.gmra.mrb[100].mxu0 %vm541_vm4, %v17346_v59 }
 0xddf   :  { %v15362_v39 = vunpack.i.h.bf16 %v15360_v19  ;;  %v15361_v50 = vunpack.i.l.bf16 %v15360_v19  ;;  %13426 = vmatprep.mubr.msk.f32.mxu0 %vm16239_vm3, %v16237_v63 }
 0xde0   :  { %v4634_v24 = vpop.permute.xlu1 %4633 }
 0xde1   :  { %v14720_v37 = vpack.c.bf16 %v15362_v39, %v15361_v50 }
 0xde2   :  { %13427 = vmatmul.mubr.msk.f32.gmra.mrb[102].mxu0 %vm541_vm4, %v17370_v20  ;;  %v15365_v23 = vpop.permute.xlu0 %15364 }
 0xde3   :  { %14722 = vmatpush3.bf16.xpose.msk.msra.mxu0 %vm16437_vm5, %v14720_v37  ;;  %13429 = vmatprep.mubr.msk.f32.mxu0 %vm16239_vm3, %v16237_v63  ;;  %v15367_v56 = vunpack.i.h.bf16 %v15365_v23  ;;  %v15366_v58 = vunpack.i.l.bf16 %v15365_v23 }
 0xde4   :  { %13451 = vmatprep.subr.mxu0 %v16237_v63  ;;  %v4624_v53 = vpop.permute.xlu1 %4623 }
 0xde5   :  { %v14727_v42 = vpack.c.bf16 %v15367_v56, %v15366_v58 }
 0xde6   :  { %13430 = vmatmul.mubr.msk.f32.gmra.mrb[104].mxu0 %vm541_vm4, %v17389_v62  ;;  %v4626_v3 = vpop.permute.xlu0 %4625 }
 0xde7   :  { %13453 = vmatprep.mubr.msk.f32.mxu0 %vm16239_vm3, %v16237_v63 }
 0xde8   :  { %v4628_v18 = vpop.permute.xlu1 %4627 }
 0xdea   :  { %v4878_v26 = vpop.permute.xlu0 %4877 }
 0xdeb   :  { %13452 = vmatpush3.xpose.msk.msra.mxu0 %vm541_vm4, %v4634_v24 }
 0xdec   :  { %14726 = vmatprep.subr.bf16.mxu0 %v16238_v4  ;;  %v15370_v1 = vpop.permute.xlu1 %15369 }
 0xded   :  { %v15372_v36 = vunpack.i.h.bf16 %v15370_v1  ;;  %v15371_v11 = vunpack.i.l.bf16 %v15370_v1 }
 0xdee   :  { %13454 = vmatmul.mubr.msk.f32.vlgmr.msra.gmra.mrb[106].mxu0 %vm541_vm4, %v4624_v53  ;;  %v4868_v57 = vpop.permute.xlu0 %4867 }
 0xdef   :  { %14729 = vmatpush3.bf16.xpose.msk.msra.mxu0 %vm16437_vm5, %v14727_v42  ;;  %13456 = vmatprep.mubr.msk.f32.mxu0 %vm16239_vm3, %v16237_v63  ;;  %v14734_v59 = vpack.c.bf16 %v15372_v36, %v15371_v11 }
 0xdf0   :  { %13481 = vmatprep.subr.mxu0 %v16237_v63  ;;  %v4870_v20 = vpop.permute.xlu1 %4869 }
 0xdf2   :  { %13457 = vmatmul.mubr.msk.f32.gmra.mrb[108].mxu0 %vm541_vm4, %v4626_v3  ;;  %v4872_v32 = vpop.permute.xlu0 %4871 }
 0xdf3   :  { %13459 = vmatprep.mubr.msk.f32.mxu0 %vm16239_vm3, %v16237_v63 }
 0xdf4   :  { %v5119_v29 = vpop.permute.xlu1 %5118 }
 0xdf6   :  { %13460 = vmatmul.mubr.msk.f32.gmra.mrb[110].mxu0 %vm541_vm4, %v4628_v18  ;;  %v5109_v7 = vpop.permute.xlu0 %5108 }
 0xdf7   :  { %13482 = vmatpush3.xpose.msk.msra.mxu0 %vm541_vm4, %v4878_v26  ;;  %13483 = vmatprep.mubr.msk.f32.mxu0 %vm16239_vm3, %v16237_v63 }
 0xdf8   :  { %14733 = vmatprep.subr.bf16.mxu0 %v16238_v4  ;;  %v5111_v62 = vpop.permute.xlu1 %5110 }
 0xdfa   :  { %13484 = vmatmul.mubr.msk.f32.vlgmr.msra.gmra.mrb[112].mxu0 %vm541_vm4, %v4868_v57  ;;  %v5113_v52 = vpop.permute.xlu0 %5112 }
 0xdfb   :  { %14736 = vmatpush3.bf16.xpose.msk.msra.mxu0 %vm16437_vm5, %v14734_v59  ;;  %13486 = vmatprep.mubr.msk.f32.mxu0 %vm16239_vm3, %v16237_v63 }
 0xdfc   :  { %13511 = vmatprep.subr.mxu0 %v16237_v63 }
 0xdfe   :  { %13487 = vmatmul.mubr.msk.f32.gmra.mrb[114].mxu0 %vm541_vm4, %v4870_v20  ;;  %v17572_v26 = vpop.permute.xlu0 %15374 }
 0xdff   :  { %13489 = vmatprep.mubr.msk.f32.mxu0 %vm16239_vm3, %v16237_v63 }
 0xe02   :  { %13490 = vmatmul.mubr.msk.f32.gmra.mrb[116].mxu0 %vm541_vm4, %v4872_v32  ;;  %v17580_v32 = vpop.permute.xlu1 %3776 }
 0xe03   :  { %13512 = vmatpush3.xpose.msk.msra.mxu0 %vm541_vm4, %v5119_v29  ;;  %13513 = vmatprep.mubr.msk.f32.mxu0 %vm16239_vm3, %v16237_v63 }
 0xe06   :  { %13514 = vmatmul.mubr.msk.f32.vlgmr.msra.gmra.mrb[118].mxu0 %vm541_vm4, %v5109_v7 }
 0xe07   :  { %13516 = vmatprep.mubr.msk.f32.mxu0 %vm16239_vm3, %v16237_v63 }
 0xe0a   :  { %13517 = vmatmul.mubr.msk.f32.gmra.mrb[120].mxu0 %vm541_vm4, %v5111_v62 }
 0xe0b   :  { %13519 = vmatprep.mubr.msk.f32.mxu0 %vm16239_vm3, %v16237_v63 }
 0xe0e   :  { %13520 = vmatmul.mubr.msk.f32.gmra.mrb[122].mxu0 %vm541_vm4, %v5113_v52  ;;  %v17588_v52 = vpop.permute.xlu0 %4017 }
 0xe1b   :  { %v3484_v17 = vpop.f32.mrb[76].mxu0 }
 0xe1c   :  { %v3498_v16 = vmul.f32 0.088388346, %v3484_v17  ;;  %v13305_v21 = vpop.f32.mrb[77].mxu0 }
 0xe1e   :  { %v17530_v22 = vsel %vm203_vm6, %v3498_v16, -1e+30 }
 0xe1f   :  { %v3489_v40 = vpop.f32.mrb[78].mxu0  ;;  %v3504_v10 = vsel %vm646_vm7, %v17530_v22, -inf }
 0xe20   :  { %v3499_v47 = vmul.f32 0.088388346, %v3489_v40  ;;  %v13308_v43 = vpop.f32.mrb[79].mxu0  ;;  %3505 = vmax.xlane.f32.xlu1 %v3504_v10  ;;  %v17594_v40 = vpop.permute.xlu1 %15379 }
 0xe22   :  { %v17536_v15 = vsel %vm203_vm6, %v3499_v47, -1e+30 }
 0xe23   :  { %v3494_v8 = vpop.f32.mrb[80].mxu0  ;;  %v3507_v25 = vsel %vm646_vm7, %v17536_v15, -inf }
 0xe24   :  { %v3500_v6 = vmul.f32 0.088388346, %v3494_v8  ;;  %v13311_v41 = vpop.f32.mrb[81].mxu0  ;;  %3508 = vmax.xlane.f32.xlu0 %v3507_v25  ;;  %v17598_v25 = vpop.permute.xlu0 %4258 }
 0xe26   :  { %v17542_v13 = vsel %vm203_vm6, %v3500_v6, -1e+30 }
 0xe27   :  { %v3510_v45 = vsel %vm646_vm7, %v17542_v13, -inf }
 0xe28   :  { %3511 = vmax.xlane.f32.xlu0 %v3510_v45 }
 0xe31   :  { %15384 = vrot.lane.b32.xlu1 %v17331_v27, %s16242_s17 }
 0xe8d   :  { %v3716_v44 = vpop.f32.mrb[82].mxu0 }
 0xe8e   :  { %v3730_v30 = vmul.f32 0.088388346, %v3716_v44  ;;  %v13335_v2 = vpop.f32.mrb[83].mxu0 }
 0xe90   :  { %v17550_v38 = vsel %vm203_vm6, %v3730_v30, -1e+30 }
 0xe91   :  { %v3721_v48 = vpop.f32.mrb[84].mxu0  ;;  %v3736_v35 = vsel %vm646_vm7, %v17550_v38, -inf }
 0xe92   :  { %v3731_v33 = vmul.f32 0.088388346, %v3721_v48  ;;  %3737 = vmax.xlane.f32.xlu0 %v3736_v35  ;;  %v13338_v46 = vpop.f32.mrb[85].mxu0 }
 0xe94   :  { %v17556_v31 = vsel %vm203_vm6, %v3731_v33, -1e+30 }
 0xe95   :  { %v3726_v19 = vpop.f32.mrb[86].mxu0  ;;  %v3739_v27 = vsel %vm646_vm7, %v17556_v31, -inf }
 0xe96   :  { %v3732_v39 = vmul.f32 0.088388346, %v3726_v19  ;;  %3740 = vmax.xlane.f32.xlu1 %v3739_v27  ;;  %v13341_v50 = vpop.f32.mrb[87].mxu0 }
 0xe98   :  { %v17562_v24 = vsel %vm203_vm6, %v3732_v39, -1e+30 }
 0xe99   :  { %v3960_v37 = vpop.f32.mrb[88].mxu0  ;;  %v3742_v23 = vsel %vm646_vm7, %v17562_v24, -inf }
 0xe9a   :  { %v3974_v53 = vmul.f32 0.088388346, %v3960_v37  ;;  %3743 = vmax.xlane.f32.xlu0 %v3742_v23  ;;  %v13365_v56 = vpop.f32.mrb[89].mxu0 }
 0xe9c   :  { %v17568_v58 = vsel %vm203_vm6, %v3974_v53, -1e+30 }
 0xe9d   :  { %v3965_v18 = vpop.f32.mrb[90].mxu0  ;;  %v3980_v42 = vsel %vm646_vm7, %v17568_v58, -inf }
 0xe9e   :  { %v3975_v3 = vmul.f32 0.088388346, %v3965_v18  ;;  %3981 = vmax.xlane.f32.xlu1 %v3980_v42  ;;  %v13368_v1 = vpop.f32.mrb[91].mxu0 }
 0xea0   :  { %v17576_v36 = vsel %vm203_vm6, %v3975_v3, -1e+30 }
 0xea1   :  { %v3970_v11 = vpop.f32.mrb[92].mxu0  ;;  %v3983_v59 = vsel %vm646_vm7, %v17576_v36, -inf }
 0xea2   :  { %v3976_v57 = vmul.f32 0.088388346, %v3970_v11  ;;  %3984 = vmax.xlane.f32.xlu0 %v3983_v59  ;;  %v13371_v20 = vpop.f32.mrb[93].mxu0 }
 0xea4   :  { %v17584_v29 = vsel %vm203_vm6, %v3976_v57, -1e+30 }
 0xea5   :  { %v4201_v7 = vpop.f32.mrb[94].mxu0  ;;  %v3986_v62 = vsel %vm646_vm7, %v17584_v29, -inf }
 0xea6   :  { %v4215_v17 = vmul.f32 0.088388346, %v4201_v7  ;;  %3987 = vmax.xlane.f32.xlu1 %v3986_v62  ;;  %v13395_v16 = vpop.f32.mrb[95].mxu0 }
 0xea8   :  { %v17592_v21 = vsel %vm203_vm6, %v4215_v17, -1e+30 }
 0xea9   :  { %v4206_v10 = vpop.f32.mrb[96].mxu0  ;;  %v4221_v47 = vsel %vm646_vm7, %v17592_v21, -inf }
 0xeaa   :  { %v4216_v43 = vmul.f32 0.088388346, %v4206_v10  ;;  %4222 = vmax.xlane.f32.xlu0 %v4221_v47  ;;  %v13398_v8 = vpop.f32.mrb[97].mxu0 }
 0xeac   :  { %v17602_v6 = vsel %vm203_vm6, %v4216_v43, -1e+30 }
 0xead   :  { %v3506_v41 = vpop.xlane.xlu1 %3505  ;;  %v4211_v45 = vpop.f32.mrb[98].mxu0  ;;  %v4224_v44 = vsel %vm646_vm7, %v17602_v6, -inf }
 0xeae   :  { %v3513_v30 = vsub.f32 %v17530_v22, %v3506_v41  ;;  %v4217_v2 = vmul.f32 0.088388346, %v4211_v45  ;;  %4225 = vmax.xlane.f32.xlu1 %v4224_v44  ;;  %v13401_v48 = vpop.f32.mrb[99].mxu0 }
 0xeb0   :  { %v3516_v35 = vmul.f32 1.442695, %v3513_v30  ;;  %v17609_v33 = vsel %vm203_vm6, %v4217_v2, -1e+30 }
 0xeb1   :  { %v3509_v46 = vpop.xlane.xlu0 %3508  ;;  %v4227_v19 = vsel %vm646_vm7, %v17609_v33, -inf  ;;  %v4481_v39 = vpop.f32.mrb[100].mxu0 }
 0xeb2   :  { %15802 = vpow2.f32 %v3516_v35  ;;  %v3514_v27 = vsub.f32 %v17536_v15, %v3509_v46  ;;  %4228 = vmax.xlane.f32.xlu0 %v4227_v19  ;;  %v4495_v50 = vmul.f32 0.088388346, %v4481_v39  ;;  %v13425_v37 = vpop.f32.mrb[101].mxu0 }
 0xeb4   :  { %v3518_v22 = vmul.f32 1.442695, %v3514_v27  ;;  %v17616_v23 = vsel %vm203_vm6, %v4495_v50, -1e+30 }
 0xeb5   :  { %v3512_v53 = vpop.xlane.xlu0 %3511  ;;  %v4486_v56 = vpop.f32.mrb[102].mxu0  ;;  %v4501_v3 = vsel %vm646_vm7, %v17616_v23, -inf }
 0xeb6   :  { %15804 = vpow2.f32 %v3518_v22  ;;  %v3515_v18 = vsub.f32 %v17542_v13, %v3512_v53  ;;  %v4496_v42 = vmul.f32 0.088388346, %v4486_v56  ;;  %v13428_v1 = vpop.f32.mrb[103].mxu0  ;;  %4502 = vmax.xlane.f32.xlu1 %v4501_v3 }
 0xeb8   :  { %v3520_v15 = vmul.f32 1.442695, %v3515_v18  ;;  %v17623_v11 = vsel %vm203_vm6, %v4496_v42, -1e+30 }
 0xeb9   :  { %v4491_v59 = vpop.f32.mrb[104].mxu0  ;;  %v4504_v57 = vsel %vm646_vm7, %v17623_v11, -inf }
 0xeba   :  { %15806 = vpow2.f32 %v3520_v15  ;;  %v4497_v20 = vmul.f32 0.088388346, %v4491_v59  ;;  %4505 = vmax.xlane.f32.xlu0 %v4504_v57  ;;  %v13431_v7 = vpop.f32.mrb[105].mxu0 }
 0xebc   :  { %v17627_v13 = vpop.eup %15802  ;;  %v17633_v17 = vsel %vm203_vm6, %v4497_v20, -1e+30 }
 0xebd   :  { %v3522_v62 = vsel %vm646_vm7, %v17627_v13, 0.0  ;;  %v4507_v47 = vsel %vm646_vm7, %v17633_v17, -inf }
 0xebe   :  { %3523 = vadd.xlane.f32.xlu1 %v3522_v62 }
 0xec0   :  { %v17635_v16 = vpop.eup %15804 }
 0xec1   :  { %v3525_v10 = vsel %vm646_vm7, %v17635_v16, 0.0  ;;  %v4713_v43 = vpop.f32.mrb[106].mxu0 }
 0xec2   :  { %3526 = vadd.xlane.f32.xlu0 %v3525_v10  ;;  %4508 = vmax.xlane.f32.xlu1 %v4507_v47  ;;  %v4727_v8 = vmul.f32 0.088388346, %v4713_v43  ;;  %v13455_v41 = vpop.f32.mrb[107].mxu0 }
 0xec4   :  { %v17641_v45 = vpop.eup %15806  ;;  %v17645_v44 = vsel %vm203_vm6, %v4727_v8, -1e+30 }
 0xec5   :  { %v3528_v30 = vsel %vm646_vm7, %v17641_v45, 0.0  ;;  %v4718_v2 = vpop.f32.mrb[108].mxu0  ;;  %v4733_v48 = vsel %vm646_vm7, %v17645_v44, -inf }
 0xec6   :  { %3529 = vadd.xlane.f32.xlu1 %v3528_v30  ;;  %v4728_v35 = vmul.f32 0.088388346, %v4718_v2  ;;  %4734 = vmax.xlane.f32.xlu0 %v4733_v48  ;;  %v13458_v46 = vpop.f32.mrb[109].mxu0 }
 0xec8   :  { %v17653_v19 = vsel %vm203_vm6, %v4728_v35, -1e+30 }
 0xec9   :  { %v4723_v27 = vpop.f32.mrb[110].mxu0  ;;  %v4736_v39 = vsel %vm646_vm7, %v17653_v19, -inf }
 0xeca   :  { %v4729_v50 = vmul.f32 0.088388346, %v4723_v27  ;;  %4737 = vmax.xlane.f32.xlu1 %v4736_v39  ;;  %v13461_v37 = vpop.f32.mrb[111].mxu0 }
 0xecc   :  { %v17659_v22 = vsel %vm203_vm6, %v4729_v50, -1e+30 }
 0xecd   :  { %v4957_v53 = vpop.f32.mrb[112].mxu0  ;;  %v4739_v56 = vsel %vm646_vm7, %v17659_v22, -inf }
 0xece   :  { %v4971_v18 = vmul.f32 0.088388346, %v4957_v53  ;;  %4740 = vmax.xlane.f32.xlu0 %v4739_v56  ;;  %v13485_v42 = vpop.f32.mrb[113].mxu0 }
 0xed0   :  { %v17665_v3 = vsel %vm203_vm6, %v4971_v18, -1e+30 }
 0xed1   :  { %v4962_v1 = vpop.f32.mrb[114].mxu0  ;;  %v4977_v15 = vsel %vm646_vm7, %v17665_v3, -inf }
 0xed2   :  { %v4972_v59 = vmul.f32 0.088388346, %v4962_v1  ;;  %4978 = vmax.xlane.f32.xlu1 %v4977_v15  ;;  %v13488_v57 = vpop.f32.mrb[115].mxu0  ;;  %v17699_v15 = vpop.permute.xlu1 %15384 }
 0xed4   :  { %v17671_v20 = vsel %vm203_vm6, %v4972_v59, -1e+30 }
 0xed5   :  { %v4967_v7 = vpop.f32.mrb[116].mxu0  ;;  %v4980_v62 = vsel %vm646_vm7, %v17671_v20, -inf }
 0xed6   :  { %v4973_v10 = vmul.f32 0.088388346, %v4967_v7  ;;  %4981 = vmax.xlane.f32.xlu0 %v4980_v62  ;;  %v13491_v47 = vpop.f32.mrb[117].mxu0 }
 0xed8   :  { %v17677_v43 = vsel %vm203_vm6, %v4973_v10, -1e+30 }
 0xed9   :  { %v5198_v8 = vpop.f32.mrb[118].mxu0  ;;  %v4983_v41 = vsel %vm646_vm7, %v17677_v43, -inf }
 0xeda   :  { %v5212_v30 = vmul.f32 0.088388346, %v5198_v8  ;;  %4984 = vmax.xlane.f32.xlu1 %v4983_v41  ;;  %v13515_v2 = vpop.f32.mrb[119].mxu0 }
 0xedc   :  { %v17683_v48 = vsel %vm203_vm6, %v5212_v30, -1e+30 }
 0xedd   :  { %v5203_v35 = vpop.f32.mrb[120].mxu0  ;;  %v5218_v46 = vsel %vm646_vm7, %v17683_v48, -inf }
 0xede   :  { %v5213_v27 = vmul.f32 0.088388346, %v5203_v35  ;;  %5219 = vmax.xlane.f32.xlu0 %v5218_v46  ;;  %v13518_v39 = vpop.f32.mrb[121].mxu0 }
 0xee0   :  { %v17689_v50 = vsel %vm203_vm6, %v5213_v27, -1e+30 }
 0xee1   :  { %v5208_v37 = vpop.f32.mrb[122].mxu0  ;;  %v5221_v53 = vsel %vm646_vm7, %v17689_v50, -inf }
 0xee2   :  { %v5214_v56 = vmul.f32 0.088388346, %v5208_v37  ;;  %5222 = vmax.xlane.f32.xlu1 %v5221_v53  ;;  %v13521_v18 = vpop.f32.mrb[123].mxu0 }
 0xee4   :  { %v17695_v42 = vsel %vm203_vm6, %v5214_v56, -1e+30 }
 0xee5   :  { %v5224_v1 = vsel %vm646_vm7, %v17695_v42, -inf }
 0xee6   :  { %5225 = vmax.xlane.f32.xlu1 %v5224_v1 }
 0xf1f   :  { %v3738_v59 = vpop.xlane.xlu0 %3737 }
 0xf20   :  { %v3745_v57 = vsub.f32 %v17550_v38, %v3738_v59 }
 0xf22   :  { %v3748_v7 = vmul.f32 1.442695, %v3745_v57 }
 0xf23   :  { %v3741_v62 = vpop.xlane.xlu1 %3740 }
 0xf24   :  { %15808 = vpow2.f32 %v3748_v7  ;;  %v3746_v10 = vsub.f32 %v17556_v31, %v3741_v62 }
 0xf26   :  { %v3750_v47 = vmul.f32 1.442695, %v3746_v10 }
 0xf27   :  { %v3744_v8 = vpop.xlane.xlu0 %3743 }
 0xf28   :  { %15810 = vpow2.f32 %v3750_v47  ;;  %v3747_v41 = vsub.f32 %v17562_v24, %v3744_v8 }
 0xf2a   :  { %v3752_v30 = vmul.f32 1.442695, %v3747_v41 }
 0xf2b   :  { %v3982_v2 = vpop.xlane.xlu1 %3981 }
 0xf2c   :  { %15812 = vpow2.f32 %v3752_v30  ;;  %v3989_v35 = vsub.f32 %v17568_v58, %v3982_v2  ;;  %v15377_v30 = vunpack.i.h.bf16 %v17572_v26  ;;  %v15376_v2 = vunpack.i.l.bf16 %v17572_v26 }
 0xf2e   :  { %v17705_v46 = vpop.eup %15808  ;;  %v3992_v27 = vmul.f32 1.442695, %v3989_v35 }
 0xf2f   :  { %v3754_v38 = vsel %vm646_vm7, %v17705_v46, 0.0  ;;  %v3985_v56 = vpop.xlane.xlu0 %3984 }
 0xf30   :  { %15814 = vpow2.f32 %v3992_v27  ;;  %3755 = vadd.xlane.f32.xlu0 %v3754_v38  ;;  %v14696_v38 = vpack.c.bf16 %v15377_v30, %v15376_v2 }
 0xf32   :  { %v17709_v39 = vpop.eup %15810 }
 0xf33   :  { %v3757_v31 = vsel %vm646_vm7, %v17709_v39, 0.0  ;;  %v3988_v18 = vpop.xlane.xlu1 %3987 }
 0xf34   :  { %3758 = vadd.xlane.f32.xlu1 %v3757_v31 }
 0xf36   :  { %v17713_v24 = vpop.eup %15812 }
 0xf37   :  { %v3760_v37 = vsel %vm646_vm7, %v17713_v24, 0.0  ;;  %v4223_v1 = vpop.xlane.xlu0 %4222 }
 0xf38   :  { %3761 = vadd.xlane.f32.xlu0 %v3760_v37  ;;  %v3990_v37 = vsub.f32 %v17576_v36, %v3985_v56 }
 0xf3a   :  { %v17717_v58 = vpop.eup %15814  ;;  %v3994_v26 = vmul.f32 1.442695, %v3990_v37 }
 0xf3b   :  { %v3998_v53 = vsel %vm646_vm7, %v17717_v58, 0.0  ;;  %v4226_v59 = vpop.xlane.xlu1 %4225 }
 0xf3c   :  { %3999 = vadd.xlane.f32.xlu1 %v3998_v53  ;;  %v3991_v53 = vsub.f32 %v17584_v29, %v3988_v18  ;;  %v4231_v36 = vsub.f32 %v17602_v6, %v4226_v59 }
 0xf3f   :  { %v4229_v57 = vpop.xlane.xlu0 %4228 }
 0xf40   :  { %v4232_v56 = vsub.f32 %v17609_v33, %v4229_v57 }
 0xf42   :  { %v4237_v6 = vmul.f32 1.442695, %v4232_v56 }
 0xf43   :  { %v4503_v7 = vpop.xlane.xlu1 %4502 }
 0xf44   :  { %v4510_v18 = vsub.f32 %v17616_v23, %v4503_v7 }
 0xf47   :  { %v4506_v62 = vpop.xlane.xlu0 %4505 }
 0xf4b   :  { %v3524_v10 = vpop.xlane.xlu1 %3523 }
 0xf4c   :  { %15816 = vrcp.f32 %v3524_v10 }
 0xf4d   :  { %15389 = vrot.lane.b32.xlu1 %v17384_v12, %s16241_s16 }
 0xf4e   :  { %4773 = vrot.lane.b32.xlu0 %v17374_v51, %s16241_s16 }
 0xf4f   :  { %v3527_v47 = vpop.xlane.xlu0 %3526  ;;  %v4509_v8 = vpop.xlane.xlu1 %4508 }
 0xf50   :  { %15818 = vrcp.f32 %v3527_v47  ;;  %v4230_v47 = vsub.f32 %v17592_v21, %v4223_v1  ;;  %v4235_v21 = vmul.f32 1.442695, %v4231_v36  ;;  %v4513_v1 = vmul.f32 1.442695, %v4510_v18 }
 0xf51   :  { %v4512_v59 = vsub.f32 %v17633_v17, %v4509_v8 }
 0xf52   :  { %15394 = vrot.lane.b32.xlu0 %v17384_v12, %s16240_s30 }
 0xf53   :  { %v3530_v41 = vpop.xlane.xlu1 %3529  ;;  %v4735_v30 = vpop.xlane.xlu0 %4734  ;;  %v4517_v23 = vmul.f32 1.442695, %v4512_v59 }
 0xf54   :  { %15820 = vrcp.f32 %v3530_v41  ;;  %v3996_v41 = vmul.f32 1.442695, %v3991_v53  ;;  %v4742_v2 = vsub.f32 %v17645_v44, %v4735_v30 }
 0xf55   :  { %15822 = vpow2.f32 %v3994_v26 }
 0xf56   :  { %v15817_v35 = vpop.eup %15816  ;;  %15824 = vpow2.f32 %v3996_v41 }
 0xf57   :  { %v3532_v27 = vmul.f32 %v15817_v35, %v17627_v13 }
 0xf59   :  { %13319 = vmatmul.mubr.msk.f32.vlgmr.msra.gmra.mrb[78].mxu1 %vm646_vm7, %v3532_v27 }
 0xf5a   :  { %v15819_v31 = vpop.eup %15818  ;;  %14697 = vmatpush3.bf16.msra.mxu1 %v14696_v38  ;;  %13321 = vmatprep.mubr.msk.f32.mxu1 %vm16239_vm3, %v16237_v63 }
 0xf5b   :  { %v3534_v10 = vmul.f32 %v15819_v31, %v17635_v16  ;;  %13346 = vmatprep.subr.mxu1 %v16237_v63  ;;  %v4233_v16 = vmul.f32 1.442695, %v4230_v47  ;;  %v4741_v38 = vpop.xlane.xlu0 %4740 }
 0xf5c   :  { %v4744_v53 = vsub.f32 %v17659_v22, %v4741_v38 }
 0xf5d   :  { %13322 = vmatmul.mubr.msk.f32.gmra.mrb[80].mxu1 %vm646_vm7, %v3534_v10  ;;  %15826 = vpow2.f32 %v4233_v16 }
 0xf5e   :  { %v15821_v13 = vpop.eup %15820  ;;  %13347 = vmatpush3.msra.mxu1 %v17580_v32  ;;  %13324 = vmatprep.mubr.msk.f32.mxu1 %vm16239_vm3, %v16237_v63  ;;  %v4738_v32 = vpop.xlane.xlu1 %4737  ;;  %15828 = vpow2.f32 %v4235_v21  ;;  %v4749_v41 = vmul.f32 1.442695, %v4744_v53 }
 0xf5f   :  { %v3536_v29 = vmul.f32 %v15821_v13, %v17641_v45  ;;  %14702 = vmatprep.subr.bf16.mxu1 %v16238_v4  ;;  %v4511_v45 = vsub.f32 %v17623_v11, %v4506_v62  ;;  %15830 = vpow2.f32 %v4237_v6  ;;  %v17754_v35 = vpop.eup %15822  ;;  %v4745_v11 = vmul.f32 1.442695, %v4742_v2 }
 0xf60   :  { %15832 = vpow2.f32 %v4513_v1  ;;  %v17756_v27 = vpop.eup %15824  ;;  %v4743_v62 = vsub.f32 %v17653_v19, %v4738_v32  ;;  %v4001_v44 = vsel %vm646_vm7, %v17754_v35, 0.0 }
 0xf61   :  { %13325 = vmatmul.mubr.msk.f32.gmra.mrb[82].mxu1 %vm646_vm7, %v3536_v29  ;;  %v4515_v57 = vmul.f32 1.442695, %v4511_v45  ;;  %v4004_v31 = vsel %vm646_vm7, %v17756_v27, 0.0 }
 0xf62   :  { %13348 = vmatprep.mubr.msk.f32.mxu1 %vm16239_vm3, %v16237_v63  ;;  %v4979_v33 = vpop.xlane.xlu1 %4978  ;;  %v4747_v37 = vmul.f32 1.442695, %v4743_v62 }
 0xf63   :  { %v4986_v7 = vsub.f32 %v17665_v3, %v4979_v33  ;;  %15834 = vpow2.f32 %v4515_v57  ;;  %v4982_v10 = vpop.xlane.xlu0 %4981 }
 0xf64   :  { %15836 = vpow2.f32 %v4517_v23  ;;  %v4987_v36 = vsub.f32 %v17671_v20, %v4982_v10 }
 0xf65   :  { %v4989_v17 = vmul.f32 1.442695, %v4986_v7  ;;  %15838 = vpow2.f32 %v4745_v11 }
 0xf66   :  { %v4991_v18 = vmul.f32 1.442695, %v4987_v36 }
 0xf67   :  { %v17759_v8 = vpop.eup %15826  ;;  %15840 = vpow2.f32 %v4989_v17  ;;  %v4985_v22 = vpop.xlane.xlu1 %4984 }
 0xf68   :  { %v17765_v3 = vpop.eup %15828  ;;  %v4239_v47 = vsel %vm646_vm7, %v17759_v8, 0.0  ;;  %15842 = vpow2.f32 %v4747_v37  ;;  %v4988_v32 = vsub.f32 %v17677_v43, %v4985_v22 }
 0xf69   :  { %v17768_v19 = vpop.eup %15830  ;;  %v4242_v26 = vsel %vm646_vm7, %v17765_v3, 0.0  ;;  %15844 = vpow2.f32 %v4749_v41 }
 0xf6a   :  { %v17774_v13 = vpop.eup %15832  ;;  %v4245_v56 = vsel %vm646_vm7, %v17768_v19, 0.0  ;;  %15846 = vpow2.f32 %v4991_v18  ;;  %v4993_v59 = vmul.f32 1.442695, %v4988_v32 }
 0xf6b   :  { %v4519_v16 = vsel %vm646_vm7, %v17774_v13, 0.0  ;;  %v5220_v38 = vpop.xlane.xlu0 %5219 }
 0xf6c   :  { %15848 = vpow2.f32 %v4993_v59 }
 0xf6d   :  { %v17777_v29 = vpop.eup %15834 }
 0xf6e   :  { %v17783_v21 = vpop.eup %15836  ;;  %v4522_v45 = vsel %vm646_vm7, %v17777_v29, 0.0 }
 0xf6f   :  { %v17786_v6 = vpop.eup %15838  ;;  %v4525_v20 = vsel %vm646_vm7, %v17783_v21, 0.0  ;;  %v5223_v37 = vpop.xlane.xlu1 %5222 }
 0xf70   :  { %v4751_v43 = vsel %vm646_vm7, %v17786_v6, 0.0 }
 0xf71   :  { %4002 = vadd.xlane.f32.xlu0 %v4001_v44  ;;  %4005 = vadd.xlane.f32.xlu1 %v4004_v31  ;;  %v17792_v1 = vpop.eup %15840  ;;  %v5227_v44 = vsub.f32 %v17683_v48, %v5220_v38 }
 0xf72   :  { %v4995_v30 = vsel %vm646_vm7, %v17792_v1, 0.0  ;;  %v17798_v33 = vpop.eup %15842 }
 0xf73   :  { %v4754_v57 = vsel %vm646_vm7, %v17798_v33, 0.0  ;;  %v17802_v2 = vpop.eup %15844  ;;  %v5230_v31 = vmul.f32 1.442695, %v5227_v44  ;;  %v5226_v53 = vpop.xlane.xlu1 %5225 }
 0xf74   :  { %v4757_v23 = vsel %vm646_vm7, %v17802_v2, 0.0  ;;  %v17806_v7 = vpop.eup %15846  ;;  %v5229_v10 = vsub.f32 %v17695_v42, %v5226_v53  ;;  %v15382_v42 = vunpack.i.h.bf16 %v17594_v40 }
 0xf75   :  { %4243 = vadd.xlane.f32.xlu0 %v4242_v26  ;;  %4240 = vadd.xlane.f32.xlu1 %v4239_v47  ;;  %v4998_v11 = vsel %vm646_vm7, %v17806_v7, 0.0  ;;  %15850 = vpow2.f32 %v5230_v31 }
 0xf76   :  { %v17810_v62 = vpop.eup %15848  ;;  %v5234_v47 = vmul.f32 1.442695, %v5229_v10 }
 0xf77   :  { %v5001_v17 = vsel %vm646_vm7, %v17810_v62, 0.0 }
 0xf78   :  { %15852 = vpow2.f32 %v5234_v47 }
 0xf79   :  { %4520 = vadd.xlane.f32.xlu0 %v4519_v16  ;;  %4246 = vadd.xlane.f32.xlu1 %v4245_v56  ;;  %v15381_v56 = vunpack.i.l.bf16 %v17594_v40 }
 0xf7d   :  { %4526 = vadd.xlane.f32.xlu0 %v4525_v20  ;;  %4523 = vadd.xlane.f32.xlu1 %v4522_v45  ;;  %v14703_v45 = vpack.c.bf16 %v15382_v42, %v15381_v56 }
 0xf7f   :  { %v17820_v26 = vpop.eup %15850 }
 0xf80   :  { %v5236_v41 = vsel %vm646_vm7, %v17820_v26, 0.0 }
 0xf81   :  { %4996 = vadd.xlane.f32.xlu0 %v4995_v30  ;;  %4752 = vadd.xlane.f32.xlu1 %v4751_v43  ;;  %v15387_v43 = vunpack.i.h.bf16 %v17699_v15 }
 0xf82   :  { %v17824_v36 = vpop.eup %15852 }
 0xf83   :  { %v5242_v16 = vsel %vm646_vm7, %v17824_v36, 0.0 }
 0xf85   :  { %4755 = vadd.xlane.f32.xlu1 %v4754_v57  ;;  %v15386_v57 = vunpack.i.l.bf16 %v17699_v15 }
 0xf89   :  { %4758 = vadd.xlane.f32.xlu1 %v4757_v23 }
 0xf8d   :  { %4999 = vadd.xlane.f32.xlu1 %v4998_v11  ;;  %v14710_v11 = vpack.c.bf16 %v15387_v43, %v15386_v57 }
 0xf91   :  { %5002 = vadd.xlane.f32.xlu1 %v5001_v17 }
 0xf97   :  { %15399 = vrot.lane.b32.xlu0 %v17384_v12, %s16242_s17 }
 0xfa2   :  { %5014 = vrot.lane.b32.xlu1 %v17374_v51, %s16240_s30 }
 0xfb6   :  { %5237 = vadd.xlane.f32.xlu0 %v5236_v41 }
 0xfbd   :  { %v3756_v12 = vpop.xlane.xlu0 %3755 }
 0xfbe   :  { %15854 = vrcp.f32 %v3756_v12 }
 0xfc1   :  { %v3759_v48 = vpop.xlane.xlu1 %3758 }
 0xfc2   :  { %15856 = vrcp.f32 %v3759_v48 }
 0xfc5   :  { %v3762_v22 = vpop.xlane.xlu0 %3761 }
 0xfc6   :  { %15858 = vrcp.f32 %v3762_v22  ;;  %5243 = vadd.xlane.f32.xlu1 %v5242_v16 }
 0xfc8   :  { %v15855_v18 = vpop.eup %15854 }
 0xfc9   :  { %v3764_v32 = vmul.f32 %v15855_v18, %v17705_v46  ;;  %v4000_v20 = vpop.xlane.xlu1 %3999 }
 0xfca   :  { %15860 = vrcp.f32 %v4000_v20 }
 0xfcb   :  { %13349 = vmatmul.mubr.msk.f32.vlgmr.msra.gmra.mrb[84].mxu1 %vm646_vm7, %v3764_v32 }
 0xfcc   :  { %v15857_v59 = vpop.eup %15856  ;;  %14704 = vmatpush3.bf16.msra.mxu1 %v14703_v45  ;;  %5255 = vrot.lane.b32.xlu0 %v17374_v51, %s16242_s17 }
 0xfcd   :  { %13351 = vmatprep.mubr.msk.f32.mxu1 %vm16239_vm3, %v16237_v63  ;;  %13376 = vmatprep.subr.mxu1 %v16237_v63  ;;  %v3766_v40 = vmul.f32 %v15857_v59, %v17709_v39  ;;  %v5228_v39 = vsub.f32 %v17689_v50, %v5223_v37  ;;  %v15390_v38 = vpop.permute.xlu1 %15389 }
 0xfcf   :  { %13352 = vmatmul.mubr.msk.f32.gmra.mrb[86].mxu1 %vm646_vm7, %v3766_v40 }
 0xfd0   :  { %v15859_v46 = vpop.eup %15858  ;;  %13377 = vmatpush3.msra.mxu1 %v17588_v52  ;;  %13354 = vmatprep.mubr.msk.f32.mxu1 %vm16239_vm3, %v16237_v63 }
 0xfd1   :  { %v3768_v30 = vmul.f32 %v15859_v46, %v17713_v24  ;;  %14709 = vmatprep.subr.bf16.mxu1 %v16238_v4  ;;  %v5232_v24 = vmul.f32 1.442695, %v5228_v39 }
 0xfd3   :  { %13355 = vmatmul.mubr.msk.f32.gmra.mrb[88].mxu1 %vm646_vm7, %v3768_v30  ;;  %15862 = vpow2.f32 %v5232_v24 }
 0xfd4   :  { %v15861_v23 = vpop.eup %15860  ;;  %13378 = vmatprep.mubr.msk.f32.mxu1 %vm16239_vm3, %v16237_v63 }
 0xfd5   :  { %v4008_v52 = vmul.f32 %v15861_v23, %v17717_v58  ;;  %v4774_v58 = vpop.permute.xlu0 %4773 }
 0xfd7   :  { %13379 = vmatmul.mubr.msk.f32.vlgmr.msra.gmra.mrb[90].mxu1 %vm646_vm7, %v4008_v52 }
 0xfd8   :  { %14711 = vmatpush3.bf16.msra.mxu1 %v14710_v11  ;;  %13381 = vmatprep.mubr.msk.f32.mxu1 %vm16239_vm3, %v16237_v63 }
 0xfd9   :  { %13406 = vmatprep.subr.mxu1 %v16237_v63  ;;  %v17861_v17 = vpop.permute.xlu0 %15394 }
 0xfda   :  { %v15397_v57 = vunpack.i.h.bf16 %v17861_v17  ;;  %v15396_v23 = vunpack.i.l.bf16 %v17861_v17 }
 0xfdc   :  { %13407 = vmatpush3.msra.mxu1 %v17598_v25  ;;  %v14731_v11 = vpack.c.bf16 %v15397_v57, %v15396_v23  ;;  %v11837_v57 = vld [vmem:[%s19980_s7 + $0xb0] sm:$0xff]  ;;  %v11838_v23 = vld [vmem:[%s19980_s7 + $0xb8] sm:$0xff] }
 0xfdd   :  { %14716 = vmatprep.subr.bf16.mxu1 %v16238_v4  ;;  %v17857_v15 = vpop.eup %15862 }
 0xfde   :  { %v5239_v50 = vsel %vm646_vm7, %v17857_v15, 0.0 }
 0xfeb   :  { %5240 = vadd.xlane.f32.xlu0 %v5239_v50 }
 0xffe   :  { %v4003_v44 = vpop.xlane.xlu0 %4002  ;;  %v4006_v31 = vpop.xlane.xlu1 %4005 }
 0xfff   :  { %15864 = vrcp.f32 %v4003_v44 }
0x1000   :  { %15866 = vrcp.f32 %v4006_v31 }
0x1002   :  { %v4241_v37 = vpop.xlane.xlu1 %4240  ;;  %v4244_v25 = vpop.xlane.xlu0 %4243 }
0x1003   :  { %15868 = vrcp.f32 %v4241_v37 }
0x1004   :  { %15870 = vrcp.f32 %v4244_v25 }
0x1006   :  { %v4247_v53 = vpop.xlane.xlu1 %4246  ;;  %v4521_v48 = vpop.xlane.xlu0 %4520 }
0x1007   :  { %15872 = vrcp.f32 %v4247_v53 }
0x1008   :  { %15874 = vrcp.f32 %v4521_v48 }
0x1009   :  { %v15865_v10 = vpop.eup %15864 }
0x100a   :  { %v4010_v47 = vmul.f32 %v15865_v10, %v17754_v35  ;;  %v15867_v41 = vpop.eup %15866  ;;  %v4524_v12 = vpop.xlane.xlu1 %4523 }
0x100b   :  { %v4012_v22 = vmul.f32 %v15867_v41, %v17756_v27  ;;  %15876 = vrcp.f32 %v4524_v12  ;;  %v4527_v27 = vpop.xlane.xlu0 %4526 }
0x100c   :  { %13382 = vmatmul.mubr.msk.f32.gmra.mrb[92].mxu1 %vm646_vm7, %v4010_v47  ;;  %15878 = vrcp.f32 %v4527_v27 }
0x100d   :  { %13384 = vmatprep.mubr.msk.f32.mxu1 %vm16239_vm3, %v16237_v63  ;;  %v15869_v16 = vpop.eup %15868 }
0x100e   :  { %v4249_v35 = vmul.f32 %v15869_v16, %v17759_v8  ;;  %v4753_v42 = vpop.xlane.xlu1 %4752  ;;  %v15871_v56 = vpop.eup %15870  ;;  %v15391_v8 = vunpack.i.l.bf16 %v15390_v38 }
0x100f   :  { %v4251_v18 = vmul.f32 %v15871_v56, %v17765_v3  ;;  %15880 = vrcp.f32 %v4753_v42 }
0x1010   :  { %13385 = vmatmul.mubr.msk.f32.gmra.mrb[94].mxu1 %vm646_vm7, %v4012_v22 }
0x1011   :  { %13408 = vmatprep.mubr.msk.f32.mxu1 %vm16239_vm3, %v16237_v63  ;;  %v15873_v32 = vpop.eup %15872 }
0x1012   :  { %v4756_v20 = vpop.xlane.xlu1 %4755  ;;  %v4253_v14 = vmul.f32 %v15873_v32, %v17768_v19  ;;  %v15875_v60 = vpop.eup %15874 }
0x1013   :  { %v4529_v3 = vmul.f32 %v15875_v60, %v17774_v13  ;;  %15882 = vrcp.f32 %v4756_v20  ;;  %v4997_v13 = vpop.xlane.xlu0 %4996 }
0x1014   :  { %13409 = vmatmul.mubr.msk.f32.vlgmr.msra.gmra.mrb[96].mxu1 %vm646_vm7, %v4249_v35 }
0x1015   :  { %14718 = vmatpush3.bf16.msra.mxu1 %v14717_v61  ;;  %13411 = vmatprep.mubr.msk.f32.mxu1 %vm16239_vm3, %v16237_v63  ;;  %v15392_v61 = vunpack.i.h.bf16 %v15390_v38 }
0x1016   :  { %13436 = vmatprep.subr.mxu1 %v16237_v63  ;;  %v4759_v45 = vpop.xlane.xlu1 %4758 }
0x1017   :  { %v14724_v59 = vpack.c.bf16 %v15392_v61, %v15391_v8  ;;  %15884 = vrcp.f32 %v4759_v45  ;;  %v15400_v17 = vpop.permute.xlu0 %15399 }
0x1018   :  { %13412 = vmatmul.mubr.msk.f32.gmra.mrb[98].mxu1 %vm646_vm7, %v4251_v18  ;;  %15886 = vrcp.f32 %v4997_v13  ;;  %v15402_v25 = vunpack.i.h.bf16 %v15400_v17  ;;  %v11835_v13 = vld [vmem:[%s19980_s7 + $0xa0] sm:$0xff] }
0x1019   :  { %13437 = vmatpush3.msra.mxu1 %v17374_v51  ;;  %13414 = vmatprep.mubr.msk.f32.mxu1 %vm16239_vm3, %v16237_v63  ;;  %v15877_v51 = vpop.eup %15876 }
0x101a   :  { %14723 = vmatprep.subr.bf16.mxu1 %v16238_v4  ;;  %v4531_v19 = vmul.f32 %v15877_v51, %v17777_v29  ;;  %v15879_v40 = vpop.eup %15878  ;;  %v5000_v46 = vpop.xlane.xlu1 %4999  ;;  %v11831_v51 = vld [vmem:[%s19980_s7 + $0x80] sm:$0xff] }
0x101b   :  { %v4533_v30 = vmul.f32 %v15879_v40, %v17783_v21  ;;  %v15881_v43 = vpop.eup %15880  ;;  %15888 = vrcp.f32 %v5000_v46  ;;  %v11834_v40 = vld [vmem:[%s19980_s7 + $0x98] sm:$0xff] }
0x101c   :  { %13415 = vmatmul.mubr.msk.f32.gmra.mrb[100].mxu1 %vm646_vm7, %v4253_v14  ;;  %v4761_v29 = vmul.f32 %v15881_v43, %v17786_v6 }
0x101d   :  { %13438 = vmatprep.mubr.msk.f32.mxu1 %vm16239_vm3, %v16237_v63  ;;  %v15883_v52 = vpop.eup %15882 }
0x101e   :  { %v5003_v39 = vpop.xlane.xlu1 %5002  ;;  %v4763_v50 = vmul.f32 %v15883_v52, %v17798_v33  ;;  %v15401_v33 = vunpack.i.l.bf16 %v15400_v17  ;;  %v11840_v52 = vld [vmem:[%s19980_s7 + $0xc8] sm:$0xff]  ;;  %v11843_v17 = vld [vmem:[%s19980_s7 + $0xe0] sm:$0xff] }
0x101f   :  { %15890 = vrcp.f32 %v5003_v39  ;;  %v11839_v39 = vld [vmem:[%s19980_s7 + $0xc0] sm:$0xff] }
0x1020   :  { %13439 = vmatmul.mubr.msk.f32.vlgmr.msra.gmra.mrb[102].mxu1 %vm646_vm7, %v4529_v3  ;;  %v14738_v12 = vpack.c.bf16 %v15402_v25, %v15401_v33  ;;  %v11845_v33 = vld [vmem:[%s19980_s7 + $0xf0] sm:$0xff] }
0x1021   :  { %14725 = vmatpush3.bf16.msra.mxu1 %v14724_v59  ;;  %13441 = vmatprep.mubr.msk.f32.mxu1 %vm16239_vm3, %v16237_v63  ;;  %v11833_v59 = vld [vmem:[%s19980_s7 + $0x90] sm:$0xff] }
0x1022   :  { %13466 = vmatprep.subr.mxu1 %v16237_v63  ;;  %v5015_v6 = vpop.permute.xlu1 %5014  ;;  %v14744_v46 = vpack.c.bf16 %v11834_v40, %v11833_v59 }
0x1024   :  { %13442 = vmatmul.mubr.msk.f32.gmra.mrb[104].mxu1 %vm646_vm7, %v4531_v19 }
0x1025   :  { %13467 = vmatpush3.msra.mxu1 %v4774_v58  ;;  %13444 = vmatprep.mubr.msk.f32.mxu1 %vm16239_vm3, %v16237_v63  ;;  %v15885_v58 = vpop.eup %15884 }
0x1026   :  { %14730 = vmatprep.subr.bf16.mxu1 %v16238_v4  ;;  %v4765_v31 = vmul.f32 %v15885_v58, %v17802_v2  ;;  %v15887_v37 = vpop.eup %15886 }
0x1027   :  { %v5005_v10 = vmul.f32 %v15887_v37, %v17792_v1  ;;  %v15889_v41 = vpop.eup %15888 }
0x1028   :  { %13445 = vmatmul.mubr.msk.f32.gmra.mrb[106].mxu1 %vm646_vm7, %v4533_v30  ;;  %v5007_v2 = vmul.f32 %v15889_v41, %v17806_v7  ;;  %v11836_v30 = vld [vmem:[%s19980_s7 + $0xa8] sm:$0xff] }
0x1029   :  { %13468 = vmatprep.mubr.msk.f32.mxu1 %vm16239_vm3, %v16237_v63  ;;  %v15891_v48 = vpop.eup %15890  ;;  %v14748_v43 = vpack.c.bf16 %v11836_v30, %v11835_v13 }
0x102a   :  { %v5009_v1 = vmul.f32 %v15891_v48, %v17810_v62 }
0x102c   :  { %13469 = vmatmul.mubr.msk.f32.vlgmr.msra.gmra.mrb[108].mxu1 %vm646_vm7, %v4761_v29  ;;  %v17907_v21 = vpop.f32.mrb[78].mxu1  ;;  %v14752_v29 = vpack.c.bf16 %v11838_v23, %v11837_v57 }
0x102d   :  { %14732 = vmatpush3.bf16.msra.mxu1 %v14731_v11  ;;  %13471 = vmatprep.mubr.msk.f32.mxu1 %vm16239_vm3, %v16237_v63  ;;  %v13320_v24 = vpop.f32.mrb[79].mxu1  ;;  %v14756_v11 = vpack.c.bf16 %v11840_v52, %v11839_v39 }
0x102e   :  { %13496 = vmatprep.subr.mxu1 %v16237_v63  ;;  %v11841_v24 = vld [vmem:[%s19980_s7 + $0xd0] sm:$0xff] }
0x1030   :  { %13472 = vmatmul.mubr.msk.f32.gmra.mrb[110].mxu1 %vm646_vm7, %v4763_v50  ;;  %v17914_v38 = vpop.f32.mrb[80].mxu1  ;;  %v11842_v50 = vld [vmem:[%s19980_s7 + $0xd8] sm:$0xff] }
0x1031   :  { %13497 = vmatpush3.msra.mxu1 %v5015_v6  ;;  %13474 = vmatprep.mubr.msk.f32.mxu1 %vm16239_vm3, %v16237_v63  ;;  %v13323_v44 = vpop.f32.mrb[81].mxu1  ;;  %v14760_v58 = vpack.c.bf16 %v11842_v50, %v11841_v24  ;;  %v11844_v6 = vld [vmem:[%s19980_s7 + $0xe8] sm:$0xff] }
0x1032   :  { %14737 = vmatprep.subr.bf16.mxu1 %v16238_v4  ;;  %v14764_v44 = vpack.c.bf16 %v11844_v6, %v11843_v17 }
0x1034   :  { %13475 = vmatmul.mubr.msk.f32.gmra.mrb[112].mxu1 %vm646_vm7, %v4765_v31  ;;  %v17921_v53 = vpop.f32.mrb[82].mxu1 }
0x1035   :  { %13498 = vmatprep.mubr.msk.f32.mxu1 %vm16239_vm3, %v16237_v63  ;;  %v13326_v47 = vpop.f32.mrb[83].mxu1 }
0x1038   :  { %13499 = vmatmul.mubr.msk.f32.vlgmr.msra.gmra.mrb[114].mxu1 %vm646_vm7, %v5005_v10  ;;  %v11846_v10 = vld [vmem:[%s19980_s7 + $0xf8] sm:$0xff] }
0x1039   :  { %14739 = vmatpush3.bf16.msra.mxu1 %v14738_v12  ;;  %13501 = vmatprep.mubr.msk.f32.mxu1 %vm16239_vm3, %v16237_v63  ;;  %v14768_v47 = vpack.c.bf16 %v11846_v10, %v11845_v33 }
0x103a   :  { %13526 = vmatprep.subr.mxu1 %v16237_v63 }
0x103c   :  { %13502 = vmatmul.mubr.msk.f32.gmra.mrb[116].mxu1 %vm646_vm7, %v5007_v2 }
0x103d   :  { %13504 = vmatprep.mubr.msk.f32.mxu1 %vm16239_vm3, %v16237_v63 }
0x1040   :  { %13505 = vmatmul.mubr.msk.f32.gmra.mrb[118].mxu1 %vm646_vm7, %v5009_v1 }
0x1041   :  { %13528 = vmatprep.mubr.msk.f32.mxu1 %vm16239_vm3, %v16237_v63 }
0x1043   :  { %v5238_v22 = vpop.xlane.xlu0 %5237 }
0x1044   :  { %15892 = vrcp.f32 %v5238_v22 }
0x1047   :  { %v5256_v16 = vpop.permute.xlu0 %5255 }
0x1048   :  { %13527 = vmatpush3.msra.mxu1 %v5256_v16 }
0x104e   :  { %v15893_v7 = vpop.eup %15892 }
0x104f   :  { %v5246_v35 = vmul.f32 %v15893_v7, %v17820_v26 }
0x1051   :  { %13529 = vmatmul.mubr.msk.f32.vlgmr.msra.gmra.mrb[120].mxu1 %vm646_vm7, %v5246_v35 }
0x1052   :  { %13531 = vmatprep.mubr.msk.f32.mxu1 %vm16239_vm3, %v16237_v63 }
0x1053   :  { %v5244_v42 = vpop.xlane.xlu1 %5243 }
0x1078   :  { %v5241_v56 = vpop.xlane.xlu0 %5240 }
0x1079   :  { %15894 = vrcp.f32 %v5241_v56 }
0x107a   :  { %15896 = vrcp.f32 %v5244_v42 }
0x1083   :  { %v15895_v62 = vpop.eup %15894 }
0x1084   :  { %v5248_v27 = vmul.f32 %v15895_v62, %v17857_v15  ;;  %v15897_v18 = vpop.eup %15896 }
0x1085   :  { %v5250_v26 = vmul.f32 %v15897_v18, %v17824_v36  ;;  %v11832_v36 = vld [vmem:[%s19980_s7 + $0x88] sm:$0xff] }
0x1086   :  { %13532 = vmatmul.mubr.msk.f32.gmra.mrb[122].mxu1 %vm646_vm7, %v5248_v27  ;;  %v14740_v19 = vpack.c.bf16 %v11832_v36, %v11831_v51 }
0x1087   :  { %13534 = vmatprep.mubr.msk.f32.mxu1 %vm16239_vm3, %v16237_v63 }
0x1088   :  { %14741 = vmatprep.subr.bf16.mxu0 %v14740_v19 }
0x1089   :  { %14743 = vmatpush3.bf16.msra.mxu0 %v14740_v19 }
0x108a   :  { %13535 = vmatmul.mubr.msk.f32.gmra.mrb[124].mxu1 %vm646_vm7, %v5250_v26  ;;  %14745 = vmatprep.subr.bf16.mxu0 %v14744_v46 }
0x108d   :  { %14747 = vmatpush3.bf16.msra.mxu0 %v14744_v46 }
0x108e   :  { %14749 = vmatprep.subr.bf16.mxu0 %v14748_v43 }
0x1091   :  { %14751 = vmatpush3.bf16.msra.mxu0 %v14748_v43 }
0x1092   :  { %14753 = vmatprep.subr.bf16.mxu0 %v14752_v29 }
0x1095   :  { %14755 = vmatpush3.bf16.msra.mxu0 %v14752_v29 }
0x1096   :  { %14757 = vmatprep.subr.bf16.mxu0 %v14756_v11 }
0x1099   :  { %14759 = vmatpush3.bf16.msra.mxu0 %v14756_v11 }
0x109a   :  { %14761 = vmatprep.subr.bf16.mxu0 %v14760_v58 }
0x109d   :  { %14763 = vmatpush3.bf16.msra.mxu0 %v14760_v58 }
0x109e   :  { %v3856_v32 = vpop.f32.mrb[84].mxu1  ;;  %14765 = vmatprep.subr.bf16.mxu0 %v14764_v44 }
0x109f   :  { %v13350_v20 = vpop.f32.mrb[85].mxu1 }
0x10a1   :  { %14767 = vmatpush3.bf16.msra.mxu0 %v14764_v44 }
0x10a2   :  { %v3861_v14 = vpop.f32.mrb[86].mxu1  ;;  %14769 = vmatprep.subr.bf16.mxu0 %v14768_v47 }
0x10a3   :  { %v15403_v60 = vpack.i.bf16 %v3861_v14, %v3856_v32  ;;  %v13353_v61 = vpop.f32.mrb[87].mxu1 }
0x10a5   :  { %15404 = vrot.lane.b32.xlu0 %v15403_v60, %s16242_s17  ;;  %14771 = vmatpush3.bf16.msra.mxu0 %v14768_v47 }
0x10a6   :  { %v17949_v8 = vpop.f32.mrb[88].mxu1 }
0x10a7   :  { %v13356_v15 = vpop.f32.mrb[89].mxu1 }
0x10aa   :  { %v4097_v3 = vpop.f32.mrb[90].mxu1 }
0x10ab   :  { %v13380_v45 = vpop.f32.mrb[91].mxu1 }
0x10df   :  { %v4102_v31 = vpop.f32.mrb[92].mxu1 }
0x10e0   :  { %v15408_v37 = vpack.i.bf16 %v4102_v31, %v4097_v3  ;;  %v13383_v25 = vpop.f32.mrb[93].mxu1 }
0x10e2   :  { %15409 = vrot.lane.b32.xlu1 %v15408_v37, %s16240_s30 }
0x10e3   :  { %v4107_v41 = vpop.f32.mrb[94].mxu1 }
0x10e4   :  { %v13386_v12 = vpop.f32.mrb[95].mxu1 }
0x10e7   :  { %v4338_v2 = vpop.f32.mrb[96].mxu1 }
0x10e8   :  { %v13410_v48 = vpop.f32.mrb[97].mxu1 }
0x10eb   :  { %v4343_v1 = vpop.f32.mrb[98].mxu1 }
0x10ec   :  { %v15413_v22 = vpack.i.bf16 %v4343_v1, %v4338_v2  ;;  %v13413_v16 = vpop.f32.mrb[99].mxu1 }
0x10ee   :  { %15414 = vrot.lane.b32.xlu0 %v15413_v22, %s16241_s16 }
0x10ef   :  { %v4348_v7 = vpop.f32.mrb[100].mxu1 }
0x10f0   :  { %v13416_v35 = vpop.f32.mrb[101].mxu1 }
0x10f3   :  { %v18001_v42 = vpop.f32.mrb[102].mxu1 }
0x10f4   :  { %v13440_v56 = vpop.f32.mrb[103].mxu1 }
0x10f7   :  { %v18003_v62 = vpop.f32.mrb[104].mxu1 }
0x10f8   :  { %v13443_v27 = vpop.f32.mrb[105].mxu1 }
0x10fb   :  { %v18005_v18 = vpop.f32.mrb[106].mxu1 }
0x10fc   :  { %v13446_v26 = vpop.f32.mrb[107].mxu1 }
0x10ff   :  { %v4853_v32 = vpop.f32.mrb[108].mxu1 }
0x1100   :  { %v15418_v20 = vpack.i.bf16 %v4853_v32, %v17949_v8  ;;  %v13470_v14 = vpop.f32.mrb[109].mxu1 }
0x1102   :  { %15419 = vrot.lane.b32.xlu0 %v15418_v20, %s16242_s17 }
0x1103   :  { %v4858_v60 = vpop.f32.mrb[110].mxu1 }
0x1104   :  { %v13473_v61 = vpop.f32.mrb[111].mxu1 }
0x1107   :  { %v4863_v15 = vpop.f32.mrb[112].mxu1 }
0x1108   :  { %v15433_v3 = vpack.i.bf16 %v4863_v15, %v4858_v60  ;;  %v13476_v45 = vpop.f32.mrb[113].mxu1 }
0x110b   :  { %v5094_v51 = vpop.f32.mrb[114].mxu1 }
0x110c   :  { %v15423_v36 = vpack.i.bf16 %v5094_v51, %v4107_v41  ;;  %v13500_v59 = vpop.f32.mrb[115].mxu1 }
0x110e   :  { %15424 = vrot.lane.b32.xlu1 %v15423_v36, %s16240_s30 }
0x110f   :  { %v5099_v19 = vpop.f32.mrb[116].mxu1 }
0x1110   :  { %v13503_v40 = vpop.f32.mrb[117].mxu1 }
0x1112   :  { %15434 = vrot.lane.b32.xlu1 %v15433_v3, %s16242_s17 }
0x1113   :  { %v5104_v46 = vpop.f32.mrb[118].mxu1 }
0x1114   :  { %v15438_v13 = vpack.i.bf16 %v5104_v46, %v5099_v19  ;;  %v13506_v8 = vpop.f32.mrb[119].mxu1 }
0x1117   :  { %v15405_v29 = vpop.permute.xlu0 %15404 }
0x1118   :  { %v15407_v11 = vunpack.i.h.bf16 %v15405_v29  ;;  %v15406_v24 = vunpack.i.l.bf16 %v15405_v29 }
0x111a   :  { %v4389_v37 = vsel %vm541_vm4, %v17914_v38, %v15407_v11  ;;  %v4388_v10 = vsel %vm541_vm4, %v17907_v21, %v15406_v24 }
0x1124   :  { %v5335_v30 = vpop.f32.mrb[120].mxu1 }
0x1125   :  { %v15428_v43 = vpack.i.bf16 %v5335_v30, %v4348_v7  ;;  %v13530_v57 = vpop.f32.mrb[121].mxu1 }
0x1127   :  { %15429 = vrot.lane.b32.xlu0 %v15428_v43, %s16241_s16  ;;  %v11848_v43 = vld [vmem:[%s19981_s8 + $0x1] ss:$0 sm:$0xff] }
0x112b   :  { %15439 = vrot.lane.b32.xlu0 %v15438_v13, %s16240_s30 }
0x1154   :  { %v15410_v52 = vpop.permute.xlu1 %15409 }
0x1155   :  { %v15412_v58 = vunpack.i.h.bf16 %v15410_v52  ;;  %v15411_v17 = vunpack.i.l.bf16 %v15410_v52 }
0x1157   :  { %v4391_v47 = vsel %vm1534_vm8, %v4388_v10, %v15411_v17  ;;  %v4392_v41 = vsel %vm1534_vm8, %v4389_v37, %v15412_v58  ;;  %v11857_v10 = vld [vmem:[%s19984_s11 + $0xa0] sm:$0xff] }
0x1159   :  { %v5340_v23 = vpop.f32.mrb[122].mxu1 }
0x115a   :  { %v13533_v39 = vpop.f32.mrb[123].mxu1 }
0x115d   :  { %v5345_v50 = vpop.f32.mrb[124].mxu1 }
0x115e   :  { %v15443_v6 = vpack.i.bf16 %v5345_v50, %v5340_v23  ;;  %v13536_v44 = vpop.f32.mrb[125].mxu1 }
0x1160   :  { %v15415_v31 = vpop.permute.xlu0 %15414  ;;  %15444 = vrot.lane.b32.xlu1 %v15443_v6, %s16241_s16 }
0x1161   :  { %v15417_v25 = vunpack.i.h.bf16 %v15415_v31  ;;  %v15416_v33 = vunpack.i.l.bf16 %v15415_v31 }
0x1163   :  { %v4394_v12 = vsel %vm1538_vm9, %v4391_v47, %v15416_v33  ;;  %v4395_v2 = vsel %vm1538_vm9, %v4392_v41, %v15417_v25  ;;  %v11858_v47 = vld [vmem:[%s19984_s11 + $0xa8] sm:$0xff] }
0x1164   :  { %13569 = vmatprep.mubr.f32.mxu0 %v4394_v12  ;;  %v14780_v41 = vpack.c.bf16 %v11858_v47, %v11857_v10 }
0x1165   :  { %13570 = vmatmul.mubr.f32.vlgmr.msra.gmra.mrb[124].mxu0 %v4395_v2 }
0x1174   :  { %v15420_v48 = vpop.permute.xlu0 %15419 }
0x1175   :  { %v15422_v22 = vunpack.i.h.bf16 %v15420_v48  ;;  %v15421_v16 = vunpack.i.l.bf16 %v15420_v48 }
0x1177   :  { %v4390_v21 = vsel %vm541_vm4, %v17921_v53, %v15421_v16  ;;  %v5385_v26 = vsel %vm541_vm4, %v18001_v42, %v15422_v22 }
0x1180   :  { %v15425_v1 = vpop.permute.xlu1 %15424 }
0x1181   :  { %v15427_v38 = vunpack.i.h.bf16 %v15425_v1  ;;  %v15426_v7 = vunpack.i.l.bf16 %v15425_v1 }
0x1183   :  { %v4393_v32 = vsel %vm1534_vm8, %v4390_v21, %v15426_v7  ;;  %v5388_v20 = vsel %vm1534_vm8, %v5385_v26, %v15427_v38  ;;  %v11861_v21 = vld [vmem:[%s19984_s11 + $0xc0] sm:$0xff]  ;;  %v11862_v26 = vld [vmem:[%s19984_s11 + $0xc8] sm:$0xff] }
0x1184   :  { %v15435_v61 = vpop.permute.xlu1 %15434 }
0x1185   :  { %v15437_v3 = vunpack.i.h.bf16 %v15435_v61  ;;  %v15436_v45 = vunpack.i.l.bf16 %v15435_v61  ;;  %v11865_v61 = vld [vmem:[%s19984_s11 + $0xe0] sm:$0xff] }
0x1187   :  { %v5386_v42 = vsel %vm541_vm4, %v18003_v62, %v15436_v45  ;;  %v5387_v40 = vsel %vm541_vm4, %v18005_v18, %v15437_v3  ;;  %v11867_v3 = vld [vmem:[%s19984_s11 + $0xf0] sm:$0xff] }
0x1199   :  { %v15430_v35 = vpop.permute.xlu0 %15429 }
0x119a   :  { %v15432_v56 = vunpack.i.h.bf16 %v15430_v35  ;;  %v15431_v27 = vunpack.i.l.bf16 %v15430_v35  ;;  %v11859_v35 = vld [vmem:[%s19984_s11 + $0xb0] sm:$0xff] }
0x119c   :  { %v4396_v14 = vsel %vm1538_vm9, %v4393_v32, %v15431_v27  ;;  %v5391_v60 = vsel %vm1538_vm9, %v5388_v20, %v15432_v56  ;;  %v11860_v56 = vld [vmem:[%s19984_s11 + $0xb8] sm:$0xff]  ;;  %v14788_v32 = vpack.c.bf16 %v11862_v26, %v11861_v21  ;;  %v11863_v20 = vld [vmem:[%s19984_s11 + $0xd0] sm:$0xff] }
0x119d   :  { %13572 = vmatprep.mubr.f32.mxu0 %v4396_v14  ;;  %v15440_v15 = vpop.permute.xlu0 %15439  ;;  %v14784_v27 = vpack.c.bf16 %v11860_v56, %v11859_v35  ;;  %v11864_v14 = vld [vmem:[%s19984_s11 + $0xd8] sm:$0xff] }
0x119e   :  { %13573 = vmatmul.mubr.f32.gmra.mrb[126].mxu0 %v5391_v60  ;;  %v15442_v51 = vunpack.i.h.bf16 %v15440_v15  ;;  %v15441_v36 = vunpack.i.l.bf16 %v15440_v15  ;;  %v14792_v60 = vpack.c.bf16 %v11864_v14, %v11863_v20  ;;  %v11866_v15 = vld [vmem:[%s19984_s11 + $0xe8] sm:$0xff] }
0x119f   :  { %v14796_v45 = vpack.c.bf16 %v11866_v15, %v11865_v61 }
0x11a0   :  { %v5389_v46 = vsel %vm1534_vm8, %v5386_v42, %v15441_v36  ;;  %v5390_v13 = vsel %vm1534_vm8, %v5387_v40, %v15442_v51  ;;  %v11868_v51 = vld [vmem:[%s19984_s11 + $0xf8] sm:$0xff] }
0x11a1   :  { %v14800_v36 = vpack.c.bf16 %v11868_v51, %v11867_v3  ;;  %v11871_v51 = vld [vmem:[%s19986_s13 + $0x40] sm:$0xff] }
0x11d2   :  { %v15445_v53 = vpop.permute.xlu1 %15444 }
0x11d3   :  { %v15447_v59 = vunpack.i.h.bf16 %v15445_v53  ;;  %v15446_v19 = vunpack.i.l.bf16 %v15445_v53 }
0x11d5   :  { %v5392_v8 = vsel %vm1538_vm9, %v5389_v46, %v15446_v19  ;;  %v5393_v30 = vsel %vm1538_vm9, %v5390_v13, %v15447_v59 }
0x11d6   :  { %13575 = vmatprep.mubr.f32.mxu0 %v5392_v8 }
0x11d7   :  { %13576 = vmatmul.mubr.f32.gmra.mrb[128].mxu0 %v5393_v30 }
0x1238   :  { %v13571_v57 = vpop.f32.mrb[124].mxu0 }
0x1239   :  { %v5491_v23 = vadd.f32 %v13571_v57, %v11848_v43  ;;  %v5485_v62 = vpop.f32.mrb[125].mxu0 }
0x123a   :  { %v5486_v29 = vadd.f32 %v11848_v43, %v5485_v62 }
0x123b   :  { %v18042_v18 = vadd.f32 %v5491_v23, %v17275_v55 }
0x123c   :  { %v18045_v39 = vadd.f32 %v5486_v29, %v17278_v54 }
0x123d   :  { %5526 = vadd.xlane.f32.xlu1 %v18042_v18 }
0x123e   :  { %5524 = vadd.xlane.f32.xlu0 %v18045_v39 }
0x1271   :  { %v13574_v52 = vpop.f32.mrb[126].mxu0 }
0x1272   :  { %v5495_v11 = vpop.f32.mrb[127].mxu0  ;;  %v5501_v50 = vadd.f32 %v13574_v52, %v11848_v43 }
0x1273   :  { %v5496_v24 = vadd.f32 %v11848_v43, %v5495_v11 }
0x1274   :  { %v18054_v17 = vadd.f32 %v5501_v50, %v17283_v9  ;;  %v11853_v9 = vld [vmem:[%s19984_s11 + $0x80] sm:$0xff] }
0x1275   :  { %v18050_v58 = vadd.f32 %v5496_v24, %v17286_v34  ;;  %v11854_v34 = vld [vmem:[%s19984_s11 + $0x88] sm:$0xff] }
0x1276   :  { %v14772_v25 = vpack.c.bf16 %v11854_v34, %v11853_v9  ;;  %v11851_v34 = vld [vmem:[%s19982_s9 + $0x1] ss:$0 sm:$0xff] }
0x1277   :  { %5528 = vadd.xlane.f32.xlu0 %v18050_v58 }
0x1278   :  { %14773 = vmatprep.subr.bf16.mxu1 %v14772_v25 }
0x1279   :  { %14775 = vmatpush3.bf16.msra.mxu1 %v14772_v25 }
0x127b   :  { %5530 = vadd.xlane.f32.xlu0 %v18054_v17 }
0x12aa   :  { %v13577_v55 = vpop.f32.mrb[128].mxu0 }
0x12ab   :  { %v5511_v54 = vadd.f32 %v13577_v55, %v11848_v43  ;;  %v5505_v6 = vpop.f32.mrb[129].mxu0 }
0x12ac   :  { %v5506_v44 = vadd.f32 %v11848_v43, %v5505_v6 }
0x12ad   :  { %v18058_v31 = vadd.f32 %v5511_v54, %v17291_v49  ;;  %v11855_v49 = vld [vmem:[%s19984_s11 + $0x90] sm:$0xff] }
0x12ae   :  { %v18061_v37 = vadd.f32 %v5506_v44, %v17294_v5  ;;  %v11856_v5 = vld [vmem:[%s19984_s11 + $0x98] sm:$0xff] }
0x12af   :  { %5534 = vadd.xlane.f32.xlu1 %v18058_v31  ;;  %v14776_v33 = vpack.c.bf16 %v11856_v5, %v11855_v49 }
0x12b0   :  { %5532 = vadd.xlane.f32.xlu0 %v18061_v37 }
0x12b1   :  { %14777 = vmatprep.subr.bf16.mxu1 %v14776_v33 }
0x12b2   :  { %14779 = vmatpush3.bf16.msra.mxu1 %v14776_v33  ;;  %v11852_v33 = vld [vmem:[%s19983_s10 + $0x1] ss:$0 sm:$0xff] }
0x12b3   :  { %14781 = vmatprep.subr.bf16.mxu1 %v14780_v41 }
0x12b6   :  { %14783 = vmatpush3.bf16.msra.mxu1 %v14780_v41 }
0x12b7   :  { %14785 = vmatprep.subr.bf16.mxu1 %v14784_v27 }
0x12ba   :  { %14787 = vmatpush3.bf16.msra.mxu1 %v14784_v27 }
0x12bb   :  { %14789 = vmatprep.subr.bf16.mxu1 %v14788_v32 }
0x12be   :  { %14791 = vmatpush3.bf16.msra.mxu1 %v14788_v32 }
0x12bf   :  { %14793 = vmatprep.subr.bf16.mxu1 %v14792_v60 }
0x12c2   :  { %14795 = vmatpush3.bf16.msra.mxu1 %v14792_v60 }
0x12c3   :  { %14797 = vmatprep.subr.bf16.mxu1 %v14796_v45 }
0x12c6   :  { %14799 = vmatpush3.bf16.msra.mxu1 %v14796_v45 }
0x12c7   :  { %14801 = vmatprep.subr.bf16.mxu1 %v14800_v36 }
0x12ca   :  { %v5527_v12 = vpop.xlane.xlu1 %5526  ;;  %14803 = vmatpush3.bf16.msra.mxu1 %v14800_v36  ;;  %v11872_v36 = vld [vmem:[%s19986_s13 + $0x48] sm:$0xff] }
0x12cb   :  { %v5537_v2 = vmul.f32 0.0078125, %v5527_v12  ;;  %v5525_v48 = vpop.xlane.xlu0 %5524 }
0x12cc   :  { %v5536_v1 = vmul.f32 0.0078125, %v5525_v48 }
0x12cd   :  { %v18084_v22 = vsub.f32 %v18042_v18, %v5537_v2 }
0x12ce   :  { %v18087_v16 = vsub.f32 %v18045_v39, %v5536_v1 }
0x12cf   :  { %v5549_v38 = vmul.f32 %v18084_v22, %v18084_v22 }
0x12d0   :  { %v5548_v7 = vmul.f32 %v18087_v16, %v18087_v16 }
0x12d1   :  { %5556 = vadd.xlane.f32.xlu1 %v5549_v38 }
0x12d2   :  { %5554 = vadd.xlane.f32.xlu0 %v5548_v7 }
0x1304   :  { %v5529_v53 = vpop.xlane.xlu0 %5528 }
0x1305   :  { %v5538_v59 = vmul.f32 0.0078125, %v5529_v53  ;;  %v14804_v53 = vpack.c.bf16 %v11872_v36, %v11871_v51 }
0x1307   :  { %v5544_v19 = vsub.f32 %v18050_v58, %v5538_v59  ;;  %14805 = vmatprep.subr.bf16.mxu0 %v14804_v53  ;;  %v11873_v59 = vld [vmem:[%s19986_s13 + $0x50] sm:$0xff] }
0x1308   :  { %v5531_v42 = vpop.xlane.xlu0 %5530  ;;  %14807 = vmatpush3.bf16.msra.mxu0 %v14804_v53 }
0x1309   :  { %v5539_v40 = vmul.f32 0.0078125, %v5531_v42  ;;  %v5550_v46 = vmul.f32 %v5544_v19, %v5544_v19 }
0x130b   :  { %v5545_v13 = vsub.f32 %v18054_v17, %v5539_v40  ;;  %5558 = vadd.xlane.f32.xlu0 %v5550_v46 }
0x130d   :  { %v5551_v8 = vmul.f32 %v5545_v13, %v5545_v13 }
0x130f   :  { %5560 = vadd.xlane.f32.xlu1 %v5551_v8 }
0x133c   :  { %v5535_v30 = vpop.xlane.xlu1 %5534 }
0x133d   :  { %v5541_v43 = vmul.f32 0.0078125, %v5535_v30  ;;  %v5533_v57 = vpop.xlane.xlu0 %5532  ;;  %v11875_v30 = vld [vmem:[%s19986_s13 + $0x60] sm:$0xff] }
0x133e   :  { %v5540_v23 = vmul.f32 0.0078125, %v5533_v57 }
0x133f   :  { %v5547_v62 = vsub.f32 %v18058_v31, %v5541_v43  ;;  %v11876_v43 = vld [vmem:[%s19986_s13 + $0x68] sm:$0xff] }
0x1340   :  { %v18127_v29 = vsub.f32 %v18061_v37, %v5540_v23  ;;  %v14812_v23 = vpack.c.bf16 %v11876_v43, %v11875_v30 }
0x1341   :  { %v5553_v52 = vmul.f32 %v5547_v62, %v5547_v62 }
0x1342   :  { %v5552_v11 = vmul.f32 %v18127_v29, %v18127_v29 }
0x1343   :  { %5564 = vadd.xlane.f32.xlu1 %v5553_v52 }
0x1344   :  { %5562 = vadd.xlane.f32.xlu0 %v5552_v11 }
0x135e   :  { %v5557_v24 = vpop.xlane.xlu1 %5556 }
0x135f   :  { %v5567_v50 = vmul.f32 0.0078125, %v5557_v24  ;;  %v5555_v55 = vpop.xlane.xlu0 %5554 }
0x1360   :  { %v5566_v54 = vmul.f32 0.0078125, %v5555_v55  ;;  %v11870_v55 = vld [vmem:[%s19985_s12 + $0x1] ss:$0 sm:$0xff] }
0x1361   :  { %v5573_v6 = vadd.f32 1e-05, %v5567_v50 }
0x1362   :  { %v5572_v44 = vadd.f32 1e-05, %v5566_v54 }
0x1363   :  { %15898 = vrsqrt.f32 %v5573_v6 }
0x1364   :  { %15900 = vrsqrt.f32 %v5572_v44 }
0x136d   :  { %v15899_v9 = vpop.eup %15898 }
0x136e   :  { %v15901_v49 = vpop.eup %15900  ;;  %v5585_v25 = vmul.f32 %v15899_v9, %v18084_v22 }
0x136f   :  { %v5584_v5 = vmul.f32 %v15901_v49, %v18087_v16 }
0x1370   :  { %v5597_v10 = vmul.f32 %v11851_v34, %v5585_v25 }
0x1371   :  { %v5596_v47 = vmul.f32 %v11851_v34, %v5584_v5 }
0x1372   :  { %v5609_v12 = vadd.f32 %v11852_v33, %v5597_v10 }
0x1373   :  { %v5608_v41 = vadd.f32 %v11852_v33, %v5596_v47 }
0x1375   :  { %13610 = vmatprep.mubr.f32.mxu1 %v5608_v41 }
0x1376   :  { %13611 = vmatmul.mubr.f32.vlgmr.msra.gmra.mrb[126].mxu1 %v5609_v12 }
0x1398   :  { %v5559_v2 = vpop.xlane.xlu0 %5558 }
0x1399   :  { %v5568_v48 = vmul.f32 0.0078125, %v5559_v2 }
0x139b   :  { %v5574_v1 = vadd.f32 1e-05, %v5568_v48 }
0x139c   :  { %v5561_v38 = vpop.xlane.xlu1 %5560 }
0x139d   :  { %15902 = vrsqrt.f32 %v5574_v1  ;;  %v5569_v7 = vmul.f32 0.0078125, %v5561_v38 }
0x139f   :  { %v5575_v35 = vadd.f32 1e-05, %v5569_v7 }
0x13a1   :  { %15904 = vrsqrt.f32 %v5575_v35 }
0x13a7   :  { %v15903_v22 = vpop.eup %15902 }
0x13a8   :  { %v5586_v16 = vmul.f32 %v15903_v22, %v5544_v19  ;;  %v11874_v19 = vld [vmem:[%s19986_s13 + $0x58] sm:$0xff] }
0x13a9   :  { %v14808_v42 = vpack.c.bf16 %v11874_v19, %v11873_v59 }
0x13aa   :  { %v5598_v56 = vmul.f32 %v11851_v34, %v5586_v16 }
0x13ab   :  { %v15905_v27 = vpop.eup %15904  ;;  %14809 = vmatprep.subr.bf16.mxu0 %v14808_v42 }
0x13ac   :  { %v5610_v21 = vadd.f32 %v11852_v33, %v5598_v56  ;;  %v5587_v26 = vmul.f32 %v15905_v27, %v5545_v13  ;;  %14811 = vmatpush3.bf16.msra.mxu0 %v14808_v42 }
0x13ad   :  { %14813 = vmatprep.subr.bf16.mxu0 %v14812_v23 }
0x13ae   :  { %13613 = vmatprep.mubr.f32.mxu1 %v5610_v21  ;;  %v5599_v32 = vmul.f32 %v11851_v34, %v5587_v26 }
0x13b0   :  { %v5611_v20 = vadd.f32 %v11852_v33, %v5599_v32  ;;  %14815 = vmatpush3.bf16.msra.mxu0 %v14812_v23 }
0x13b2   :  { %13614 = vmatmul.mubr.f32.gmra.mrb[128].mxu1 %v5611_v20 }
0x13d0   :  { %v5565_v14 = vpop.xlane.xlu1 %5564 }
0x13d1   :  { %v5571_v60 = vmul.f32 0.0078125, %v5565_v14  ;;  %v5563_v61 = vpop.xlane.xlu0 %5562 }
0x13d2   :  { %v5570_v15 = vmul.f32 0.0078125, %v5563_v61 }
0x13d3   :  { %v5577_v3 = vadd.f32 1e-05, %v5571_v60 }
0x13d4   :  { %v5576_v45 = vadd.f32 1e-05, %v5570_v15 }
0x13d5   :  { %15906 = vrsqrt.f32 %v5577_v3 }
0x13d6   :  { %15908 = vrsqrt.f32 %v5576_v45 }
0x13df   :  { %v15907_v40 = vpop.eup %15906 }
0x13e0   :  { %v15909_v46 = vpop.eup %15908  ;;  %v5589_v13 = vmul.f32 %v15907_v40, %v5547_v62  ;;  %v11877_v62 = vld [vmem:[%s19986_s13 + $0x70] sm:$0xff] }
0x13e1   :  { %v5588_v8 = vmul.f32 %v15909_v46, %v18127_v29  ;;  %v11878_v29 = vld [vmem:[%s19986_s13 + $0x78] sm:$0xff] }
0x13e2   :  { %v5601_v57 = vmul.f32 %v11851_v34, %v5589_v13  ;;  %v14816_v50 = vpack.c.bf16 %v11878_v29, %v11877_v62 }
0x13e3   :  { %v5600_v52 = vmul.f32 %v11851_v34, %v5588_v8 }
0x13e4   :  { %v5613_v24 = vadd.f32 %v11852_v33, %v5601_v57  ;;  %14817 = vmatprep.subr.bf16.mxu0 %v14816_v50 }
0x13e5   :  { %v5612_v11 = vadd.f32 %v11852_v33, %v5600_v52  ;;  %14819 = vmatpush3.bf16.msra.mxu0 %v14816_v50 }
0x13e7   :  { %13616 = vmatprep.mubr.f32.mxu1 %v5612_v11 }
0x13e8   :  { %13617 = vmatmul.mubr.f32.gmra.mrb[130].mxu1 %v5613_v24 }
0x13e9   :  { %6131 = vmatprep.mubr.f32.mxu1 %v16237_v63 }
0x1449   :  { %v13612_v54 = vpop.f32.mrb[126].mxu1 }
0x144a   :  { %v5711_v6 = vadd.f32 %v13612_v54, %v11870_v55  ;;  %v5705_v44 = vpop.f32.mrb[127].mxu1 }
0x144b   :  { %v5706_v9 = vadd.f32 %v11870_v55, %v5705_v44 }
0x144c   :  { %v5735_v34 = vmul.f32 %v5711_v6, %v5711_v6 }
0x144d   :  { %v5734_v49 = vmul.f32 %v5706_v9, %v5706_v9 }
0x144e   :  { %v5741_v25 = vmul.f32 %v5735_v34, %v5711_v6 }
0x144f   :  { %v5740_v5 = vmul.f32 %v5734_v49, %v5706_v9 }
0x1450   :  { %v5747_v33 = vmul.f32 0.044715, %v5741_v25 }
0x1451   :  { %v5746_v10 = vmul.f32 0.044715, %v5740_v5 }
0x1452   :  { %v5753_v47 = vadd.f32 %v5747_v33, %v5711_v6 }
0x1453   :  { %v5752_v41 = vadd.f32 %v5746_v10, %v5706_v9 }
0x1454   :  { %v5759_v12 = vmul.f32 0.7978846, %v5753_v47 }
0x1455   :  { %v5758_v2 = vmul.f32 0.7978846, %v5752_v41 }
0x1456   :  { %15910 = vtanh.f32 %v5759_v12  ;;  %v11880_v12 = vld [vmem:[%s19987_s14 + $0x1] ss:$0 sm:$0xff] }
0x1457   :  { %15912 = vtanh.f32 %v5758_v2 }
0x1460   :  { %v15911_v48 = vpop.eup %15910 }
0x1461   :  { %v15913_v1 = vpop.eup %15912  ;;  %v5771_v38 = vadd.f32 1.0, %v15911_v48 }
0x1462   :  { %v5770_v7 = vadd.f32 1.0, %v15913_v1 }
0x1463   :  { %v5777_v35 = vmul.f32 0.5, %v5771_v38 }
0x1464   :  { %v5776_v22 = vmul.f32 0.5, %v5770_v7 }
0x1465   :  { %v5783_v56 = vmul.f32 %v5777_v35, %v5711_v6 }
0x1466   :  { %v5782_v16 = vmul.f32 %v5776_v22, %v5706_v9 }
0x1468   :  { %13635 = vmatprep.mubr.msk.f32.mxu0 %vm1534_vm8, %v5782_v16 }
0x1469   :  { %13636 = vmatmul.mubr.msk.f32.vlgmr.msra.gmra.mrb[130].mxu0 %vm1534_vm8, %v5783_v56 }
0x1485   :  { %v13615_v27 = vpop.f32.mrb[128].mxu1 }
0x1486   :  { %v5721_v21 = vadd.f32 %v13615_v27, %v11870_v55  ;;  %v5715_v26 = vpop.f32.mrb[129].mxu1 }
0x1487   :  { %v5716_v32 = vadd.f32 %v11870_v55, %v5715_v26 }
0x1488   :  { %v5737_v20 = vmul.f32 %v5721_v21, %v5721_v21 }
0x1489   :  { %v5736_v14 = vmul.f32 %v5716_v32, %v5716_v32 }
0x148a   :  { %v5743_v60 = vmul.f32 %v5737_v20, %v5721_v21 }
0x148b   :  { %v5742_v61 = vmul.f32 %v5736_v14, %v5716_v32 }
0x148c   :  { %v5749_v15 = vmul.f32 0.044715, %v5743_v60 }
0x148d   :  { %v5748_v3 = vmul.f32 0.044715, %v5742_v61  ;;  %v6019_v61 = vld [vmem:[#allocation2 + $0x300] sm:$0xff] }
0x148e   :  { %v5755_v45 = vadd.f32 %v5749_v15, %v5721_v21 }
0x148f   :  { %v5754_v51 = vadd.f32 %v5748_v3, %v5716_v32  ;;  %v6022_v3 = vld [vmem:[#allocation2 + $0x318] sm:$0xff] }
0x1490   :  { %v5761_v36 = vmul.f32 0.7978846, %v5755_v45  ;;  %v6021_v45 = vld [vmem:[#allocation2 + $0x310] sm:$0xff] }
0x1491   :  { %v5760_v53 = vmul.f32 0.7978846, %v5754_v51  ;;  %v6024_v51 = vld [vmem:[#allocation2 + $0x328] sm:$0xff] }
0x1492   :  { %15914 = vtanh.f32 %v5761_v36  ;;  %v14822_v36 = vpack.c.bf16 %v6022_v3, %v6019_v61  ;;  %v6049_v61 = vld [vmem:[#allocation2 + $0x3f0] sm:$0xff]  ;;  %v6051_v3 = vld [vmem:[#allocation2 + $0x400] sm:$0xff] }
0x1493   :  { %15916 = vtanh.f32 %v5760_v53  ;;  %v14852_v53 = vpack.c.bf16 %v6024_v51, %v6021_v45  ;;  %v6054_v51 = vld [vmem:[#allocation2 + $0x418] sm:$0xff] }
0x1495   :  { %14853 = vmatprep.subr.bf16.mxu0 %v14852_v53 }
0x1496   :  { %14855 = vmatpush3.bf16.msra.mxu0 %v14852_v53  ;;  %v6056_v53 = vld [vmem:[#allocation2 + $0x428] sm:$0xff] }
0x149c   :  { %v15915_v59 = vpop.eup %15914 }
0x149d   :  { %v15917_v19 = vpop.eup %15916  ;;  %v5773_v42 = vadd.f32 1.0, %v15915_v59  ;;  %v6026_v59 = vld [vmem:[#allocation2 + $0x338] sm:$0xff] }
0x149e   :  { %v5772_v40 = vadd.f32 1.0, %v15917_v19  ;;  %v6029_v19 = vld [vmem:[#allocation2 + $0x350] sm:$0xff] }
0x149f   :  { %v5779_v46 = vmul.f32 0.5, %v5773_v42  ;;  %v14824_v42 = vpack.c.bf16 %v6029_v19, %v6026_v59  ;;  %v6059_v59 = vld [vmem:[#allocation2 + $0x440] sm:$0xff] }
0x14a0   :  { %v5778_v13 = vmul.f32 0.5, %v5772_v40  ;;  %v6027_v40 = vld [vmem:[#allocation2 + $0x340] sm:$0xff]  ;;  %v14844_v19 = vpack.c.bf16 %v6059_v59, %v6056_v53 }
0x14a1   :  { %v5785_v30 = vmul.f32 %v5779_v46, %v5721_v21  ;;  %v6030_v46 = vld [vmem:[#allocation2 + $0x358] sm:$0xff] }
0x14a2   :  { %v5784_v8 = vmul.f32 %v5778_v13, %v5716_v32 }
0x14a4   :  { %13638 = vmatprep.mubr.msk.f32.mxu0 %vm1534_vm8, %v5784_v8  ;;  %v14856_v8 = vpack.c.bf16 %v6030_v46, %v6027_v40  ;;  %v6060_v46 = vld [vmem:[#allocation2 + $0x448] sm:$0xff] }
0x14a5   :  { %13639 = vmatmul.mubr.msk.f32.gmra.mrb[132].mxu0 %vm1534_vm8, %v5785_v30  ;;  %v6032_v30 = vld [vmem:[#allocation2 + $0x368] sm:$0xff] }
0x14a6   :  { %14857 = vmatprep.subr.bf16.mxu0 %v14856_v8 }
0x14a7   :  { %14859 = vmatpush3.bf16.msra.mxu0 %v14856_v8  ;;  %v6065_v8 = vld [vmem:[#allocation2 + $0x470] sm:$0xff] }
0x14bb   :  { %v13618_v43 = vpop.f32.mrb[130].mxu1 }
0x14bc   :  { %v5731_v57 = vadd.f32 %v13618_v43, %v11870_v55  ;;  %v5725_v23 = vpop.f32.mrb[131].mxu1  ;;  %v6035_v43 = vld [vmem:[#allocation2 + $0x380] sm:$0xff] }
0x14bd   :  { %v5726_v52 = vadd.f32 %v11870_v55, %v5725_v23  ;;  %v14828_v23 = vpack.c.bf16 %v6035_v43, %v6032_v30 }
0x14be   :  { %v5739_v11 = vmul.f32 %v5731_v57, %v5731_v57 }
0x14bf   :  { %v5738_v62 = vmul.f32 %v5726_v52, %v5726_v52 }
0x14c0   :  { %v5745_v29 = vmul.f32 %v5739_v11, %v5731_v57  ;;  %v6033_v11 = vld [vmem:[#allocation2 + $0x370] sm:$0xff] }
0x14c1   :  { %v5744_v24 = vmul.f32 %v5738_v62, %v5726_v52  ;;  %v6036_v62 = vld [vmem:[#allocation2 + $0x388] sm:$0xff] }
0x14c2   :  { %v5751_v50 = vmul.f32 0.044715, %v5745_v29 }
0x14c3   :  { %v5750_v54 = vmul.f32 0.044715, %v5744_v24  ;;  %v14860_v24 = vpack.c.bf16 %v6036_v62, %v6033_v11  ;;  %v6066_v62 = vld [vmem:[#allocation2 + $0x478] sm:$0xff] }
0x14c4   :  { %v5757_v6 = vadd.f32 %v5751_v50, %v5731_v57 }
0x14c5   :  { %v5756_v44 = vadd.f32 %v5750_v54, %v5726_v52  ;;  %14861 = vmatprep.subr.bf16.mxu0 %v14860_v24 }
0x14c6   :  { %v5763_v9 = vmul.f32 0.7978846, %v5757_v6  ;;  %14863 = vmatpush3.bf16.msra.mxu0 %v14860_v24 }
0x14c7   :  { %v5762_v34 = vmul.f32 0.7978846, %v5756_v44 }
0x14c8   :  { %15918 = vtanh.f32 %v5763_v9 }
0x14c9   :  { %15920 = vtanh.f32 %v5762_v34 }
0x14d2   :  { %v15919_v49 = vpop.eup %15918 }
0x14d3   :  { %v15921_v25 = vpop.eup %15920  ;;  %v5775_v5 = vadd.f32 1.0, %v15919_v49 }
0x14d4   :  { %v5774_v33 = vadd.f32 1.0, %v15921_v25 }
0x14d5   :  { %v5781_v10 = vmul.f32 0.5, %v5775_v5  ;;  %v6038_v5 = vld [vmem:[#allocation2 + $0x398] sm:$0xff] }
0x14d6   :  { %v5780_v47 = vmul.f32 0.5, %v5774_v33  ;;  %v6041_v33 = vld [vmem:[#allocation2 + $0x3b0] sm:$0xff] }
0x14d7   :  { %v5787_v55 = vmul.f32 %v5781_v10, %v5731_v57  ;;  %v6031_v57 = vld [vmem:[#allocation2 + $0x360] sm:$0xff]  ;;  %v14832_v10 = vpack.c.bf16 %v6041_v33, %v6038_v5 }
0x14d8   :  { %v5786_v41 = vmul.f32 %v5780_v47, %v5726_v52  ;;  %v6034_v52 = vld [vmem:[#allocation2 + $0x378] sm:$0xff]  ;;  %v6037_v47 = vld [vmem:[#allocation2 + $0x390] sm:$0xff] }
0x14d9   :  { %v14830_v44 = vpack.c.bf16 %v6034_v52, %v6031_v57  ;;  %v6061_v57 = vld [vmem:[#allocation2 + $0x450] sm:$0xff]  ;;  %v6063_v52 = vld [vmem:[#allocation2 + $0x460] sm:$0xff] }
0x14da   :  { %13641 = vmatprep.mubr.msk.f32.mxu0 %vm1534_vm8, %v5786_v41  ;;  %v6040_v41 = vld [vmem:[#allocation2 + $0x3a8] sm:$0xff] }
0x14db   :  { %13642 = vmatmul.mubr.msk.f32.gmra.mrb[134].mxu0 %vm1534_vm8, %v5787_v55  ;;  %v6039_v55 = vld [vmem:[#allocation2 + $0x3a0] sm:$0xff] }
0x153c   :  { %v13637_v2 = vpop.f32.mrb[130].mxu0 }
0x153d   :  { %v5895_v48 = vadd.f32 %v13637_v2, %v11880_v12  ;;  %v5889_v1 = vpop.f32.mrb[131].mxu0  ;;  %v6042_v2 = vld [vmem:[#allocation2 + $0x3b8] sm:$0xff] }
0x153e   :  { %v5890_v38 = vadd.f32 %v11880_v12, %v5889_v1  ;;  %v6044_v1 = vld [vmem:[#allocation2 + $0x3c8] sm:$0xff] }
0x153f   :  { %v18178_v7 = vadd.f32 %v5895_v48, %v18042_v18  ;;  %v14864_v48 = vpack.c.bf16 %v6042_v2, %v6039_v55 }
0x1540   :  { %v18181_v35 = vadd.f32 %v5890_v38, %v18045_v39  ;;  %v6047_v38 = vld [vmem:[#allocation2 + $0x3e0] sm:$0xff] }
0x1541   :  { %5930 = vadd.xlane.f32.xlu1 %v18178_v7  ;;  %14865 = vmatprep.subr.bf16.mxu0 %v14864_v48 }
0x1542   :  { %5928 = vadd.xlane.f32.xlu0 %v18181_v35  ;;  %14867 = vmatpush3.bf16.msra.mxu0 %v14864_v48 }
0x1578   :  { %v13640_v22 = vpop.f32.mrb[132].mxu0 }
0x1579   :  { %v5905_v16 = vadd.f32 %v13640_v22, %v11880_v12  ;;  %v5899_v56 = vpop.f32.mrb[133].mxu0  ;;  %v14836_v22 = vpack.c.bf16 %v6047_v38, %v6044_v1 }
0x157a   :  { %v5900_v27 = vadd.f32 %v11880_v12, %v5899_v56  ;;  %v6046_v56 = vld [vmem:[#allocation2 + $0x3d8] sm:$0xff] }
0x157b   :  { %v18186_v21 = vadd.f32 %v5905_v16, %v18054_v17  ;;  %v6023_v17 = vld [vmem:[#allocation2 + $0x320] sm:$0xff] }
0x157c   :  { %v18189_v26 = vadd.f32 %v5900_v27, %v18050_v58  ;;  %v6020_v58 = vld [vmem:[#allocation2 + $0x308] sm:$0xff]  ;;  %v6043_v16 = vld [vmem:[#allocation2 + $0x3c0] sm:$0xff]  ;;  %v6045_v27 = vld [vmem:[#allocation2 + $0x3d0] sm:$0xff] }
0x157d   :  { %5934 = vadd.xlane.f32.xlu1 %v18186_v21  ;;  %v14820_v15 = vpack.c.bf16 %v6023_v17, %v6020_v58  ;;  %v6053_v58 = vld [vmem:[#allocation2 + $0x410] sm:$0xff] }
0x157e   :  { %5932 = vadd.xlane.f32.xlu0 %v18189_v26 }
0x157f   :  { %14821 = vmatprep.subr.bf16.mxu1 %v14820_v15  ;;  %v6052_v15 = vld [vmem:[#allocation2 + $0x408] sm:$0xff] }
0x1580   :  { %14823 = vmatpush1.bf16.msra.mxu1 %v14822_v36  ;;  %v14842_v45 = vpack.c.bf16 %v6052_v15, %v6049_v61  ;;  %v14872_v36 = vpack.c.bf16 %v6054_v51, %v6051_v3 }
0x1581   :  { %14825 = vmatprep.subr.bf16.mxu1 %v14824_v42  ;;  %v6058_v42 = vld [vmem:[#allocation2 + $0x438] sm:$0xff] }
0x15ae   :  { %v13643_v18 = vpop.f32.mrb[134].mxu0 }
0x15af   :  { %v5915_v39 = vadd.f32 %v13643_v18, %v11880_v12  ;;  %v5909_v32 = vpop.f32.mrb[135].mxu0  ;;  %v14838_v18 = vpack.c.bf16 %v6046_v56, %v6043_v16 }
0x15b0   :  { %v5910_v20 = vadd.f32 %v11880_v12, %v5909_v32  ;;  %v14834_v12 = vpack.c.bf16 %v6040_v41, %v6037_v47 }
0x15b1   :  { %v18194_v14 = vadd.f32 %v5915_v39, %v18058_v31  ;;  %v6025_v31 = vld [vmem:[#allocation2 + $0x330] sm:$0xff]  ;;  %v6048_v39 = vld [vmem:[#allocation2 + $0x3e8] sm:$0xff] }
0x15b2   :  { %v18197_v60 = vadd.f32 %v5910_v20, %v18061_v37  ;;  %v6028_v37 = vld [vmem:[#allocation2 + $0x348] sm:$0xff]  ;;  %v14868_v32 = vpack.c.bf16 %v6048_v39, %v6045_v27  ;;  %v6050_v20 = vld [vmem:[#allocation2 + $0x3f8] sm:$0xff]  ;;  %v11889_v39 = vld [vmem:[%s19977_s4 + $0x2] ss:$0 sm:$0xff] }
0x15b3   :  { %5938 = vadd.xlane.f32.xlu1 %v18194_v14  ;;  %v14826_v13 = vpack.c.bf16 %v6028_v37, %v6025_v31  ;;  %v14840_v17 = vpack.c.bf16 %v6053_v58, %v6050_v20  ;;  %v6055_v31 = vld [vmem:[#allocation2 + $0x420] sm:$0xff]  ;;  %v6057_v37 = vld [vmem:[#allocation2 + $0x430] sm:$0xff] }
0x15b4   :  { %5936 = vadd.xlane.f32.xlu0 %v18197_v60  ;;  %14869 = vmatprep.subr.bf16.mxu0 %v14868_v32  ;;  %v14846_v40 = vpack.c.bf16 %v6058_v42, %v6055_v31  ;;  %v14876_v30 = vpack.c.bf16 %v6060_v46, %v6057_v37 }
0x15b5   :  { %14827 = vmatpush1.bf16.msra.mxu1 %v14826_v13  ;;  %14871 = vmatpush3.bf16.msra.mxu0 %v14868_v32  ;;  %v6062_v13 = vld [vmem:[#allocation2 + $0x458] sm:$0xff] }
0x15b6   :  { %14829 = vmatprep.subr.bf16.mxu1 %v14828_v23  ;;  %14873 = vmatprep.subr.bf16.mxu0 %v14872_v36  ;;  %v14848_v43 = vpack.c.bf16 %v6065_v8, %v6062_v13  ;;  %v6064_v23 = vld [vmem:[#allocation2 + $0x468] sm:$0xff] }
0x15b7   :  { %v14850_v11 = vpack.c.bf16 %v6064_v23, %v6061_v57 }
0x15b9   :  { %14831 = vmatpush1.bf16.msra.mxu1 %v14830_v44  ;;  %14875 = vmatpush3.bf16.msra.mxu0 %v14872_v36 }
0x15ba   :  { %14833 = vmatprep.subr.bf16.mxu1 %v14832_v10  ;;  %14877 = vmatprep.subr.bf16.mxu0 %v14876_v30 }
0x15bd   :  { %14835 = vmatpush1.bf16.msra.mxu1 %v14834_v12  ;;  %14879 = vmatpush3.bf16.msra.mxu0 %v14876_v30 }
0x15be   :  { %14837 = vmatprep.subr.bf16.mxu1 %v14836_v22 }
0x15c1   :  { %14839 = vmatpush1.bf16.msra.mxu1 %v14838_v18 }
0x15c2   :  { %14841 = vmatprep.subr.bf16.mxu1 %v14840_v17  ;;  %v11890_v17 = vld [vmem:[%s19978_s5 + $0x2] ss:$0 sm:$0xff] }
0x15c5   :  { %14843 = vmatpush1.bf16.msra.mxu1 %v14842_v45 }
0x15c6   :  { %14845 = vmatprep.subr.bf16.mxu1 %v14844_v19 }
0x15c9   :  { %14847 = vmatpush1.bf16.msra.mxu1 %v14846_v40 }
0x15ca   :  { %14849 = vmatprep.subr.bf16.mxu1 %v14848_v43 }
0x15cd   :  { %14851 = vmatpush1.bf16.msra.mxu1 %v14850_v11 }
0x15ce   :  { %v5931_v29 = vpop.xlane.xlu1 %5930  ;;  %14888 = vmatprep.subr.bf16.mxu1 %v16238_v4 }
0x15cf   :  { %v5941_v50 = vmul.f32 0.0078125, %v5931_v29  ;;  %v5929_v54 = vpop.xlane.xlu0 %5928  ;;  %v14880_v29 = vpack.c.bf16 %v6066_v62, %v6063_v52 }
0x15d0   :  { %v5940_v6 = vmul.f32 0.0078125, %v5929_v54 }
0x15d1   :  { %v18202_v9 = vsub.f32 %v18178_v7, %v5941_v50  ;;  %14881 = vmatprep.subr.bf16.mxu0 %v14880_v29 }
0x15d2   :  { %v18205_v34 = vsub.f32 %v18181_v35, %v5940_v6  ;;  %14883 = vmatpush3.bf16.msra.mxu0 %v14880_v29 }
0x15d3   :  { %v5953_v49 = vmul.f32 %v18202_v9, %v18202_v9  ;;  %14884 = vmatprep.subr.bf16.mxu0 %v16238_v4 }
0x15d4   :  { %v5952_v25 = vmul.f32 %v18205_v34, %v18205_v34 }
0x15d5   :  { %5960 = vadd.xlane.f32.xlu1 %v5953_v49 }
0x15d6   :  { %5958 = vadd.xlane.f32.xlu0 %v5952_v25 }
0x160a   :  { %v5935_v24 = vpop.xlane.xlu1 %5934 }
0x160b   :  { %v5943_v50 = vmul.f32 0.0078125, %v5935_v24  ;;  %v5933_v54 = vpop.xlane.xlu0 %5932 }
0x160c   :  { %v5942_v6 = vmul.f32 0.0078125, %v5933_v54 }
0x160d   :  { %v5949_v44 = vsub.f32 %v18186_v21, %v5943_v50 }
0x160e   :  { %v5948_v49 = vsub.f32 %v18189_v26, %v5942_v6 }
0x160f   :  { %v5955_v25 = vmul.f32 %v5949_v44, %v5949_v44 }
0x1610   :  { %v5954_v5 = vmul.f32 %v5948_v49, %v5948_v49 }
0x1611   :  { %5964 = vadd.xlane.f32.xlu1 %v5955_v25 }
0x1612   :  { %5962 = vadd.xlane.f32.xlu0 %v5954_v5 }
0x1640   :  { %v5939_v33 = vpop.xlane.xlu1 %5938 }
0x1641   :  { %v5945_v10 = vmul.f32 0.0078125, %v5939_v33  ;;  %v5937_v47 = vpop.xlane.xlu0 %5936 }
0x1642   :  { %v5944_v41 = vmul.f32 0.0078125, %v5937_v47 }
0x1643   :  { %v5951_v55 = vsub.f32 %v18194_v14, %v5945_v10 }
0x1644   :  { %v5950_v12 = vsub.f32 %v18197_v60, %v5944_v41 }
0x1645   :  { %v5957_v2 = vmul.f32 %v5951_v55, %v5951_v55 }
0x1646   :  { %v5956_v48 = vmul.f32 %v5950_v12, %v5950_v12 }
0x1647   :  { %5968 = vadd.xlane.f32.xlu1 %v5957_v2 }
0x1648   :  { %5966 = vadd.xlane.f32.xlu0 %v5956_v48 }
0x1662   :  { %v5961_v1 = vpop.xlane.xlu1 %5960 }
0x1663   :  { %v5971_v38 = vmul.f32 0.0078125, %v5961_v1  ;;  %v5959_v22 = vpop.xlane.xlu0 %5958 }
0x1664   :  { %v5970_v16 = vmul.f32 0.0078125, %v5959_v22 }
0x1665   :  { %v5977_v56 = vadd.f32 1e-05, %v5971_v38 }
0x1666   :  { %v5976_v27 = vadd.f32 1e-05, %v5970_v16 }
0x1667   :  { %15922 = vrsqrt.f32 %v5977_v56 }
0x1668   :  { %15924 = vrsqrt.f32 %v5976_v27 }
0x1671   :  { %v15923_v18 = vpop.eup %15922 }
0x1672   :  { %v15925_v32 = vpop.eup %15924  ;;  %v5989_v20 = vmul.f32 %v15923_v18, %v18202_v9 }
0x1673   :  { %v5988_v58 = vmul.f32 %v15925_v32, %v18205_v34 }
0x1674   :  { %v6001_v61 = vmul.f32 %v11889_v39, %v5989_v20 }
0x1675   :  { %v6000_v15 = vmul.f32 %v11889_v39, %v5988_v58 }
0x1676   :  { %v6013_v45 = vadd.f32 %v11890_v17, %v6001_v61 }
0x1677   :  { %v6012_v3 = vadd.f32 %v11890_v17, %v6000_v15 }
0x1679   :  { %6132 = vmatmul.mubr.f32.vlgmr.msra.gmra.mrb[132].mxu1 %v6012_v3  ;;  %13676 = vmatprep.mubr.f32.mxu0 %v6012_v3 }
0x167a   :  { %13677 = vmatmul.mubr.f32.vlgmr.msra.gmra.mrb[136].mxu0 %v6013_v45  ;;  %6137 = vmatprep.mubr.f32.mxu1 %v16237_v63 }
0x167d   :  { %6138 = vmatmul.mubr.f32.gmra.mrb[134].mxu1 %v6013_v45 }
0x167e   :  { %6143 = vmatprep.mubr.f32.mxu1 %v16237_v63 }
0x169e   :  { %v5965_v51 = vpop.xlane.xlu1 %5964 }
0x169f   :  { %v5973_v9 = vmul.f32 0.0078125, %v5965_v51  ;;  %v5963_v36 = vpop.xlane.xlu0 %5962 }
0x16a0   :  { %v5972_v34 = vmul.f32 0.0078125, %v5963_v36 }
0x16a1   :  { %v5979_v53 = vadd.f32 1e-05, %v5973_v9 }
0x16a2   :  { %v5978_v59 = vadd.f32 1e-05, %v5972_v34 }
0x16a3   :  { %15926 = vrsqrt.f32 %v5979_v53 }
0x16a4   :  { %15928 = vrsqrt.f32 %v5978_v59 }
0x16ad   :  { %v15927_v19 = vpop.eup %15926 }
0x16ae   :  { %v15929_v31 = vpop.eup %15928  ;;  %v5991_v42 = vmul.f32 %v15927_v19, %v5949_v44 }
0x16af   :  { %v5990_v37 = vmul.f32 %v15929_v31, %v5948_v49 }
0x16b0   :  { %v6003_v40 = vmul.f32 %v11889_v39, %v5991_v42 }
0x16b1   :  { %v6002_v46 = vmul.f32 %v11889_v39, %v5990_v37 }
0x16b2   :  { %v6015_v8 = vadd.f32 %v11890_v17, %v6003_v40 }
0x16b3   :  { %v6014_v13 = vadd.f32 %v11890_v17, %v6002_v46 }
0x16b5   :  { %6144 = vmatmul.mubr.f32.gmra.mrb[136].mxu1 %v6014_v13  ;;  %13679 = vmatprep.mubr.f32.mxu0 %v6014_v13 }
0x16b6   :  { %13680 = vmatmul.mubr.f32.gmra.mrb[138].mxu0 %v6015_v8  ;;  %6149 = vmatprep.mubr.f32.mxu1 %v16237_v63 }
0x16b9   :  { %6150 = vmatmul.mubr.f32.gmra.mrb[138].mxu1 %v6015_v8 }
0x16ba   :  { %6155 = vmatprep.mubr.f32.mxu1 %v16237_v63 }
0x16d4   :  { %v5969_v30 = vpop.xlane.xlu1 %5968 }
0x16d5   :  { %v5975_v43 = vmul.f32 0.0078125, %v5969_v30  ;;  %v5967_v57 = vpop.xlane.xlu0 %5966 }
0x16d6   :  { %v5974_v23 = vmul.f32 0.0078125, %v5967_v57 }
0x16d7   :  { %v5981_v52 = vadd.f32 1e-05, %v5975_v43 }
0x16d8   :  { %v5980_v11 = vadd.f32 1e-05, %v5974_v23 }
0x16d9   :  { %15930 = vrsqrt.f32 %v5981_v52 }
0x16da   :  { %15932 = vrsqrt.f32 %v5980_v11 }
0x16e3   :  { %v15931_v62 = vpop.eup %15930 }
0x16e4   :  { %v15933_v29 = vpop.eup %15932  ;;  %v5993_v24 = vmul.f32 %v15931_v62, %v5951_v55 }
0x16e5   :  { %v5992_v50 = vmul.f32 %v15933_v29, %v5950_v12 }
0x16e6   :  { %v6005_v54 = vmul.f32 %v11889_v39, %v5993_v24 }
0x16e7   :  { %v6004_v6 = vmul.f32 %v11889_v39, %v5992_v50 }
0x16e8   :  { %v6017_v49 = vadd.f32 %v11890_v17, %v6005_v54 }
0x16e9   :  { %v6016_v44 = vadd.f32 %v11890_v17, %v6004_v6 }
0x16eb   :  { %6156 = vmatmul.mubr.f32.gmra.mrb[140].mxu1 %v6016_v44  ;;  %13682 = vmatprep.mubr.f32.mxu0 %v6016_v44 }
0x16ec   :  { %13683 = vmatmul.mubr.f32.gmra.mrb[140].mxu0 %v6017_v49  ;;  %6161 = vmatprep.mubr.f32.mxu1 %v16237_v63 }
0x16ed   :  { %13691 = vmatprep.mubr.msk.f32.mxu0 %vm16239_vm3, %v16237_v63 }
0x16ef   :  { %6162 = vmatmul.mubr.f32.gmra.mrb[142].mxu1 %v6017_v49 }
0x16f0   :  { %13706 = vmatprep.mubr.msk.f32.mxu1 %vm16239_vm3, %v16237_v63 }
0x174c   :  { %v6133_v25 = vpop.f32.mrb[132].mxu1 }
0x174d   :  { %v6135_v5 = vpop.f32.mrb[133].mxu1  ;;  %v13678_v33 = vpop.f32.mrb[136].mxu0 }
0x174e   :  { %v6234_v10 = vpop.f32.mrb[137].mxu0 }
0x174f   :  { %v18234_v47 = vpack.i.bf16 %v13678_v33, %v6234_v10  ;;  %v14889_v41 = vpack.c.bf16 %v13678_v33, %v6234_v10 }
0x1750   :  { %v6139_v55 = vpop.f32.mrb[134].mxu1 }
0x1751   :  { %v6141_v12 = vpop.f32.mrb[135].mxu1  ;;  %14890 = vmatpush3.bf16.msra.mxu1 %v14889_v41 }
0x1752   :  { %v15458_v2 = vpack.i.bf16 %v6141_v12, %v6135_v5  ;;  %v14885_v48 = vpack.c.bf16 %v6141_v12, %v6135_v5  ;;  %13704 = vmatprep.subr.mxu1 %v16237_v63 }
0x1754   :  { %15454 = vrot.lane.b32.xlu1 %v15458_v2, %s16240_s30  ;;  %15449 = vrot.lane.b32.xlu0 %v15458_v2, %s16241_s16 }
0x1755   :  { %14887 = vmatpush3.bf16.xpose.msk.msra.mxu0 %vm16437_vm5, %v14885_v48 }
0x1756   :  { %13689 = vmatprep.subr.mxu0 %v16237_v63 }
0x1758   :  { %6491 = vrot.lane.b32.xlu0 %v6139_v55, %s16241_s16 }
0x1788   :  { %v6145_v1 = vpop.f32.mrb[136].mxu1 }
0x1789   :  { %v6147_v38 = vpop.f32.mrb[137].mxu1  ;;  %v18243_v22 = vpop.f32.mrb[138].mxu0 }
0x178a   :  { %v18245_v16 = vpop.f32.mrb[139].mxu0  ;;  %6743 = vrot.lane.b32.xlu0 %v6147_v38, %s16240_s30  ;;  %6499 = vrot.lane.b32.xlu1 %v6147_v38, %s16241_s16 }
0x178b   :  { %13690 = vmatpush3.xpose.msk.msra.mxu0 %vm541_vm4, %v6147_v38  ;;  %13705 = vmatpush3.msra.mxu1 %v18245_v16 }
0x178c   :  { %v18251_v56 = vpop.f32.mrb[138].mxu1  ;;  %14891 = vmatprep.subr.bf16.mxu0 %v16238_v4  ;;  %14895 = vmatprep.subr.bf16.mxu1 %v16238_v4 }
0x178d   :  { %v18255_v27 = vpop.f32.mrb[139].mxu1 }
0x178e   :  { %13692 = vmatmul.mubr.msk.f32.vlgmr.msra.gmra.mrb[142].mxu0 %vm541_vm4, %v6133_v25  ;;  %6733 = vrot.lane.b32.xlu0 %v6133_v25, %s16240_s30 }
0x178f   :  { %6489 = vrot.lane.b32.xlu1 %v6133_v25, %s16241_s16  ;;  %13694 = vmatprep.mubr.msk.f32.mxu0 %vm16239_vm3, %v16237_v63 }
0x1792   :  { %13695 = vmatmul.mubr.msk.f32.gmra.mrb[144].mxu0 %vm541_vm4, %v6139_v55  ;;  %6737 = vrot.lane.b32.xlu0 %v6145_v1, %s16240_s30 }
0x1793   :  { %6493 = vrot.lane.b32.xlu1 %v6145_v1, %s16241_s16  ;;  %13697 = vmatprep.mubr.msk.f32.mxu0 %vm16239_vm3, %v16237_v63 }
0x1796   :  { %13698 = vmatmul.mubr.msk.f32.gmra.mrb[146].mxu0 %vm541_vm4, %v6145_v1  ;;  %6974 = vrot.lane.b32.xlu0 %v6133_v25, %s16242_s17 }
0x1797   :  { %15459 = vrot.lane.b32.xlu1 %v15458_v2, %s16242_s17  ;;  %13721 = vmatprep.mubr.msk.f32.mxu0 %vm16239_vm3, %v16237_v63 }
0x179a   :  { %6978 = vrot.lane.b32.xlu0 %v6145_v1, %s16242_s17 }
0x179b   :  { %6735 = vrot.lane.b32.xlu1 %v6139_v55, %s16240_s30 }
0x179f   :  { %6984 = vrot.lane.b32.xlu1 %v6147_v38, %s16242_s17 }
0x17a3   :  { %6976 = vrot.lane.b32.xlu1 %v6139_v55, %s16242_s17 }
0x17be   :  { %v18276_v18 = vpop.f32.mrb[140].mxu1 }
0x17bf   :  { %v18278_v39 = vpop.f32.mrb[141].mxu1  ;;  %v18280_v32 = vpop.f32.mrb[140].mxu0 }
0x17c0   :  { %v15473_v20 = vpack.i.bf16 %v18278_v39, %v18255_v27  ;;  %v14913_v58 = vpack.c.bf16 %v18278_v39, %v18255_v27  ;;  %v18286_v17 = vpop.f32.mrb[141].mxu0 }
0x17c1   :  { %v18290_v61 = vpack.i.bf16 %v18286_v17, %v18243_v22  ;;  %v14917_v15 = vpack.c.bf16 %v18286_v17, %v18243_v22 }
0x17c2   :  { %15464 = vrot.lane.b32.xlu1 %v15473_v20, %s16241_s16  ;;  %v18295_v3 = vpop.f32.mrb[142].mxu1 }
0x17c3   :  { %v18297_v45 = vpop.f32.mrb[143].mxu1 }
0x17c4   :  { %7496 = vrot.lane.b32.xlu0 %v18297_v45, %s16241_s16 }
0x17c6   :  { %15469 = vrot.lane.b32.xlu1 %v15473_v20, %s16240_s30  ;;  %v15450_v51 = vpop.permute.xlu0 %15449  ;;  %v15455_v53 = vpop.permute.xlu1 %15454 }
0x17c7   :  { %v15452_v9 = vunpack.i.h.bf16 %v15450_v51  ;;  %v15451_v36 = vunpack.i.l.bf16 %v15450_v51  ;;  %v15457_v19 = vunpack.i.h.bf16 %v15455_v53  ;;  %v15456_v31 = vunpack.i.l.bf16 %v15455_v53 }
0x17c8   :  { %7486 = vrot.lane.b32.xlu0 %v18251_v56, %s16241_s16 }
0x17c9   :  { %v14892_v34 = vpack.c.bf16 %v15452_v9, %v15451_v36  ;;  %v14899_v42 = vpack.c.bf16 %v15457_v19, %v15456_v31 }
0x17ca   :  { %7488 = vrot.lane.b32.xlu1 %v18276_v18, %s16241_s16  ;;  %v6492_v40 = vpop.permute.xlu0 %6491 }
0x17cb   :  { %14894 = vmatpush3.bf16.xpose.msk.msra.mxu0 %vm16437_vm5, %v14892_v34 }
0x17cc   :  { %7490 = vrot.lane.b32.xlu0 %v18295_v3, %s16241_s16  ;;  %13719 = vmatprep.subr.mxu0 %v16237_v63 }
0x17ce   :  { %7740 = vrot.lane.b32.xlu1 %v18297_v45, %s16240_s30 }
0x17d0   :  { %15474 = vrot.lane.b32.xlu0 %v15473_v20, %s16242_s17 }
0x17d2   :  { %7730 = vrot.lane.b32.xlu1 %v18251_v56, %s16240_s30 }
0x17d4   :  { %7732 = vrot.lane.b32.xlu0 %v18276_v18, %s16240_s30 }
0x17d6   :  { %7734 = vrot.lane.b32.xlu1 %v18295_v3, %s16240_s30 }
0x17d8   :  { %7981 = vrot.lane.b32.xlu0 %v18297_v45, %s16242_s17 }
0x17da   :  { %7971 = vrot.lane.b32.xlu1 %v18251_v56, %s16242_s17 }
0x17dc   :  { %7973 = vrot.lane.b32.xlu0 %v18276_v18, %s16242_s17 }
0x17de   :  { %7975 = vrot.lane.b32.xlu1 %v18295_v3, %s16242_s17 }
0x17e0   :  { %6639 = vrot.lane.b32.xlu0 %v18245_v16, %s16241_s16 }
0x17e2   :  { %15479 = vrot.lane.b32.xlu1 %v18234_v47, %s16241_s16 }
0x17e4   :  { %15484 = vrot.lane.b32.xlu0 %v18234_v47, %s16240_s30 }
0x17e6   :  { %6880 = vrot.lane.b32.xlu1 %v18245_v16, %s16240_s30 }
0x17fc   :  { %v6500_v59 = vpop.permute.xlu1 %6499  ;;  %v6744_v13 = vpop.permute.xlu0 %6743 }
0x17fd   :  { %13720 = vmatpush3.xpose.msk.msra.mxu0 %vm541_vm4, %v6500_v59 }
0x17fe   :  { %14898 = vmatprep.subr.bf16.mxu0 %v16238_v4 }
0x1800   :  { %v6734_v23 = vpop.permute.xlu0 %6733 }
0x1801   :  { %v6490_v37 = vpop.permute.xlu1 %6489 }
0x1802   :  { %13722 = vmatmul.mubr.msk.f32.vlgmr.msra.gmra.mrb[148].mxu0 %vm541_vm4, %v6490_v37 }
0x1803   :  { %14901 = vmatpush3.bf16.xpose.msk.msra.mxu0 %vm16437_vm5, %v14899_v42  ;;  %13724 = vmatprep.mubr.msk.f32.mxu0 %vm16239_vm3, %v16237_v63 }
0x1804   :  { %13749 = vmatprep.subr.mxu0 %v16237_v63  ;;  %v6738_v11 = vpop.permute.xlu0 %6737 }
0x1805   :  { %v6494_v46 = vpop.permute.xlu1 %6493 }
0x1806   :  { %13725 = vmatmul.mubr.msk.f32.gmra.mrb[150].mxu0 %vm541_vm4, %v6492_v40 }
0x1807   :  { %13727 = vmatprep.mubr.msk.f32.mxu0 %vm16239_vm3, %v16237_v63 }
0x1808   :  { %v6975_v29 = vpop.permute.xlu0 %6974 }
0x1809   :  { %v15460_v8 = vpop.permute.xlu1 %15459 }
0x180a   :  { %v15462_v30 = vunpack.i.h.bf16 %v15460_v8  ;;  %v15461_v43 = vunpack.i.l.bf16 %v15460_v8  ;;  %13728 = vmatmul.mubr.msk.f32.gmra.mrb[152].mxu0 %vm541_vm4, %v6494_v46 }
0x180b   :  { %13750 = vmatpush3.xpose.msk.msra.mxu0 %vm541_vm4, %v6744_v13  ;;  %13751 = vmatprep.mubr.msk.f32.mxu0 %vm16239_vm3, %v16237_v63 }
0x180c   :  { %v14906_v57 = vpack.c.bf16 %v15462_v30, %v15461_v43  ;;  %14905 = vmatprep.subr.bf16.mxu0 %v16238_v4  ;;  %v6979_v50 = vpop.permute.xlu0 %6978 }
0x180d   :  { %v6736_v52 = vpop.permute.xlu1 %6735 }
0x180e   :  { %13752 = vmatmul.mubr.msk.f32.vlgmr.msra.gmra.mrb[154].mxu0 %vm541_vm4, %v6734_v23 }
0x180f   :  { %14908 = vmatpush3.bf16.xpose.msk.msra.mxu0 %vm16437_vm5, %v14906_v57  ;;  %13754 = vmatprep.mubr.msk.f32.mxu0 %vm16239_vm3, %v16237_v63 }
0x1810   :  { %13779 = vmatprep.subr.mxu0 %v16237_v63 }
0x1811   :  { %v6985_v62 = vpop.permute.xlu1 %6984 }
0x1812   :  { %13755 = vmatmul.mubr.msk.f32.gmra.mrb[156].mxu0 %vm541_vm4, %v6736_v52 }
0x1813   :  { %13757 = vmatprep.mubr.msk.f32.mxu0 %vm16239_vm3, %v16237_v63 }
0x1815   :  { %v6977_v24 = vpop.permute.xlu1 %6976 }
0x1816   :  { %13758 = vmatmul.mubr.msk.f32.gmra.mrb[158].mxu0 %vm541_vm4, %v6738_v11 }
0x1817   :  { %13780 = vmatpush3.xpose.msk.msra.mxu0 %vm541_vm4, %v6985_v62  ;;  %13781 = vmatprep.mubr.msk.f32.mxu0 %vm16239_vm3, %v16237_v63 }
0x1818   :  { %14912 = vmatprep.subr.bf16.mxu0 %v16238_v4 }
0x181a   :  { %13782 = vmatmul.mubr.msk.f32.vlgmr.msra.gmra.mrb[160].mxu0 %vm541_vm4, %v6975_v29 }
0x181b   :  { %14915 = vmatpush3.bf16.xpose.msk.msra.mxu0 %vm16437_vm5, %v14913_v58  ;;  %13784 = vmatprep.mubr.msk.f32.mxu0 %vm16239_vm3, %v16237_v63 }
0x181c   :  { %13809 = vmatprep.subr.mxu0 %v16237_v63 }
0x181e   :  { %13785 = vmatmul.mubr.msk.f32.gmra.mrb[162].mxu0 %vm541_vm4, %v6977_v24 }
0x181f   :  { %13787 = vmatprep.mubr.msk.f32.mxu0 %vm16239_vm3, %v16237_v63 }
0x1822   :  { %13788 = vmatmul.mubr.msk.f32.gmra.mrb[164].mxu0 %vm541_vm4, %v6979_v50 }
0x1823   :  { %13810 = vmatpush3.xpose.msk.msra.mxu0 %vm541_vm4, %v18297_v45  ;;  %13811 = vmatprep.mubr.msk.f32.mxu0 %vm16239_vm3, %v16237_v63 }
0x1824   :  { %14919 = vmatprep.subr.bf16.mxu0 %v16238_v4 }
0x1826   :  { %13812 = vmatmul.mubr.msk.f32.vlgmr.msra.gmra.mrb[166].mxu0 %vm541_vm4, %v18251_v56 }
0x1827   :  { %13814 = vmatprep.mubr.msk.f32.mxu0 %vm16239_vm3, %v16237_v63 }
0x182a   :  { %13815 = vmatmul.mubr.msk.f32.gmra.mrb[168].mxu0 %vm541_vm4, %v18276_v18 }
0x182b   :  { %13817 = vmatprep.mubr.msk.f32.mxu0 %vm16239_vm3, %v16237_v63 }
0x182e   :  { %13818 = vmatmul.mubr.msk.f32.gmra.mrb[170].mxu0 %vm541_vm4, %v18295_v3 }
0x182f   :  { %13841 = vmatprep.mubr.msk.f32.mxu0 %vm16239_vm3, %v16237_v63 }
0x1834   :  { %v15465_v54 = vpop.permute.xlu1 %15464 }
0x1835   :  { %v15467_v6 = vunpack.i.h.bf16 %v15465_v54  ;;  %v15466_v44 = vunpack.i.l.bf16 %v15465_v54 }
0x1836   :  { %v7497_v49 = vpop.permute.xlu0 %7496 }
0x1837   :  { %v14920_v25 = vpack.c.bf16 %v15467_v6, %v15466_v44 }
0x1838   :  { %v15470_v5 = vpop.permute.xlu1 %15469 }
0x1839   :  { %14922 = vmatpush3.bf16.xpose.msk.msra.mxu0 %vm16437_vm5, %v14920_v25  ;;  %v15472_v10 = vunpack.i.h.bf16 %v15470_v5  ;;  %v15471_v41 = vunpack.i.l.bf16 %v15470_v5 }
0x183a   :  { %13839 = vmatprep.subr.mxu0 %v16237_v63  ;;  %v7487_v33 = vpop.permute.xlu0 %7486 }
0x183b   :  { %v14927_v12 = vpack.c.bf16 %v15472_v10, %v15471_v41 }
0x183c   :  { %v7489_v2 = vpop.permute.xlu1 %7488 }
0x183e   :  { %v7491_v55 = vpop.permute.xlu0 %7490 }
0x1840   :  { %v7741_v1 = vpop.permute.xlu1 %7740 }
0x1841   :  { %13840 = vmatpush3.xpose.msk.msra.mxu0 %vm541_vm4, %v7497_v49 }
0x1842   :  { %14926 = vmatprep.subr.bf16.mxu0 %v16238_v4  ;;  %v15475_v48 = vpop.permute.xlu0 %15474 }
0x1843   :  { %v15477_v38 = vunpack.i.h.bf16 %v15475_v48  ;;  %v15476_v56 = vunpack.i.l.bf16 %v15475_v48 }
0x1844   :  { %13842 = vmatmul.mubr.msk.f32.vlgmr.msra.gmra.mrb[172].mxu0 %vm541_vm4, %v7487_v33  ;;  %v7731_v18 = vpop.permute.xlu1 %7730 }
0x1845   :  { %14929 = vmatpush3.bf16.xpose.msk.msra.mxu0 %vm16437_vm5, %v14927_v12  ;;  %13844 = vmatprep.mubr.msk.f32.mxu0 %vm16239_vm3, %v16237_v63  ;;  %v14934_v27 = vpack.c.bf16 %v15477_v38, %v15476_v56 }
0x1846   :  { %13869 = vmatprep.subr.mxu0 %v16237_v63  ;;  %v7733_v39 = vpop.permute.xlu0 %7732 }
0x1848   :  { %13845 = vmatmul.mubr.msk.f32.gmra.mrb[174].mxu0 %vm541_vm4, %v7489_v2  ;;  %v7735_v20 = vpop.permute.xlu1 %7734 }
0x1849   :  { %13847 = vmatprep.mubr.msk.f32.mxu0 %vm16239_vm3, %v16237_v63 }
0x184a   :  { %v7982_v58 = vpop.permute.xlu0 %7981 }
0x184c   :  { %13848 = vmatmul.mubr.msk.f32.gmra.mrb[176].mxu0 %vm541_vm4, %v7491_v55  ;;  %v7972_v3 = vpop.permute.xlu1 %7971 }
0x184d   :  { %13870 = vmatpush3.xpose.msk.msra.mxu0 %vm541_vm4, %v7741_v1  ;;  %13871 = vmatprep.mubr.msk.f32.mxu0 %vm16239_vm3, %v16237_v63 }
0x184e   :  { %14933 = vmatprep.subr.bf16.mxu0 %v16238_v4  ;;  %v7974_v45 = vpop.permute.xlu0 %7973 }
0x1850   :  { %13872 = vmatmul.mubr.msk.f32.vlgmr.msra.gmra.mrb[178].mxu0 %vm541_vm4, %v7731_v18  ;;  %v7976_v34 = vpop.permute.xlu1 %7975 }
0x1851   :  { %14936 = vmatpush3.bf16.xpose.msk.msra.mxu0 %vm16437_vm5, %v14934_v27  ;;  %13874 = vmatprep.mubr.msk.f32.mxu0 %vm16239_vm3, %v16237_v63 }
0x1852   :  { %13899 = vmatprep.subr.mxu0 %v16237_v63  ;;  %v18483_v56 = vpop.permute.xlu0 %6639 }
0x1854   :  { %13875 = vmatmul.mubr.msk.f32.gmra.mrb[180].mxu0 %vm541_vm4, %v7733_v39 }
0x1855   :  { %13877 = vmatprep.mubr.msk.f32.mxu0 %vm16239_vm3, %v16237_v63 }
0x1858   :  { %13878 = vmatmul.mubr.msk.f32.gmra.mrb[182].mxu0 %vm541_vm4, %v7735_v20 }
0x1859   :  { %13900 = vmatpush3.xpose.msk.msra.mxu0 %vm541_vm4, %v7982_v58  ;;  %13901 = vmatprep.mubr.msk.f32.mxu0 %vm16239_vm3, %v16237_v63 }
0x185c   :  { %13902 = vmatmul.mubr.msk.f32.vlgmr.msra.gmra.mrb[184].mxu0 %vm541_vm4, %v7972_v3  ;;  %v18491_v3 = vpop.permute.xlu1 %15479 }
0x185d   :  { %13904 = vmatprep.mubr.msk.f32.mxu0 %vm16239_vm3, %v16237_v63 }
0x1860   :  { %13905 = vmatmul.mubr.msk.f32.gmra.mrb[186].mxu0 %vm541_vm4, %v7974_v45 }
0x1861   :  { %v6347_v51 = vpop.f32.mrb[142].mxu0  ;;  %13907 = vmatprep.mubr.msk.f32.mxu0 %vm16239_vm3, %v16237_v63 }
0x1862   :  { %v6361_v9 = vmul.f32 0.088388346, %v6347_v51  ;;  %v13693_v36 = vpop.f32.mrb[143].mxu0 }
0x1864   :  { %v18436_v53 = vsel %vm203_vm6, %v6361_v9, -1e+30  ;;  %13908 = vmatmul.mubr.msk.f32.gmra.mrb[188].mxu0 %vm541_vm4, %v7976_v34  ;;  %v18495_v34 = vpop.permute.xlu0 %15484 }
0x1865   :  { %v6352_v59 = vpop.f32.mrb[144].mxu0  ;;  %v6367_v19 = vsel %vm646_vm7, %v18436_v53, -inf }
0x1866   :  { %v6362_v31 = vmul.f32 0.088388346, %v6352_v59  ;;  %v13696_v42 = vpop.f32.mrb[145].mxu0  ;;  %6368 = vmax.xlane.f32.xlu0 %v6367_v19 }
0x1868   :  { %v18443_v37 = vsel %vm203_vm6, %v6362_v31, -1e+30 }
0x1869   :  { %v6357_v40 = vpop.f32.mrb[146].mxu0  ;;  %v6370_v46 = vsel %vm646_vm7, %v18443_v37, -inf }
0x186a   :  { %v6363_v13 = vmul.f32 0.088388346, %v6357_v40  ;;  %v13699_v8 = vpop.f32.mrb[147].mxu0  ;;  %6371 = vmax.xlane.f32.xlu1 %v6370_v46  ;;  %v18503_v46 = vpop.permute.xlu1 %6880 }
0x186c   :  { %v18449_v30 = vsel %vm203_vm6, %v6363_v13, -1e+30 }
0x186d   :  { %v6373_v43 = vsel %vm646_vm7, %v18449_v30, -inf }
0x186e   :  { %6374 = vmax.xlane.f32.xlu0 %v6373_v43 }
0x187b   :  { %15489 = vrot.lane.b32.xlu1 %v18234_v47, %s16242_s17 }
0x18d5   :  { %v6579_v57 = vpop.f32.mrb[148].mxu0 }
0x18d6   :  { %v6593_v23 = vmul.f32 0.088388346, %v6579_v57  ;;  %v13723_v52 = vpop.f32.mrb[149].mxu0 }
0x18d8   :  { %v18457_v11 = vsel %vm203_vm6, %v6593_v23, -1e+30 }
0x18d9   :  { %v6584_v62 = vpop.f32.mrb[150].mxu0  ;;  %v6599_v29 = vsel %vm646_vm7, %v18457_v11, -inf }
0x18da   :  { %v6594_v24 = vmul.f32 0.088388346, %v6584_v62  ;;  %6600 = vmax.xlane.f32.xlu0 %v6599_v29  ;;  %v13726_v50 = vpop.f32.mrb[151].mxu0 }
0x18dc   :  { %v18463_v54 = vsel %vm203_vm6, %v6594_v24, -1e+30 }
0x18dd   :  { %v6589_v6 = vpop.f32.mrb[152].mxu0  ;;  %v6602_v47 = vsel %vm646_vm7, %v18463_v54, -inf }
0x18de   :  { %v6595_v44 = vmul.f32 0.088388346, %v6589_v6  ;;  %6603 = vmax.xlane.f32.xlu0 %v6602_v47  ;;  %v13729_v49 = vpop.f32.mrb[153].mxu0 }
0x18e0   :  { %v18469_v25 = vsel %vm203_vm6, %v6595_v44, -1e+30 }
0x18e1   :  { %v6823_v5 = vpop.f32.mrb[154].mxu0  ;;  %v6605_v33 = vsel %vm646_vm7, %v18469_v25, -inf }
0x18e2   :  { %v6837_v10 = vmul.f32 0.088388346, %v6823_v5  ;;  %6606 = vmax.xlane.f32.xlu1 %v6605_v33  ;;  %v13753_v41 = vpop.f32.mrb[155].mxu0 }
0x18e4   :  { %v18475_v55 = vsel %vm203_vm6, %v6837_v10, -1e+30 }
0x18e5   :  { %v6828_v12 = vpop.f32.mrb[156].mxu0  ;;  %v6843_v2 = vsel %vm646_vm7, %v18475_v55, -inf }
0x18e6   :  { %v6838_v48 = vmul.f32 0.088388346, %v6828_v12  ;;  %6844 = vmax.xlane.f32.xlu0 %v6843_v2  ;;  %v13756_v1 = vpop.f32.mrb[157].mxu0 }
0x18e8   :  { %v18481_v38 = vsel %vm203_vm6, %v6838_v48, -1e+30 }
0x18e9   :  { %v6833_v27 = vpop.f32.mrb[158].mxu0  ;;  %v6846_v18 = vsel %vm646_vm7, %v18481_v38, -inf }
0x18ea   :  { %v6839_v39 = vmul.f32 0.088388346, %v6833_v27  ;;  %6847 = vmax.xlane.f32.xlu1 %v6846_v18  ;;  %v13759_v20 = vpop.f32.mrb[159].mxu0 }
0x18ec   :  { %v18489_v58 = vsel %vm203_vm6, %v6839_v39, -1e+30 }
0x18ed   :  { %v7064_v45 = vpop.f32.mrb[160].mxu0  ;;  %v6849_v51 = vsel %vm646_vm7, %v18489_v58, -inf }
0x18ee   :  { %v7078_v9 = vmul.f32 0.088388346, %v7064_v45  ;;  %6850 = vmax.xlane.f32.xlu0 %v6849_v51  ;;  %v13783_v36 = vpop.f32.mrb[161].mxu0 }
0x18f0   :  { %v18499_v59 = vsel %vm203_vm6, %v7078_v9, -1e+30 }
0x18f1   :  { %v7069_v19 = vpop.f32.mrb[162].mxu0  ;;  %v7084_v31 = vsel %vm646_vm7, %v18499_v59, -inf }
0x18f2   :  { %v7079_v42 = vmul.f32 0.088388346, %v7069_v19  ;;  %7085 = vmax.xlane.f32.xlu1 %v7084_v31  ;;  %v13786_v40 = vpop.f32.mrb[163].mxu0 }
0x18f3   :  { %v6369_v13 = vpop.xlane.xlu0 %6368 }
0x18f4   :  { %v18507_v8 = vsel %vm203_vm6, %v7079_v42, -1e+30  ;;  %v6376_v43 = vsub.f32 %v18436_v53, %v6369_v13 }
0x18f5   :  { %v7074_v57 = vpop.f32.mrb[164].mxu0  ;;  %v7087_v23 = vsel %vm646_vm7, %v18507_v8, -inf }
0x18f6   :  { %v6379_v52 = vmul.f32 1.442695, %v6376_v43  ;;  %v7080_v62 = vmul.f32 0.088388346, %v7074_v57  ;;  %7088 = vmax.xlane.f32.xlu0 %v7087_v23  ;;  %v13789_v29 = vpop.f32.mrb[165].mxu0 }
0x18f7   :  { %v6372_v24 = vpop.xlane.xlu1 %6371 }
0x18f8   :  { %15934 = vpow2.f32 %v6379_v52  ;;  %v18514_v50 = vsel %vm203_vm6, %v7080_v62, -1e+30  ;;  %v6377_v6 = vsub.f32 %v18443_v37, %v6372_v24 }
0x18f9   :  { %v7344_v47 = vpop.f32.mrb[166].mxu0  ;;  %v7090_v53 = vsel %vm646_vm7, %v18514_v50, -inf }
0x18fa   :  { %v6381_v44 = vmul.f32 1.442695, %v6377_v6  ;;  %v7358_v49 = vmul.f32 0.088388346, %v7344_v47  ;;  %7091 = vmax.xlane.f32.xlu1 %v7090_v53  ;;  %v13813_v5 = vpop.f32.mrb[167].mxu0 }
0x18fb   :  { %v6375_v33 = vpop.xlane.xlu0 %6374 }
0x18fc   :  { %15936 = vpow2.f32 %v6381_v44  ;;  %v18521_v10 = vsel %vm203_vm6, %v7358_v49, -1e+30  ;;  %v6378_v41 = vsub.f32 %v18449_v30, %v6375_v33 }
0x18fd   :  { %v7349_v12 = vpop.f32.mrb[168].mxu0  ;;  %v7364_v37 = vsel %vm646_vm7, %v18521_v10, -inf }
0x18fe   :  { %v7359_v2 = vmul.f32 0.088388346, %v7349_v12  ;;  %7365 = vmax.xlane.f32.xlu0 %v7364_v37  ;;  %v13816_v48 = vpop.f32.mrb[169].mxu0  ;;  %v6383_v1 = vmul.f32 1.442695, %v6378_v41 }
0x1900   :  { %v18528_v27 = vsel %vm203_vm6, %v7359_v2, -1e+30  ;;  %15938 = vpow2.f32 %v6383_v1 }
0x1901   :  { %v7354_v18 = vpop.f32.mrb[170].mxu0  ;;  %v7367_v39 = vsel %vm646_vm7, %v18528_v27, -inf }
0x1902   :  { %v18532_v20 = vpop.eup %15934  ;;  %v7360_v30 = vmul.f32 0.088388346, %v7354_v18  ;;  %7368 = vmax.xlane.f32.xlu1 %v7367_v39  ;;  %v13819_v45 = vpop.f32.mrb[171].mxu0 }
0x1903   :  { %v6385_v51 = vsel %vm646_vm7, %v18532_v20, 0.0 }
0x1904   :  { %v18538_v9 = vsel %vm203_vm6, %v7360_v30, -1e+30  ;;  %6386 = vadd.xlane.f32.xlu0 %v6385_v51 }
0x1905   :  { %v7370_v31 = vsel %vm646_vm7, %v18538_v9, -inf }
0x1906   :  { %v18540_v36 = vpop.eup %15936 }
0x1907   :  { %v6388_v19 = vsel %vm646_vm7, %v18540_v36, 0.0 }
0x1908   :  { %6389 = vadd.xlane.f32.xlu1 %v6388_v19  ;;  %7371 = vmax.xlane.f32.xlu0 %v7370_v31 }
0x190a   :  { %v18546_v42 = vpop.eup %15938 }
0x190b   :  { %v6391_v40 = vsel %vm646_vm7, %v18546_v42, 0.0 }
0x190c   :  { %6392 = vadd.xlane.f32.xlu0 %v6391_v40 }
0x1917   :  { %v7576_v13 = vpop.f32.mrb[172].mxu0 }
0x1918   :  { %v7590_v43 = vmul.f32 0.088388346, %v7576_v13  ;;  %v13843_v57 = vpop.f32.mrb[173].mxu0 }
0x191a   :  { %v18552_v23 = vsel %vm203_vm6, %v7590_v43, -1e+30 }
0x191b   :  { %v7581_v52 = vpop.f32.mrb[174].mxu0  ;;  %v7596_v62 = vsel %vm646_vm7, %v18552_v23, -inf }
0x191c   :  { %v7591_v29 = vmul.f32 0.088388346, %v7581_v52  ;;  %7597 = vmax.xlane.f32.xlu1 %v7596_v62  ;;  %v13846_v24 = vpop.f32.mrb[175].mxu0 }
0x191e   :  { %v18558_v6 = vsel %vm203_vm6, %v7591_v29, -1e+30 }
0x191f   :  { %v7586_v47 = vpop.f32.mrb[176].mxu0  ;;  %v7599_v53 = vsel %vm646_vm7, %v18558_v6, -inf }
0x1920   :  { %v7592_v44 = vmul.f32 0.088388346, %v7586_v47  ;;  %7600 = vmax.xlane.f32.xlu0 %v7599_v53  ;;  %v13849_v49 = vpop.f32.mrb[177].mxu0 }
0x1922   :  { %v18564_v5 = vsel %vm203_vm6, %v7592_v44, -1e+30 }
0x1923   :  { %v7820_v33 = vpop.f32.mrb[178].mxu0  ;;  %v7602_v41 = vsel %vm646_vm7, %v18564_v5, -inf }
0x1924   :  { %v7834_v12 = vmul.f32 0.088388346, %v7820_v33  ;;  %7603 = vmax.xlane.f32.xlu1 %v7602_v41  ;;  %v13873_v37 = vpop.f32.mrb[179].mxu0 }
0x1926   :  { %v18570_v2 = vsel %vm203_vm6, %v7834_v12, -1e+30 }
0x1927   :  { %v7825_v48 = vpop.f32.mrb[180].mxu0  ;;  %v7840_v1 = vsel %vm646_vm7, %v18570_v2, -inf }
0x1928   :  { %v7835_v18 = vmul.f32 0.088388346, %v7825_v48  ;;  %7841 = vmax.xlane.f32.xlu0 %v7840_v1  ;;  %v13876_v39 = vpop.f32.mrb[181].mxu0 }
0x192a   :  { %v18576_v30 = vsel %vm203_vm6, %v7835_v18, -1e+30 }
0x192b   :  { %v7830_v45 = vpop.f32.mrb[182].mxu0  ;;  %v7843_v51 = vsel %vm646_vm7, %v18576_v30, -inf }
0x192c   :  { %v7836_v19 = vmul.f32 0.088388346, %v7830_v45  ;;  %7844 = vmax.xlane.f32.xlu1 %v7843_v51  ;;  %v13879_v31 = vpop.f32.mrb[183].mxu0  ;;  %v18605_v45 = vpop.permute.xlu1 %15489 }
0x192e   :  { %v18582_v40 = vsel %vm203_vm6, %v7836_v19, -1e+30 }
0x192f   :  { %v8061_v13 = vpop.f32.mrb[184].mxu0  ;;  %v7846_v43 = vsel %vm646_vm7, %v18582_v40, -inf }
0x1930   :  { %v8075_v57 = vmul.f32 0.088388346, %v8061_v13  ;;  %7847 = vmax.xlane.f32.xlu0 %v7846_v43  ;;  %v13903_v52 = vpop.f32.mrb[185].mxu0 }
0x1932   :  { %v18588_v62 = vsel %vm203_vm6, %v8075_v57, -1e+30 }
0x1933   :  { %v8066_v29 = vpop.f32.mrb[186].mxu0  ;;  %v8081_v24 = vsel %vm646_vm7, %v18588_v62, -inf }
0x1934   :  { %v8076_v47 = vmul.f32 0.088388346, %v8066_v29  ;;  %8082 = vmax.xlane.f32.xlu1 %v8081_v24  ;;  %v13906_v53 = vpop.f32.mrb[187].mxu0 }
0x1936   :  { %v18594_v44 = vsel %vm203_vm6, %v8076_v47, -1e+30 }
0x1937   :  { %v8071_v49 = vpop.f32.mrb[188].mxu0  ;;  %v8084_v33 = vsel %vm646_vm7, %v18594_v44, -inf }
0x1938   :  { %v8077_v41 = vmul.f32 0.088388346, %v8071_v49  ;;  %8085 = vmax.xlane.f32.xlu0 %v8084_v33  ;;  %v13909_v12 = vpop.f32.mrb[189].mxu0 }
0x193a   :  { %v18600_v37 = vsel %vm203_vm6, %v8077_v41, -1e+30 }
0x193b   :  { %v8087_v48 = vsel %vm646_vm7, %v18600_v37, -inf }
0x193c   :  { %8088 = vmax.xlane.f32.xlu0 %v8087_v48 }
0x1967   :  { %v6601_v1 = vpop.xlane.xlu0 %6600 }
0x1968   :  { %v6608_v18 = vsub.f32 %v18457_v11, %v6601_v1 }
0x196a   :  { %v6611_v39 = vmul.f32 1.442695, %v6608_v18 }
0x196b   :  { %v6604_v51 = vpop.xlane.xlu0 %6603 }
0x196c   :  { %15940 = vpow2.f32 %v6611_v39  ;;  %v6609_v19 = vsub.f32 %v18463_v54, %v6604_v51 }
0x196e   :  { %v6613_v31 = vmul.f32 1.442695, %v6609_v19 }
0x196f   :  { %v6607_v13 = vpop.xlane.xlu1 %6606 }
0x1970   :  { %15942 = vpow2.f32 %v6613_v31  ;;  %v6610_v43 = vsub.f32 %v18469_v25, %v6607_v13 }
0x1972   :  { %v6615_v57 = vmul.f32 1.442695, %v6610_v43  ;;  %v15482_v43 = vunpack.i.h.bf16 %v18491_v3 }
0x1973   :  { %v6845_v33 = vpop.xlane.xlu0 %6844 }
0x1974   :  { %15944 = vpow2.f32 %v6615_v57  ;;  %v15481_v57 = vunpack.i.l.bf16 %v18491_v3 }
0x1976   :  { %v18609_v52 = vpop.eup %15940 }
0x1977   :  { %v6848_v29 = vpop.xlane.xlu1 %6847  ;;  %v6617_v11 = vsel %vm646_vm7, %v18609_v52, 0.0 }
0x1978   :  { %v6853_v24 = vsub.f32 %v18481_v38, %v6848_v29  ;;  %6618 = vadd.xlane.f32.xlu1 %v6617_v11  ;;  %v6852_v11 = vsub.f32 %v18475_v55, %v6845_v33 }
0x197a   :  { %v18614_v47 = vpop.eup %15942  ;;  %v6857_v53 = vmul.f32 1.442695, %v6853_v24 }
0x197b   :  { %v6620_v54 = vsel %vm646_vm7, %v18614_v47, 0.0  ;;  %v6851_v41 = vpop.xlane.xlu0 %6850 }
0x197c   :  { %15946 = vpow2.f32 %v6857_v53  ;;  %6621 = vadd.xlane.f32.xlu0 %v6620_v54  ;;  %v14896_v54 = vpack.c.bf16 %v15482_v43, %v15481_v57 }
0x197e   :  { %v18618_v25 = vpop.eup %15944 }
0x197f   :  { %v6623_v49 = vsel %vm646_vm7, %v18618_v25, 0.0  ;;  %v7086_v48 = vpop.xlane.xlu1 %7085 }
0x1980   :  { %6624 = vadd.xlane.f32.xlu1 %v6623_v49  ;;  %v6855_v49 = vmul.f32 1.442695, %v6852_v11  ;;  %v7093_v33 = vsub.f32 %v18499_v59, %v7086_v48 }
0x1983   :  { %v7089_v1 = vpop.xlane.xlu0 %7088 }
0x1986   :  { %v18622_v12 = vpop.eup %15946 }
0x1987   :  { %v6864_v38 = vsel %vm646_vm7, %v18622_v12, 0.0  ;;  %v7092_v18 = vpop.xlane.xlu1 %7091 }
0x1988   :  { %6865 = vadd.xlane.f32.xlu1 %v6864_v38 }
0x198b   :  { %v7366_v39 = vpop.xlane.xlu0 %7365 }
0x198c   :  { %v7373_v59 = vsub.f32 %v18521_v10, %v7366_v39 }
0x198f   :  { %v7369_v51 = vpop.xlane.xlu1 %7368 }
0x1991   :  { %v6387_v19 = vpop.xlane.xlu0 %6386 }
0x1992   :  { %15948 = vrcp.f32 %v6387_v19  ;;  %7121 = vrot.lane.b32.xlu0 %v18245_v16, %s16242_s17  ;;  %v6854_v16 = vsub.f32 %v18489_v58, %v6851_v41  ;;  %v7095_v19 = vsub.f32 %v18514_v50, %v7092_v18 }
0x1994   :  { %v6859_v55 = vmul.f32 1.442695, %v6854_v16  ;;  %v7100_v48 = vmul.f32 1.442695, %v7095_v19 }
0x1995   :  { %v6390_v31 = vpop.xlane.xlu1 %6389  ;;  %v7372_v13 = vpop.xlane.xlu0 %7371 }
0x1996   :  { %15950 = vrcp.f32 %v6390_v31  ;;  %v7374_v31 = vsub.f32 %v18528_v27, %v7369_v51 }
0x1998   :  { %v7378_v50 = vmul.f32 1.442695, %v7374_v31 }
0x1999   :  { %15494 = vrot.lane.b32.xlu1 %v18290_v61, %s16241_s16  ;;  %v6393_v29 = vpop.xlane.xlu0 %6392 }
0x199a   :  { %15952 = vrcp.f32 %v6393_v29 }
0x199b   :  { %15954 = vpow2.f32 %v6855_v49 }
0x199c   :  { %v15949_v24 = vpop.eup %15948  ;;  %15956 = vpow2.f32 %v6859_v55 }
0x199d   :  { %v6395_v53 = vmul.f32 %v15949_v24, %v18532_v20  ;;  %v7094_v20 = vsub.f32 %v18507_v8, %v7089_v1  ;;  %v7375_v1 = vsub.f32 %v18538_v9, %v7372_v13 }
0x199f   :  { %13707 = vmatmul.mubr.msk.f32.vlgmr.msra.gmra.mrb[144].mxu1 %vm646_vm7, %v6395_v53  ;;  %v7380_v27 = vmul.f32 1.442695, %v7375_v1 }
0x19a0   :  { %v15951_v38 = vpop.eup %15950  ;;  %14897 = vmatpush3.bf16.msra.mxu1 %v14896_v54  ;;  %13709 = vmatprep.mubr.msk.f32.mxu1 %vm16239_vm3, %v16237_v63 }
0x19a1   :  { %13734 = vmatprep.subr.mxu1 %v16237_v63  ;;  %v6397_v3 = vmul.f32 %v15951_v38, %v18540_v36  ;;  %v7096_v36 = vmul.f32 1.442695, %v7093_v33 }
0x19a3   :  { %13710 = vmatmul.mubr.msk.f32.gmra.mrb[146].mxu1 %vm646_vm7, %v6397_v3  ;;  %15958 = vpow2.f32 %v7096_v36 }
0x19a4   :  { %13735 = vmatpush3.msra.mxu1 %v18483_v56  ;;  %13712 = vmatprep.mubr.msk.f32.mxu1 %vm16239_vm3, %v16237_v63  ;;  %v15953_v58 = vpop.eup %15952  ;;  %v7098_v56 = vmul.f32 1.442695, %v7094_v20 }
0x19a5   :  { %14902 = vmatprep.subr.bf16.mxu1 %v16238_v4  ;;  %v6399_v41 = vmul.f32 %v15953_v58, %v18546_v42  ;;  %v18654_v8 = vpop.eup %15954  ;;  %v7376_v42 = vmul.f32 1.442695, %v7373_v59 }
0x19a6   :  { %15960 = vpow2.f32 %v7098_v56  ;;  %v6861_v29 = vsel %vm646_vm7, %v18654_v8, 0.0  ;;  %v18660_v10 = vpop.eup %15956 }
0x19a7   :  { %13713 = vmatmul.mubr.msk.f32.gmra.mrb[148].mxu1 %vm646_vm7, %v6399_v41  ;;  %15962 = vpow2.f32 %v7100_v48  ;;  %v6867_v13 = vsel %vm646_vm7, %v18660_v10, 0.0 }
0x19a8   :  { %13736 = vmatprep.mubr.msk.f32.mxu1 %vm16239_vm3, %v16237_v63  ;;  %15964 = vpow2.f32 %v7376_v42 }
0x19a9   :  { %v7598_v43 = vpop.xlane.xlu1 %7597  ;;  %15966 = vpow2.f32 %v7378_v50 }
0x19aa   :  { %v7605_v18 = vsub.f32 %v18552_v23, %v7598_v43  ;;  %15968 = vpow2.f32 %v7380_v27 }
0x19ac   :  { %v7608_v11 = vmul.f32 1.442695, %v7605_v18 }
0x19ad   :  { %v7601_v57 = vpop.xlane.xlu0 %7600  ;;  %v18666_v23 = vpop.eup %15958 }
0x19ae   :  { %v7606_v51 = vsub.f32 %v18558_v6, %v7601_v57  ;;  %15970 = vpow2.f32 %v7608_v11  ;;  %v7102_v6 = vsel %vm646_vm7, %v18666_v23, 0.0 }
0x19b0   :  { %v7610_v53 = vmul.f32 1.442695, %v7606_v51  ;;  %v18669_v16 = vpop.eup %15960 }
0x19b1   :  { %6862 = vadd.xlane.f32.xlu0 %v6861_v29  ;;  %v7604_v39 = vpop.xlane.xlu1 %7603  ;;  %v18673_v38 = vpop.eup %15962  ;;  %v7105_v58 = vsel %vm646_vm7, %v18669_v16, 0.0 }
0x19b2   :  { %v7607_v9 = vsub.f32 %v18564_v5, %v7604_v39  ;;  %15972 = vpow2.f32 %v7610_v53  ;;  %v18676_v33 = vpop.eup %15964 }
0x19b3   :  { %v18682_v20 = vpop.eup %15966  ;;  %v7382_v59 = vsel %vm646_vm7, %v18676_v33, 0.0 }
0x19b4   :  { %v7612_v54 = vmul.f32 1.442695, %v7607_v9  ;;  %v18685_v56 = vpop.eup %15968  ;;  %v7385_v48 = vsel %vm646_vm7, %v18682_v20, 0.0 }
0x19b5   :  { %6868 = vadd.xlane.f32.xlu0 %v6867_v13  ;;  %v7842_v24 = vpop.xlane.xlu0 %7841  ;;  %v7388_v18 = vsel %vm646_vm7, %v18685_v56, 0.0 }
0x19b6   :  { %v7849_v49 = vsub.f32 %v18570_v2, %v7842_v24  ;;  %15974 = vpow2.f32 %v7612_v54  ;;  %v7108_v2 = vsel %vm646_vm7, %v18673_v38, 0.0 }
0x19b8   :  { %v7852_v3 = vmul.f32 1.442695, %v7849_v49  ;;  %v18691_v31 = vpop.eup %15970 }
0x19b9   :  { %7103 = vadd.xlane.f32.xlu0 %v7102_v6  ;;  %v7845_v5 = vpop.xlane.xlu1 %7844  ;;  %v7614_v50 = vsel %vm646_vm7, %v18691_v31, 0.0 }
0x19ba   :  { %v7850_v55 = vsub.f32 %v18576_v30, %v7845_v5  ;;  %15976 = vpow2.f32 %v7852_v3 }
0x19bc   :  { %v7854_v19 = vmul.f32 1.442695, %v7850_v55 }
0x19bd   :  { %7106 = vadd.xlane.f32.xlu1 %v7105_v58  ;;  %7109 = vadd.xlane.f32.xlu0 %v7108_v2  ;;  %v7848_v41 = vpop.xlane.xlu0 %7847 }
0x19be   :  { %v7851_v36 = vsub.f32 %v18582_v40, %v7848_v41  ;;  %v18694_v40 = vpop.eup %15972 }
0x19c0   :  { %v7856_v30 = vmul.f32 1.442695, %v7851_v36  ;;  %v18700_v57 = vpop.eup %15974 }
0x19c1   :  { %7383 = vadd.xlane.f32.xlu1 %v7382_v59  ;;  %7386 = vadd.xlane.f32.xlu0 %v7385_v48  ;;  %v8083_v43 = vpop.xlane.xlu1 %8082  ;;  %v7620_v29 = vsel %vm646_vm7, %v18700_v57, 0.0 }
0x19c2   :  { %15978 = vpow2.f32 %v7856_v30  ;;  %v8090_v42 = vsub.f32 %v18588_v62, %v8083_v43  ;;  %v7617_v62 = vsel %vm646_vm7, %v18694_v40, 0.0  ;;  %v15486_v30 = vunpack.i.l.bf16 %v18495_v34 }
0x19c3   :  { %15980 = vpow2.f32 %v7854_v19 }
0x19c4   :  { %v8093_v1 = vmul.f32 1.442695, %v8090_v42  ;;  %v18706_v39 = vpop.eup %15976 }
0x19c5   :  { %7615 = vadd.xlane.f32.xlu1 %v7614_v50  ;;  %7389 = vadd.xlane.f32.xlu0 %v7388_v18  ;;  %v7858_v51 = vsel %vm646_vm7, %v18706_v39, 0.0  ;;  %v8086_v54 = vpop.xlane.xlu0 %8085 }
0x19c6   :  { %15982 = vpow2.f32 %v8093_v1  ;;  %v8091_v3 = vsub.f32 %v18594_v44, %v8086_v54 }
0x19c8   :  { %v8095_v55 = vmul.f32 1.442695, %v8091_v3 }
0x19c9   :  { %7621 = vadd.xlane.f32.xlu1 %v7620_v29  ;;  %7618 = vadd.xlane.f32.xlu0 %v7617_v62  ;;  %v8089_v49 = vpop.xlane.xlu0 %8088 }
0x19ca   :  { %v8092_v6 = vsub.f32 %v18600_v37, %v8089_v49  ;;  %v15487_v37 = vunpack.i.h.bf16 %v18495_v34 }
0x19cc   :  { %v18708_v27 = vpop.eup %15978  ;;  %v8097_v5 = vmul.f32 1.442695, %v8092_v6  ;;  %v14903_v43 = vpack.c.bf16 %v15487_v37, %v15486_v30 }
0x19cd   :  { %v18712_v11 = vpop.eup %15980  ;;  %7859 = vadd.xlane.f32.xlu1 %v7858_v51  ;;  %v7864_v9 = vsel %vm646_vm7, %v18708_v27, 0.0  ;;  %v15492_v51 = vunpack.i.h.bf16 %v18605_v45 }
0x19ce   :  { %7865 = vadd.xlane.f32.xlu0 %v7864_v9  ;;  %v7861_v24 = vsel %vm646_vm7, %v18712_v11, 0.0  ;;  %15984 = vpow2.f32 %v8097_v5 }
0x19cf   :  { %15986 = vpow2.f32 %v8095_v55 }
0x19d0   :  { %v18716_v13 = vpop.eup %15982 }
0x19d1   :  { %7862 = vadd.xlane.f32.xlu1 %v7861_v24  ;;  %v8099_v53 = vsel %vm646_vm7, %v18716_v13, 0.0 }
0x19d2   :  { %8100 = vadd.xlane.f32.xlu0 %v8099_v53 }
0x19d8   :  { %v18734_v58 = vpop.eup %15984 }
0x19d9   :  { %v8105_v41 = vsel %vm646_vm7, %v18734_v58, 0.0  ;;  %v18738_v19 = vpop.eup %15986 }
0x19da   :  { %v8102_v48 = vsel %vm646_vm7, %v18738_v19, 0.0 }
0x19e2   :  { %15499 = vrot.lane.b32.xlu1 %v18290_v61, %s16240_s30 }
0x19e6   :  { %7877 = vrot.lane.b32.xlu1 %v18280_v32, %s16240_s30 }
0x19e8   :  { %7636 = vrot.lane.b32.xlu0 %v18280_v32, %s16241_s16 }
0x19ea   :  { %15504 = vrot.lane.b32.xlu1 %v18290_v61, %s16242_s17 }
0x19ee   :  { %8118 = vrot.lane.b32.xlu1 %v18280_v32, %s16242_s17 }
0x1a05   :  { %v6619_v2 = vpop.xlane.xlu1 %6618 }
0x1a06   :  { %15988 = vrcp.f32 %v6619_v2 }
0x1a07   :  { %8106 = vadd.xlane.f32.xlu0 %v8105_v41 }
0x1a09   :  { %v6622_v61 = vpop.xlane.xlu0 %6621 }
0x1a0a   :  { %15990 = vrcp.f32 %v6622_v61 }
0x1a0d   :  { %v6625_v36 = vpop.xlane.xlu1 %6624  ;;  %v7122_v50 = vpop.permute.xlu0 %7121 }
0x1a0e   :  { %15992 = vrcp.f32 %v6625_v36 }
0x1a10   :  { %v15989_v44 = vpop.eup %15988 }
0x1a11   :  { %v6627_v59 = vmul.f32 %v15989_v44, %v18609_v52 }
0x1a12   :  { %8103 = vadd.xlane.f32.xlu1 %v8102_v48 }
0x1a13   :  { %13737 = vmatmul.mubr.msk.f32.vlgmr.msra.gmra.mrb[150].mxu1 %vm646_vm7, %v6627_v59 }
0x1a14   :  { %v15991_v42 = vpop.eup %15990  ;;  %14904 = vmatpush3.bf16.msra.mxu1 %v14903_v43  ;;  %13739 = vmatprep.mubr.msk.f32.mxu1 %vm16239_vm3, %v16237_v63 }
0x1a15   :  { %13764 = vmatprep.subr.mxu1 %v16237_v63  ;;  %v6629_v34 = vmul.f32 %v15991_v42, %v18614_v47  ;;  %v6866_v18 = vpop.xlane.xlu1 %6865 }
0x1a17   :  { %13740 = vmatmul.mubr.msk.f32.gmra.mrb[152].mxu1 %vm646_vm7, %v6629_v34 }
0x1a18   :  { %v15993_v1 = vpop.eup %15992  ;;  %13765 = vmatpush3.msra.mxu1 %v18503_v46  ;;  %13742 = vmatprep.mubr.msk.f32.mxu1 %vm16239_vm3, %v16237_v63 }
0x1a19   :  { %v6631_v52 = vmul.f32 %v15993_v1, %v18618_v25  ;;  %14909 = vmatprep.subr.bf16.mxu1 %v16238_v4  ;;  %v15495_v46 = vpop.permute.xlu1 %15494  ;;  %v15491_v25 = vunpack.i.l.bf16 %v18605_v45 }
0x1a1a   :  { %v15496_v48 = vunpack.i.l.bf16 %v15495_v46 }
0x1a1b   :  { %13743 = vmatmul.mubr.msk.f32.gmra.mrb[154].mxu1 %vm646_vm7, %v6631_v52  ;;  %v14910_v6 = vpack.c.bf16 %v15492_v51, %v15491_v25 }
0x1a1c   :  { %13766 = vmatprep.mubr.msk.f32.mxu1 %vm16239_vm3, %v16237_v63 }
0x1a3e   :  { %v6863_v47 = vpop.xlane.xlu0 %6862 }
0x1a3f   :  { %15994 = vrcp.f32 %v6863_v47 }
0x1a40   :  { %15996 = vrcp.f32 %v6866_v18 }
0x1a42   :  { %v6869_v29 = vpop.xlane.xlu0 %6868 }
0x1a43   :  { %15998 = vrcp.f32 %v6869_v29 }
0x1a46   :  { %v7104_v62 = vpop.xlane.xlu0 %7103 }
0x1a47   :  { %16000 = vrcp.f32 %v7104_v62 }
0x1a49   :  { %v15995_v9 = vpop.eup %15994 }
0x1a4a   :  { %v6871_v24 = vmul.f32 %v15995_v9, %v18654_v8  ;;  %v7107_v53 = vpop.xlane.xlu1 %7106  ;;  %v7110_v54 = vpop.xlane.xlu0 %7109 }
0x1a4b   :  { %v15997_v49 = vpop.eup %15996  ;;  %16002 = vrcp.f32 %v7107_v53 }
0x1a4c   :  { %13767 = vmatmul.mubr.msk.f32.vlgmr.msra.gmra.mrb[156].mxu1 %vm646_vm7, %v6871_v24  ;;  %v6873_v45 = vmul.f32 %v15997_v49, %v18622_v12  ;;  %16004 = vrcp.f32 %v7110_v54 }
0x1a4d   :  { %14911 = vmatpush3.bf16.msra.mxu1 %v14910_v6  ;;  %13769 = vmatprep.mubr.msk.f32.mxu1 %vm16239_vm3, %v16237_v63  ;;  %v15999_v55 = vpop.eup %15998 }
0x1a4e   :  { %v7384_v5 = vpop.xlane.xlu1 %7383  ;;  %v7387_v3 = vpop.xlane.xlu0 %7386  ;;  %13794 = vmatprep.subr.mxu1 %v16237_v63  ;;  %v6875_v41 = vmul.f32 %v15999_v55, %v18660_v10 }
0x1a4f   :  { %16006 = vrcp.f32 %v7384_v5 }
0x1a50   :  { %13770 = vmatmul.mubr.msk.f32.gmra.mrb[158].mxu1 %vm646_vm7, %v6873_v45  ;;  %16008 = vrcp.f32 %v7387_v3 }
0x1a51   :  { %13795 = vmatpush3.msra.mxu1 %v7122_v50  ;;  %13772 = vmatprep.mubr.msk.f32.mxu1 %vm16239_vm3, %v16237_v63  ;;  %v16001_v61 = vpop.eup %16000 }
0x1a52   :  { %v7616_v8 = vpop.xlane.xlu1 %7615  ;;  %v7390_v2 = vpop.xlane.xlu0 %7389  ;;  %14916 = vmatprep.subr.bf16.mxu1 %v16238_v4  ;;  %v7112_v12 = vmul.f32 %v16001_v61, %v18666_v23 }
0x1a53   :  { %16010 = vrcp.f32 %v7390_v2 }
0x1a54   :  { %13773 = vmatmul.mubr.msk.f32.gmra.mrb[160].mxu1 %vm646_vm7, %v6875_v41  ;;  %16012 = vrcp.f32 %v7616_v8 }
0x1a55   :  { %13796 = vmatprep.mubr.msk.f32.mxu1 %vm16239_vm3, %v16237_v63  ;;  %v16003_v37 = vpop.eup %16002 }
0x1a56   :  { %v7622_v36 = vpop.xlane.xlu1 %7621  ;;  %v7619_v30 = vpop.xlane.xlu0 %7618  ;;  %v7114_v10 = vmul.f32 %v16003_v37, %v18669_v16 }
0x1a57   :  { %v16005_v44 = vpop.eup %16004  ;;  %16014 = vrcp.f32 %v7619_v30 }
0x1a58   :  { %13797 = vmatmul.mubr.msk.f32.vlgmr.msra.gmra.mrb[162].mxu1 %vm646_vm7, %v7112_v12  ;;  %v7116_v22 = vmul.f32 %v16005_v44, %v18673_v38  ;;  %16016 = vrcp.f32 %v7622_v36 }
0x1a59   :  { %14918 = vmatpush3.bf16.msra.mxu1 %v14917_v15  ;;  %13799 = vmatprep.mubr.msk.f32.mxu1 %vm16239_vm3, %v16237_v63  ;;  %v16007_v17 = vpop.eup %16006  ;;  %v15497_v15 = vunpack.i.h.bf16 %v15495_v46 }
0x1a5a   :  { %13824 = vmatprep.subr.mxu1 %v16237_v63  ;;  %v7860_v59 = vpop.xlane.xlu1 %7859  ;;  %v7392_v16 = vmul.f32 %v16007_v17, %v18676_v33  ;;  %v16009_v42 = vpop.eup %16008 }
0x1a5b   :  { %v7866_v23 = vpop.xlane.xlu0 %7865  ;;  %v14924_v34 = vpack.c.bf16 %v15497_v15, %v15496_v48  ;;  %v7394_v38 = vmul.f32 %v16009_v42, %v18682_v20  ;;  %16018 = vrcp.f32 %v7860_v59  ;;  %v11963_v48 = vld [vmem:[%s19980_s7 + $0x100] sm:$0xff] }
0x1a5c   :  { %13800 = vmatmul.mubr.msk.f32.gmra.mrb[164].mxu1 %vm646_vm7, %v7114_v10 }
0x1a5d   :  { %13825 = vmatpush3.msra.mxu1 %v18280_v32  ;;  %13802 = vmatprep.mubr.msk.f32.mxu1 %vm16239_vm3, %v16237_v63  ;;  %v16011_v1 = vpop.eup %16010 }
0x1a5e   :  { %14923 = vmatprep.subr.bf16.mxu1 %v16238_v4  ;;  %v7863_v43 = vpop.xlane.xlu1 %7862  ;;  %v7396_v33 = vmul.f32 %v16011_v1, %v18685_v56  ;;  %v16013_v18 = vpop.eup %16012 }
0x1a5f   :  { %v8101_v32 = vpop.xlane.xlu0 %8100  ;;  %v7624_v20 = vmul.f32 %v16013_v18, %v18691_v31  ;;  %16020 = vrcp.f32 %v7863_v43  ;;  %v11971_v18 = vld [vmem:[%s19980_s7 + $0x140] sm:$0xff] }
0x1a60   :  { %13803 = vmatmul.mubr.msk.f32.gmra.mrb[166].mxu1 %vm646_vm7, %v7116_v22  ;;  %16022 = vrcp.f32 %v7866_v23 }
0x1a61   :  { %13826 = vmatprep.mubr.msk.f32.mxu1 %vm16239_vm3, %v16237_v63  ;;  %v16015_v62 = vpop.eup %16014  ;;  %16024 = vrcp.f32 %v8101_v32  ;;  %v11966_v32 = vld [vmem:[%s19980_s7 + $0x118] sm:$0xff] }
0x1a62   :  { %v15500_v52 = vpop.permute.xlu1 %15499  ;;  %v7626_v25 = vmul.f32 %v16015_v62, %v18694_v40  ;;  %v16017_v9 = vpop.eup %16016 }
0x1a63   :  { %v7637_v50 = vpop.permute.xlu0 %7636  ;;  %v15502_v47 = vunpack.i.h.bf16 %v15500_v52  ;;  %v15501_v29 = vunpack.i.l.bf16 %v15500_v52  ;;  %v7628_v54 = vmul.f32 %v16017_v9, %v18700_v57  ;;  %v11969_v52 = vld [vmem:[%s19980_s7 + $0x130] sm:$0xff] }
0x1a64   :  { %13827 = vmatmul.mubr.msk.f32.vlgmr.msra.gmra.mrb[168].mxu1 %vm646_vm7, %v7392_v16  ;;  %v11965_v16 = vld [vmem:[%s19980_s7 + $0x110] sm:$0xff] }
0x1a65   :  { %14925 = vmatpush3.bf16.msra.mxu1 %v14924_v34  ;;  %13829 = vmatprep.mubr.msk.f32.mxu1 %vm16239_vm3, %v16237_v63  ;;  %v14931_v51 = vpack.c.bf16 %v15502_v47, %v15501_v29  ;;  %v16019_v49 = vpop.eup %16018  ;;  %v14944_v42 = vpack.c.bf16 %v11966_v32, %v11965_v16  ;;  %v11967_v34 = vld [vmem:[%s19980_s7 + $0x120] sm:$0xff]  ;;  %v11972_v47 = vld [vmem:[%s19980_s7 + $0x148] sm:$0xff] }
0x1a66   :  { %13854 = vmatprep.subr.mxu1 %v16237_v63  ;;  %v7878_v46 = vpop.permute.xlu1 %7877  ;;  %v7868_v3 = vmul.f32 %v16019_v49, %v18706_v39  ;;  %v14956_v29 = vpack.c.bf16 %v11972_v47, %v11971_v18 }
0x1a68   :  { %13830 = vmatmul.mubr.msk.f32.gmra.mrb[170].mxu1 %vm646_vm7, %v7394_v38  ;;  %v11968_v38 = vld [vmem:[%s19980_s7 + $0x128] sm:$0xff] }
0x1a69   :  { %13855 = vmatpush3.msra.mxu1 %v7637_v50  ;;  %13832 = vmatprep.mubr.msk.f32.mxu1 %vm16239_vm3, %v16237_v63  ;;  %v16021_v45 = vpop.eup %16020  ;;  %v14948_v1 = vpack.c.bf16 %v11968_v38, %v11967_v34  ;;  %v11970_v50 = vld [vmem:[%s19980_s7 + $0x138] sm:$0xff] }
0x1a6a   :  { %14930 = vmatprep.subr.bf16.mxu1 %v16238_v4  ;;  %v15505_v53 = vpop.permute.xlu1 %15504  ;;  %v7870_v57 = vmul.f32 %v16021_v45, %v18712_v11  ;;  %v16023_v41 = vpop.eup %16022 }
0x1a6b   :  { %v15507_v6 = vunpack.i.h.bf16 %v15505_v53  ;;  %v15506_v5 = vunpack.i.l.bf16 %v15505_v53  ;;  %v7872_v39 = vmul.f32 %v16023_v41, %v18708_v27  ;;  %v16025_v12 = vpop.eup %16024 }
0x1a6c   :  { %13833 = vmatmul.mubr.msk.f32.gmra.mrb[172].mxu1 %vm646_vm7, %v7396_v33  ;;  %v8109_v36 = vmul.f32 %v16025_v12, %v18716_v13  ;;  %v14952_v33 = vpack.c.bf16 %v11970_v50, %v11969_v52 }
0x1a6d   :  { %13856 = vmatprep.mubr.msk.f32.mxu1 %vm16239_vm3, %v16237_v63  ;;  %v14938_v55 = vpack.c.bf16 %v15507_v6, %v15506_v5  ;;  %v11977_v5 = vld [vmem:[%s19980_s7 + $0x170] sm:$0xff] }
0x1a6e   :  { %v8119_v61 = vpop.permute.xlu1 %8118 }
0x1a70   :  { %13857 = vmatmul.mubr.msk.f32.vlgmr.msra.gmra.mrb[174].mxu1 %vm646_vm7, %v7624_v20  ;;  %v11973_v20 = vld [vmem:[%s19980_s7 + $0x150] sm:$0xff] }
0x1a71   :  { %14932 = vmatpush3.bf16.msra.mxu1 %v14931_v51  ;;  %13859 = vmatprep.mubr.msk.f32.mxu1 %vm16239_vm3, %v16237_v63  ;;  %v11975_v51 = vld [vmem:[%s19980_s7 + $0x160] sm:$0xff] }
0x1a72   :  { %v18811_v56 = vpop.f32.mrb[144].mxu1  ;;  %13884 = vmatprep.subr.mxu1 %v16237_v63 }
0x1a73   :  { %v13708_v24 = vpop.f32.mrb[145].mxu1 }
0x1a74   :  { %13860 = vmatmul.mubr.msk.f32.gmra.mrb[176].mxu1 %vm646_vm7, %v7626_v25  ;;  %v11976_v25 = vld [vmem:[%s19980_s7 + $0x168] sm:$0xff] }
0x1a75   :  { %13885 = vmatpush3.msra.mxu1 %v7878_v46  ;;  %13862 = vmatprep.mubr.msk.f32.mxu1 %vm16239_vm3, %v16237_v63  ;;  %v11974_v46 = vld [vmem:[%s19980_s7 + $0x158] sm:$0xff]  ;;  %v14964_v9 = vpack.c.bf16 %v11976_v25, %v11975_v51 }
0x1a76   :  { %v18818_v31 = vpop.f32.mrb[146].mxu1  ;;  %14937 = vmatprep.subr.bf16.mxu1 %v16238_v4  ;;  %v14960_v62 = vpack.c.bf16 %v11974_v46, %v11973_v20 }
0x1a77   :  { %v13711_v40 = vpop.f32.mrb[147].mxu1 }
0x1a78   :  { %13863 = vmatmul.mubr.msk.f32.gmra.mrb[178].mxu1 %vm646_vm7, %v7628_v54  ;;  %v11978_v40 = vld [vmem:[%s19980_s7 + $0x178] sm:$0xff] }
0x1a79   :  { %13886 = vmatprep.mubr.msk.f32.mxu1 %vm16239_vm3, %v16237_v63 }
0x1a7a   :  { %v18826_v8 = vpop.f32.mrb[148].mxu1 }
0x1a7b   :  { %v13714_v2 = vpop.f32.mrb[149].mxu1 }
0x1a7c   :  { %13887 = vmatmul.mubr.msk.f32.vlgmr.msra.gmra.mrb[180].mxu1 %vm646_vm7, %v7868_v3  ;;  %v14968_v3 = vpack.c.bf16 %v11978_v40, %v11977_v5 }
0x1a7d   :  { %14939 = vmatpush3.bf16.msra.mxu1 %v14938_v55  ;;  %13889 = vmatprep.mubr.msk.f32.mxu1 %vm16239_vm3, %v16237_v63 }
0x1a7e   :  { %13914 = vmatprep.subr.mxu1 %v16237_v63 }
0x1a80   :  { %13890 = vmatmul.mubr.msk.f32.gmra.mrb[182].mxu1 %vm646_vm7, %v7870_v57 }
0x1a81   :  { %13915 = vmatpush3.msra.mxu1 %v8119_v61  ;;  %13892 = vmatprep.mubr.msk.f32.mxu1 %vm16239_vm3, %v16237_v63 }
0x1a84   :  { %13893 = vmatmul.mubr.msk.f32.gmra.mrb[184].mxu1 %vm646_vm7, %v7872_v39 }
0x1a85   :  { %13916 = vmatprep.mubr.msk.f32.mxu1 %vm16239_vm3, %v16237_v63 }
0x1a88   :  { %13917 = vmatmul.mubr.msk.f32.vlgmr.msra.gmra.mrb[186].mxu1 %vm646_vm7, %v8109_v36 }
0x1a89   :  { %13919 = vmatprep.mubr.msk.f32.mxu1 %vm16239_vm3, %v16237_v63 }
0x1a94   :  { %v8107_v11 = vpop.xlane.xlu0 %8106 }
0x1a9f   :  { %v8104_v37 = vpop.xlane.xlu1 %8103 }
0x1aa0   :  { %16026 = vrcp.f32 %v8104_v37 }
0x1aa1   :  { %16028 = vrcp.f32 %v8107_v11 }
0x1aaa   :  { %v16027_v30 = vpop.eup %16026 }
0x1aab   :  { %v8111_v27 = vmul.f32 %v16027_v30, %v18738_v19  ;;  %v16029_v10 = vpop.eup %16028 }
0x1aac   :  { %v8113_v13 = vmul.f32 %v16029_v10, %v18734_v58  ;;  %v11964_v58 = vld [vmem:[%s19980_s7 + $0x108] sm:$0xff] }
0x1aad   :  { %13920 = vmatmul.mubr.msk.f32.gmra.mrb[188].mxu1 %vm646_vm7, %v8111_v27  ;;  %v14940_v43 = vpack.c.bf16 %v11964_v58, %v11963_v48 }
0x1aae   :  { %13922 = vmatprep.mubr.msk.f32.mxu1 %vm16239_vm3, %v16237_v63 }
0x1aaf   :  { %14941 = vmatprep.subr.bf16.mxu0 %v14940_v43 }
0x1ab0   :  { %14943 = vmatpush3.bf16.msra.mxu0 %v14940_v43 }
0x1ab1   :  { %13923 = vmatmul.mubr.msk.f32.gmra.mrb[190].mxu1 %vm646_vm7, %v8113_v13  ;;  %14945 = vmatprep.subr.bf16.mxu0 %v14944_v42 }
0x1ab4   :  { %14947 = vmatpush3.bf16.msra.mxu0 %v14944_v42 }
0x1ab5   :  { %14949 = vmatprep.subr.bf16.mxu0 %v14948_v1 }
0x1ab8   :  { %14951 = vmatpush3.bf16.msra.mxu0 %v14948_v1 }
0x1ab9   :  { %14953 = vmatprep.subr.bf16.mxu0 %v14952_v33 }
0x1abc   :  { %14955 = vmatpush3.bf16.msra.mxu0 %v14952_v33 }
0x1abd   :  { %14957 = vmatprep.subr.bf16.mxu0 %v14956_v29 }
0x1ac0   :  { %14959 = vmatpush3.bf16.msra.mxu0 %v14956_v29 }
0x1ac1   :  { %14961 = vmatprep.subr.bf16.mxu0 %v14960_v62 }
0x1ac4   :  { %14963 = vmatpush3.bf16.msra.mxu0 %v14960_v62 }
0x1ac5   :  { %14965 = vmatprep.subr.bf16.mxu0 %v14964_v9 }
0x1ac8   :  { %14967 = vmatpush3.bf16.msra.mxu0 %v14964_v9 }
0x1ac9   :  { %14969 = vmatprep.subr.bf16.mxu0 %v14968_v3 }
0x1acc   :  { %14971 = vmatpush3.bf16.msra.mxu0 %v14968_v3 }
0x1ae6   :  { %v6719_v44 = vpop.f32.mrb[150].mxu1 }
0x1ae7   :  { %v13738_v59 = vpop.f32.mrb[151].mxu1 }
0x1aea   :  { %v6724_v23 = vpop.f32.mrb[152].mxu1 }
0x1aeb   :  { %v15508_v22 = vpack.i.bf16 %v6724_v23, %v6719_v44  ;;  %v13741_v17 = vpop.f32.mrb[153].mxu1 }
0x1aed   :  { %15509 = vrot.lane.b32.xlu0 %v15508_v22, %s16242_s17 }
0x1aee   :  { %v18851_v15 = vpop.f32.mrb[154].mxu1 }
0x1aef   :  { %v13744_v19 = vpop.f32.mrb[155].mxu1 }
0x1b1f   :  { %v6960_v24 = vpop.f32.mrb[156].mxu1 }
0x1b20   :  { %v13768_v53 = vpop.f32.mrb[157].mxu1 }
0x1b23   :  { %v6965_v54 = vpop.f32.mrb[158].mxu1 }
0x1b24   :  { %v15513_v49 = vpack.i.bf16 %v6965_v54, %v6960_v24  ;;  %v13771_v6 = vpop.f32.mrb[159].mxu1 }
0x1b26   :  { %15514 = vrot.lane.b32.xlu1 %v15513_v49, %s16240_s30 }
0x1b27   :  { %v6970_v45 = vpop.f32.mrb[160].mxu1 }
0x1b28   :  { %v13774_v55 = vpop.f32.mrb[161].mxu1 }
0x1b2b   :  { %v7201_v2 = vpop.f32.mrb[162].mxu1 }
0x1b2c   :  { %v13798_v57 = vpop.f32.mrb[163].mxu1 }
0x1b2f   :  { %v7206_v41 = vpop.f32.mrb[164].mxu1 }
0x1b30   :  { %v15518_v61 = vpack.i.bf16 %v7206_v41, %v7201_v2  ;;  %v13801_v39 = vpop.f32.mrb[165].mxu1 }
0x1b32   :  { %15519 = vrot.lane.b32.xlu1 %v15518_v61, %s16241_s16 }
0x1b33   :  { %v7211_v12 = vpop.f32.mrb[166].mxu1 }
0x1b34   :  { %v13804_v36 = vpop.f32.mrb[167].mxu1 }
0x1b37   :  { %v18903_v11 = vpop.f32.mrb[168].mxu1 }
0x1b38   :  { %v13828_v37 = vpop.f32.mrb[169].mxu1 }
0x1b3b   :  { %v18905_v30 = vpop.f32.mrb[170].mxu1 }
0x1b3c   :  { %v13831_v27 = vpop.f32.mrb[171].mxu1 }
0x1b3f   :  { %v18907_v10 = vpop.f32.mrb[172].mxu1 }
0x1b40   :  { %v13834_v13 = vpop.f32.mrb[173].mxu1 }
0x1b43   :  { %v7716_v44 = vpop.f32.mrb[174].mxu1 }
0x1b44   :  { %v15523_v59 = vpack.i.bf16 %v7716_v44, %v18851_v15  ;;  %v13858_v23 = vpop.f32.mrb[175].mxu1 }
0x1b46   :  { %15524 = vrot.lane.b32.xlu1 %v15523_v59, %s16242_s17 }
0x1b47   :  { %v7721_v22 = vpop.f32.mrb[176].mxu1 }
0x1b48   :  { %v13861_v17 = vpop.f32.mrb[177].mxu1 }
0x1b4b   :  { %v7726_v19 = vpop.f32.mrb[178].mxu1 }
0x1b4c   :  { %v15538_v48 = vpack.i.bf16 %v7726_v19, %v7721_v22  ;;  %v13864_v58 = vpop.f32.mrb[179].mxu1 }
0x1b4f   :  { %v7957_v16 = vpop.f32.mrb[180].mxu1 }
0x1b50   :  { %v15528_v43 = vpack.i.bf16 %v7957_v16, %v6970_v45  ;;  %v13888_v32 = vpop.f32.mrb[181].mxu1 }
0x1b52   :  { %15529 = vrot.lane.b32.xlu0 %v15528_v43, %s16240_s30 }
0x1b53   :  { %v7962_v42 = vpop.f32.mrb[182].mxu1 }
0x1b54   :  { %v13891_v34 = vpop.f32.mrb[183].mxu1 }
0x1b56   :  { %15539 = vrot.lane.b32.xlu0 %v15538_v48, %s16242_s17 }
0x1b57   :  { %v7967_v38 = vpop.f32.mrb[184].mxu1 }
0x1b58   :  { %v15543_v1 = vpack.i.bf16 %v7967_v38, %v7962_v42  ;;  %v13894_v15 = vpop.f32.mrb[185].mxu1 }
0x1b5b   :  { %v8198_v52 = vpop.f32.mrb[186].mxu1 }
0x1b5c   :  { %v15533_v50 = vpack.i.bf16 %v8198_v52, %v7211_v12  ;;  %v13918_v33 = vpop.f32.mrb[187].mxu1 }
0x1b5e   :  { %15534 = vrot.lane.b32.xlu1 %v15533_v50, %s16241_s16  ;;  %v11980_v50 = vld [vmem:[%s19981_s8 + $0x2] ss:$0 sm:$0xff] }
0x1b5f   :  { %v15510_v62 = vpop.permute.xlu0 %15509 }
0x1b60   :  { %v15512_v25 = vunpack.i.h.bf16 %v15510_v62  ;;  %v15511_v9 = vunpack.i.l.bf16 %v15510_v62 }
0x1b62   :  { %15544 = vrot.lane.b32.xlu1 %v15543_v1, %s16240_s30  ;;  %v7252_v49 = vsel %vm541_vm4, %v18818_v31, %v15512_v25  ;;  %v7251_v40 = vsel %vm541_vm4, %v18811_v56, %v15511_v9 }
0x1b80   :  { %v8203_v18 = vpop.f32.mrb[188].mxu1 }
0x1b81   :  { %v13921_v47 = vpop.f32.mrb[189].mxu1 }
0x1b84   :  { %v8208_v29 = vpop.f32.mrb[190].mxu1 }
0x1b85   :  { %v15548_v20 = vpack.i.bf16 %v8208_v29, %v8203_v18  ;;  %v13924_v46 = vpop.f32.mrb[191].mxu1 }
0x1b87   :  { %15549 = vrot.lane.b32.xlu0 %v15548_v20, %s16241_s16 }
0x1b98   :  { %v15515_v51 = vpop.permute.xlu1 %15514 }
0x1b99   :  { %v15517_v24 = vunpack.i.h.bf16 %v15515_v51  ;;  %v15516_v53 = vunpack.i.l.bf16 %v15515_v51 }
0x1b9b   :  { %v7254_v3 = vsel %vm1534_vm8, %v7251_v40, %v15516_v53  ;;  %v7255_v45 = vsel %vm1534_vm8, %v7252_v49, %v15517_v24  ;;  %v11989_v40 = vld [vmem:[%s19984_s11 + $0x120] sm:$0xff] }
0x1ba4   :  { %v15520_v54 = vpop.permute.xlu1 %15519 }
0x1ba5   :  { %v15522_v6 = vunpack.i.h.bf16 %v15520_v54  ;;  %v15521_v5 = vunpack.i.l.bf16 %v15520_v54 }
0x1ba7   :  { %v7257_v55 = vsel %vm1538_vm9, %v7254_v3, %v15521_v5  ;;  %v7258_v2 = vsel %vm1538_vm9, %v7255_v45, %v15522_v6  ;;  %v11990_v3 = vld [vmem:[%s19984_s11 + $0x128] sm:$0xff] }
0x1ba8   :  { %13957 = vmatprep.mubr.f32.mxu0 %v7257_v55  ;;  %v14980_v45 = vpack.c.bf16 %v11990_v3, %v11989_v40 }
0x1ba9   :  { %13958 = vmatmul.mubr.f32.vlgmr.msra.gmra.mrb[190].mxu0 %v7258_v2 }
0x1bb8   :  { %v15525_v57 = vpop.permute.xlu1 %15524 }
0x1bb9   :  { %v15527_v61 = vunpack.i.h.bf16 %v15525_v57  ;;  %v15526_v39 = vunpack.i.l.bf16 %v15525_v57 }
0x1bbb   :  { %v7253_v56 = vsel %vm541_vm4, %v18826_v8, %v15526_v39  ;;  %v8248_v13 = vsel %vm541_vm4, %v18903_v11, %v15527_v61 }
0x1bc4   :  { %v15530_v41 = vpop.permute.xlu0 %15529 }
0x1bc5   :  { %v15532_v31 = vunpack.i.h.bf16 %v15530_v41  ;;  %v15531_v12 = vunpack.i.l.bf16 %v15530_v41 }
0x1bc7   :  { %v7256_v44 = vsel %vm1534_vm8, %v7253_v56, %v15531_v12  ;;  %v8251_v59 = vsel %vm1534_vm8, %v8248_v13, %v15532_v31  ;;  %v11993_v56 = vld [vmem:[%s19984_s11 + $0x140] sm:$0xff]  ;;  %v11994_v13 = vld [vmem:[%s19984_s11 + $0x148] sm:$0xff] }
0x1bc8   :  { %v15540_v17 = vpop.permute.xlu0 %15539 }
0x1bc9   :  { %v15542_v48 = vunpack.i.h.bf16 %v15540_v17  ;;  %v15541_v58 = vunpack.i.l.bf16 %v15540_v17  ;;  %v11997_v17 = vld [vmem:[%s19984_s11 + $0x160] sm:$0xff] }
0x1bcb   :  { %v8249_v11 = vsel %vm541_vm4, %v18905_v30, %v15541_v58  ;;  %v8250_v34 = vsel %vm541_vm4, %v18907_v10, %v15542_v48  ;;  %v11999_v58 = vld [vmem:[%s19984_s11 + $0x170] sm:$0xff] }
0x1bd0   :  { %v15535_v36 = vpop.permute.xlu1 %15534 }
0x1bd1   :  { %v15537_v37 = vunpack.i.h.bf16 %v15535_v36  ;;  %v15536_v27 = vunpack.i.l.bf16 %v15535_v36  ;;  %v11991_v36 = vld [vmem:[%s19984_s11 + $0x130] sm:$0xff] }
0x1bd3   :  { %v7259_v23 = vsel %vm1538_vm9, %v7256_v44, %v15536_v27  ;;  %v8254_v22 = vsel %vm1538_vm9, %v8251_v59, %v15537_v37  ;;  %v11992_v37 = vld [vmem:[%s19984_s11 + $0x138] sm:$0xff]  ;;  %v14988_v44 = vpack.c.bf16 %v11994_v13, %v11993_v56  ;;  %v11995_v59 = vld [vmem:[%s19984_s11 + $0x150] sm:$0xff] }
0x1bd4   :  { %13960 = vmatprep.mubr.f32.mxu0 %v7259_v23  ;;  %v15545_v19 = vpop.permute.xlu1 %15544  ;;  %v14984_v27 = vpack.c.bf16 %v11992_v37, %v11991_v36  ;;  %v11996_v23 = vld [vmem:[%s19984_s11 + $0x158] sm:$0xff] }
0x1bd5   :  { %13961 = vmatmul.mubr.f32.gmra.mrb[192].mxu0 %v8254_v22  ;;  %v15547_v16 = vunpack.i.h.bf16 %v15545_v19  ;;  %v15546_v43 = vunpack.i.l.bf16 %v15545_v19  ;;  %v14992_v22 = vpack.c.bf16 %v11996_v23, %v11995_v59  ;;  %v11998_v19 = vld [vmem:[%s19984_s11 + $0x168] sm:$0xff] }
0x1bd6   :  { %v14996_v48 = vpack.c.bf16 %v11998_v19, %v11997_v17 }
0x1bd7   :  { %v8252_v38 = vsel %vm1534_vm8, %v8249_v11, %v15546_v43  ;;  %v8253_v1 = vsel %vm1534_vm8, %v8250_v34, %v15547_v16  ;;  %v12000_v16 = vld [vmem:[%s19984_s11 + $0x178] sm:$0xff] }
0x1bd8   :  { %v15000_v43 = vpack.c.bf16 %v12000_v16, %v11999_v58 }
0x1bf9   :  { %v15550_v8 = vpop.permute.xlu0 %15549 }
0x1bfa   :  { %v15552_v32 = vunpack.i.h.bf16 %v15550_v8  ;;  %v15551_v42 = vunpack.i.l.bf16 %v15550_v8 }
0x1bfc   :  { %v8255_v15 = vsel %vm1538_vm9, %v8252_v38, %v15551_v42  ;;  %v8256_v52 = vsel %vm1538_vm9, %v8253_v1, %v15552_v32 }
0x1bfd   :  { %13963 = vmatprep.mubr.f32.mxu0 %v8255_v15 }
0x1bfe   :  { %13964 = vmatmul.mubr.f32.gmra.mrb[194].mxu0 %v8256_v52 }
0x1c7c   :  { %v13959_v33 = vpop.f32.mrb[190].mxu0 }
0x1c7d   :  { %v8354_v18 = vadd.f32 %v13959_v33, %v11980_v50  ;;  %v8348_v30 = vpop.f32.mrb[191].mxu0 }
0x1c7e   :  { %v8349_v47 = vadd.f32 %v11980_v50, %v8348_v30 }
0x1c7f   :  { %v18944_v10 = vadd.f32 %v8354_v18, %v18178_v7 }
0x1c80   :  { %v18947_v29 = vadd.f32 %v8349_v47, %v18181_v35 }
0x1c81   :  { %8389 = vadd.xlane.f32.xlu0 %v18944_v10 }
0x1c82   :  { %8387 = vadd.xlane.f32.xlu1 %v18947_v29 }
0x1ca8   :  { %v13962_v20 = vpop.f32.mrb[192].mxu0 }
0x1ca9   :  { %v8358_v46 = vpop.f32.mrb[193].mxu0  ;;  %v8364_v51 = vadd.f32 %v13962_v20, %v11980_v50 }
0x1caa   :  { %v8359_v62 = vadd.f32 %v11980_v50, %v8358_v46 }
0x1cab   :  { %v18956_v9 = vadd.f32 %v8364_v51, %v18186_v21  ;;  %v11985_v21 = vld [vmem:[%s19984_s11 + $0x100] sm:$0xff] }
0x1cac   :  { %v18952_v25 = vadd.f32 %v8359_v62, %v18189_v26  ;;  %v11986_v26 = vld [vmem:[%s19984_s11 + $0x108] sm:$0xff] }
0x1cad   :  { %v14972_v6 = vpack.c.bf16 %v11986_v26, %v11985_v21  ;;  %v11983_v26 = vld [vmem:[%s19982_s9 + $0x2] ss:$0 sm:$0xff] }
0x1cae   :  { %8391 = vadd.xlane.f32.xlu0 %v18952_v25 }
0x1caf   :  { %14973 = vmatprep.subr.bf16.mxu1 %v14972_v6 }
0x1cb0   :  { %14975 = vmatpush3.bf16.msra.mxu1 %v14972_v6 }
0x1cb2   :  { %8393 = vadd.xlane.f32.xlu0 %v18956_v9 }
0x1cd1   :  { %v13965_v7 = vpop.f32.mrb[194].mxu0 }
0x1cd2   :  { %v8374_v35 = vadd.f32 %v13965_v7, %v11980_v50  ;;  %v8368_v24 = vpop.f32.mrb[195].mxu0 }
0x1cd3   :  { %v8369_v53 = vadd.f32 %v11980_v50, %v8368_v24 }
0x1cd4   :  { %v18960_v54 = vadd.f32 %v8374_v35, %v18194_v14  ;;  %v11987_v14 = vld [vmem:[%s19984_s11 + $0x110] sm:$0xff] }
0x1cd5   :  { %v18963_v49 = vadd.f32 %v8369_v53, %v18197_v60  ;;  %v11988_v60 = vld [vmem:[%s19984_s11 + $0x118] sm:$0xff] }
0x1cd6   :  { %8397 = vadd.xlane.f32.xlu0 %v18960_v54  ;;  %v14976_v5 = vpack.c.bf16 %v11988_v60, %v11987_v14 }
0x1cd7   :  { %8395 = vadd.xlane.f32.xlu1 %v18963_v49 }
0x1cd8   :  { %14977 = vmatprep.subr.bf16.mxu1 %v14976_v5 }
0x1cd9   :  { %14979 = vmatpush3.bf16.msra.mxu1 %v14976_v5  ;;  %v11984_v5 = vld [vmem:[%s19983_s10 + $0x2] ss:$0 sm:$0xff] }
0x1cda   :  { %14981 = vmatprep.subr.bf16.mxu1 %v14980_v45 }
0x1cdd   :  { %14983 = vmatpush3.bf16.msra.mxu1 %v14980_v45 }
0x1cde   :  { %14985 = vmatprep.subr.bf16.mxu1 %v14984_v27 }
0x1ce1   :  { %14987 = vmatpush3.bf16.msra.mxu1 %v14984_v27 }
0x1ce2   :  { %14989 = vmatprep.subr.bf16.mxu1 %v14988_v44 }
0x1ce5   :  { %14991 = vmatpush3.bf16.msra.mxu1 %v14988_v44 }
0x1ce6   :  { %14993 = vmatprep.subr.bf16.mxu1 %v14992_v22 }
0x1ce9   :  { %14995 = vmatpush3.bf16.msra.mxu1 %v14992_v22 }
0x1cea   :  { %14997 = vmatprep.subr.bf16.mxu1 %v14996_v48 }
0x1ced   :  { %14999 = vmatpush3.bf16.msra.mxu1 %v14996_v48 }
0x1cee   :  { %15001 = vmatprep.subr.bf16.mxu1 %v15000_v43 }
0x1cf1   :  { %15003 = vmatpush3.bf16.msra.mxu1 %v15000_v43 }
0x1d0e   :  { %v8390_v55 = vpop.xlane.xlu0 %8389 }
0x1d0f   :  { %v8400_v2 = vmul.f32 0.0078125, %v8390_v55  ;;  %v8388_v57 = vpop.xlane.xlu1 %8387 }
0x1d10   :  { %v8399_v41 = vmul.f32 0.0078125, %v8388_v57 }
0x1d11   :  { %v8406_v61 = vsub.f32 %v18944_v10, %v8400_v2 }
0x1d12   :  { %v8405_v39 = vsub.f32 %v18947_v29, %v8399_v41 }
0x1d13   :  { %v8412_v31 = vmul.f32 %v8406_v61, %v8406_v61 }
0x1d14   :  { %v8411_v12 = vmul.f32 %v8405_v39, %v8405_v39 }
0x1d15   :  { %8419 = vadd.xlane.f32.xlu0 %v8412_v31 }
0x1d16   :  { %8417 = vadd.xlane.f32.xlu1 %v8411_v12 }
0x1d3b   :  { %v8392_v8 = vpop.xlane.xlu0 %8391 }
0x1d3c   :  { %v8401_v32 = vmul.f32 0.0078125, %v8392_v8 }
0x1d3e   :  { %v8407_v42 = vsub.f32 %v18952_v25, %v8401_v32 }
0x1d3f   :  { %v8394_v11 = vpop.xlane.xlu0 %8393 }
0x1d40   :  { %v8402_v34 = vmul.f32 0.0078125, %v8394_v11  ;;  %v8413_v38 = vmul.f32 %v8407_v42, %v8407_v42 }
0x1d42   :  { %v8408_v1 = vsub.f32 %v18956_v9, %v8402_v34  ;;  %8421 = vadd.xlane.f32.xlu1 %v8413_v38 }
0x1d44   :  { %v8414_v15 = vmul.f32 %v8408_v1, %v8408_v1 }
0x1d46   :  { %8423 = vadd.xlane.f32.xlu0 %v8414_v15  ;;  %v12004_v15 = vld [vmem:[%s19986_s13 + $0x88] sm:$0xff] }
0x1d63   :  { %v8398_v52 = vpop.xlane.xlu0 %8397 }
0x1d64   :  { %v8404_v50 = vmul.f32 0.0078125, %v8398_v52  ;;  %v8396_v33 = vpop.xlane.xlu1 %8395 }
0x1d65   :  { %v8403_v18 = vmul.f32 0.0078125, %v8396_v33  ;;  %v12006_v33 = vld [vmem:[%s19986_s13 + $0x98] sm:$0xff] }
0x1d66   :  { %v8410_v30 = vsub.f32 %v18960_v54, %v8404_v50  ;;  %v12005_v50 = vld [vmem:[%s19986_s13 + $0x90] sm:$0xff] }
0x1d67   :  { %v8409_v47 = vsub.f32 %v18963_v49, %v8403_v18  ;;  %v15008_v18 = vpack.c.bf16 %v12006_v33, %v12005_v50 }
0x1d68   :  { %v8416_v20 = vmul.f32 %v8410_v30, %v8410_v30 }
0x1d69   :  { %v8415_v46 = vmul.f32 %v8409_v47, %v8409_v47 }
0x1d6a   :  { %8427 = vadd.xlane.f32.xlu0 %v8416_v20 }
0x1d6b   :  { %8425 = vadd.xlane.f32.xlu1 %v8415_v46  ;;  %v12009_v46 = vld [vmem:[%s19986_s13 + $0xb0] sm:$0xff] }
0x1da2   :  { %v8420_v62 = vpop.xlane.xlu0 %8419 }
0x1da3   :  { %v8430_v51 = vmul.f32 0.0078125, %v8420_v62  ;;  %v8418_v7 = vpop.xlane.xlu1 %8417  ;;  %v12010_v62 = vld [vmem:[%s19986_s13 + $0xb8] sm:$0xff] }
0x1da4   :  { %v8429_v35 = vmul.f32 0.0078125, %v8418_v7  ;;  %v12002_v7 = vld [vmem:[%s19985_s12 + $0x2] ss:$0 sm:$0xff] }
0x1da5   :  { %v8436_v24 = vadd.f32 1e-05, %v8430_v51  ;;  %v15016_v51 = vpack.c.bf16 %v12010_v62, %v12009_v46 }
0x1da6   :  { %v8435_v53 = vadd.f32 1e-05, %v8429_v35 }
0x1da7   :  { %16030 = vrsqrt.f32 %v8436_v24 }
0x1da8   :  { %16032 = vrsqrt.f32 %v8435_v53 }
0x1db1   :  { %v16031_v21 = vpop.eup %16030 }
0x1db2   :  { %v16033_v14 = vpop.eup %16032  ;;  %v8448_v6 = vmul.f32 %v16031_v21, %v8406_v61 }
0x1db3   :  { %v8447_v60 = vmul.f32 %v16033_v14, %v8405_v39 }
0x1db4   :  { %v8460_v40 = vmul.f32 %v11983_v26, %v8448_v6 }
0x1db5   :  { %v8459_v3 = vmul.f32 %v11983_v26, %v8447_v60 }
0x1db6   :  { %v8472_v55 = vadd.f32 %v11984_v5, %v8460_v40 }
0x1db7   :  { %v8471_v45 = vadd.f32 %v11984_v5, %v8459_v3 }
0x1db9   :  { %13998 = vmatprep.mubr.f32.mxu1 %v8471_v45 }
0x1dba   :  { %13999 = vmatmul.mubr.f32.vlgmr.msra.gmra.mrb[192].mxu1 %v8472_v55 }
0x1dcf   :  { %v8422_v2 = vpop.xlane.xlu1 %8421 }
0x1dd0   :  { %v8431_v57 = vmul.f32 0.0078125, %v8422_v2 }
0x1dd2   :  { %v8437_v41 = vadd.f32 1e-05, %v8431_v57 }
0x1dd3   :  { %v8424_v31 = vpop.xlane.xlu0 %8423 }
0x1dd4   :  { %16034 = vrsqrt.f32 %v8437_v41  ;;  %v8432_v12 = vmul.f32 0.0078125, %v8424_v31 }
0x1dd6   :  { %v8438_v36 = vadd.f32 1e-05, %v8432_v12 }
0x1dd8   :  { %16036 = vrsqrt.f32 %v8438_v36 }
0x1dde   :  { %v16035_v61 = vpop.eup %16034 }
0x1ddf   :  { %v8449_v39 = vmul.f32 %v16035_v61, %v8407_v42 }
0x1de1   :  { %v8461_v37 = vmul.f32 %v11983_v26, %v8449_v39 }
0x1de2   :  { %v16037_v27 = vpop.eup %16036 }
0x1de3   :  { %v8473_v56 = vadd.f32 %v11984_v5, %v8461_v37  ;;  %v8450_v13 = vmul.f32 %v16037_v27, %v8408_v1  ;;  %v12003_v1 = vld [vmem:[%s19986_s13 + $0x80] sm:$0xff] }
0x1de4   :  { %v15004_v52 = vpack.c.bf16 %v12004_v15, %v12003_v1 }
0x1de5   :  { %14001 = vmatprep.mubr.f32.mxu1 %v8473_v56  ;;  %v8462_v44 = vmul.f32 %v11983_v26, %v8450_v13 }
0x1de6   :  { %15005 = vmatprep.subr.bf16.mxu0 %v15004_v52 }
0x1de7   :  { %v8474_v59 = vadd.f32 %v11984_v5, %v8462_v44  ;;  %15007 = vmatpush3.bf16.msra.mxu0 %v15004_v52 }
0x1de8   :  { %15009 = vmatprep.subr.bf16.mxu0 %v15008_v18 }
0x1de9   :  { %14002 = vmatmul.mubr.f32.gmra.mrb[194].mxu1 %v8474_v59 }
0x1deb   :  { %15011 = vmatpush3.bf16.msra.mxu0 %v15008_v18 }
0x1df7   :  { %v8428_v23 = vpop.xlane.xlu0 %8427 }
0x1df8   :  { %v8434_v22 = vmul.f32 0.0078125, %v8428_v23  ;;  %v8426_v17 = vpop.xlane.xlu1 %8425 }
0x1df9   :  { %v8433_v19 = vmul.f32 0.0078125, %v8426_v17 }
0x1dfa   :  { %v8440_v48 = vadd.f32 1e-05, %v8434_v22 }
0x1dfb   :  { %v8439_v58 = vadd.f32 1e-05, %v8433_v19 }
0x1dfc   :  { %16038 = vrsqrt.f32 %v8440_v48 }
0x1dfd   :  { %16040 = vrsqrt.f32 %v8439_v58 }
0x1e06   :  { %v16039_v16 = vpop.eup %16038 }
0x1e07   :  { %v16041_v43 = vpop.eup %16040  ;;  %v8452_v8 = vmul.f32 %v16039_v16, %v8410_v30  ;;  %v12007_v30 = vld [vmem:[%s19986_s13 + $0xa0] sm:$0xff] }
0x1e08   :  { %v8451_v32 = vmul.f32 %v16041_v43, %v8409_v47  ;;  %v12008_v47 = vld [vmem:[%s19986_s13 + $0xa8] sm:$0xff] }
0x1e09   :  { %v8464_v42 = vmul.f32 %v11983_v26, %v8452_v8  ;;  %v15012_v20 = vpack.c.bf16 %v12008_v47, %v12007_v30 }
0x1e0a   :  { %v8463_v11 = vmul.f32 %v11983_v26, %v8451_v32 }
0x1e0b   :  { %v8476_v38 = vadd.f32 %v11984_v5, %v8464_v42  ;;  %15013 = vmatprep.subr.bf16.mxu0 %v15012_v20 }
0x1e0c   :  { %v8475_v34 = vadd.f32 %v11984_v5, %v8463_v11  ;;  %15015 = vmatpush3.bf16.msra.mxu0 %v15012_v20 }
0x1e0d   :  { %15017 = vmatprep.subr.bf16.mxu0 %v15016_v51 }
0x1e0e   :  { %14004 = vmatprep.mubr.f32.mxu1 %v8475_v34 }
0x1e0f   :  { %14005 = vmatmul.mubr.f32.gmra.mrb[196].mxu1 %v8476_v38 }
0x1e10   :  { %8994 = vmatprep.mubr.f32.mxu1 %v16237_v63  ;;  %15019 = vmatpush3.bf16.msra.mxu0 %v15016_v51 }
0x1e8d   :  { %v14000_v35 = vpop.f32.mrb[192].mxu1 }
0x1e8e   :  { %v8574_v24 = vadd.f32 %v14000_v35, %v12002_v7  ;;  %v8568_v53 = vpop.f32.mrb[193].mxu1 }
0x1e8f   :  { %v8569_v21 = vadd.f32 %v12002_v7, %v8568_v53 }
0x1e90   :  { %v8598_v26 = vmul.f32 %v8574_v24, %v8574_v24 }
0x1e91   :  { %v8597_v14 = vmul.f32 %v8569_v21, %v8569_v21 }
0x1e92   :  { %v8604_v6 = vmul.f32 %v8598_v26, %v8574_v24 }
0x1e93   :  { %v8603_v60 = vmul.f32 %v8597_v14, %v8569_v21 }
0x1e94   :  { %v8610_v5 = vmul.f32 0.044715, %v8604_v6 }
0x1e95   :  { %v8609_v40 = vmul.f32 0.044715, %v8603_v60 }
0x1e96   :  { %v8616_v3 = vadd.f32 %v8610_v5, %v8574_v24 }
0x1e97   :  { %v8615_v45 = vadd.f32 %v8609_v40, %v8569_v21 }
0x1e98   :  { %v8622_v55 = vmul.f32 0.7978846, %v8616_v3 }
0x1e99   :  { %v8621_v2 = vmul.f32 0.7978846, %v8615_v45 }
0x1e9a   :  { %16042 = vtanh.f32 %v8622_v55  ;;  %v12012_v55 = vld [vmem:[%s19987_s14 + $0x2] ss:$0 sm:$0xff] }
0x1e9b   :  { %16044 = vtanh.f32 %v8621_v2 }
0x1ea4   :  { %v16043_v57 = vpop.eup %16042 }
0x1ea5   :  { %v16045_v41 = vpop.eup %16044  ;;  %v8634_v31 = vadd.f32 1.0, %v16043_v57 }
0x1ea6   :  { %v8633_v12 = vadd.f32 1.0, %v16045_v41 }
0x1ea7   :  { %v8640_v36 = vmul.f32 0.5, %v8634_v31 }
0x1ea8   :  { %v8639_v61 = vmul.f32 0.5, %v8633_v12 }
0x1ea9   :  { %v8646_v37 = vmul.f32 %v8640_v36, %v8574_v24 }
0x1eaa   :  { %v8645_v39 = vmul.f32 %v8639_v61, %v8569_v21 }
0x1eac   :  { %14023 = vmatprep.mubr.msk.f32.mxu0 %vm1534_vm8, %v8645_v39 }
0x1ead   :  { %14024 = vmatmul.mubr.msk.f32.vlgmr.msra.gmra.mrb[196].mxu0 %vm1534_vm8, %v8646_v37 }
0x1ebc   :  { %v14003_v27 = vpop.f32.mrb[194].mxu1 }
0x1ebd   :  { %v8584_v56 = vadd.f32 %v14003_v27, %v12002_v7  ;;  %v8578_v13 = vpop.f32.mrb[195].mxu1 }
0x1ebe   :  { %v8579_v44 = vadd.f32 %v12002_v7, %v8578_v13 }
0x1ebf   :  { %v8600_v59 = vmul.f32 %v8584_v56, %v8584_v56 }
0x1ec0   :  { %v8599_v23 = vmul.f32 %v8579_v44, %v8579_v44 }
0x1ec1   :  { %v8606_v22 = vmul.f32 %v8600_v59, %v8584_v56 }
0x1ec2   :  { %v8605_v17 = vmul.f32 %v8599_v23, %v8579_v44 }
0x1ec3   :  { %v8612_v19 = vmul.f32 0.044715, %v8606_v22 }
0x1ec4   :  { %v8611_v48 = vmul.f32 0.044715, %v8605_v17  ;;  %v8882_v17 = vld [vmem:[#allocation2 + $0x480] sm:$0xff] }
0x1ec5   :  { %v8618_v58 = vadd.f32 %v8612_v19, %v8584_v56 }
0x1ec6   :  { %v8617_v16 = vadd.f32 %v8611_v48, %v8579_v44  ;;  %v8885_v48 = vld [vmem:[#allocation2 + $0x498] sm:$0xff] }
0x1ec7   :  { %v8624_v43 = vmul.f32 0.7978846, %v8618_v58  ;;  %v8884_v58 = vld [vmem:[#allocation2 + $0x490] sm:$0xff] }
0x1ec8   :  { %v8623_v8 = vmul.f32 0.7978846, %v8617_v16  ;;  %v8887_v16 = vld [vmem:[#allocation2 + $0x4a8] sm:$0xff] }
0x1ec9   :  { %16046 = vtanh.f32 %v8624_v43  ;;  %v15022_v43 = vpack.c.bf16 %v8885_v48, %v8882_v17  ;;  %v8912_v17 = vld [vmem:[#allocation2 + $0x570] sm:$0xff]  ;;  %v8914_v48 = vld [vmem:[#allocation2 + $0x580] sm:$0xff] }
0x1eca   :  { %16048 = vtanh.f32 %v8623_v8  ;;  %v15052_v8 = vpack.c.bf16 %v8887_v16, %v8884_v58  ;;  %v8917_v16 = vld [vmem:[#allocation2 + $0x598] sm:$0xff] }
0x1ecc   :  { %15053 = vmatprep.subr.bf16.mxu0 %v15052_v8 }
0x1ecd   :  { %15055 = vmatpush3.bf16.msra.mxu0 %v15052_v8  ;;  %v8919_v8 = vld [vmem:[#allocation2 + $0x5a8] sm:$0xff] }
0x1ed3   :  { %v16047_v32 = vpop.eup %16046 }
0x1ed4   :  { %v16049_v42 = vpop.eup %16048  ;;  %v8636_v11 = vadd.f32 1.0, %v16047_v32  ;;  %v8889_v32 = vld [vmem:[#allocation2 + $0x4b8] sm:$0xff] }
0x1ed5   :  { %v8635_v34 = vadd.f32 1.0, %v16049_v42  ;;  %v8892_v42 = vld [vmem:[#allocation2 + $0x4d0] sm:$0xff] }
0x1ed6   :  { %v8642_v38 = vmul.f32 0.5, %v8636_v11  ;;  %v15024_v11 = vpack.c.bf16 %v8892_v42, %v8889_v32  ;;  %v8922_v32 = vld [vmem:[#allocation2 + $0x5c0] sm:$0xff] }
0x1ed7   :  { %v8641_v1 = vmul.f32 0.5, %v8635_v34  ;;  %v8890_v34 = vld [vmem:[#allocation2 + $0x4c0] sm:$0xff]  ;;  %v15044_v42 = vpack.c.bf16 %v8922_v32, %v8919_v8 }
0x1ed8   :  { %v8648_v52 = vmul.f32 %v8642_v38, %v8584_v56  ;;  %v8893_v38 = vld [vmem:[#allocation2 + $0x4d8] sm:$0xff] }
0x1ed9   :  { %v8647_v15 = vmul.f32 %v8641_v1, %v8579_v44 }
0x1edb   :  { %14026 = vmatprep.mubr.msk.f32.mxu0 %vm1534_vm8, %v8647_v15  ;;  %v15056_v15 = vpack.c.bf16 %v8893_v38, %v8890_v34  ;;  %v8923_v38 = vld [vmem:[#allocation2 + $0x5c8] sm:$0xff] }
0x1edc   :  { %14027 = vmatmul.mubr.msk.f32.gmra.mrb[198].mxu0 %vm1534_vm8, %v8648_v52  ;;  %v8895_v52 = vld [vmem:[#allocation2 + $0x4e8] sm:$0xff] }
0x1edd   :  { %15057 = vmatprep.subr.bf16.mxu0 %v15056_v15 }
0x1ede   :  { %15059 = vmatpush3.bf16.msra.mxu0 %v15056_v15  ;;  %v8925_v15 = vld [vmem:[#allocation2 + $0x5d8] sm:$0xff] }
0x1ee2   :  { %v14006_v50 = vpop.f32.mrb[196].mxu1 }
0x1ee3   :  { %v8594_v33 = vadd.f32 %v14006_v50, %v12002_v7  ;;  %v8588_v18 = vpop.f32.mrb[197].mxu1  ;;  %v8898_v50 = vld [vmem:[#allocation2 + $0x500] sm:$0xff] }
0x1ee4   :  { %v8589_v30 = vadd.f32 %v12002_v7, %v8588_v18  ;;  %v15028_v18 = vpack.c.bf16 %v8898_v50, %v8895_v52  ;;  %v8928_v52 = vld [vmem:[#allocation2 + $0x5f0] sm:$0xff] }
0x1ee5   :  { %v8602_v47 = vmul.f32 %v8594_v33, %v8594_v33  ;;  %v8924_v50 = vld [vmem:[#allocation2 + $0x5d0] sm:$0xff] }
0x1ee6   :  { %v8601_v20 = vmul.f32 %v8589_v30, %v8589_v30 }
0x1ee7   :  { %v8608_v46 = vmul.f32 %v8602_v47, %v8594_v33  ;;  %v8896_v47 = vld [vmem:[#allocation2 + $0x4f0] sm:$0xff] }
0x1ee8   :  { %v8607_v62 = vmul.f32 %v8601_v20, %v8589_v30  ;;  %v8899_v20 = vld [vmem:[#allocation2 + $0x508] sm:$0xff] }
0x1ee9   :  { %v8614_v51 = vmul.f32 0.044715, %v8608_v46  ;;  %v15060_v46 = vpack.c.bf16 %v8899_v20, %v8896_v47  ;;  %v8929_v47 = vld [vmem:[#allocation2 + $0x5f8] sm:$0xff] }
0x1eea   :  { %v8613_v35 = vmul.f32 0.044715, %v8607_v62 }
0x1eeb   :  { %v8620_v24 = vadd.f32 %v8614_v51, %v8594_v33  ;;  %15061 = vmatprep.subr.bf16.mxu0 %v15060_v46 }
0x1eec   :  { %v8619_v53 = vadd.f32 %v8613_v35, %v8589_v30  ;;  %15063 = vmatpush3.bf16.msra.mxu0 %v15060_v46 }
0x1eed   :  { %v8626_v21 = vmul.f32 0.7978846, %v8620_v24 }
0x1eee   :  { %v8625_v26 = vmul.f32 0.7978846, %v8619_v53 }
0x1eef   :  { %16050 = vtanh.f32 %v8626_v21 }
0x1ef0   :  { %16052 = vtanh.f32 %v8625_v26 }
0x1ef9   :  { %v16051_v14 = vpop.eup %16050 }
0x1efa   :  { %v16053_v6 = vpop.eup %16052  ;;  %v8638_v60 = vadd.f32 1.0, %v16051_v14 }
0x1efb   :  { %v8637_v5 = vadd.f32 1.0, %v16053_v6 }
0x1efc   :  { %v8644_v40 = vmul.f32 0.5, %v8638_v60  ;;  %v8901_v60 = vld [vmem:[#allocation2 + $0x518] sm:$0xff] }
0x1efd   :  { %v8643_v3 = vmul.f32 0.5, %v8637_v5  ;;  %v8904_v5 = vld [vmem:[#allocation2 + $0x530] sm:$0xff] }
0x1efe   :  { %v8650_v7 = vmul.f32 %v8644_v40, %v8594_v33  ;;  %v8894_v33 = vld [vmem:[#allocation2 + $0x4e0] sm:$0xff]  ;;  %v15032_v40 = vpack.c.bf16 %v8904_v5, %v8901_v60 }
0x1eff   :  { %v8649_v45 = vmul.f32 %v8643_v3, %v8589_v30  ;;  %v8897_v30 = vld [vmem:[#allocation2 + $0x4f8] sm:$0xff]  ;;  %v8900_v3 = vld [vmem:[#allocation2 + $0x510] sm:$0xff] }
0x1f00   :  { %v15030_v62 = vpack.c.bf16 %v8897_v30, %v8894_v33  ;;  %v15048_v33 = vpack.c.bf16 %v8928_v52, %v8925_v15  ;;  %v8926_v30 = vld [vmem:[#allocation2 + $0x5e0] sm:$0xff] }
0x1f01   :  { %14029 = vmatprep.mubr.msk.f32.mxu0 %vm1534_vm8, %v8649_v45  ;;  %v8903_v45 = vld [vmem:[#allocation2 + $0x528] sm:$0xff]  ;;  %v15080_v46 = vpack.c.bf16 %v8929_v47, %v8926_v30 }
0x1f02   :  { %14030 = vmatmul.mubr.msk.f32.gmra.mrb[200].mxu0 %vm1534_vm8, %v8650_v7  ;;  %v8902_v7 = vld [vmem:[#allocation2 + $0x520] sm:$0xff] }
0x1f80   :  { %v14025_v2 = vpop.f32.mrb[196].mxu0 }
0x1f81   :  { %v8758_v57 = vadd.f32 %v14025_v2, %v12012_v55  ;;  %v8752_v41 = vpop.f32.mrb[197].mxu0  ;;  %v8905_v2 = vld [vmem:[#allocation2 + $0x538] sm:$0xff] }
0x1f82   :  { %v8753_v31 = vadd.f32 %v12012_v55, %v8752_v41  ;;  %v8907_v41 = vld [vmem:[#allocation2 + $0x548] sm:$0xff] }
0x1f83   :  { %v19065_v12 = vadd.f32 %v8758_v57, %v18944_v10  ;;  %v15064_v57 = vpack.c.bf16 %v8905_v2, %v8902_v7 }
0x1f84   :  { %v19068_v36 = vadd.f32 %v8753_v31, %v18947_v29  ;;  %v8910_v31 = vld [vmem:[#allocation2 + $0x560] sm:$0xff] }
0x1f85   :  { %8793 = vadd.xlane.f32.xlu0 %v19065_v12  ;;  %15065 = vmatprep.subr.bf16.mxu0 %v15064_v57 }
0x1f86   :  { %8791 = vadd.xlane.f32.xlu1 %v19068_v36  ;;  %15067 = vmatpush3.bf16.msra.mxu0 %v15064_v57 }
0x1faf   :  { %v14028_v61 = vpop.f32.mrb[198].mxu0 }
0x1fb0   :  { %v8768_v39 = vadd.f32 %v14028_v61, %v12012_v55  ;;  %v8762_v37 = vpop.f32.mrb[199].mxu0  ;;  %v15036_v61 = vpack.c.bf16 %v8910_v31, %v8907_v41 }
0x1fb1   :  { %v8763_v27 = vadd.f32 %v12012_v55, %v8762_v37  ;;  %v8909_v37 = vld [vmem:[#allocation2 + $0x558] sm:$0xff] }
0x1fb2   :  { %v19073_v56 = vadd.f32 %v8768_v39, %v18956_v9  ;;  %v8886_v9 = vld [vmem:[#allocation2 + $0x4a0] sm:$0xff] }
0x1fb3   :  { %v19076_v13 = vadd.f32 %v8763_v27, %v18952_v25  ;;  %v8883_v25 = vld [vmem:[#allocation2 + $0x488] sm:$0xff]  ;;  %v8906_v39 = vld [vmem:[#allocation2 + $0x540] sm:$0xff]  ;;  %v8908_v27 = vld [vmem:[#allocation2 + $0x550] sm:$0xff] }
0x1fb4   :  { %8797 = vadd.xlane.f32.xlu0 %v19073_v56  ;;  %v15020_v19 = vpack.c.bf16 %v8886_v9, %v8883_v25  ;;  %v8916_v25 = vld [vmem:[#allocation2 + $0x590] sm:$0xff] }
0x1fb5   :  { %8795 = vadd.xlane.f32.xlu1 %v19076_v13 }
0x1fb6   :  { %15021 = vmatprep.subr.bf16.mxu1 %v15020_v19  ;;  %v8915_v19 = vld [vmem:[#allocation2 + $0x588] sm:$0xff] }
0x1fb7   :  { %15023 = vmatpush1.bf16.msra.mxu1 %v15022_v43  ;;  %v15042_v58 = vpack.c.bf16 %v8915_v19, %v8912_v17  ;;  %v15072_v43 = vpack.c.bf16 %v8917_v16, %v8914_v48 }
0x1fb8   :  { %15025 = vmatprep.subr.bf16.mxu1 %v15024_v11  ;;  %v8921_v11 = vld [vmem:[#allocation2 + $0x5b8] sm:$0xff] }
0x1fd5   :  { %v14031_v10 = vpop.f32.mrb[200].mxu0 }
0x1fd6   :  { %v8778_v29 = vadd.f32 %v14031_v10, %v12012_v55  ;;  %v8772_v44 = vpop.f32.mrb[201].mxu0  ;;  %v15038_v10 = vpack.c.bf16 %v8909_v37, %v8906_v39 }
0x1fd7   :  { %v8773_v59 = vadd.f32 %v12012_v55, %v8772_v44  ;;  %v15034_v55 = vpack.c.bf16 %v8903_v45, %v8900_v3 }
0x1fd8   :  { %v19081_v23 = vadd.f32 %v8778_v29, %v18960_v54  ;;  %v8888_v54 = vld [vmem:[#allocation2 + $0x4b0] sm:$0xff]  ;;  %v8911_v29 = vld [vmem:[#allocation2 + $0x568] sm:$0xff] }
0x1fd9   :  { %v19084_v22 = vadd.f32 %v8773_v59, %v18963_v49  ;;  %v8891_v49 = vld [vmem:[#allocation2 + $0x4c8] sm:$0xff]  ;;  %v15068_v44 = vpack.c.bf16 %v8911_v29, %v8908_v27  ;;  %v8913_v59 = vld [vmem:[#allocation2 + $0x578] sm:$0xff]  ;;  %v12021_v29 = vld [vmem:[%s19977_s4 + $0x3] ss:$0 sm:$0xff] }
0x1fda   :  { %8801 = vadd.xlane.f32.xlu0 %v19081_v23  ;;  %v15026_v1 = vpack.c.bf16 %v8891_v49, %v8888_v54  ;;  %v15040_v9 = vpack.c.bf16 %v8916_v25, %v8913_v59  ;;  %v8918_v54 = vld [vmem:[#allocation2 + $0x5a0] sm:$0xff]  ;;  %v8920_v49 = vld [vmem:[#allocation2 + $0x5b0] sm:$0xff] }
0x1fdb   :  { %8799 = vadd.xlane.f32.xlu1 %v19084_v22  ;;  %15069 = vmatprep.subr.bf16.mxu0 %v15068_v44  ;;  %v15046_v34 = vpack.c.bf16 %v8921_v11, %v8918_v54 }
0x1fdc   :  { %15027 = vmatpush1.bf16.msra.mxu1 %v15026_v1  ;;  %15071 = vmatpush3.bf16.msra.mxu0 %v15068_v44  ;;  %v15076_v1 = vpack.c.bf16 %v8923_v38, %v8920_v49 }
0x1fdd   :  { %15029 = vmatprep.subr.bf16.mxu1 %v15028_v18  ;;  %15073 = vmatprep.subr.bf16.mxu0 %v15072_v43  ;;  %v8927_v18 = vld [vmem:[#allocation2 + $0x5e8] sm:$0xff] }
0x1fde   :  { %v15050_v20 = vpack.c.bf16 %v8927_v18, %v8924_v50 }
0x1fe0   :  { %15031 = vmatpush1.bf16.msra.mxu1 %v15030_v62  ;;  %15075 = vmatpush3.bf16.msra.mxu0 %v15072_v43 }
0x1fe1   :  { %15033 = vmatprep.subr.bf16.mxu1 %v15032_v40  ;;  %15077 = vmatprep.subr.bf16.mxu0 %v15076_v1 }
0x1fe4   :  { %15035 = vmatpush1.bf16.msra.mxu1 %v15034_v55  ;;  %15079 = vmatpush3.bf16.msra.mxu0 %v15076_v1 }
0x1fe5   :  { %15037 = vmatprep.subr.bf16.mxu1 %v15036_v61  ;;  %15081 = vmatprep.subr.bf16.mxu0 %v15080_v46 }
0x1fe8   :  { %15039 = vmatpush1.bf16.msra.mxu1 %v15038_v10  ;;  %15083 = vmatpush3.bf16.msra.mxu0 %v15080_v46 }
0x1fe9   :  { %15041 = vmatprep.subr.bf16.mxu1 %v15040_v9  ;;  %15088 = vmatprep.subr.bf16.mxu0 %v16238_v4  ;;  %v12022_v9 = vld [vmem:[%s19978_s5 + $0x3] ss:$0 sm:$0xff] }
0x1fec   :  { %15043 = vmatpush1.bf16.msra.mxu1 %v15042_v58 }
0x1fed   :  { %15045 = vmatprep.subr.bf16.mxu1 %v15044_v42 }
0x1ff0   :  { %15047 = vmatpush1.bf16.msra.mxu1 %v15046_v34 }
0x1ff1   :  { %15049 = vmatprep.subr.bf16.mxu1 %v15048_v33 }
0x1ff4   :  { %15051 = vmatpush1.bf16.msra.mxu1 %v15050_v20 }
0x1ff5   :  { %15084 = vmatprep.subr.bf16.mxu1 %v16238_v4 }
0x2012   :  { %v8794_v51 = vpop.xlane.xlu0 %8793 }
0x2013   :  { %v8804_v35 = vmul.f32 0.0078125, %v8794_v51  ;;  %v8792_v24 = vpop.xlane.xlu1 %8791 }
0x2014   :  { %v8803_v53 = vmul.f32 0.0078125, %v8792_v24 }
0x2015   :  { %v19089_v21 = vsub.f32 %v19065_v12, %v8804_v35 }
0x2016   :  { %v19092_v26 = vsub.f32 %v19068_v36, %v8803_v53 }
0x2017   :  { %v8816_v14 = vmul.f32 %v19089_v21, %v19089_v21 }
0x2018   :  { %v8815_v6 = vmul.f32 %v19092_v26, %v19092_v26 }
0x2019   :  { %8823 = vadd.xlane.f32.xlu0 %v8816_v14 }
0x201a   :  { %8821 = vadd.xlane.f32.xlu1 %v8815_v6 }
0x2041   :  { %v8798_v62 = vpop.xlane.xlu0 %8797 }
0x2042   :  { %v8806_v51 = vmul.f32 0.0078125, %v8798_v62  ;;  %v8796_v35 = vpop.xlane.xlu1 %8795 }
0x2043   :  { %v8805_v24 = vmul.f32 0.0078125, %v8796_v35 }
0x2044   :  { %v8812_v53 = vsub.f32 %v19073_v56, %v8806_v51 }
0x2045   :  { %v8811_v14 = vsub.f32 %v19076_v13, %v8805_v24 }
0x2046   :  { %v8818_v6 = vmul.f32 %v8812_v53, %v8812_v53 }
0x2047   :  { %v8817_v60 = vmul.f32 %v8811_v14, %v8811_v14 }
0x2048   :  { %8827 = vadd.xlane.f32.xlu0 %v8818_v6 }
0x2049   :  { %8825 = vadd.xlane.f32.xlu1 %v8817_v60 }
0x2067   :  { %v8802_v5 = vpop.xlane.xlu0 %8801 }
0x2068   :  { %v8808_v40 = vmul.f32 0.0078125, %v8802_v5  ;;  %v8800_v3 = vpop.xlane.xlu1 %8799 }
0x2069   :  { %v8807_v45 = vmul.f32 0.0078125, %v8800_v3 }
0x206a   :  { %v8814_v7 = vsub.f32 %v19081_v23, %v8808_v40 }
0x206b   :  { %v8813_v55 = vsub.f32 %v19084_v22, %v8807_v45 }
0x206c   :  { %v8820_v2 = vmul.f32 %v8814_v7, %v8814_v7 }
0x206d   :  { %v8819_v57 = vmul.f32 %v8813_v55, %v8813_v55 }
0x206e   :  { %8831 = vadd.xlane.f32.xlu0 %v8820_v2 }
0x206f   :  { %8829 = vadd.xlane.f32.xlu1 %v8819_v57 }
0x20a6   :  { %v8824_v41 = vpop.xlane.xlu0 %8823 }
0x20a7   :  { %v8834_v31 = vmul.f32 0.0078125, %v8824_v41  ;;  %v8822_v61 = vpop.xlane.xlu1 %8821 }
0x20a8   :  { %v8833_v39 = vmul.f32 0.0078125, %v8822_v61 }
0x20a9   :  { %v8840_v37 = vadd.f32 1e-05, %v8834_v31 }
0x20aa   :  { %v8839_v27 = vadd.f32 1e-05, %v8833_v39 }
0x20ab   :  { %16054 = vrsqrt.f32 %v8840_v37 }
0x20ac   :  { %16056 = vrsqrt.f32 %v8839_v27 }
0x20b5   :  { %v16055_v10 = vpop.eup %16054 }
0x20b6   :  { %v16057_v44 = vpop.eup %16056  ;;  %v8852_v59 = vmul.f32 %v16055_v10, %v19089_v21 }
0x20b7   :  { %v8851_v25 = vmul.f32 %v16057_v44, %v19092_v26 }
0x20b8   :  { %v8864_v17 = vmul.f32 %v12021_v29, %v8852_v59 }
0x20b9   :  { %v8863_v19 = vmul.f32 %v12021_v29, %v8851_v25 }
0x20ba   :  { %v8876_v58 = vadd.f32 %v12022_v9, %v8864_v17 }
0x20bb   :  { %v8875_v48 = vadd.f32 %v12022_v9, %v8863_v19 }
0x20bd   :  { %8995 = vmatmul.mubr.f32.vlgmr.msra.gmra.mrb[198].mxu1 %v8875_v48  ;;  %14064 = vmatprep.mubr.f32.mxu0 %v8875_v48 }
0x20be   :  { %14065 = vmatmul.mubr.f32.vlgmr.msra.gmra.mrb[202].mxu0 %v8876_v58  ;;  %9000 = vmatprep.mubr.f32.mxu1 %v16237_v63 }
0x20c1   :  { %9001 = vmatmul.mubr.f32.gmra.mrb[200].mxu1 %v8876_v58 }
0x20c2   :  { %9006 = vmatprep.mubr.f32.mxu1 %v16237_v63 }
0x20d5   :  { %v8828_v16 = vpop.xlane.xlu0 %8827 }
0x20d6   :  { %v8836_v21 = vmul.f32 0.0078125, %v8828_v16  ;;  %v8826_v43 = vpop.xlane.xlu1 %8825 }
0x20d7   :  { %v8835_v26 = vmul.f32 0.0078125, %v8826_v43 }
0x20d8   :  { %v8842_v8 = vadd.f32 1e-05, %v8836_v21 }
0x20d9   :  { %v8841_v32 = vadd.f32 1e-05, %v8835_v26 }
0x20da   :  { %16058 = vrsqrt.f32 %v8842_v8 }
0x20db   :  { %16060 = vrsqrt.f32 %v8841_v32 }
0x20e4   :  { %v16059_v42 = vpop.eup %16058 }
0x20e5   :  { %v16061_v54 = vpop.eup %16060  ;;  %v8854_v11 = vmul.f32 %v16059_v42, %v8812_v53 }
0x20e6   :  { %v8853_v49 = vmul.f32 %v16061_v54, %v8811_v14 }
0x20e7   :  { %v8866_v34 = vmul.f32 %v12021_v29, %v8854_v11 }
0x20e8   :  { %v8865_v38 = vmul.f32 %v12021_v29, %v8853_v49 }
0x20e9   :  { %v8878_v15 = vadd.f32 %v12022_v9, %v8866_v34 }
0x20ea   :  { %v8877_v1 = vadd.f32 %v12022_v9, %v8865_v38 }
0x20ec   :  { %9007 = vmatmul.mubr.f32.gmra.mrb[202].mxu1 %v8877_v1  ;;  %14067 = vmatprep.mubr.f32.mxu0 %v8877_v1 }
0x20ed   :  { %14068 = vmatmul.mubr.f32.gmra.mrb[204].mxu0 %v8878_v15  ;;  %9012 = vmatprep.mubr.f32.mxu1 %v16237_v63 }
0x20f0   :  { %9013 = vmatmul.mubr.f32.gmra.mrb[204].mxu1 %v8878_v15 }
0x20f1   :  { %9018 = vmatprep.mubr.f32.mxu1 %v16237_v63 }
0x20fb   :  { %v8832_v52 = vpop.xlane.xlu0 %8831 }
0x20fc   :  { %v8838_v50 = vmul.f32 0.0078125, %v8832_v52  ;;  %v8830_v33 = vpop.xlane.xlu1 %8829 }
0x20fd   :  { %v8837_v18 = vmul.f32 0.0078125, %v8830_v33 }
0x20fe   :  { %v8844_v30 = vadd.f32 1e-05, %v8838_v50 }
0x20ff   :  { %v8843_v47 = vadd.f32 1e-05, %v8837_v18 }
0x2100   :  { %16062 = vrsqrt.f32 %v8844_v30 }
0x2101   :  { %16064 = vrsqrt.f32 %v8843_v47 }
0x210a   :  { %v16063_v20 = vpop.eup %16062 }
0x210b   :  { %v16065_v46 = vpop.eup %16064  ;;  %v8856_v62 = vmul.f32 %v16063_v20, %v8814_v7 }
0x210c   :  { %v8855_v51 = vmul.f32 %v16065_v46, %v8813_v55 }
0x210d   :  { %v8868_v35 = vmul.f32 %v12021_v29, %v8856_v62 }
0x210e   :  { %v8867_v24 = vmul.f32 %v12021_v29, %v8855_v51 }
0x210f   :  { %v8880_v14 = vadd.f32 %v12022_v9, %v8868_v35 }
0x2110   :  { %v8879_v53 = vadd.f32 %v12022_v9, %v8867_v24 }
0x2112   :  { %9019 = vmatmul.mubr.f32.gmra.mrb[206].mxu1 %v8879_v53  ;;  %14070 = vmatprep.mubr.f32.mxu0 %v8879_v53 }
0x2113   :  { %14071 = vmatmul.mubr.f32.gmra.mrb[206].mxu0 %v8880_v14  ;;  %9024 = vmatprep.mubr.f32.mxu1 %v16237_v63 }
0x2114   :  { %14094 = vmatprep.mubr.msk.f32.mxu0 %vm16239_vm3, %v16237_v63 }
0x2116   :  { %9025 = vmatmul.mubr.f32.gmra.mrb[208].mxu1 %v8880_v14 }
0x2117   :  { %14079 = vmatprep.mubr.msk.f32.mxu1 %vm16239_vm3, %v16237_v63 }
0x2190   :  { %v8996_v6 = vpop.f32.mrb[198].mxu1 }
0x2191   :  { %v8998_v60 = vpop.f32.mrb[199].mxu1  ;;  %v14066_v5 = vpop.f32.mrb[202].mxu0 }
0x2192   :  { %v9097_v40 = vpop.f32.mrb[203].mxu0 }
0x2193   :  { %v19121_v3 = vpack.i.bf16 %v14066_v5, %v9097_v40  ;;  %v15089_v45 = vpack.c.bf16 %v14066_v5, %v9097_v40 }
0x2194   :  { %v9002_v7 = vpop.f32.mrb[200].mxu1 }
0x2195   :  { %v9004_v55 = vpop.f32.mrb[201].mxu1  ;;  %15090 = vmatpush3.bf16.msra.mxu0 %v15089_v45 }
0x2196   :  { %v15563_v2 = vpack.i.bf16 %v9004_v55, %v8998_v60  ;;  %v15085_v57 = vpack.c.bf16 %v9004_v55, %v8998_v60  ;;  %14092 = vmatprep.subr.mxu0 %v16237_v63 }
0x2198   :  { %15554 = vrot.lane.b32.xlu1 %v15563_v2, %s16241_s16  ;;  %15087 = vmatpush3.bf16.xpose.msk.msra.mxu1 %vm16437_vm5, %v15085_v57 }
0x2199   :  { %14077 = vmatprep.subr.mxu1 %v16237_v63 }
0x219c   :  { %15559 = vrot.lane.b32.xlu1 %v15563_v2, %s16240_s30 }
0x21a0   :  { %9352 = vrot.lane.b32.xlu1 %v8996_v6, %s16241_s16 }
0x21a4   :  { %9354 = vrot.lane.b32.xlu1 %v9002_v7, %s16241_s16 }
0x21bf   :  { %v9008_v41 = vpop.f32.mrb[202].mxu1 }
0x21c0   :  { %v9010_v31 = vpop.f32.mrb[203].mxu1  ;;  %v19131_v61 = vpop.f32.mrb[204].mxu0 }
0x21c1   :  { %v19133_v39 = vpop.f32.mrb[205].mxu0  ;;  %9606 = vrot.lane.b32.xlu1 %v9010_v31, %s16240_s30  ;;  %9362 = vrot.lane.b32.xlu0 %v9010_v31, %s16241_s16 }
0x21c2   :  { %14078 = vmatpush3.xpose.msk.msra.mxu1 %vm541_vm4, %v9010_v31  ;;  %14093 = vmatpush3.msra.mxu0 %v19133_v39 }
0x21c3   :  { %v19139_v37 = vpop.f32.mrb[204].mxu1  ;;  %15091 = vmatprep.subr.bf16.mxu1 %v16238_v4  ;;  %15095 = vmatprep.subr.bf16.mxu0 %v16238_v4 }
0x21c4   :  { %v19143_v27 = vpop.f32.mrb[205].mxu1 }
0x21c5   :  { %14080 = vmatmul.mubr.msk.f32.vlgmr.msra.gmra.mrb[210].mxu1 %vm541_vm4, %v8996_v6  ;;  %9596 = vrot.lane.b32.xlu1 %v8996_v6, %s16240_s30 }
0x21c6   :  { %9356 = vrot.lane.b32.xlu0 %v9008_v41, %s16241_s16  ;;  %14082 = vmatprep.mubr.msk.f32.mxu1 %vm16239_vm3, %v16237_v63 }
0x21c9   :  { %14083 = vmatmul.mubr.msk.f32.gmra.mrb[212].mxu1 %vm541_vm4, %v9002_v7  ;;  %9600 = vrot.lane.b32.xlu1 %v9008_v41, %s16240_s30 }
0x21ca   :  { %15564 = vrot.lane.b32.xlu0 %v15563_v2, %s16242_s17  ;;  %14085 = vmatprep.mubr.msk.f32.mxu1 %vm16239_vm3, %v16237_v63 }
0x21cd   :  { %14086 = vmatmul.mubr.msk.f32.gmra.mrb[214].mxu1 %vm541_vm4, %v9008_v41  ;;  %9837 = vrot.lane.b32.xlu1 %v8996_v6, %s16242_s17 }
0x21ce   :  { %9598 = vrot.lane.b32.xlu0 %v9002_v7, %s16240_s30  ;;  %14109 = vmatprep.mubr.msk.f32.mxu1 %vm16239_vm3, %v16237_v63 }
0x21d1   :  { %9841 = vrot.lane.b32.xlu1 %v9008_v41, %s16242_s17 }
0x21d2   :  { %9847 = vrot.lane.b32.xlu0 %v9010_v31, %s16242_s17 }
0x21d6   :  { %9839 = vrot.lane.b32.xlu0 %v9002_v7, %s16242_s17 }
0x21e5   :  { %v19163_v10 = vpop.f32.mrb[206].mxu1 }
0x21e6   :  { %v19165_v29 = vpop.f32.mrb[207].mxu1  ;;  %v19167_v44 = vpop.f32.mrb[206].mxu0 }
0x21e7   :  { %v15578_v59 = vpack.i.bf16 %v19165_v29, %v19143_v27  ;;  %v15113_v25 = vpack.c.bf16 %v19165_v29, %v19143_v27  ;;  %v19173_v9 = vpop.f32.mrb[207].mxu0 }
0x21e8   :  { %v19177_v17 = vpack.i.bf16 %v19173_v9, %v19131_v61  ;;  %v15117_v19 = vpack.c.bf16 %v19173_v9, %v19131_v61 }
0x21e9   :  { %15569 = vrot.lane.b32.xlu0 %v15578_v59, %s16241_s16  ;;  %v19182_v48 = vpop.f32.mrb[208].mxu1 }
0x21ea   :  { %v19184_v58 = vpop.f32.mrb[209].mxu1 }
0x21eb   :  { %10359 = vrot.lane.b32.xlu1 %v19184_v58, %s16241_s16 }
0x21ed   :  { %15574 = vrot.lane.b32.xlu0 %v15578_v59, %s16240_s30 }
0x21ef   :  { %10349 = vrot.lane.b32.xlu1 %v19139_v37, %s16241_s16 }
0x21f1   :  { %10351 = vrot.lane.b32.xlu0 %v19163_v10, %s16241_s16 }
0x21f3   :  { %10353 = vrot.lane.b32.xlu1 %v19182_v48, %s16241_s16 }
0x21f5   :  { %10603 = vrot.lane.b32.xlu0 %v19184_v58, %s16240_s30 }
0x21f7   :  { %15579 = vrot.lane.b32.xlu1 %v15578_v59, %s16242_s17 }
0x21f9   :  { %10593 = vrot.lane.b32.xlu0 %v19139_v37, %s16240_s30 }
0x21fb   :  { %10595 = vrot.lane.b32.xlu1 %v19163_v10, %s16240_s30 }
0x21fd   :  { %10597 = vrot.lane.b32.xlu0 %v19182_v48, %s16240_s30 }
0x21ff   :  { %10844 = vrot.lane.b32.xlu1 %v19184_v58, %s16242_s17 }
0x2201   :  { %10834 = vrot.lane.b32.xlu0 %v19139_v37, %s16242_s17 }
0x2203   :  { %10836 = vrot.lane.b32.xlu1 %v19163_v10, %s16242_s17 }
0x2205   :  { %10838 = vrot.lane.b32.xlu0 %v19182_v48, %s16242_s17 }
0x2207   :  { %15584 = vrot.lane.b32.xlu1 %v19121_v3, %s16241_s16 }
0x2209   :  { %9502 = vrot.lane.b32.xlu0 %v19133_v39, %s16241_s16 }
0x220a   :  { %v15555_v16 = vpop.permute.xlu1 %15554 }
0x220b   :  { %v15557_v21 = vunpack.i.h.bf16 %v15555_v16  ;;  %v15556_v43 = vunpack.i.l.bf16 %v15555_v16  ;;  %9743 = vrot.lane.b32.xlu1 %v19133_v39, %s16240_s30 }
0x220d   :  { %v15092_v26 = vpack.c.bf16 %v15557_v21, %v15556_v43  ;;  %15589 = vrot.lane.b32.xlu0 %v19121_v3, %s16240_s30 }
0x220e   :  { %v15560_v8 = vpop.permute.xlu1 %15559 }
0x220f   :  { %15094 = vmatpush3.bf16.xpose.msk.msra.mxu1 %vm16437_vm5, %v15092_v26  ;;  %v15562_v32 = vunpack.i.h.bf16 %v15560_v8  ;;  %v15561_v42 = vunpack.i.l.bf16 %v15560_v8 }
0x2210   :  { %14107 = vmatprep.subr.mxu1 %v16237_v63 }
0x2211   :  { %15594 = vrot.lane.b32.xlu0 %v19121_v3, %s16242_s17  ;;  %v15099_v49 = vpack.c.bf16 %v15562_v32, %v15561_v42 }
0x2212   :  { %v9353_v54 = vpop.permute.xlu1 %9352 }
0x2216   :  { %v9355_v34 = vpop.permute.xlu1 %9354 }
0x2233   :  { %v9363_v11 = vpop.permute.xlu0 %9362  ;;  %v9607_v1 = vpop.permute.xlu1 %9606 }
0x2234   :  { %14108 = vmatpush3.xpose.msk.msra.mxu1 %vm541_vm4, %v9363_v11 }
0x2235   :  { %15098 = vmatprep.subr.bf16.mxu1 %v16238_v4 }
0x2237   :  { %14110 = vmatmul.mubr.msk.f32.vlgmr.msra.gmra.mrb[216].mxu1 %vm541_vm4, %v9353_v54  ;;  %v9597_v33 = vpop.permute.xlu1 %9596 }
0x2238   :  { %v9357_v38 = vpop.permute.xlu0 %9356  ;;  %15101 = vmatpush3.bf16.xpose.msk.msra.mxu1 %vm16437_vm5, %v15099_v49  ;;  %14112 = vmatprep.mubr.msk.f32.mxu1 %vm16239_vm3, %v16237_v63 }
0x2239   :  { %14137 = vmatprep.subr.mxu1 %v16237_v63 }
0x223b   :  { %14113 = vmatmul.mubr.msk.f32.gmra.mrb[218].mxu1 %vm541_vm4, %v9355_v34  ;;  %v9601_v47 = vpop.permute.xlu1 %9600 }
0x223c   :  { %v15565_v15 = vpop.permute.xlu0 %15564  ;;  %14115 = vmatprep.mubr.msk.f32.mxu1 %vm16239_vm3, %v16237_v63 }
0x223d   :  { %v15567_v52 = vunpack.i.h.bf16 %v15565_v15  ;;  %v15566_v50 = vunpack.i.l.bf16 %v15565_v15 }
0x223f   :  { %14116 = vmatmul.mubr.msk.f32.gmra.mrb[220].mxu1 %vm541_vm4, %v9357_v38  ;;  %v15106_v18 = vpack.c.bf16 %v15567_v52, %v15566_v50  ;;  %v9838_v46 = vpop.permute.xlu1 %9837 }
0x2240   :  { %14138 = vmatpush3.xpose.msk.msra.mxu1 %vm541_vm4, %v9607_v1  ;;  %14139 = vmatprep.mubr.msk.f32.mxu1 %vm16239_vm3, %v16237_v63  ;;  %v9599_v30 = vpop.permute.xlu0 %9598 }
0x2241   :  { %15105 = vmatprep.subr.bf16.mxu1 %v16238_v4 }
0x2243   :  { %14140 = vmatmul.mubr.msk.f32.vlgmr.msra.gmra.mrb[222].mxu1 %vm541_vm4, %v9597_v33  ;;  %v9842_v51 = vpop.permute.xlu1 %9841 }
0x2244   :  { %15108 = vmatpush3.bf16.xpose.msk.msra.mxu1 %vm16437_vm5, %v15106_v18  ;;  %14142 = vmatprep.mubr.msk.f32.mxu1 %vm16239_vm3, %v16237_v63  ;;  %v9848_v20 = vpop.permute.xlu0 %9847 }
0x2245   :  { %14167 = vmatprep.subr.mxu1 %v16237_v63 }
0x2247   :  { %14143 = vmatmul.mubr.msk.f32.gmra.mrb[224].mxu1 %vm541_vm4, %v9599_v30 }
0x2248   :  { %14145 = vmatprep.mubr.msk.f32.mxu1 %vm16239_vm3, %v16237_v63  ;;  %v9840_v62 = vpop.permute.xlu0 %9839 }
0x224b   :  { %14146 = vmatmul.mubr.msk.f32.gmra.mrb[226].mxu1 %vm541_vm4, %v9601_v47 }
0x224c   :  { %14168 = vmatpush3.xpose.msk.msra.mxu1 %vm541_vm4, %v9848_v20  ;;  %14169 = vmatprep.mubr.msk.f32.mxu1 %vm16239_vm3, %v16237_v63 }
0x224d   :  { %15112 = vmatprep.subr.bf16.mxu1 %v16238_v4 }
0x224f   :  { %14170 = vmatmul.mubr.msk.f32.vlgmr.msra.gmra.mrb[228].mxu1 %vm541_vm4, %v9838_v46 }
0x2250   :  { %15115 = vmatpush3.bf16.xpose.msk.msra.mxu1 %vm16437_vm5, %v15113_v25  ;;  %14172 = vmatprep.mubr.msk.f32.mxu1 %vm16239_vm3, %v16237_v63 }
0x2251   :  { %14197 = vmatprep.subr.mxu1 %v16237_v63 }
0x2253   :  { %14173 = vmatmul.mubr.msk.f32.gmra.mrb[230].mxu1 %vm541_vm4, %v9840_v62 }
0x2254   :  { %14175 = vmatprep.mubr.msk.f32.mxu1 %vm16239_vm3, %v16237_v63 }
0x2257   :  { %14176 = vmatmul.mubr.msk.f32.gmra.mrb[232].mxu1 %vm541_vm4, %v9842_v51 }
0x2258   :  { %14198 = vmatpush3.xpose.msk.msra.mxu1 %vm541_vm4, %v19184_v58  ;;  %14199 = vmatprep.mubr.msk.f32.mxu1 %vm16239_vm3, %v16237_v63 }
0x2259   :  { %15119 = vmatprep.subr.bf16.mxu1 %v16238_v4 }
0x225b   :  { %v15570_v35 = vpop.permute.xlu0 %15569  ;;  %14200 = vmatmul.mubr.msk.f32.vlgmr.msra.gmra.mrb[234].mxu1 %vm541_vm4, %v19139_v37 }
0x225c   :  { %v15572_v24 = vunpack.i.h.bf16 %v15570_v35  ;;  %v15571_v53 = vunpack.i.l.bf16 %v15570_v35  ;;  %14202 = vmatprep.mubr.msk.f32.mxu1 %vm16239_vm3, %v16237_v63 }
0x225d   :  { %v10360_v14 = vpop.permute.xlu1 %10359 }
0x225e   :  { %v15120_v6 = vpack.c.bf16 %v15572_v24, %v15571_v53 }
0x225f   :  { %14203 = vmatmul.mubr.msk.f32.gmra.mrb[236].mxu1 %vm541_vm4, %v19163_v10  ;;  %v15575_v60 = vpop.permute.xlu0 %15574 }
0x2260   :  { %15122 = vmatpush3.bf16.xpose.msk.msra.mxu1 %vm16437_vm5, %v15120_v6  ;;  %14205 = vmatprep.mubr.msk.f32.mxu1 %vm16239_vm3, %v16237_v63  ;;  %v15577_v40 = vunpack.i.h.bf16 %v15575_v60  ;;  %v15576_v3 = vunpack.i.l.bf16 %v15575_v60 }
0x2261   :  { %14227 = vmatprep.subr.mxu1 %v16237_v63  ;;  %v10350_v5 = vpop.permute.xlu1 %10349 }
0x2262   :  { %v15127_v7 = vpack.c.bf16 %v15577_v40, %v15576_v3 }
0x2263   :  { %14206 = vmatmul.mubr.msk.f32.gmra.mrb[238].mxu1 %vm541_vm4, %v19182_v48  ;;  %v10352_v55 = vpop.permute.xlu0 %10351 }
0x2264   :  { %14229 = vmatprep.mubr.msk.f32.mxu1 %vm16239_vm3, %v16237_v63 }
0x2265   :  { %v10354_v45 = vpop.permute.xlu1 %10353 }
0x2267   :  { %v10604_v57 = vpop.permute.xlu0 %10603 }
0x2268   :  { %14228 = vmatpush3.xpose.msk.msra.mxu1 %vm541_vm4, %v10360_v14 }
0x2269   :  { %15126 = vmatprep.subr.bf16.mxu1 %v16238_v4  ;;  %v15580_v2 = vpop.permute.xlu1 %15579 }
0x226a   :  { %v15582_v41 = vunpack.i.h.bf16 %v15580_v2  ;;  %v15581_v31 = vunpack.i.l.bf16 %v15580_v2 }
0x226b   :  { %14230 = vmatmul.mubr.msk.f32.vlgmr.msra.gmra.mrb[240].mxu1 %vm541_vm4, %v10350_v5  ;;  %v10594_v27 = vpop.permute.xlu0 %10593 }
0x226c   :  { %15129 = vmatpush3.bf16.xpose.msk.msra.mxu1 %vm16437_vm5, %v15127_v7  ;;  %14232 = vmatprep.mubr.msk.f32.mxu1 %vm16239_vm3, %v16237_v63  ;;  %v15134_v37 = vpack.c.bf16 %v15582_v41, %v15581_v31 }
0x226d   :  { %14257 = vmatprep.subr.mxu1 %v16237_v63  ;;  %v10596_v10 = vpop.permute.xlu1 %10595 }
0x226f   :  { %14233 = vmatmul.mubr.msk.f32.gmra.mrb[242].mxu1 %vm541_vm4, %v10352_v55  ;;  %v10598_v29 = vpop.permute.xlu0 %10597 }
0x2270   :  { %14235 = vmatprep.mubr.msk.f32.mxu1 %vm16239_vm3, %v16237_v63 }
0x2271   :  { %v10845_v59 = vpop.permute.xlu1 %10844 }
0x2273   :  { %14236 = vmatmul.mubr.msk.f32.gmra.mrb[244].mxu1 %vm541_vm4, %v10354_v45  ;;  %v10835_v0 = vpop.permute.xlu0 %10834 }
0x2274   :  { %14258 = vmatpush3.xpose.msk.msra.mxu1 %vm541_vm4, %v10604_v57  ;;  %14259 = vmatprep.mubr.msk.f32.mxu1 %vm16239_vm3, %v16237_v63 }
0x2275   :  { %15133 = vmatprep.subr.bf16.mxu1 %v16238_v4  ;;  %v10837_v25 = vpop.permute.xlu1 %10836 }
0x2277   :  { %14260 = vmatmul.mubr.msk.f32.vlgmr.msra.gmra.mrb[246].mxu1 %vm541_vm4, %v10594_v27  ;;  %v10839_v48 = vpop.permute.xlu0 %10838 }
0x2278   :  { %15136 = vmatpush3.bf16.xpose.msk.msra.mxu1 %vm16437_vm5, %v15134_v37  ;;  %14262 = vmatprep.mubr.msk.f32.mxu1 %vm16239_vm3, %v16237_v63 }
0x2279   :  { %14287 = vmatprep.subr.mxu1 %v16237_v63 }
0x227b   :  { %14263 = vmatmul.mubr.msk.f32.gmra.mrb[248].mxu1 %vm541_vm4, %v10596_v10 }
0x227c   :  { %14265 = vmatprep.mubr.msk.f32.mxu1 %vm16239_vm3, %v16237_v63 }
0x227f   :  { %14266 = vmatmul.mubr.msk.f32.gmra.mrb[250].mxu1 %vm541_vm4, %v10598_v29 }
0x2280   :  { %14288 = vmatpush3.xpose.msk.msra.mxu1 %vm541_vm4, %v10845_v59  ;;  %14289 = vmatprep.mubr.msk.f32.mxu1 %vm16239_vm3, %v16237_v63 }
0x2283   :  { %14290 = vmatmul.mubr.msk.f32.vlgmr.msra.gmra.mrb[252].mxu1 %vm541_vm4, %v10835_v0 }
0x2284   :  { %14292 = vmatprep.mubr.msk.f32.mxu1 %vm16239_vm3, %v16237_v63 }
0x2287   :  { %14293 = vmatmul.mubr.msk.f32.gmra.mrb[254].mxu1 %vm541_vm4, %v10837_v25 }
0x2288   :  { %14295 = vmatprep.mubr.msk.f32.mxu1 %vm16239_vm3, %v16237_v63 }
0x228b   :  { %14296 = vmatmul.mubr.msk.f32.gmra.mrb[0].mxu1 %vm541_vm4, %v10839_v48 }
0x2298   :  { %v9210_v58 = vpop.f32.mrb[210].mxu1 }
0x2299   :  { %v9224_v16 = vmul.f32 0.088388346, %v9210_v58  ;;  %v14081_v21 = vpop.f32.mrb[211].mxu1 }
0x229b   :  { %v19326_v43 = vsel %vm203_vm6, %v9224_v16, -1e+30 }
0x229c   :  { %v9215_v26 = vpop.f32.mrb[212].mxu1  ;;  %v9230_v8 = vsel %vm646_vm7, %v19326_v43, -inf }
0x229d   :  { %v9225_v32 = vmul.f32 0.088388346, %v9215_v26  ;;  %9231 = vmax.xlane.f32.xlu1 %v9230_v8  ;;  %v14084_v42 = vpop.f32.mrb[213].mxu1 }
0x229f   :  { %v19332_v54 = vsel %vm203_vm6, %v9225_v32, -1e+30 }
0x22a0   :  { %v9220_v11 = vpop.f32.mrb[214].mxu1  ;;  %v9233_v49 = vsel %vm646_vm7, %v19332_v54, -inf }
0x22a1   :  { %v9226_v34 = vmul.f32 0.088388346, %v9220_v11  ;;  %9234 = vmax.xlane.f32.xlu0 %v9233_v49  ;;  %v14087_v38 = vpop.f32.mrb[215].mxu1 }
0x22a3   :  { %v19338_v1 = vsel %vm203_vm6, %v9226_v34, -1e+30 }
0x22a4   :  { %v9236_v15 = vsel %vm646_vm7, %v19338_v1, -inf }
0x22a5   :  { %9237 = vmax.xlane.f32.xlu0 %v9236_v15 }
0x230a   :  { %v9442_v52 = vpop.f32.mrb[216].mxu1 }
0x230b   :  { %v9456_v50 = vmul.f32 0.088388346, %v9442_v52  ;;  %v14111_v33 = vpop.f32.mrb[217].mxu1 }
0x230d   :  { %v19344_v18 = vsel %vm203_vm6, %v9456_v50, -1e+30 }
0x230e   :  { %v9447_v30 = vpop.f32.mrb[218].mxu1  ;;  %v9462_v47 = vsel %vm646_vm7, %v19344_v18, -inf }
0x230f   :  { %v9457_v20 = vmul.f32 0.088388346, %v9447_v30  ;;  %9463 = vmax.xlane.f32.xlu0 %v9462_v47  ;;  %v14114_v46 = vpop.f32.mrb[219].mxu1 }
0x2310   :  { %v19400_v46 = vpop.permute.xlu0 %9502 }
0x2311   :  { %v19350_v62 = vsel %vm203_vm6, %v9457_v20, -1e+30  ;;  %v19398_v20 = vpop.permute.xlu1 %15584 }
0x2312   :  { %v9452_v51 = vpop.f32.mrb[220].mxu1  ;;  %v9465_v35 = vsel %vm646_vm7, %v19350_v62, -inf }
0x2313   :  { %v9458_v24 = vmul.f32 0.088388346, %v9452_v51  ;;  %9466 = vmax.xlane.f32.xlu1 %v9465_v35  ;;  %v14117_v53 = vpop.f32.mrb[221].mxu1 }
0x2315   :  { %v19356_v14 = vsel %vm203_vm6, %v9458_v24, -1e+30  ;;  %v19402_v24 = vpop.permute.xlu1 %9743 }
0x2316   :  { %v9686_v6 = vpop.f32.mrb[222].mxu1  ;;  %v9468_v60 = vsel %vm646_vm7, %v19356_v14, -inf }
0x2317   :  { %v9700_v5 = vmul.f32 0.088388346, %v9686_v6  ;;  %9469 = vmax.xlane.f32.xlu0 %v9468_v60  ;;  %v14141_v40 = vpop.f32.mrb[223].mxu1 }
0x2319   :  { %v19362_v3 = vsel %vm203_vm6, %v9700_v5, -1e+30 }
0x231a   :  { %v9691_v45 = vpop.f32.mrb[224].mxu1  ;;  %v9706_v7 = vsel %vm646_vm7, %v19362_v3, -inf }
0x231b   :  { %v9701_v55 = vmul.f32 0.088388346, %v9691_v45  ;;  %9707 = vmax.xlane.f32.xlu1 %v9706_v7  ;;  %v14144_v2 = vpop.f32.mrb[225].mxu1 }
0x231d   :  { %v19368_v57 = vsel %vm203_vm6, %v9701_v55, -1e+30 }
0x231e   :  { %v9696_v41 = vpop.f32.mrb[226].mxu1  ;;  %v9709_v31 = vsel %vm646_vm7, %v19368_v57, -inf }
0x231f   :  { %v9702_v37 = vmul.f32 0.088388346, %v9696_v41  ;;  %9710 = vmax.xlane.f32.xlu0 %v9709_v31  ;;  %v14147_v27 = vpop.f32.mrb[227].mxu1 }
0x2321   :  { %v19374_v10 = vsel %vm203_vm6, %v9702_v37, -1e+30 }
0x2322   :  { %v9927_v29 = vpop.f32.mrb[228].mxu1  ;;  %v9712_v59 = vsel %vm646_vm7, %v19374_v10, -inf }
0x2323   :  { %v9941_v0 = vmul.f32 0.088388346, %v9927_v29  ;;  %9713 = vmax.xlane.f32.xlu1 %v9712_v59  ;;  %v14171_v25 = vpop.f32.mrb[229].mxu1 }
0x2325   :  { %v19380_v48 = vsel %vm203_vm6, %v9941_v0, -1e+30 }
0x2326   :  { %v9932_v58 = vpop.f32.mrb[230].mxu1  ;;  %v9947_v16 = vsel %vm646_vm7, %v19380_v48, -inf }
0x2327   :  { %9948 = vmax.xlane.f32.xlu0 %v9947_v16  ;;  %v14174_v21 = vpop.f32.mrb[231].mxu1  ;;  %v9942_v29 = vmul.f32 0.088388346, %v9932_v58 }
0x2329   :  { %v19414_v21 = vsel %vm203_vm6, %v9942_v29, -1e+30 }
0x232a   :  { %v9937_v26 = vpop.f32.mrb[232].mxu1  ;;  %v9232_v5 = vpop.xlane.xlu1 %9231 }
0x232b   :  { %v9943_v8 = vmul.f32 0.088388346, %v9937_v26  ;;  %v14177_v32 = vpop.f32.mrb[233].mxu1  ;;  %v9239_v7 = vsub.f32 %v19326_v43, %v9232_v5 }
0x232d   :  { %v19386_v42 = vsel %vm203_vm6, %v9943_v8, -1e+30  ;;  %v9242_v31 = vmul.f32 1.442695, %v9239_v7 }
0x232e   :  { %v10207_v11 = vpop.f32.mrb[234].mxu1  ;;  %v9953_v49 = vsel %vm646_vm7, %v19386_v42, -inf }
0x232f   :  { %9954 = vmax.xlane.f32.xlu0 %v9953_v49  ;;  %v14201_v34 = vpop.f32.mrb[235].mxu1  ;;  %16066 = vpow2.f32 %v9242_v31  ;;  %v10221_v43 = vmul.f32 0.088388346, %v10207_v11 }
0x2330   :  { %v9950_v34 = vsel %vm646_vm7, %v19414_v21, -inf }
0x2331   :  { %v19421_v58 = vsel %vm203_vm6, %v10221_v43, -1e+30 }
0x2332   :  { %v10212_v38 = vpop.f32.mrb[236].mxu1  ;;  %v10227_v11 = vsel %vm646_vm7, %v19421_v58, -inf }
0x2333   :  { %v10222_v15 = vmul.f32 0.088388346, %v10212_v38  ;;  %v14204_v52 = vpop.f32.mrb[237].mxu1 }
0x2334   :  { %9984 = vrot.lane.b32.xlu1 %v19133_v39, %s16242_s17  ;;  %v19404_v39 = vpop.permute.xlu0 %15589 }
0x2335   :  { %v19394_v50 = vsel %vm203_vm6, %v10222_v15, -1e+30 }
0x2336   :  { %v10217_v33 = vpop.f32.mrb[238].mxu1  ;;  %v10230_v30 = vsel %vm646_vm7, %v19394_v50, -inf }
0x2337   :  { %10231 = vmax.xlane.f32.xlu0 %v10230_v30  ;;  %v14207_v47 = vpop.f32.mrb[239].mxu1 }
0x2338   :  { %v19406_v45 = vpop.permute.xlu0 %15594 }
0x2339   :  { %v19425_v52 = vpop.eup %16066 }
0x233c   :  { %v9235_v41 = vpop.xlane.xlu0 %9234 }
0x233d   :  { %v9240_v59 = vsub.f32 %v19332_v54, %v9235_v41 }
0x233e   :  { %v10439_v51 = vpop.f32.mrb[240].mxu1 }
0x233f   :  { %v14231_v35 = vpop.f32.mrb[241].mxu1  ;;  %v9244_v26 = vmul.f32 1.442695, %v9240_v59  ;;  %v10453_v7 = vmul.f32 0.088388346, %v10439_v51 }
0x2340   :  { %v9238_v25 = vpop.xlane.xlu0 %9237  ;;  %v9248_v35 = vsel %vm646_vm7, %v19425_v52, 0.0 }
0x2341   :  { %v9241_v8 = vsub.f32 %v19338_v1, %v9238_v25  ;;  %16068 = vpow2.f32 %v9244_v26  ;;  %v10223_v1 = vmul.f32 0.088388346, %v10217_v33  ;;  %v19443_v41 = vsel %vm203_vm6, %v10453_v7, -1e+30 }
0x2342   :  { %v10444_v53 = vpop.f32.mrb[242].mxu1  ;;  %v10459_v51 = vsel %vm646_vm7, %v19443_v41, -inf }
0x2343   :  { %v14234_v6 = vpop.f32.mrb[243].mxu1  ;;  %v9246_v54 = vmul.f32 1.442695, %v9241_v8  ;;  %v10454_v31 = vmul.f32 0.088388346, %v10444_v53 }
0x2344   :  { %v19431_v6 = vsel %vm203_vm6, %v10223_v1, -1e+30 }
0x2345   :  { %16070 = vpow2.f32 %v9246_v54  ;;  %v10233_v5 = vsel %vm646_vm7, %v19431_v6, -inf  ;;  %v19451_v25 = vsel %vm203_vm6, %v10454_v31, -1e+30 }
0x2346   :  { %v10449_v60 = vpop.f32.mrb[244].mxu1 }
0x2347   :  { %v14237_v40 = vpop.f32.mrb[245].mxu1 }
0x234a   :  { %v10683_v55 = vpop.f32.mrb[246].mxu1 }
0x234b   :  { %v14261_v2 = vpop.f32.mrb[247].mxu1  ;;  %v19435_v40 = vpop.eup %16068  ;;  %v10697_v29 = vmul.f32 0.088388346, %v10683_v55 }
0x234c   :  { %v9251_v33 = vsel %vm646_vm7, %v19435_v40, 0.0 }
0x234d   :  { %15599 = vrot.lane.b32.xlu0 %v19177_v17, %s16241_s16  ;;  %v19459_v53 = vsel %vm203_vm6, %v10697_v29, -1e+30 }
0x234e   :  { %v10688_v37 = vpop.f32.mrb[248].mxu1 }
0x234f   :  { %v14264_v27 = vpop.f32.mrb[249].mxu1  ;;  %v19439_v2 = vpop.eup %16070  ;;  %v10698_v43 = vmul.f32 0.088388346, %v10688_v37  ;;  %v10703_v37 = vsel %vm646_vm7, %v19459_v53, -inf }
0x2350   :  { %v10455_v27 = vmul.f32 0.088388346, %v10449_v60  ;;  %v9254_v59 = vsel %vm646_vm7, %v19439_v2, 0.0  ;;  %v10462_v60 = vsel %vm646_vm7, %v19451_v25, -inf }
0x2351   :  { %v19467_v26 = vsel %vm203_vm6, %v10698_v43, -1e+30 }
0x2352   :  { %v10693_v0 = vpop.f32.mrb[250].mxu1 }
0x2353   :  { %v14267_v16 = vpop.f32.mrb[251].mxu1  ;;  %v10699_v8 = vmul.f32 0.088388346, %v10693_v0 }
0x2354   :  { %v19455_v16 = vsel %vm203_vm6, %v10455_v27, -1e+30 }
0x2355   :  { %v10465_v55 = vsel %vm646_vm7, %v19455_v16, -inf  ;;  %v19475_v54 = vsel %vm203_vm6, %v10699_v8, -1e+30 }
0x2356   :  { %v10924_v32 = vpop.f32.mrb[252].mxu1  ;;  %v10709_v0 = vsel %vm646_vm7, %v19475_v54, -inf }
0x2357   :  { %v14291_v49 = vpop.f32.mrb[253].mxu1 }
0x2358   :  { %9951 = vmax.xlane.f32.xlu1 %v9950_v34  ;;  %v10938_v49 = vmul.f32 0.088388346, %v10924_v32  ;;  %v10706_v34 = vsel %vm646_vm7, %v19467_v26, -inf }
0x235a   :  { %v10929_v38 = vpop.f32.mrb[254].mxu1 }
0x235b   :  { %v14294_v15 = vpop.f32.mrb[255].mxu1 }
0x235c   :  { %10228 = vmax.xlane.f32.xlu1 %v10227_v11  ;;  %v19479_v15 = vsel %vm203_vm6, %v10938_v49, -1e+30  ;;  %v10939_v11 = vmul.f32 0.088388346, %v10929_v38 }
0x235d   :  { %v10944_v32 = vsel %vm646_vm7, %v19479_v15, -inf }
0x235e   :  { %v10934_v30 = vpop.f32.mrb[0].mxu1  ;;  %v19487_v1 = vsel %vm203_vm6, %v10939_v11, -1e+30 }
0x235f   :  { %v14297_v47 = vpop.f32.mrb[1].mxu1 }
0x2360   :  { %9249 = vadd.xlane.f32.xlu1 %v9248_v35  ;;  %v10940_v47 = vmul.f32 0.088388346, %v10934_v30  ;;  %v10947_v35 = vsel %vm646_vm7, %v19487_v1, -inf }
0x2362   :  { %v19493_v38 = vsel %vm203_vm6, %v10940_v47, -1e+30 }
0x2364   :  { %10234 = vmax.xlane.f32.xlu1 %v10233_v5  ;;  %v10950_v5 = vsel %vm646_vm7, %v19493_v38, -inf }
0x2368   :  { %9252 = vadd.xlane.f32.xlu1 %v9251_v33 }
0x236c   :  { %9255 = vadd.xlane.f32.xlu1 %v9254_v59  ;;  %10460 = vmax.xlane.f32.xlu0 %v10459_v51 }
0x2370   :  { %10463 = vmax.xlane.f32.xlu1 %v10462_v60  ;;  %10466 = vmax.xlane.f32.xlu0 %v10465_v55 }
0x2374   :  { %10704 = vmax.xlane.f32.xlu1 %v10703_v37  ;;  %10707 = vmax.xlane.f32.xlu0 %v10706_v34 }
0x2378   :  { %10710 = vmax.xlane.f32.xlu1 %v10709_v0  ;;  %10945 = vmax.xlane.f32.xlu0 %v10944_v32 }
0x237c   :  { %10948 = vmax.xlane.f32.xlu0 %v10947_v35 }
0x2380   :  { %10951 = vmax.xlane.f32.xlu0 %v10950_v5 }
0x239c   :  { %v9464_v7 = vpop.xlane.xlu0 %9463 }
0x239d   :  { %v9471_v33 = vsub.f32 %v19344_v18, %v9464_v7 }
0x239f   :  { %v9474_v31 = vmul.f32 1.442695, %v9471_v33 }
0x23a0   :  { %v9467_v27 = vpop.xlane.xlu1 %9466 }
0x23a1   :  { %16072 = vpow2.f32 %v9474_v31  ;;  %v9472_v30 = vsub.f32 %v19350_v62, %v9467_v27 }
0x23a3   :  { %v9476_v29 = vmul.f32 1.442695, %v9472_v30 }
0x23a4   :  { %v9470_v59 = vpop.xlane.xlu0 %9469 }
0x23a5   :  { %16074 = vpow2.f32 %v9476_v29  ;;  %v9473_v28 = vsub.f32 %v19356_v14, %v9470_v59 }
0x23a7   :  { %v9478_v51 = vmul.f32 1.442695, %v9473_v28 }
0x23a8   :  { %v9708_v43 = vpop.xlane.xlu1 %9707 }
0x23a9   :  { %16076 = vpow2.f32 %v9478_v51  ;;  %v9715_v60 = vsub.f32 %v19362_v3, %v9708_v43 }
0x23ab   :  { %v19501_v55 = vpop.eup %16072  ;;  %v9718_v8 = vmul.f32 1.442695, %v9715_v60 }
0x23ac   :  { %v9711_v49 = vpop.xlane.xlu0 %9710  ;;  %v9480_v18 = vsel %vm646_vm7, %v19501_v55, 0.0 }
0x23ad   :  { %16078 = vpow2.f32 %v9718_v8  ;;  %v9716_v62 = vsub.f32 %v19368_v57, %v9711_v49  ;;  %9481 = vadd.xlane.f32.xlu0 %v9480_v18 }
0x23af   :  { %v19506_v37 = vpop.eup %16074  ;;  %v9720_v34 = vmul.f32 1.442695, %v9716_v62 }
0x23b0   :  { %v9714_v14 = vpop.xlane.xlu1 %9713  ;;  %v9483_v11 = vsel %vm646_vm7, %v19506_v37, 0.0 }
0x23b1   :  { %16080 = vpow2.f32 %v9720_v34  ;;  %v9717_v3 = vsub.f32 %v19374_v10, %v9714_v14  ;;  %9484 = vadd.xlane.f32.xlu1 %v9483_v11 }
0x23b3   :  { %v19511_v0 = vpop.eup %16076  ;;  %v9722_v32 = vmul.f32 1.442695, %v9717_v3 }
0x23b4   :  { %v9949_v47 = vpop.xlane.xlu0 %9948  ;;  %v9486_v35 = vsel %vm646_vm7, %v19511_v0, 0.0  ;;  %v19542_v34 = vpop.permute.xlu1 %9984 }
0x23b5   :  { %16082 = vpow2.f32 %v9722_v32  ;;  %v9956_v57 = vsub.f32 %v19380_v48, %v9949_v47  ;;  %9487 = vadd.xlane.f32.xlu0 %v9486_v35 }
0x23b7   :  { %v19516_v5 = vpop.eup %16078  ;;  %v9959_v7 = vmul.f32 1.442695, %v9956_v57 }
0x23b8   :  { %v9724_v33 = vsel %vm646_vm7, %v19516_v5, 0.0 }
0x23b9   :  { %16084 = vpow2.f32 %v9959_v7  ;;  %9725 = vadd.xlane.f32.xlu1 %v9724_v33 }
0x23bb   :  { %v19520_v10 = vpop.eup %16080 }
0x23bc   :  { %v9955_v31 = vpop.xlane.xlu0 %9954  ;;  %v9727_v27 = vsel %vm646_vm7, %v19520_v10, 0.0 }
0x23bd   :  { %v9958_v30 = vsub.f32 %v19386_v42, %v9955_v31  ;;  %9728 = vadd.xlane.f32.xlu0 %v9727_v27  ;;  %v15587_v31 = vunpack.i.h.bf16 %v19398_v20 }
0x23bf   :  { %v19525_v29 = vpop.eup %16082  ;;  %v9963_v48 = vmul.f32 1.442695, %v9958_v30 }
0x23c0   :  { %v9730_v59 = vsel %vm646_vm7, %v19525_v29, 0.0 }
0x23c1   :  { %16086 = vpow2.f32 %v9963_v48  ;;  %9731 = vadd.xlane.f32.xlu0 %v9730_v59 }
0x23c3   :  { %v19529_v28 = vpop.eup %16084 }
0x23c4   :  { %v10232_v51 = vpop.xlane.xlu0 %10231  ;;  %v9965_v43 = vsel %vm646_vm7, %v19529_v28, 0.0 }
0x23c5   :  { %v10237_v60 = vsub.f32 %v19394_v50, %v10232_v51  ;;  %9966 = vadd.xlane.f32.xlu0 %v9965_v43 }
0x23c7   :  { %v10241_v8 = vmul.f32 1.442695, %v10237_v60 }
0x23c8   :  { %v19551_v57 = vpop.permute.xlu0 %15599 }
0x23c9   :  { %16088 = vpow2.f32 %v10241_v8 }
0x23cb   :  { %v19534_v42 = vpop.eup %16086 }
0x23cc   :  { %v9971_v49 = vsel %vm646_vm7, %v19534_v42, 0.0 }
0x23cd   :  { %9972 = vadd.xlane.f32.xlu0 %v9971_v49 }
0x23d3   :  { %v19538_v18 = vpop.eup %16088 }
0x23d4   :  { %v10248_v62 = vsel %vm646_vm7, %v19538_v18, 0.0 }
0x23d5   :  { %10249 = vadd.xlane.f32.xlu0 %v10248_v62 }
0x23e5   :  { %v9952_v14 = vpop.xlane.xlu1 %9951 }
0x23e6   :  { %v9957_v50 = vsub.f32 %v19414_v21, %v9952_v14  ;;  %v15586_v21 = vunpack.i.l.bf16 %v19398_v20 }
0x23e8   :  { %v9961_v11 = vmul.f32 1.442695, %v9957_v50  ;;  %v15096_v43 = vpack.c.bf16 %v15587_v31, %v15586_v21 }
0x23e9   :  { %v19545_v3 = vpop.xlane.xlu1 %10228 }
0x23ea   :  { %16090 = vpow2.f32 %v9961_v11 }
0x23ed   :  { %v9250_v32 = vpop.xlane.xlu1 %9249 }
0x23ee   :  { %16092 = vrcp.f32 %v9250_v32 }
0x23f1   :  { %v19547_v47 = vpop.xlane.xlu1 %10234 }
0x23f4   :  { %v19549_v35 = vpop.eup %16090 }
0x23f5   :  { %v9253_v7 = vpop.xlane.xlu1 %9252  ;;  %v9968_v33 = vsel %vm646_vm7, %v19549_v35, 0.0 }
0x23f6   :  { %9969 = vadd.xlane.f32.xlu1 %v9968_v33  ;;  %16094 = vrcp.f32 %v9253_v7 }
0x23f8   :  { %v16093_v27 = vpop.eup %16092 }
0x23f9   :  { %v9256_v30 = vpop.xlane.xlu1 %9255  ;;  %v10461_v48 = vpop.xlane.xlu0 %10460  ;;  %v9258_v59 = vmul.f32 %v16093_v27, %v19425_v52 }
0x23fa   :  { %16096 = vrcp.f32 %v9256_v30  ;;  %v10468_v51 = vsub.f32 %v19443_v41, %v10461_v48 }
0x23fb   :  { %14095 = vmatmul.mubr.msk.f32.vlgmr.msra.gmra.mrb[208].mxu0 %vm646_vm7, %v9258_v59  ;;  %v10236_v59 = vsub.f32 %v19421_v58, %v19545_v3 }
0x23fc   :  { %v10471_v60 = vmul.f32 1.442695, %v10468_v51  ;;  %15097 = vmatpush3.bf16.msra.mxu0 %v15096_v43  ;;  %14097 = vmatprep.mubr.msk.f32.mxu0 %vm16239_vm3, %v16237_v63 }
0x23fd   :  { %v10464_v8 = vpop.xlane.xlu1 %10463  ;;  %v10467_v49 = vpop.xlane.xlu0 %10466  ;;  %14122 = vmatprep.subr.mxu0 %v16237_v63 }
0x23fe   :  { %16098 = vpow2.f32 %v10471_v60  ;;  %v10469_v20 = vsub.f32 %v19451_v25, %v10464_v8  ;;  %v10239_v60 = vmul.f32 1.442695, %v10236_v59  ;;  %v10238_v8 = vsub.f32 %v19431_v6, %v19547_v47 }
0x23ff   :  { %v15592_v59 = vunpack.i.h.bf16 %v19404_v39 }
0x2400   :  { %v10473_v62 = vmul.f32 1.442695, %v10469_v20  ;;  %v16095_v52 = vpop.eup %16094  ;;  %14123 = vmatpush3.msra.mxu0 %v19400_v46 }
0x2401   :  { %v10705_v41 = vpop.xlane.xlu1 %10704  ;;  %v10708_v14 = vpop.xlane.xlu0 %10707  ;;  %v9260_v32 = vmul.f32 %v16095_v52, %v19435_v40  ;;  %15102 = vmatprep.subr.bf16.mxu0 %v16238_v4  ;;  %v10243_v52 = vmul.f32 1.442695, %v10238_v8 }
0x2402   :  { %16100 = vpow2.f32 %v10473_v62  ;;  %v10712_v50 = vsub.f32 %v19459_v53, %v10705_v41  ;;  %v10713_v11 = vsub.f32 %v19467_v26, %v10708_v14  ;;  %v10470_v41 = vsub.f32 %v19455_v16, %v10467_v49 }
0x2403   :  { %14098 = vmatmul.mubr.msk.f32.gmra.mrb[210].mxu0 %vm646_vm7, %v9260_v32 }
0x2404   :  { %v16097_v7 = vpop.eup %16096  ;;  %v10715_v33 = vmul.f32 1.442695, %v10712_v50  ;;  %v10717_v25 = vmul.f32 1.442695, %v10713_v11  ;;  %14100 = vmatprep.mubr.msk.f32.mxu0 %vm16239_vm3, %v16237_v63  ;;  %v10475_v58 = vmul.f32 1.442695, %v10470_v41 }
0x2405   :  { %v10711_v31 = vpop.xlane.xlu1 %10710  ;;  %v9262_v46 = vmul.f32 %v16097_v7, %v19439_v2  ;;  %v10946_v62 = vpop.xlane.xlu0 %10945 }
0x2406   :  { %16102 = vpow2.f32 %v10715_v33  ;;  %v10714_v53 = vsub.f32 %v19475_v54, %v10711_v31  ;;  %v10953_v3 = vsub.f32 %v19479_v15, %v10946_v62 }
0x2407   :  { %10499 = vrot.lane.b32.xlu1 %v19167_v44, %s16241_s16  ;;  %16104 = vpow2.f32 %v10717_v25  ;;  %14101 = vmatmul.mubr.msk.f32.gmra.mrb[212].mxu0 %vm646_vm7, %v9262_v46 }
0x2408   :  { %v19576_v40 = vpop.eup %16098  ;;  %v10719_v26 = vmul.f32 1.442695, %v10714_v53  ;;  %14124 = vmatprep.mubr.msk.f32.mxu0 %vm16239_vm3, %v16237_v63  ;;  %v10956_v50 = vmul.f32 1.442695, %v10953_v3 }
0x2409   :  { %v10477_v21 = vsel %vm646_vm7, %v19576_v40, 0.0  ;;  %v10949_v14 = vpop.xlane.xlu0 %10948 }
0x240a   :  { %10478 = vadd.xlane.f32.xlu0 %v10477_v21  ;;  %16106 = vpow2.f32 %v10719_v26  ;;  %v10954_v11 = vsub.f32 %v19487_v1, %v10949_v14  ;;  %v15597_v14 = vunpack.i.h.bf16 %v19406_v45 }
0x240b   :  { %16108 = vpow2.f32 %v10239_v60 }
0x240c   :  { %v19583_v2 = vpop.eup %16100  ;;  %16110 = vpow2.f32 %v10243_v52  ;;  %v10958_v6 = vmul.f32 1.442695, %v10954_v11 }
0x240d   :  { %v10480_v54 = vsel %vm646_vm7, %v19583_v2, 0.0  ;;  %16112 = vpow2.f32 %v10475_v58  ;;  %v10952_v33 = vpop.xlane.xlu0 %10951 }
0x240e   :  { %10481 = vadd.xlane.f32.xlu0 %v10480_v54  ;;  %16114 = vpow2.f32 %v10956_v50  ;;  %v10955_v46 = vsub.f32 %v19493_v38, %v10952_v33  ;;  %v15596_v50 = vunpack.i.l.bf16 %v19406_v45 }
0x240f   :  { %16116 = vpow2.f32 %v10958_v6 }
0x2410   :  { %v19587_v27 = vpop.eup %16102  ;;  %v10960_v21 = vmul.f32 1.442695, %v10955_v46  ;;  %v15110_v6 = vpack.c.bf16 %v15597_v14, %v15596_v50 }
0x2411   :  { %v10721_v30 = vsel %vm646_vm7, %v19587_v27, 0.0  ;;  %v19591_v48 = vpop.eup %16104 }
0x2412   :  { %10722 = vadd.xlane.f32.xlu0 %v10721_v30  ;;  %v10724_v51 = vsel %vm646_vm7, %v19591_v48, 0.0 }
0x2414   :  { %v19597_v43 = vpop.eup %16106 }
0x2415   :  { %v10727_v20 = vsel %vm646_vm7, %v19597_v43, 0.0  ;;  %v19606_v32 = vpop.eup %16108 }
0x2416   :  { %10725 = vadd.xlane.f32.xlu0 %v10724_v51  ;;  %v10245_v47 = vsel %vm646_vm7, %v19606_v32, 0.0  ;;  %v19610_v7 = vpop.eup %16110  ;;  %v15591_v51 = vunpack.i.l.bf16 %v19404_v39 }
0x2417   :  { %v10251_v16 = vsel %vm646_vm7, %v19610_v7, 0.0  ;;  %v19614_v15 = vpop.eup %16112 }
0x2418   :  { %v10483_v1 = vsel %vm646_vm7, %v19614_v15, 0.0  ;;  %v19620_v49 = vpop.eup %16114 }
0x2419   :  { %v10962_v25 = vsel %vm646_vm7, %v19620_v49, 0.0  ;;  %v19624_v31 = vpop.eup %16116 }
0x241a   :  { %10728 = vadd.xlane.f32.xlu0 %v10727_v20  ;;  %v10965_v26 = vsel %vm646_vm7, %v19624_v31, 0.0  ;;  %v15103_v20 = vpack.c.bf16 %v15592_v59, %v15591_v51 }
0x242b   :  { %10246 = vadd.xlane.f32.xlu1 %v10245_v47 }
0x242f   :  { %10252 = vadd.xlane.f32.xlu1 %v10251_v16 }
0x2430   :  { %15604 = vrot.lane.b32.xlu0 %v19177_v17, %s16240_s30 }
0x2433   :  { %10484 = vadd.xlane.f32.xlu1 %v10483_v1 }
0x2437   :  { %10963 = vadd.xlane.f32.xlu1 %v10962_v25 }
0x243a   :  { %v9482_v53 = vpop.xlane.xlu0 %9481 }
0x243b   :  { %16118 = vrcp.f32 %v9482_v53  ;;  %10966 = vadd.xlane.f32.xlu1 %v10965_v26 }
0x243e   :  { %v9485_v54 = vpop.xlane.xlu1 %9484 }
0x243f   :  { %16120 = vrcp.f32 %v9485_v54  ;;  %v15602_v54 = vunpack.i.h.bf16 %v19551_v57 }
0x2440   :  { %16122 = vpow2.f32 %v10960_v21 }
0x2442   :  { %v9488_v30 = vpop.xlane.xlu0 %9487 }
0x2443   :  { %16124 = vrcp.f32 %v9488_v30 }
0x2445   :  { %v16119_v60 = vpop.eup %16118 }
0x2446   :  { %v9490_v8 = vmul.f32 %v16119_v60, %v19501_v55  ;;  %v9726_v38 = vpop.xlane.xlu1 %9725 }
0x2447   :  { %16126 = vrcp.f32 %v9726_v38 }
0x2448   :  { %14125 = vmatmul.mubr.msk.f32.vlgmr.msra.gmra.mrb[214].mxu0 %vm646_vm7, %v9490_v8 }
0x2449   :  { %v16121_v62 = vpop.eup %16120  ;;  %15104 = vmatpush3.bf16.msra.mxu0 %v15103_v20  ;;  %14127 = vmatprep.mubr.msk.f32.mxu0 %vm16239_vm3, %v16237_v63 }
0x244a   :  { %v9729_v52 = vpop.xlane.xlu0 %9728  ;;  %14152 = vmatprep.subr.mxu0 %v16237_v63  ;;  %v9492_v41 = vmul.f32 %v16121_v62, %v19506_v37  ;;  %v19637_v39 = vpop.eup %16122 }
0x244b   :  { %16128 = vrcp.f32 %v9729_v52  ;;  %v10968_v3 = vsel %vm646_vm7, %v19637_v39, 0.0 }
0x244c   :  { %10740 = vrot.lane.b32.xlu1 %v19167_v44, %s16240_s30  ;;  %14128 = vmatmul.mubr.msk.f32.gmra.mrb[216].mxu0 %vm646_vm7, %v9492_v41 }
0x244d   :  { %v16125_v55 = vpop.eup %16124  ;;  %14153 = vmatpush3.msra.mxu0 %v19402_v24  ;;  %14130 = vmatprep.mubr.msk.f32.mxu0 %vm16239_vm3, %v16237_v63 }
0x244e   :  { %v9732_v58 = vpop.xlane.xlu0 %9731  ;;  %v9494_v37 = vmul.f32 %v16125_v55, %v19511_v0  ;;  %15109 = vmatprep.subr.bf16.mxu0 %v16238_v4 }
0x244f   :  { %16130 = vrcp.f32 %v9732_v58  ;;  %10969 = vadd.xlane.f32.xlu0 %v10968_v3 }
0x2450   :  { %15609 = vrot.lane.b32.xlu1 %v19177_v17, %s16242_s17  ;;  %14131 = vmatmul.mubr.msk.f32.gmra.mrb[218].mxu0 %vm646_vm7, %v9494_v37 }
0x2451   :  { %v16127_v24 = vpop.eup %16126  ;;  %14154 = vmatprep.mubr.msk.f32.mxu0 %vm16239_vm3, %v16237_v63 }
0x2452   :  { %v9734_v11 = vmul.f32 %v16127_v24, %v19516_v5  ;;  %v9967_v0 = vpop.xlane.xlu0 %9966 }
0x2453   :  { %16132 = vrcp.f32 %v9967_v0 }
0x2454   :  { %10981 = vrot.lane.b32.xlu1 %v19167_v44, %s16242_s17  ;;  %14155 = vmatmul.mubr.msk.f32.vlgmr.msra.gmra.mrb[220].mxu0 %vm646_vm7, %v9734_v11 }
0x2455   :  { %v16129_v45 = vpop.eup %16128  ;;  %15111 = vmatpush3.bf16.msra.mxu0 %v15110_v6  ;;  %14157 = vmatprep.mubr.msk.f32.mxu0 %vm16239_vm3, %v16237_v63 }
0x2456   :  { %14182 = vmatprep.subr.mxu0 %v16237_v63  ;;  %v9736_v17 = vmul.f32 %v16129_v45, %v19520_v10 }
0x2458   :  { %14158 = vmatmul.mubr.msk.f32.gmra.mrb[222].mxu0 %vm646_vm7, %v9736_v17 }
0x2459   :  { %v16131_v5 = vpop.eup %16130  ;;  %14183 = vmatpush3.msra.mxu0 %v19542_v34  ;;  %14160 = vmatprep.mubr.msk.f32.mxu0 %vm16239_vm3, %v16237_v63 }
0x245a   :  { %v9738_v47 = vmul.f32 %v16131_v5, %v19525_v29  ;;  %15116 = vmatprep.subr.bf16.mxu0 %v16238_v4  ;;  %v9973_v29 = vpop.xlane.xlu0 %9972 }
0x245c   :  { %14161 = vmatmul.mubr.msk.f32.gmra.mrb[224].mxu0 %vm646_vm7, %v9738_v47 }
0x245d   :  { %v16133_v16 = vpop.eup %16132  ;;  %14184 = vmatprep.mubr.msk.f32.mxu0 %vm16239_vm3, %v16237_v63 }
0x245e   :  { %v9975_v10 = vmul.f32 %v16133_v16, %v19529_v28 }
0x2460   :  { %14185 = vmatmul.mubr.msk.f32.vlgmr.msra.gmra.mrb[226].mxu0 %vm646_vm7, %v9975_v10 }
0x2461   :  { %15118 = vmatpush3.bf16.msra.mxu0 %v15117_v19  ;;  %14187 = vmatprep.mubr.msk.f32.mxu0 %vm16239_vm3, %v16237_v63 }
0x2462   :  { %14212 = vmatprep.subr.mxu0 %v16237_v63 }
0x2465   :  { %14213 = vmatpush3.msra.mxu0 %v19167_v44  ;;  %v10250_v44 = vpop.xlane.xlu0 %10249 }
0x2466   :  { %15123 = vmatprep.subr.bf16.mxu0 %v16238_v4 }
0x2483   :  { %v9970_v34 = vpop.xlane.xlu1 %9969 }
0x2484   :  { %16134 = vrcp.f32 %v9970_v34 }
0x2485   :  { %16136 = vrcp.f32 %v9973_v29 }
0x2487   :  { %v10500_v25 = vpop.permute.xlu1 %10499 }
0x248e   :  { %v16135_v28 = vpop.eup %16134 }
0x248f   :  { %v9977_v1 = vmul.f32 %v16135_v28, %v19549_v35  ;;  %v16137_v33 = vpop.eup %16136 }
0x2490   :  { %v9979_v61 = vmul.f32 %v16137_v33, %v19534_v42  ;;  %v15601_v42 = vunpack.i.l.bf16 %v19551_v57 }
0x2491   :  { %14188 = vmatmul.mubr.msk.f32.gmra.mrb[228].mxu0 %vm646_vm7, %v9977_v1 }
0x2492   :  { %14190 = vmatprep.mubr.msk.f32.mxu0 %vm16239_vm3, %v16237_v63  ;;  %v15124_v38 = vpack.c.bf16 %v15602_v54, %v15601_v42 }
0x2495   :  { %14191 = vmatmul.mubr.msk.f32.gmra.mrb[230].mxu0 %vm646_vm7, %v9979_v61 }
0x2496   :  { %14214 = vmatprep.mubr.msk.f32.mxu0 %vm16239_vm3, %v16237_v63 }
0x2497   :  { %v10479_v9 = vpop.xlane.xlu0 %10478 }
0x249b   :  { %v10482_v19 = vpop.xlane.xlu0 %10481 }
0x249f   :  { %v10723_v46 = vpop.xlane.xlu0 %10722 }
0x24a3   :  { %v10726_v26 = vpop.xlane.xlu0 %10725 }
0x24a7   :  { %v10729_v59 = vpop.xlane.xlu0 %10728 }
0x24ab   :  { %v15605_v62 = vpop.permute.xlu0 %15604 }
0x24ac   :  { %v15607_v55 = vunpack.i.h.bf16 %v15605_v62  ;;  %v15606_v58 = vunpack.i.l.bf16 %v15605_v62 }
0x24ae   :  { %v15131_v24 = vpack.c.bf16 %v15607_v55, %v15606_v58  ;;  %v12101_v55 = vld [vmem:[%s19980_s7 + $0x1b0] sm:$0xff]  ;;  %v12102_v58 = vld [vmem:[%s19980_s7 + $0x1b8] sm:$0xff] }
0x24b8   :  { %v10247_v53 = vpop.xlane.xlu1 %10246 }
0x24b9   :  { %16138 = vrcp.f32 %v10247_v53 }
0x24ba   :  { %16140 = vrcp.f32 %v10250_v44 }
0x24bc   :  { %v10253_v35 = vpop.xlane.xlu1 %10252 }
0x24bd   :  { %16142 = vrcp.f32 %v10253_v35 }
0x24be   :  { %16144 = vrcp.f32 %v10479_v9 }
0x24bf   :  { %16146 = vrcp.f32 %v10482_v19 }
0x24c0   :  { %v10485_v21 = vpop.xlane.xlu1 %10484 }
0x24c1   :  { %16148 = vrcp.f32 %v10485_v21 }
0x24c2   :  { %16150 = vrcp.f32 %v10723_v46 }
0x24c3   :  { %v16139_v30 = vpop.eup %16138  ;;  %16152 = vrcp.f32 %v10726_v26 }
0x24c4   :  { %v10255_v51 = vmul.f32 %v16139_v30, %v19606_v32  ;;  %v10964_v60 = vpop.xlane.xlu1 %10963  ;;  %v16141_v8 = vpop.eup %16140  ;;  %16154 = vrcp.f32 %v10729_v59 }
0x24c5   :  { %v10257_v20 = vmul.f32 %v16141_v8, %v19538_v18  ;;  %16156 = vrcp.f32 %v10964_v60  ;;  %v12095_v60 = vld [vmem:[%s19980_s7 + $0x180] sm:$0xff]  ;;  %v12096_v8 = vld [vmem:[%s19980_s7 + $0x188] sm:$0xff] }
0x24c6   :  { %14215 = vmatmul.mubr.msk.f32.vlgmr.msra.gmra.mrb[232].mxu0 %vm646_vm7, %v10255_v51 }
0x24c7   :  { %15125 = vmatpush3.bf16.msra.mxu0 %v15124_v38  ;;  %14217 = vmatprep.mubr.msk.f32.mxu0 %vm16239_vm3, %v16237_v63  ;;  %v16143_v57 = vpop.eup %16142  ;;  %v15140_v38 = vpack.c.bf16 %v12096_v8, %v12095_v60 }
0x24c8   :  { %14242 = vmatprep.subr.mxu0 %v16237_v63  ;;  %v10967_v52 = vpop.xlane.xlu1 %10966  ;;  %v10259_v32 = vmul.f32 %v16143_v57, %v19610_v7  ;;  %v16145_v41 = vpop.eup %16144  ;;  %v12098_v57 = vld [vmem:[%s19980_s7 + $0x198] sm:$0xff] }
0x24c9   :  { %v10487_v3 = vmul.f32 %v16145_v41, %v19576_v40  ;;  %v16147_v50 = vpop.eup %16146  ;;  %16158 = vrcp.f32 %v10967_v52  ;;  %15141 = vmatprep.subr.bf16.mxu1 %v15140_v38  ;;  %v12099_v52 = vld [vmem:[%s19980_s7 + $0x1a0] sm:$0xff] }
0x24ca   :  { %14218 = vmatmul.mubr.msk.f32.gmra.mrb[234].mxu0 %vm646_vm7, %v10257_v20  ;;  %v10489_v7 = vmul.f32 %v16147_v50, %v19583_v2  ;;  %15143 = vmatpush3.bf16.msra.mxu1 %v15140_v38  ;;  %v12097_v20 = vld [vmem:[%s19980_s7 + $0x190] sm:$0xff] }
0x24cb   :  { %14243 = vmatpush3.msra.mxu0 %v10500_v25  ;;  %14220 = vmatprep.mubr.msk.f32.mxu0 %vm16239_vm3, %v16237_v63  ;;  %v16149_v11 = vpop.eup %16148  ;;  %v15144_v62 = vpack.c.bf16 %v12098_v57, %v12097_v20 }
0x24cc   :  { %15130 = vmatprep.subr.bf16.mxu0 %v16238_v4  ;;  %v10741_v37 = vpop.permute.xlu1 %10740  ;;  %v10491_v45 = vmul.f32 %v16149_v11, %v19614_v15  ;;  %v16151_v17 = vpop.eup %16150 }
0x24cd   :  { %v10731_v16 = vmul.f32 %v16151_v17, %v19587_v27  ;;  %v16153_v29 = vpop.eup %16152  ;;  %15145 = vmatprep.subr.bf16.mxu1 %v15144_v62  ;;  %v12109_v17 = vld [vmem:[%s19980_s7 + $0x1f0] sm:$0xff] }
0x24ce   :  { %14221 = vmatmul.mubr.msk.f32.gmra.mrb[236].mxu0 %vm646_vm7, %v10259_v32  ;;  %v19705_v18 = vpop.f32.mrb[208].mxu0  ;;  %v10733_v15 = vmul.f32 %v16153_v29, %v19591_v48  ;;  %v16155_v28 = vpop.eup %16154  ;;  %15147 = vmatpush3.bf16.msra.mxu1 %v15144_v62  ;;  %v12100_v32 = vld [vmem:[%s19980_s7 + $0x1a8] sm:$0xff] }
0x24cf   :  { %14244 = vmatprep.mubr.msk.f32.mxu0 %vm16239_vm3, %v16237_v63  ;;  %v14096_v14 = vpop.f32.mrb[209].mxu0  ;;  %v10735_v27 = vmul.f32 %v16155_v28, %v19597_v43  ;;  %v16157_v33 = vpop.eup %16156  ;;  %v15148_v41 = vpack.c.bf16 %v12100_v32, %v12099_v52 }
0x24d0   :  { %v15610_v0 = vpop.permute.xlu1 %15609  ;;  %v10972_v61 = vmul.f32 %v16157_v33, %v19620_v49  ;;  %v12104_v14 = vld [vmem:[%s19980_s7 + $0x1c8] sm:$0xff] }
0x24d1   :  { %v15612_v5 = vunpack.i.h.bf16 %v15610_v0  ;;  %v15611_v47 = vunpack.i.l.bf16 %v15610_v0  ;;  %15149 = vmatprep.subr.bf16.mxu1 %v15148_v41  ;;  %v12107_v0 = vld [vmem:[%s19980_s7 + $0x1e0] sm:$0xff] }
0x24d2   :  { %14245 = vmatmul.mubr.msk.f32.vlgmr.msra.gmra.mrb[238].mxu0 %vm646_vm7, %v10487_v3  ;;  %v12103_v3 = vld [vmem:[%s19980_s7 + $0x1c0] sm:$0xff]  ;;  %15151 = vmatpush3.bf16.msra.mxu1 %v15148_v41 }
0x24d3   :  { %15132 = vmatpush3.bf16.msra.mxu0 %v15131_v24  ;;  %14247 = vmatprep.mubr.msk.f32.mxu0 %vm16239_vm3, %v16237_v63  ;;  %v15138_v34 = vpack.c.bf16 %v15612_v5, %v15611_v47  ;;  %v16159_v48 = vpop.eup %16158  ;;  %v15156_v50 = vpack.c.bf16 %v12104_v14, %v12103_v3  ;;  %v12105_v24 = vld [vmem:[%s19980_s7 + $0x1d0] sm:$0xff]  ;;  %v12110_v5 = vld [vmem:[%s19980_s7 + $0x1f8] sm:$0xff] }
0x24d4   :  { %14272 = vmatprep.subr.mxu0 %v16237_v63  ;;  %v10982_v1 = vpop.permute.xlu1 %10981  ;;  %v10974_v44 = vmul.f32 %v16159_v48, %v19624_v31  ;;  %v15168_v47 = vpack.c.bf16 %v12110_v5, %v12109_v17 }
0x24d6   :  { %14248 = vmatmul.mubr.msk.f32.gmra.mrb[240].mxu0 %vm646_vm7, %v10489_v7  ;;  %v19716_v40 = vpop.f32.mrb[210].mxu0  ;;  %v12106_v7 = vld [vmem:[%s19980_s7 + $0x1d8] sm:$0xff] }
0x24d7   :  { %14273 = vmatpush3.msra.mxu0 %v10741_v37  ;;  %14250 = vmatprep.mubr.msk.f32.mxu0 %vm16239_vm3, %v16237_v63  ;;  %v14099_v6 = vpop.f32.mrb[211].mxu0  ;;  %v15152_v37 = vpack.c.bf16 %v12102_v58, %v12101_v55  ;;  %v15160_v11 = vpack.c.bf16 %v12106_v7, %v12105_v24 }
0x24d8   :  { %15137 = vmatprep.subr.bf16.mxu0 %v16238_v4  ;;  %v12108_v6 = vld [vmem:[%s19980_s7 + $0x1e8] sm:$0xff] }
0x24d9   :  { %15153 = vmatprep.subr.bf16.mxu1 %v15152_v37 }
0x24da   :  { %14251 = vmatmul.mubr.msk.f32.gmra.mrb[242].mxu0 %vm646_vm7, %v10491_v45  ;;  %v19723_v2 = vpop.f32.mrb[212].mxu0  ;;  %15155 = vmatpush3.bf16.msra.mxu1 %v15152_v37  ;;  %v15164_v45 = vpack.c.bf16 %v12108_v6, %v12107_v0 }
0x24db   :  { %14274 = vmatprep.mubr.msk.f32.mxu0 %vm16239_vm3, %v16237_v63  ;;  %v14102_v10 = vpop.f32.mrb[213].mxu0  ;;  %15157 = vmatprep.subr.bf16.mxu1 %v15156_v50 }
0x24dc   :  { %v10970_v4 = vpop.xlane.xlu0 %10969 }
0x24dd   :  { %16160 = vrcp.f32 %v10970_v4 }
0x24de   :  { %14275 = vmatmul.mubr.msk.f32.vlgmr.msra.gmra.mrb[244].mxu0 %vm646_vm7, %v10731_v16  ;;  %15159 = vmatpush3.bf16.msra.mxu1 %v15156_v50 }
0x24df   :  { %15139 = vmatpush3.bf16.msra.mxu0 %v15138_v34  ;;  %14277 = vmatprep.mubr.msk.f32.mxu0 %vm16239_vm3, %v16237_v63 }
0x24e0   :  { %14302 = vmatprep.subr.mxu0 %v16237_v63  ;;  %15161 = vmatprep.subr.bf16.mxu1 %v15160_v11 }
0x24e2   :  { %14278 = vmatmul.mubr.msk.f32.gmra.mrb[246].mxu0 %vm646_vm7, %v10733_v15  ;;  %15163 = vmatpush3.bf16.msra.mxu1 %v15160_v11 }
0x24e3   :  { %14303 = vmatpush3.msra.mxu0 %v10982_v1  ;;  %14280 = vmatprep.mubr.msk.f32.mxu0 %vm16239_vm3, %v16237_v63 }
0x24e4   :  { %15165 = vmatprep.subr.bf16.mxu1 %v15164_v45 }
0x24e6   :  { %14281 = vmatmul.mubr.msk.f32.gmra.mrb[248].mxu0 %vm646_vm7, %v10735_v27  ;;  %15167 = vmatpush3.bf16.msra.mxu1 %v15164_v45 }
0x24e7   :  { %14304 = vmatprep.mubr.msk.f32.mxu0 %vm16239_vm3, %v16237_v63  ;;  %v16161_v9 = vpop.eup %16160  ;;  %15169 = vmatprep.subr.bf16.mxu1 %v15168_v47 }
0x24e8   :  { %v10976_v43 = vmul.f32 %v16161_v9, %v19637_v39 }
0x24ea   :  { %14305 = vmatmul.mubr.msk.f32.vlgmr.msra.gmra.mrb[250].mxu0 %vm646_vm7, %v10972_v61  ;;  %15171 = vmatpush3.bf16.msra.mxu1 %v15168_v47 }
0x24eb   :  { %14307 = vmatprep.mubr.msk.f32.mxu0 %vm16239_vm3, %v16237_v63 }
0x24ee   :  { %14308 = vmatmul.mubr.msk.f32.gmra.mrb[252].mxu0 %vm646_vm7, %v10974_v44 }
0x24ef   :  { %14310 = vmatprep.mubr.msk.f32.mxu0 %vm16239_vm3, %v16237_v63 }
0x24f2   :  { %14311 = vmatmul.mubr.msk.f32.gmra.mrb[254].mxu0 %vm646_vm7, %v10976_v43 }
0x251b   :  { %v9582_v19 = vpop.f32.mrb[214].mxu0 }
0x251c   :  { %v14126_v49 = vpop.f32.mrb[215].mxu0 }
0x251f   :  { %v9587_v25 = vpop.f32.mrb[216].mxu0 }
0x2520   :  { %v15613_v46 = vpack.i.bf16 %v9587_v25, %v9582_v19  ;;  %v14129_v53 = vpop.f32.mrb[217].mxu0 }
0x2522   :  { %15614 = vrot.lane.b32.xlu0 %v15613_v46, %s16242_s17 }
0x2523   :  { %v19751_v35 = vpop.f32.mrb[218].mxu0 }
0x2524   :  { %v14132_v31 = vpop.f32.mrb[219].mxu0 }
0x2527   :  { %v9823_v26 = vpop.f32.mrb[220].mxu0 }
0x2528   :  { %v14156_v21 = vpop.f32.mrb[221].mxu0 }
0x252b   :  { %v9828_v54 = vpop.f32.mrb[222].mxu0 }
0x252c   :  { %v15618_v42 = vpack.i.bf16 %v9828_v54, %v9823_v26  ;;  %v14159_v30 = vpop.f32.mrb[223].mxu0 }
0x252e   :  { %15619 = vrot.lane.b32.xlu1 %v15618_v42, %s16240_s30 }
0x252f   :  { %v19754_v63 = vpop.f32.mrb[224].mxu0 }
0x2530   :  { %v14162_v39 = vpop.f32.mrb[225].mxu0 }
0x2533   :  { %v10064_v59 = vpop.f32.mrb[226].mxu0 }
0x2534   :  { %v14186_v51 = vpop.f32.mrb[227].mxu0 }
0x2564   :  { %v10069_v16 = vpop.f32.mrb[228].mxu0 }
0x2565   :  { %v15623_v10 = vpack.i.bf16 %v10069_v16, %v10064_v59  ;;  %v14189_v29 = vpop.f32.mrb[229].mxu0 }
0x2567   :  { %15624 = vrot.lane.b32.xlu1 %v15623_v10, %s16241_s16 }
0x2568   :  { %v10074_v34 = vpop.f32.mrb[230].mxu0 }
0x2569   :  { %v14192_v4 = vpop.f32.mrb[231].mxu0 }
0x2594   :  { %v15615_v57 = vpop.permute.xlu0 %15614 }
0x2595   :  { %v15617_v52 = vunpack.i.h.bf16 %v15615_v57  ;;  %v15616_v32 = vunpack.i.l.bf16 %v15615_v57 }
0x2597   :  { %v10115_v3 = vsel %vm541_vm4, %v19716_v40, %v15617_v52  ;;  %v10114_v50 = vsel %vm541_vm4, %v19705_v18, %v15616_v32 }
0x2599   :  { %v10335_v15 = vpop.f32.mrb[232].mxu0 }
0x259a   :  { %v14216_v28 = vpop.f32.mrb[233].mxu0 }
0x259d   :  { %v19805_v1 = vpop.f32.mrb[234].mxu0 }
0x259e   :  { %v14219_v27 = vpop.f32.mrb[235].mxu0 }
0x25a0   :  { %v15620_v62 = vpop.permute.xlu1 %15619 }
0x25a1   :  { %v19807_v33 = vpop.f32.mrb[236].mxu0  ;;  %v15622_v41 = vunpack.i.h.bf16 %v15620_v62  ;;  %v15621_v55 = vunpack.i.l.bf16 %v15620_v62 }
0x25a2   :  { %v14222_v61 = vpop.f32.mrb[237].mxu0 }
0x25a3   :  { %v10118_v24 = vsel %vm1534_vm8, %v10115_v3, %v15622_v41  ;;  %v10117_v7 = vsel %vm1534_vm8, %v10114_v50, %v15621_v55  ;;  %v12122_v3 = vld [vmem:[%s19984_s11 + $0x1a8] sm:$0xff] }
0x25a5   :  { %v10579_v48 = vpop.f32.mrb[238].mxu0 }
0x25a6   :  { %v15628_v44 = vpack.i.bf16 %v10579_v48, %v19751_v35  ;;  %v14246_v9 = vpop.f32.mrb[239].mxu0 }
0x25a8   :  { %15629 = vrot.lane.b32.xlu1 %v15628_v44, %s16242_s17 }
0x25a9   :  { %v10584_v43 = vpop.f32.mrb[240].mxu0 }
0x25aa   :  { %v14249_v19 = vpop.f32.mrb[241].mxu0 }
0x25ad   :  { %v10589_v49 = vpop.f32.mrb[242].mxu0 }
0x25ae   :  { %v15643_v25 = vpack.i.bf16 %v10589_v49, %v10584_v43  ;;  %v14252_v46 = vpop.f32.mrb[243].mxu0 }
0x25b1   :  { %v10820_v53 = vpop.f32.mrb[244].mxu0 }
0x25b2   :  { %v15633_v31 = vpack.i.bf16 %v10820_v53, %v19754_v63  ;;  %v14276_v26 = vpop.f32.mrb[245].mxu0 }
0x25b4   :  { %15634 = vrot.lane.b32.xlu1 %v15633_v31, %s16240_s30 }
0x25b5   :  { %v10825_v21 = vpop.f32.mrb[246].mxu0 }
0x25b6   :  { %v14279_v54 = vpop.f32.mrb[247].mxu0 }
0x25b9   :  { %v10830_v42 = vpop.f32.mrb[248].mxu0 }
0x25ba   :  { %v15648_v30 = vpack.i.bf16 %v10830_v42, %v10825_v21  ;;  %v14282_v39 = vpop.f32.mrb[249].mxu0 }
0x25bc   :  { %15649 = vrot.lane.b32.xlu0 %v15648_v30, %s16240_s30 }
0x25bd   :  { %v11061_v35 = vpop.f32.mrb[250].mxu0 }
0x25be   :  { %v15638_v59 = vpack.i.bf16 %v11061_v35, %v10074_v34  ;;  %v14306_v51 = vpop.f32.mrb[251].mxu0 }
0x25c0   :  { %15639 = vrot.lane.b32.xlu1 %v15638_v59, %s16241_s16 }
0x25c1   :  { %v11066_v60 = vpop.f32.mrb[252].mxu0 }
0x25c2   :  { %v14309_v8 = vpop.f32.mrb[253].mxu0 }
0x25c4   :  { %15644 = vrot.lane.b32.xlu1 %v15643_v25, %s16242_s17 }
0x25c5   :  { %v11071_v63 = vpop.f32.mrb[254].mxu0 }
0x25c6   :  { %v15653_v38 = vpack.i.bf16 %v11071_v63, %v11066_v60  ;;  %v14312_v20 = vpop.f32.mrb[255].mxu0 }
0x25c8   :  { %15654 = vrot.lane.b32.xlu1 %v15653_v38, %s16241_s16 }
0x25d9   :  { %v15625_v58 = vpop.permute.xlu1 %15624 }
0x25da   :  { %v15627_v37 = vunpack.i.h.bf16 %v15625_v58  ;;  %v15626_v14 = vunpack.i.l.bf16 %v15625_v58  ;;  %v12121_v58 = vld [vmem:[%s19984_s11 + $0x1a0] sm:$0xff] }
0x25dc   :  { %v10121_v11 = vsel %vm1538_vm9, %v10118_v24, %v15627_v37  ;;  %v10120_v0 = vsel %vm1538_vm9, %v10117_v7, %v15626_v14  ;;  %v15180_v37 = vpack.c.bf16 %v12122_v3, %v12121_v58 }
0x25dd   :  { %14345 = vmatprep.mubr.f32.mxu1 %v10120_v0 }
0x25de   :  { %14346 = vmatmul.mubr.f32.vlgmr.msra.gmra.mrb[2].mxu1 %v10121_v11 }
0x261a   :  { %v15630_v6 = vpop.permute.xlu1 %15629 }
0x261b   :  { %v15632_v17 = vunpack.i.h.bf16 %v15630_v6  ;;  %v15631_v5 = vunpack.i.l.bf16 %v15630_v6 }
0x261d   :  { %v11111_v10 = vsel %vm541_vm4, %v10335_v15, %v15632_v17  ;;  %v10116_v34 = vsel %vm541_vm4, %v19723_v2, %v15631_v5  ;;  %v12123_v17 = vld [vmem:[%s19984_s11 + $0x1b0] sm:$0xff]  ;;  %v12124_v5 = vld [vmem:[%s19984_s11 + $0x1b8] sm:$0xff] }
0x2626   :  { %v15635_v45 = vpop.permute.xlu1 %15634 }
0x2627   :  { %v15637_v40 = vunpack.i.h.bf16 %v15635_v45  ;;  %v15636_v47 = vunpack.i.l.bf16 %v15635_v45 }
0x2629   :  { %v11114_v4 = vsel %vm1534_vm8, %v11111_v10, %v15637_v40  ;;  %v10119_v28 = vsel %vm1534_vm8, %v10116_v34, %v15636_v47  ;;  %v15184_v40 = vpack.c.bf16 %v12124_v5, %v12123_v17  ;;  %v12125_v47 = vld [vmem:[%s19984_s11 + $0x1c0] sm:$0xff] }
0x262e   :  { %v15650_v44 = vpop.permute.xlu0 %15649 }
0x262f   :  { %v15652_v19 = vunpack.i.h.bf16 %v15650_v44  ;;  %v15651_v49 = vunpack.i.l.bf16 %v15650_v44 }
0x2632   :  { %v15640_v16 = vpop.permute.xlu1 %15639 }
0x2633   :  { %v15642_v18 = vunpack.i.h.bf16 %v15640_v16  ;;  %v15641_v29 = vunpack.i.l.bf16 %v15640_v16  ;;  %v12126_v16 = vld [vmem:[%s19984_s11 + $0x1c8] sm:$0xff] }
0x2634   :  { %v15188_v10 = vpack.c.bf16 %v12126_v16, %v12125_v47 }
0x2635   :  { %v10122_v27 = vsel %vm1538_vm9, %v10119_v28, %v15641_v29  ;;  %v11117_v61 = vsel %vm1538_vm9, %v11114_v4, %v15642_v18  ;;  %v12127_v18 = vld [vmem:[%s19984_s11 + $0x1d0] sm:$0xff]  ;;  %v12128_v29 = vld [vmem:[%s19984_s11 + $0x1d8] sm:$0xff]  ;;  %v12129_v4 = vld [vmem:[%s19984_s11 + $0x1e0] sm:$0xff] }
0x2636   :  { %v15645_v48 = vpop.permute.xlu1 %15644  ;;  %14348 = vmatprep.mubr.f32.mxu1 %v10122_v27  ;;  %v15192_v34 = vpack.c.bf16 %v12128_v29, %v12127_v18  ;;  %v12130_v28 = vld [vmem:[%s19984_s11 + $0x1e8] sm:$0xff] }
0x2637   :  { %v15647_v9 = vunpack.i.h.bf16 %v15645_v48  ;;  %v15646_v43 = vunpack.i.l.bf16 %v15645_v48  ;;  %14349 = vmatmul.mubr.f32.gmra.mrb[4].mxu1 %v11117_v61  ;;  %v15196_v27 = vpack.c.bf16 %v12130_v28, %v12129_v4  ;;  %v12131_v61 = vld [vmem:[%s19984_s11 + $0x1f0] sm:$0xff]  ;;  %v12132_v48 = vld [vmem:[%s19984_s11 + $0x1f8] sm:$0xff] }
0x2638   :  { %v15200_v44 = vpack.c.bf16 %v12132_v48, %v12131_v61  ;;  %v12135_v48 = vld [vmem:[%s19986_s13 + $0xc0] sm:$0xff] }
0x2639   :  { %v11113_v15 = vsel %vm541_vm4, %v19807_v33, %v15647_v9  ;;  %v11112_v2 = vsel %vm541_vm4, %v19805_v1, %v15646_v43  ;;  %v12112_v33 = vld [vmem:[%s19981_s8 + $0x3] ss:$0 sm:$0xff] }
0x263a   :  { %v15655_v25 = vpop.permute.xlu1 %15654  ;;  %v11115_v31 = vsel %vm1534_vm8, %v11112_v2, %v15651_v49  ;;  %v11116_v26 = vsel %vm1534_vm8, %v11113_v15, %v15652_v19 }
0x263b   :  { %v15657_v46 = vunpack.i.h.bf16 %v15655_v25  ;;  %v15656_v53 = vunpack.i.l.bf16 %v15655_v25 }
0x263d   :  { %v11118_v21 = vsel %vm1538_vm9, %v11115_v31, %v15656_v53  ;;  %v11119_v54 = vsel %vm1538_vm9, %v11116_v26, %v15657_v46 }
0x263e   :  { %14351 = vmatprep.mubr.f32.mxu1 %v11118_v21 }
0x263f   :  { %14352 = vmatmul.mubr.f32.gmra.mrb[6].mxu1 %v11119_v54 }
0x26b1   :  { %v14347_v1 = vpop.f32.mrb[2].mxu1 }
0x26b2   :  { %v11217_v42 = vadd.f32 %v14347_v1, %v12112_v33  ;;  %v11211_v30 = vpop.f32.mrb[3].mxu1 }
0x26b3   :  { %v11212_v39 = vadd.f32 %v12112_v33, %v11211_v30 }
0x26b4   :  { %v11241_v35 = vadd.f32 %v11217_v42, %v19065_v12 }
0x26b5   :  { %v19845_v59 = vadd.f32 %v11212_v39, %v19068_v36 }
0x26b6   :  { %11252 = vadd.xlane.f32.xlu1 %v11241_v35 }
0x26b7   :  { %11250 = vadd.xlane.f32.xlu0 %v19845_v59 }
0x270a   :  { %v14350_v51 = vpop.f32.mrb[4].mxu1 }
0x270b   :  { %v11221_v60 = vpop.f32.mrb[5].mxu1  ;;  %v11227_v63 = vadd.f32 %v14350_v51, %v12112_v33 }
0x270c   :  { %v11222_v8 = vadd.f32 %v12112_v33, %v11221_v60 }
0x270d   :  { %v19853_v20 = vadd.f32 %v11227_v63, %v19073_v56  ;;  %v12117_v56 = vld [vmem:[%s19984_s11 + $0x180] sm:$0xff] }
0x270e   :  { %v19849_v38 = vadd.f32 %v11222_v8, %v19076_v13  ;;  %v12118_v13 = vld [vmem:[%s19984_s11 + $0x188] sm:$0xff] }
0x270f   :  { %v15172_v41 = vpack.c.bf16 %v12118_v13, %v12117_v56 }
0x2710   :  { %11254 = vadd.xlane.f32.xlu0 %v19849_v38 }
0x2711   :  { %15173 = vmatprep.subr.bf16.mxu0 %v15172_v41 }
0x2712   :  { %v14353_v57 = vpop.f32.mrb[6].mxu1  ;;  %15175 = vmatpush3.bf16.msra.mxu0 %v15172_v41 }
0x2713   :  { %v11237_v12 = vadd.f32 %v14353_v57, %v12112_v33  ;;  %v11231_v62 = vpop.f32.mrb[7].mxu1 }
0x2714   :  { %v11232_v36 = vadd.f32 %v12112_v33, %v11231_v62  ;;  %11256 = vadd.xlane.f32.xlu0 %v19853_v20 }
0x2715   :  { %v19857_v52 = vadd.f32 %v11237_v12, %v19081_v23  ;;  %v12119_v23 = vld [vmem:[%s19984_s11 + $0x190] sm:$0xff] }
0x2716   :  { %v19860_v32 = vadd.f32 %v11232_v36, %v19084_v22  ;;  %v12120_v22 = vld [vmem:[%s19984_s11 + $0x198] sm:$0xff] }
0x2717   :  { %11260 = vadd.xlane.f32.xlu1 %v19857_v52  ;;  %v15176_v55 = vpack.c.bf16 %v12120_v22, %v12119_v23 }
0x2718   :  { %11258 = vadd.xlane.f32.xlu0 %v19860_v32 }
0x2719   :  { %15177 = vmatprep.subr.bf16.mxu0 %v15176_v55 }
0x271a   :  { %15179 = vmatpush3.bf16.msra.mxu0 %v15176_v55 }
0x271b   :  { %15181 = vmatprep.subr.bf16.mxu0 %v15180_v37 }
0x271e   :  { %15183 = vmatpush3.bf16.msra.mxu0 %v15180_v37 }
0x271f   :  { %15185 = vmatprep.subr.bf16.mxu0 %v15184_v40 }
0x2722   :  { %15187 = vmatpush3.bf16.msra.mxu0 %v15184_v40 }
0x2723   :  { %15189 = vmatprep.subr.bf16.mxu0 %v15188_v10 }
0x2726   :  { %15191 = vmatpush3.bf16.msra.mxu0 %v15188_v10 }
0x2727   :  { %15193 = vmatprep.subr.bf16.mxu0 %v15192_v34 }
0x272a   :  { %15195 = vmatpush3.bf16.msra.mxu0 %v15192_v34 }
0x272b   :  { %15197 = vmatprep.subr.bf16.mxu0 %v15196_v27 }
0x272e   :  { %15199 = vmatpush3.bf16.msra.mxu0 %v15196_v27 }
0x272f   :  { %15201 = vmatprep.subr.bf16.mxu0 %v15200_v44 }
0x2732   :  { %15203 = vmatpush3.bf16.msra.mxu0 %v15200_v44  ;;  %v12136_v44 = vld [vmem:[%s19986_s13 + $0xc8] sm:$0xff] }
0x2743   :  { %v11253_v14 = vpop.xlane.xlu1 %11252 }
0x2744   :  { %v11263_v50 = vmul.f32 0.0078125, %v11253_v14  ;;  %v11251_v24 = vpop.xlane.xlu0 %11250 }
0x2745   :  { %v11262_v7 = vmul.f32 0.0078125, %v11251_v24 }
0x2746   :  { %v11269_v11 = vsub.f32 %v11241_v35, %v11263_v50 }
0x2747   :  { %v11268_v0 = vsub.f32 %v19845_v59, %v11262_v7 }
0x2748   :  { %v11275_v6 = vmul.f32 %v11269_v11, %v11269_v11 }
0x2749   :  { %v11274_v45 = vmul.f32 %v11268_v0, %v11268_v0 }
0x274a   :  { %11282 = vadd.xlane.f32.xlu1 %v11275_v6 }
0x274b   :  { %11280 = vadd.xlane.f32.xlu0 %v11274_v45 }
0x279d   :  { %v11255_v9 = vpop.xlane.xlu0 %11254 }
0x279e   :  { %v11264_v43 = vmul.f32 0.0078125, %v11255_v9  ;;  %v15204_v9 = vpack.c.bf16 %v12136_v44, %v12135_v48 }
0x27a0   :  { %v11270_v15 = vsub.f32 %v19849_v38, %v11264_v43  ;;  %v12115_v38 = vld [vmem:[%s19982_s9 + $0x3] ss:$0 sm:$0xff]  ;;  %15205 = vmatprep.subr.bf16.mxu0 %v15204_v9  ;;  %15220 = vmatprep.subr.bf16.mxu1 %v15204_v9  ;;  %v12137_v43 = vld [vmem:[%s19986_s13 + $0xd0] sm:$0xff] }
0x27a1   :  { %v11257_v2 = vpop.xlane.xlu0 %11256  ;;  %15224 = vmatpush3.bf16.msra.mxu1 %v15204_v9 }
0x27a2   :  { %v11265_v19 = vmul.f32 0.0078125, %v11257_v2  ;;  %v11276_v49 = vmul.f32 %v11270_v15, %v11270_v15 }
0x27a4   :  { %v11271_v25 = vsub.f32 %v19853_v20, %v11265_v19  ;;  %v11261_v46 = vpop.xlane.xlu1 %11260  ;;  %11284 = vadd.xlane.f32.xlu0 %v11276_v49  ;;  %v12139_v19 = vld [vmem:[%s19986_s13 + $0xe0] sm:$0xff]  ;;  %v12140_v49 = vld [vmem:[%s19986_s13 + $0xe8] sm:$0xff] }
0x27a5   :  { %v11267_v53 = vmul.f32 0.0078125, %v11261_v46  ;;  %v11259_v31 = vpop.xlane.xlu0 %11258  ;;  %v12141_v46 = vld [vmem:[%s19986_s13 + $0xf0] sm:$0xff] }
0x27a6   :  { %v11266_v26 = vmul.f32 0.0078125, %v11259_v31  ;;  %v11277_v21 = vmul.f32 %v11271_v25, %v11271_v25 }
0x27a7   :  { %v11273_v54 = vsub.f32 %v19857_v52, %v11267_v53  ;;  %v12116_v52 = vld [vmem:[%s19983_s10 + $0x3] ss:$0 sm:$0xff]  ;;  %v12142_v53 = vld [vmem:[%s19986_s13 + $0xf8] sm:$0xff] }
0x27a8   :  { %v11272_v33 = vsub.f32 %v19860_v32, %v11266_v26  ;;  %11286 = vadd.xlane.f32.xlu1 %v11277_v21  ;;  %v15216_v31 = vpack.c.bf16 %v12142_v53, %v12141_v46  ;;  %v12134_v26 = vld [vmem:[%s19985_s12 + $0x3] ss:$0 sm:$0xff] }
0x27a9   :  { %v11279_v1 = vmul.f32 %v11273_v54, %v11273_v54 }
0x27aa   :  { %v11278_v42 = vmul.f32 %v11272_v33, %v11272_v33 }
0x27ac   :  { %11290 = vadd.xlane.f32.xlu1 %v11279_v1  ;;  %11288 = vadd.xlane.f32.xlu0 %v11278_v42 }
0x27d7   :  { %v11283_v30 = vpop.xlane.xlu1 %11282 }
0x27d8   :  { %v11293_v39 = vmul.f32 0.0078125, %v11283_v30  ;;  %v11281_v35 = vpop.xlane.xlu0 %11280 }
0x27d9   :  { %v11292_v51 = vmul.f32 0.0078125, %v11281_v35 }
0x27da   :  { %v11299_v60 = vadd.f32 1e-05, %v11293_v39 }
0x27db   :  { %v11298_v8 = vadd.f32 1e-05, %v11292_v51 }
0x27dc   :  { %16162 = vrsqrt.f32 %v11299_v60 }
0x27dd   :  { %16164 = vrsqrt.f32 %v11298_v8 }
0x27e6   :  { %v16163_v63 = vpop.eup %16162 }
0x27e7   :  { %v16165_v57 = vpop.eup %16164  ;;  %v11311_v12 = vmul.f32 %v16163_v63, %v11269_v11 }
0x27e8   :  { %v11310_v62 = vmul.f32 %v16165_v57, %v11268_v0 }
0x27e9   :  { %v11323_v36 = vmul.f32 %v12115_v38, %v11311_v12 }
0x27ea   :  { %v11322_v32 = vmul.f32 %v12115_v38, %v11310_v62 }
0x27eb   :  { %v11335_v13 = vadd.f32 %v12116_v52, %v11323_v36 }
0x27ec   :  { %v11334_v56 = vadd.f32 %v12116_v52, %v11322_v32 }
0x27ee   :  { %14386 = vmatprep.mubr.f32.mxu0 %v11334_v56 }
0x27ef   :  { %14387 = vmatmul.mubr.f32.vlgmr.msra.gmra.mrb[0].mxu0 %v11335_v13 }
0x27f0   :  { %15207 = vmatpush3.bf16.msra.mxu0 %v15204_v9 }
0x2831   :  { %v11285_v23 = vpop.xlane.xlu0 %11284 }
0x2832   :  { %v11294_v41 = vmul.f32 0.0078125, %v11285_v23 }
0x2834   :  { %v11300_v22 = vadd.f32 1e-05, %v11294_v41 }
0x2835   :  { %v11287_v55 = vpop.xlane.xlu1 %11286 }
0x2836   :  { %16166 = vrsqrt.f32 %v11300_v22  ;;  %v11295_v58 = vmul.f32 0.0078125, %v11287_v55 }
0x2838   :  { %v11301_v3 = vadd.f32 1e-05, %v11295_v58 }
0x2839   :  { %v11291_v37 = vpop.xlane.xlu1 %11290  ;;  %v11289_v14 = vpop.xlane.xlu0 %11288 }
0x283a   :  { %16168 = vrsqrt.f32 %v11301_v3  ;;  %v11297_v50 = vmul.f32 0.0078125, %v11291_v37  ;;  %v11296_v24 = vmul.f32 0.0078125, %v11289_v14 }
0x283c   :  { %v11303_v7 = vadd.f32 1e-05, %v11297_v50  ;;  %v11302_v11 = vadd.f32 1e-05, %v11296_v24 }
0x283e   :  { %16170 = vrsqrt.f32 %v11303_v7 }
0x283f   :  { %16172 = vrsqrt.f32 %v11302_v11 }
0x2840   :  { %v16167_v0 = vpop.eup %16166 }
0x2841   :  { %v11312_v6 = vmul.f32 %v16167_v0, %v11270_v15  ;;  %v12138_v15 = vld [vmem:[%s19986_s13 + $0xd8] sm:$0xff] }
0x2842   :  { %v15208_v2 = vpack.c.bf16 %v12138_v15, %v12137_v43 }
0x2843   :  { %v11324_v45 = vmul.f32 %v12115_v38, %v11312_v6 }
0x2844   :  { %v16169_v17 = vpop.eup %16168  ;;  %15209 = vmatprep.subr.bf16.mxu0 %v15208_v2  ;;  %15221 = vmatprep.subr.bf16.mxu1 %v15208_v2 }
0x2845   :  { %v11313_v5 = vmul.f32 %v16169_v17, %v11271_v25  ;;  %v11336_v40 = vadd.f32 %v12116_v52, %v11324_v45  ;;  %15211 = vmatpush3.bf16.msra.mxu0 %v15208_v2  ;;  %15225 = vmatpush3.bf16.msra.mxu1 %v15208_v2  ;;  %v15212_v25 = vpack.c.bf16 %v12140_v49, %v12139_v19 }
0x2847   :  { %14389 = vmatprep.mubr.f32.mxu0 %v11336_v40  ;;  %v11325_v47 = vmul.f32 %v12115_v38, %v11313_v5  ;;  %15213 = vmatprep.subr.bf16.mxu0 %v15212_v25 }
0x2848   :  { %v16171_v16 = vpop.eup %16170  ;;  %15222 = vmatprep.subr.bf16.mxu1 %v15212_v25 }
0x2849   :  { %v16173_v10 = vpop.eup %16172  ;;  %v11315_v18 = vmul.f32 %v16171_v16, %v11273_v54  ;;  %v11337_v29 = vadd.f32 %v12116_v52, %v11325_v47  ;;  %15215 = vmatpush3.bf16.msra.mxu0 %v15212_v25  ;;  %15226 = vmatpush3.bf16.msra.mxu1 %v15212_v25 }
0x284a   :  { %v11314_v34 = vmul.f32 %v16173_v10, %v11272_v33  ;;  %15217 = vmatprep.subr.bf16.mxu0 %v15216_v31  ;;  %15223 = vmatprep.subr.bf16.mxu1 %v15216_v31 }
0x284b   :  { %v11327_v4 = vmul.f32 %v12115_v38, %v11315_v18  ;;  %14390 = vmatmul.mubr.f32.gmra.mrb[2].mxu0 %v11337_v29 }
0x284c   :  { %v11326_v28 = vmul.f32 %v12115_v38, %v11314_v34 }
0x284d   :  { %v11339_v27 = vadd.f32 %v12116_v52, %v11327_v4  ;;  %15219 = vmatpush3.bf16.msra.mxu0 %v15216_v31  ;;  %15227 = vmatpush3.bf16.msra.mxu1 %v15216_v31 }
0x284e   :  { %v11338_v61 = vadd.f32 %v12116_v52, %v11326_v28 }
0x2850   :  { %14392 = vmatprep.mubr.f32.mxu0 %v11338_v61 }
0x2851   :  { %14393 = vmatmul.mubr.f32.gmra.mrb[4].mxu0 %v11339_v27 }
0x28c2   :  { %v14388_v21 = vpop.f32.mrb[0].mxu0 }
0x28c3   :  { %v11437_v54 = vadd.f32 %v14388_v21, %v12134_v26  ;;  %v11431_v33 = vpop.f32.mrb[1].mxu0 }
0x28c4   :  { %v11432_v1 = vadd.f32 %v12134_v26, %v11431_v33 }
0x28c5   :  { %v11461_v42 = vmul.f32 %v11437_v54, %v11437_v54 }
0x28c6   :  { %v11460_v30 = vmul.f32 %v11432_v1, %v11432_v1 }
0x28c7   :  { %v11467_v39 = vmul.f32 %v11461_v42, %v11437_v54 }
0x28c8   :  { %v11466_v35 = vmul.f32 %v11460_v30, %v11432_v1 }
0x28c9   :  { %v11473_v51 = vmul.f32 0.044715, %v11467_v39  ;;  %v12144_v39 = vld [vmem:[%s19987_s14 + $0x3] ss:$0 sm:$0xff] }
0x28ca   :  { %v11472_v60 = vmul.f32 0.044715, %v11466_v35 }
0x28cb   :  { %v11479_v8 = vadd.f32 %v11473_v51, %v11437_v54 }
0x28cc   :  { %v11478_v63 = vadd.f32 %v11472_v60, %v11432_v1 }
0x28cd   :  { %v11485_v38 = vmul.f32 0.7978846, %v11479_v8 }
0x28ce   :  { %v11484_v57 = vmul.f32 0.7978846, %v11478_v63 }
0x28cf   :  { %16174 = vtanh.f32 %v11485_v38 }
0x28d0   :  { %16176 = vtanh.f32 %v11484_v57 }
0x28d9   :  { %v16175_v12 = vpop.eup %16174 }
0x28da   :  { %v16177_v62 = vpop.eup %16176  ;;  %v11497_v36 = vadd.f32 1.0, %v16175_v12 }
0x28db   :  { %v11496_v52 = vadd.f32 1.0, %v16177_v62 }
0x28dc   :  { %v11503_v32 = vmul.f32 0.5, %v11497_v36 }
0x28dd   :  { %v11502_v56 = vmul.f32 0.5, %v11496_v52 }
0x28de   :  { %v11509_v23 = vmul.f32 %v11503_v32, %v11437_v54 }
0x28df   :  { %v11508_v13 = vmul.f32 %v11502_v56, %v11432_v1 }
0x28e1   :  { %14411 = vmatprep.mubr.msk.f32.mxu0 %vm1534_vm8, %v11508_v13 }
0x28e2   :  { %14412 = vmatmul.mubr.msk.f32.vlgmr.msra.gmra.mrb[6].mxu0 %vm1534_vm8, %v11509_v23 }
0x291e   :  { %v14391_v41 = vpop.f32.mrb[2].mxu0 }
0x291f   :  { %v11447_v22 = vadd.f32 %v14391_v41, %v12134_v26  ;;  %v11441_v55 = vpop.f32.mrb[3].mxu0 }
0x2920   :  { %v11442_v58 = vadd.f32 %v12134_v26, %v11441_v55 }
0x2921   :  { %v11463_v3 = vmul.f32 %v11447_v22, %v11447_v22 }
0x2922   :  { %v11462_v37 = vmul.f32 %v11442_v58, %v11442_v58 }
0x2923   :  { %v11469_v14 = vmul.f32 %v11463_v3, %v11447_v22 }
0x2924   :  { %v11468_v50 = vmul.f32 %v11462_v37, %v11442_v58  ;;  %v14394_v24 = vpop.f32.mrb[4].mxu0 }
0x2925   :  { %v11475_v7 = vmul.f32 0.044715, %v11469_v14  ;;  %v11457_v11 = vadd.f32 %v14394_v24, %v12134_v26  ;;  %v11451_v0 = vpop.f32.mrb[5].mxu0 }
0x2926   :  { %v11474_v6 = vmul.f32 0.044715, %v11468_v50  ;;  %v11452_v45 = vadd.f32 %v12134_v26, %v11451_v0 }
0x2927   :  { %v11481_v17 = vadd.f32 %v11475_v7, %v11447_v22  ;;  %v11465_v5 = vmul.f32 %v11457_v11, %v11457_v11 }
0x2928   :  { %v11480_v40 = vadd.f32 %v11474_v6, %v11442_v58  ;;  %v11464_v47 = vmul.f32 %v11452_v45, %v11452_v45 }
0x2929   :  { %v11487_v16 = vmul.f32 0.7978846, %v11481_v17  ;;  %v11471_v10 = vmul.f32 %v11465_v5, %v11457_v11 }
0x292a   :  { %v11486_v18 = vmul.f32 0.7978846, %v11480_v40  ;;  %v11470_v29 = vmul.f32 %v11464_v47, %v11452_v45 }
0x292b   :  { %16178 = vtanh.f32 %v11487_v16  ;;  %v11477_v34 = vmul.f32 0.044715, %v11471_v10 }
0x292c   :  { %16180 = vtanh.f32 %v11486_v18  ;;  %v11476_v4 = vmul.f32 0.044715, %v11470_v29 }
0x292d   :  { %v11483_v28 = vadd.f32 %v11477_v34, %v11457_v11 }
0x292e   :  { %v11482_v27 = vadd.f32 %v11476_v4, %v11452_v45 }
0x292f   :  { %v11489_v61 = vmul.f32 0.7978846, %v11483_v28 }
0x2930   :  { %v11488_v48 = vmul.f32 0.7978846, %v11482_v27 }
0x2931   :  { %16182 = vtanh.f32 %v11489_v61 }
0x2932   :  { %16184 = vtanh.f32 %v11488_v48 }
0x2935   :  { %v16179_v44 = vpop.eup %16178 }
0x2936   :  { %v16181_v9 = vpop.eup %16180  ;;  %v11499_v43 = vadd.f32 1.0, %v16179_v44 }
0x2937   :  { %v11498_v15 = vadd.f32 1.0, %v16181_v9 }
0x2938   :  { %v11505_v2 = vmul.f32 0.5, %v11499_v43 }
0x2939   :  { %v11504_v19 = vmul.f32 0.5, %v11498_v15 }
0x293a   :  { %v11511_v53 = vmul.f32 %v11505_v2, %v11447_v22 }
0x293b   :  { %v16183_v49 = vpop.eup %16182  ;;  %v11510_v25 = vmul.f32 %v11504_v19, %v11442_v58 }
0x293c   :  { %v16185_v46 = vpop.eup %16184  ;;  %v11501_v31 = vadd.f32 1.0, %v16183_v49 }
0x293d   :  { %14414 = vmatprep.mubr.msk.f32.mxu1 %vm1534_vm8, %v11510_v25  ;;  %v11500_v26 = vadd.f32 1.0, %v16185_v46 }
0x293e   :  { %v11507_v21 = vmul.f32 0.5, %v11501_v31  ;;  %14415 = vmatmul.mubr.msk.f32.vlgmr.msra.gmra.mrb[8].mxu1 %vm1534_vm8, %v11511_v53 }
0x293f   :  { %v11506_v54 = vmul.f32 0.5, %v11500_v26 }
0x2940   :  { %v11513_v1 = vmul.f32 %v11507_v21, %v11457_v11 }
0x2941   :  { %v11512_v33 = vmul.f32 %v11506_v54, %v11452_v45 }
0x2943   :  { %14417 = vmatprep.mubr.msk.f32.mxu1 %vm1534_vm8, %v11512_v33 }
0x2944   :  { %14418 = vmatmul.mubr.msk.f32.gmra.mrb[10].mxu1 %vm1534_vm8, %v11513_v1 }
0x29b5   :  { %v14413_v42 = vpop.f32.mrb[6].mxu0 }
0x29b6   :  { %v11615_v30 = vpop.f32.mrb[7].mxu0 }
0x29b7   :  { %v11616_v51 = vadd.f32 %v12144_v39, %v11615_v30 }
0x29b9   :  { %v11640_v38 = vadd.f32 %v11616_v51, %v19845_v59 }
0x2a11   :  { %v14416_v35 = vpop.f32.mrb[8].mxu1 }
0x2a12   :  { %v11629_v60 = vadd.f32 %v14416_v35, %v12144_v39  ;;  %v11624_v8 = vpop.f32.mrb[9].mxu1 }
0x2a14   :  { %v11641_v63 = vadd.f32 %v11629_v60, %v19853_v20 }
0x2a16   :  { %v11644_v57 = vrot.slane %v11641_v63, 7 }
0x2a17   :  { %v14419_v12 = vpop.f32.mrb[10].mxu1 }
0x2a18   :  { %v11633_v62 = vpop.f32.mrb[11].mxu1  ;;  %v11646_v36 = vsel %vm11645_vm10, %v11644_v57, %v11640_v38 }
0x2a19   :  { %11648 = vst [vmem:[#allocation5] sm:$0x3] %v11646_v36 }
0x2a1a   :  { %16219 = shalt.err (!%p16216_p12)
}
0x2a1b   :  { %s16220_s25 = scalar_lea.hbm %s19988_s15, 32 }
0x2a1c   :  { %p16221_p13 = scmp.ne.s32.totalorder %s19988_s15, %s16220_s25  ;;  %p16224_p0 = scmp.lt.u32.totalorder %s16220_s25, %s19988_s15 }
0x2a1e   :  { %p16226_p1 = pnand %p16224_p0, %p16221_p13 }
0x2a20   :  { %16229 = shalt.err (!%p16226_p1)
}
0x2a21   :  { %11658 = dma.vmem_to_hbm [thread:$0]  %s11656_s24, 32, %s19988_s15, [#allocation4]  }
0x2a22   :  { %16232 = dma.done.wait [#allocation4], 32  }
0x2a23   :  { %16233 = vsyncadd [#allocation4], 4294967264 }
0x2a24   :  { %11662 = vsyncpa [#allocation3], 1 }
0x2a25   :  { %11663 = vsyncpa [#allocation4], 1 }

</bundles_post_ra>
